<compile_context>
chip_gen: v5e
topology: v5e:2x2
jax: 0.10.0
libtpu: 0.0.40
codegen_flags: <defaults>
</compile_context>

<pallas_src>
import math

import jax
import jax.numpy as jnp
from jax.experimental import pallas as pl
from jax.experimental.pallas import tpu as pltpu

INPUT_CH = 3
OUTPUT_CH = 4
WIDTH = 256
DEPTH = 4                     # number of hidden (W-wide) layers (tcnn n_hidden_layers)
PAD_IN = 8                    # lane-padded input feature dim (== full array dim)
PAD_OUT = 8                   # lane-padded output feature dim (== full array dim)
TILE_M = 2048                 # max rows per grid step (sweep 1024-4096)
VMEM_LIMIT_BYTES = 48 * 1024 * 1024   # <= 48 MiB: safe on v7x (64 MiB physical)


def _nerf_mlp_kernel(x_ref, w0_ref, w1_ref, w2_ref, w3_ref, w4_ref, o_ref):
    # layer 0: bf16 (tm, 8) @ bf16 (8, W) -> f32 acc -> ReLU -> bf16
    h = jnp.dot(x_ref[...], w0_ref[...], preferred_element_type=jnp.float32)
    h = jnp.maximum(h, 0.0).astype(jnp.bfloat16)
    # hidden layers 1..3: bf16 (tm, W) @ bf16 (W, W) -> f32 acc -> ReLU -> bf16
    h = jnp.maximum(
        jnp.dot(h, w1_ref[...], preferred_element_type=jnp.float32), 0.0
    ).astype(jnp.bfloat16)
    h = jnp.maximum(
        jnp.dot(h, w2_ref[...], preferred_element_type=jnp.float32), 0.0
    ).astype(jnp.bfloat16)
    h = jnp.maximum(
        jnp.dot(h, w3_ref[...], preferred_element_type=jnp.float32), 0.0
    ).astype(jnp.bfloat16)
    # output layer: bf16 (tm, W) @ bf16 (W, 8) -> f32, no output activation
    o_ref[...] = jnp.dot(h, w4_ref[...], preferred_element_type=jnp.float32)


def nerf_forward(x, weights):
    """x: (N, INPUT_CH) float32. weights: [w0 bf16(8,W), w1..w3 bf16(W,W), w4 bf16(W,8)]."""
    n = x.shape[0]
    # Pad rows to a multiple of 256 (MXU-friendly), then choose the row tile:
    # full TILE_M for large N, a single tile for small N (no wasted zero rows).
    n_pad = pl.cdiv(n, 256) * 256
    tile_m = min(TILE_M, n_pad)
    n_pad = pl.cdiv(n_pad, tile_m) * tile_m
    grid = n_pad // tile_m

    # zero-pad rows n -> n_pad and features 3 -> 8; cast input to bf16 in the
    # wrapper so layer 0 uses the native bf16 MXU path (and input HBM traffic halves)
    x_pad = jnp.zeros((n_pad, PAD_IN), dtype=jnp.bfloat16)
    x_pad = x_pad.at[:n, :INPUT_CH].set(x.astype(jnp.bfloat16))

    w0, w1, w2, w3, w4 = weights

    def weight_spec(w):
        # Grid-invariant full block resident in VMEM; single buffer is enough.
        return pl.BlockSpec(w.shape, lambda i: (0, 0), pipeline_mode=pl.Buffered(1))

    out_pad = pl.pallas_call(
        _nerf_mlp_kernel,
        out_shape=jax.ShapeDtypeStruct((n_pad, PAD_OUT), jnp.float32),
        grid_spec=pltpu.PrefetchScalarGridSpec(
            num_scalar_prefetch=0,
            grid=(grid,),
            in_specs=[
                pl.BlockSpec((tile_m, PAD_IN), lambda i: (i, 0)),
                weight_spec(w0),
                weight_spec(w1),
                weight_spec(w2),
                weight_spec(w3),
                weight_spec(w4),
            ],
            out_specs=pl.BlockSpec((tile_m, PAD_OUT), lambda i: (i, 0)),
        ),
        compiler_params=pltpu.CompilerParams(
            dimension_semantics=("parallel",),   # shard row tiles across TCs (v7x)
            vmem_limit_bytes=VMEM_LIMIT_BYTES,
        ),
    )(x_pad, w0, w1, w2, w3, w4)

    return out_pad[:n, :OUTPUT_CH]


def init_weights(key):
    """Deterministic uniform He-ish init (like tcnn). Bias-free MLP, matching
    tcnn CutlassMLP semantics. All weights stored in bf16 (tcnn runs in half
    precision); padded rows/cols are zero so padding is mathematically inert."""
    ks = jax.random.split(key, DEPTH + 1)

    def uni(k, fan_in, shape):
        s = 1.0 / math.sqrt(fan_in)
        return jax.random.uniform(k, shape, jnp.float32, -s, s)

    # layer 0: (INPUT_CH -> WIDTH), padded to (PAD_IN, WIDTH), bf16
    w0 = jnp.zeros((PAD_IN, WIDTH), jnp.float32).at[:INPUT_CH, :].set(
        uni(ks[0], INPUT_CH, (INPUT_CH, WIDTH))).astype(jnp.bfloat16)
    # hidden layers 1..DEPTH-1: (WIDTH -> WIDTH), bf16
    w1 = uni(ks[1], WIDTH, (WIDTH, WIDTH)).astype(jnp.bfloat16)
    w2 = uni(ks[2], WIDTH, (WIDTH, WIDTH)).astype(jnp.bfloat16)
    w3 = uni(ks[3], WIDTH, (WIDTH, WIDTH)).astype(jnp.bfloat16)
    # output layer: (WIDTH -> OUTPUT_CH), padded to (WIDTH, PAD_OUT), bf16
    w4 = jnp.zeros((WIDTH, PAD_OUT), jnp.float32).at[:, :OUTPUT_CH].set(
        uni(ks[4], WIDTH, (WIDTH, OUTPUT_CH))).astype(jnp.bfloat16)
    return [w0, w1, w2, w3, w4]


def nerf_reference(x, weights):
    """Pure-JAX reference with identical numerics (bf16 matmul inputs, f32 acc)."""
    w0, w1, w2, w3, w4 = weights
    h = x.astype(jnp.bfloat16)
    h = jnp.maximum(jnp.dot(h, w0[:INPUT_CH, :], preferred_element_type=jnp.float32),
                    0.0).astype(jnp.bfloat16)
    h = jnp.maximum(jnp.dot(h, w1, preferred_element_type=jnp.float32),
                    0.0).astype(jnp.bfloat16)
    h = jnp.maximum(jnp.dot(h, w2, preferred_element_type=jnp.float32),
                    0.0).astype(jnp.bfloat16)
    h = jnp.maximum(jnp.dot(h, w3, preferred_element_type=jnp.float32),
                    0.0).astype(jnp.bfloat16)
    return jnp.dot(h, w4[:, :OUTPUT_CH], preferred_element_type=jnp.float32)


if __name__ == "__main__":
    key = jax.random.PRNGKey(0)
    k_w, k_x = jax.random.split(key)

    weights = init_weights(k_w)

    N = 1000  # ragged on purpose (not a multiple of the tile): wrapper pads rows
    x = jax.random.normal(k_x, (N, INPUT_CH), dtype=jnp.float32)

    out = nerf_forward(x, weights)
    out = jax.block_until_ready(out)

    ref = nerf_reference(x, weights)
    assert out.shape == (N, OUTPUT_CH), out.shape
    assert jnp.allclose(out, ref, atol=2e-3, rtol=2e-3), "mismatch vs reference"

    print("KERNEL_OK")
</pallas_src>

<mosaic_0001>
module attributes {stable_mosaic.version = 11 : i64} {
  func.func @_nerf_mlp_kernel(%arg0: i32, %arg1: memref<1024x8xbf16, #tpu.memory_space<vmem>>, %arg2: memref<8x256xbf16, #tpu.memory_space<vmem>>, %arg3: memref<256x256xbf16, #tpu.memory_space<vmem>>, %arg4: memref<256x256xbf16, #tpu.memory_space<vmem>>, %arg5: memref<256x256xbf16, #tpu.memory_space<vmem>>, %arg6: memref<256x8xbf16, #tpu.memory_space<vmem>>, %arg7: memref<1024x8xf32, #tpu.memory_space<vmem>>) attributes {dimension_semantics = [#tpu.dimension_semantics<parallel>], iteration_bounds = array<i64: 1>, scalar_prefetch = 0 : i64, scratch_operands = 0 : i64, tpu.core_type = #tpu.core_type<tc>, window_params = [{transform_indices = @transform_0, window_bounds = array<i64: 1024, 8>}, {pipeline_mode = #tpu.pipeline_mode<synchronous>, transform_indices = @transform_1, window_bounds = array<i64: 8, 256>}, {pipeline_mode = #tpu.pipeline_mode<synchronous>, transform_indices = @transform_2, window_bounds = array<i64: 256, 256>}, {pipeline_mode = #tpu.pipeline_mode<synchronous>, transform_indices = @transform_3, window_bounds = array<i64: 256, 256>}, {pipeline_mode = #tpu.pipeline_mode<synchronous>, transform_indices = @transform_4, window_bounds = array<i64: 256, 256>}, {pipeline_mode = #tpu.pipeline_mode<synchronous>, transform_indices = @transform_5, window_bounds = array<i64: 256, 8>}, {transform_indices = @transform_6, window_bounds = array<i64: 1024, 8>}]} {
    %c0 = arith.constant 0 : index
    %c0_0 = arith.constant 0 : index
    %0 = vector.load %arg1[%c0, %c0_0] : memref<1024x8xbf16, #tpu.memory_space<vmem>>, vector<1024x8xbf16>
    %c0_1 = arith.constant 0 : index
    %c0_2 = arith.constant 0 : index
    %1 = vector.load %arg2[%c0_1, %c0_2] : memref<8x256xbf16, #tpu.memory_space<vmem>>, vector<8x256xbf16>
    %cst = arith.constant dense<0.000000e+00> : vector<1024x256xf32>
    %2 = tpu.matmul %0, %1, %cst {dimension_numbers = #tpu.dot_dimension_numbers<[1], [0], [0], [1], [0, 0, 1, 1], [], []>} : vector<1024x8xbf16>, vector<8x256xbf16>, vector<1024x256xf32> -> vector<1024x256xf32>
    %cst_3 = arith.constant 0.000000e+00 : f32
    %3 = vector.broadcast %cst_3 : f32 to vector<1024x256xf32>
    %4 = arith.maximumf %2, %3 : vector<1024x256xf32>
    %5 = arith.truncf %4 : vector<1024x256xf32> to vector<1024x256xbf16>
    %c0_4 = arith.constant 0 : index
    %c0_5 = arith.constant 0 : index
    %6 = vector.load %arg3[%c0_4, %c0_5] : memref<256x256xbf16, #tpu.memory_space<vmem>>, vector<256x256xbf16>
    %cst_6 = arith.constant dense<0.000000e+00> : vector<1024x256xf32>
    %7 = tpu.matmul %5, %6, %cst_6 {dimension_numbers = #tpu.dot_dimension_numbers<[1], [0], [0], [1], [0, 0, 1, 1], [], []>} : vector<1024x256xbf16>, vector<256x256xbf16>, vector<1024x256xf32> -> vector<1024x256xf32>
    %cst_7 = arith.constant 0.000000e+00 : f32
    %8 = vector.broadcast %cst_7 : f32 to vector<1024x256xf32>
    %9 = arith.maximumf %7, %8 : vector<1024x256xf32>
    %10 = arith.truncf %9 : vector<1024x256xf32> to vector<1024x256xbf16>
    %c0_8 = arith.constant 0 : index
    %c0_9 = arith.constant 0 : index
    %11 = vector.load %arg4[%c0_8, %c0_9] : memref<256x256xbf16, #tpu.memory_space<vmem>>, vector<256x256xbf16>
    %cst_10 = arith.constant dense<0.000000e+00> : vector<1024x256xf32>
    %12 = tpu.matmul %10, %11, %cst_10 {dimension_numbers = #tpu.dot_dimension_numbers<[1], [0], [0], [1], [0, 0, 1, 1], [], []>} : vector<1024x256xbf16>, vector<256x256xbf16>, vector<1024x256xf32> -> vector<1024x256xf32>
    %cst_11 = arith.constant 0.000000e+00 : f32
    %13 = vector.broadcast %cst_11 : f32 to vector<1024x256xf32>
    %14 = arith.maximumf %12, %13 : vector<1024x256xf32>
    %15 = arith.truncf %14 : vector<1024x256xf32> to vector<1024x256xbf16>
    %c0_12 = arith.constant 0 : index
    %c0_13 = arith.constant 0 : index
    %16 = vector.load %arg5[%c0_12, %c0_13] : memref<256x256xbf16, #tpu.memory_space<vmem>>, vector<256x256xbf16>
    %cst_14 = arith.constant dense<0.000000e+00> : vector<1024x256xf32>
    %17 = tpu.matmul %15, %16, %cst_14 {dimension_numbers = #tpu.dot_dimension_numbers<[1], [0], [0], [1], [0, 0, 1, 1], [], []>} : vector<1024x256xbf16>, vector<256x256xbf16>, vector<1024x256xf32> -> vector<1024x256xf32>
    %cst_15 = arith.constant 0.000000e+00 : f32
    %18 = vector.broadcast %cst_15 : f32 to vector<1024x256xf32>
    %19 = arith.maximumf %17, %18 : vector<1024x256xf32>
    %20 = arith.truncf %19 : vector<1024x256xf32> to vector<1024x256xbf16>
    %c0_16 = arith.constant 0 : index
    %c0_17 = arith.constant 0 : index
    %21 = vector.load %arg6[%c0_16, %c0_17] : memref<256x8xbf16, #tpu.memory_space<vmem>>, vector<256x8xbf16>
    %cst_18 = arith.constant dense<0.000000e+00> : vector<1024x8xf32>
    %22 = tpu.matmul %20, %21, %cst_18 {dimension_numbers = #tpu.dot_dimension_numbers<[1], [0], [0], [1], [0, 0, 1, 1], [], []>} : vector<1024x256xbf16>, vector<256x8xbf16>, vector<1024x8xf32> -> vector<1024x8xf32>
    %c0_19 = arith.constant 0 : index
    %c0_20 = arith.constant 0 : index
    %23 = vector.load %arg7[%c0_19, %c0_20] : memref<1024x8xf32, #tpu.memory_space<vmem>>, vector<1024x8xf32>
    tpu.vector_store %arg7[%c0_19, %c0_20], %22 {strides = array<i32>} : memref<1024x8xf32, #tpu.memory_space<vmem>>, vector<1024x8xf32>,
    return
  }
  func.func @transform_0(%arg0: i32) -> (i32, i32) {
    %c0_i32 = arith.constant 0 : i32
    %c0_i32_0 = arith.constant 0 : i32
    return %arg0, %c0_i32 : i32, i32
  }
  func.func @transform_1(%arg0: i32) -> (i32, i32) {
    %c0_i32 = arith.constant 0 : i32
    %c0_i32_0 = arith.constant 0 : i32
    %c0_i32_1 = arith.constant 0 : i32
    return %c0_i32, %c0_i32_0 : i32, i32
  }
  func.func @transform_2(%arg0: i32) -> (i32, i32) {
    %c0_i32 = arith.constant 0 : i32
    %c0_i32_0 = arith.constant 0 : i32
    %c0_i32_1 = arith.constant 0 : i32
    return %c0_i32, %c0_i32_0 : i32, i32
  }
  func.func @transform_3(%arg0: i32) -> (i32, i32) {
    %c0_i32 = arith.constant 0 : i32
    %c0_i32_0 = arith.constant 0 : i32
    %c0_i32_1 = arith.constant 0 : i32
    return %c0_i32, %c0_i32_0 : i32, i32
  }
  func.func @transform_4(%arg0: i32) -> (i32, i32) {
    %c0_i32 = arith.constant 0 : i32
    %c0_i32_0 = arith.constant 0 : i32
    %c0_i32_1 = arith.constant 0 : i32
    return %c0_i32, %c0_i32_0 : i32, i32
  }
  func.func @transform_5(%arg0: i32) -> (i32, i32) {
    %c0_i32 = arith.constant 0 : i32
    %c0_i32_0 = arith.constant 0 : i32
    %c0_i32_1 = arith.constant 0 : i32
    return %c0_i32, %c0_i32_0 : i32, i32
  }
  func.func @transform_6(%arg0: i32) -> (i32, i32) {
    %c0_i32 = arith.constant 0 : i32
    %c0_i32_0 = arith.constant 0 : i32
    return %arg0, %c0_i32 : i32, i32
  }
}

</mosaic_0001>

<bundles_post_ra>
// kernel: tpu_custom_call.1
= control target key start
LH: loop header
LB: loop body
LE: loop exit
PB: predicated region body
PF: predicated region fallthrough
CT: control target
= control target key end

     0   :  { %11 = vsyncpa [#allocation3], 0  ;;  %s9368_s24 = smov [#allocation2]   ;;  %s9369_s26 = smov 128   ;;  %s12404_s0 = inlined_call_operand.vmem [shape: bf16[1024,8], index: 0, kind: input, shape index: {}]   ;;  %s12405_s1 = inlined_call_operand.vmem [shape: bf16[8,256], index: 1, kind: input, shape index: {}]   ;;  %s12406_s2 = inlined_call_operand.vmem [shape: bf16[256,256], index: 2, kind: input, shape index: {}]   ;;  %s12407_s3 = inlined_call_operand.vmem [shape: bf16[256,256], index: 3, kind: input, shape index: {}]   ;;  %s12408_s4 = inlined_call_operand.hbm [shape: bf16[256,256], index: 4, kind: input, shape index: {}]   ;;  %s12409_s5 = inlined_call_operand.vmem [shape: bf16[256,8], index: 5, kind: input, shape index: {}]   ;;  %s12410_s6 = inlined_call_operand.vmem [shape: f32[1024,8], index: 6, kind: output, shape index: {}]  }
   0x1   :  { %s24_s23 = sshll.u32 %s12408_s4, 4  ;;  %s26_s25 = sshll.u32 %s9368_s24, 4  ;;  %s25_s23 = int_to_ptr.hbm [resolvable:$true] %s24_s23  ;;  %s27_s25 = int_to_ptr.vmem [resolvable:$true] %s26_s25 }
   0x2   :  { %s9370_s27 = smov 8  }
   0x3   :  { %32 = dma.hbm_to_vmem [thread:$0]  %s25_s23, 4096, %s27_s25, [#allocation3], %s9369_s26, %s9369_s26, %s9370_s27  }
   0x4   :  { %9366 = dma.done.wait [#allocation3], 4096  }
   0x5   :  { %9367 = vsyncadd [#allocation3], 4294963200  ;;  %v168_v0 = vld [vmem:[%s12405_s1] sm:$0xff]  ;;  %v9241_v1 = vld [vmem:[%s12406_s2 + $0x74] sm:$0xf]  ;;  %vm687_vm0 = vcmask 1043456  }
   0x6   :  { %v490_v2 = vunpack.c.l.b16 %v168_v0  ;;  %v491_v3 = vunpack.c.h.b16 %v168_v0  ;;  %v8775_v4 = vld [vmem:[%s12406_s2 + $0x78] sm:$0xf0]  ;;  %v9257_v5 = vld [vmem:[%s12406_s2 + $0xf4] sm:$0xf]  ;;  %v9163_v13 = vld [vmem:[%s12404_s0] sm:$0xff]  ;;  %vm494_vm1 = vcmask 64512  }
   0x7   :  { %v8839_v6 = vld [vmem:[%s12406_s2 + $0xf8] sm:$0xf0]  ;;  %v8778_v9 = vor.u32 %v9241_v1, %v8775_v4  ;;  %v9164_v14 = vld [vmem:[%s12404_s0 + $0x8] sm:$0xff]  ;;  %v9165_v15 = vld [vmem:[%s12404_s0 + $0x10] sm:$0xff] }
   0x8   :  { %v492_v7 = vpack.c.b16 %v490_v2, %v490_v2  ;;  %v493_v8 = vpack.c.b16 %v491_v3, %v491_v3  ;;  %v8842_v10 = vor.u32 %v9257_v5, %v8839_v6  ;;  %v9166_v16 = vld [vmem:[%s12404_s0 + $0x18] sm:$0xff]  ;;  %v9167_v17 = vld [vmem:[%s12404_s0 + $0x20] sm:$0xff]  ;;  %v8773_v18 = vld [vmem:[%s12406_s2 + $0x70] sm:$0xf] }
   0x9   :  { %v9242_v19 = vld [vmem:[%s12406_s2 + $0x74] sm:$0xf0]  ;;  %v8837_v20 = vld [vmem:[%s12406_s2 + $0xf0] sm:$0xf]  ;;  %v8765_v23 = vld [vmem:[%s12406_s2 + $0x60] sm:$0xf] }
   0xa   :  { %v689_v11 = vsel %vm687_vm0, %v492_v7, 0  ;;  %v692_v12 = vsel %vm687_vm0, %v493_v8, 0  ;;  %v8774_v21 = vor.u32 %v9242_v19, %v8773_v18  ;;  %v9258_v22 = vld [vmem:[%s12406_s2 + $0xf4] sm:$0xf0]  ;;  %v9240_v24 = vld [vmem:[%s12406_s2 + $0x64] sm:$0xf0] }
   0xb   :  { %701 = vmatpush.bf16.msra.mxu0 %v689_v11  ;;  %1030 = vmatpush.bf16.msra.mxu1 %v692_v12  ;;  %v8838_v25 = vor.u32 %v9258_v22, %v8837_v20  ;;  %v8829_v26 = vld [vmem:[%s12406_s2 + $0xe0] sm:$0xf]  ;;  %v9256_v27 = vld [vmem:[%s12406_s2 + $0xe4] sm:$0xf0]  ;;  %v8766_v28 = vor.u32 %v9240_v24, %v8765_v23  ;;  %v8757_v31 = vld [vmem:[%s12406_s2 + $0x50] sm:$0xf] }
   0xc   :  { %1928 = vmatpush.bf16.msra.mxu2 %v8774_v21  ;;  %v8830_v29 = vor.u32 %v9256_v27, %v8829_v26  ;;  %v9168_v30 = vld [vmem:[%s12404_s0 + $0x28] sm:$0xff]  ;;  %v9238_v32 = vld [vmem:[%s12406_s2 + $0x54] sm:$0xf0]  ;;  %v8821_v33 = vld [vmem:[%s12406_s2 + $0xd0] sm:$0xf] }
   0xd   :  { %2257 = vmatpush.bf16.msra.mxu3 %v8838_v25  ;;  %v8758_v34 = vor.u32 %v9238_v32, %v8757_v31  ;;  %v9254_v35 = vld [vmem:[%s12406_s2 + $0xd4] sm:$0xf0]  ;;  %v8749_v36 = vld [vmem:[%s12406_s2 + $0x40] sm:$0xf]  ;;  %v9236_v37 = vld [vmem:[%s12406_s2 + $0x44] sm:$0xf0] }
   0xe   :  { %8587 = vmatmul.msk.bf16.vlgmr.msra.gmra.mxu0 %vm494_vm1, %v9163_v13  ;;  %8651 = vmatmul.msk.bf16.vlgmr.msra.gmra.mxu1 %vm494_vm1, %v9163_v13  ;;  %v8822_v38 = vor.u32 %v9254_v35, %v8821_v33  ;;  %v8813_v39 = vld [vmem:[%s12406_s2 + $0xc0] sm:$0xf]  ;;  %v9252_v40 = vld [vmem:[%s12406_s2 + $0xc4] sm:$0xf0]  ;;  %v8750_v41 = vor.u32 %v9236_v37, %v8749_v36  ;;  %v8741_v43 = vld [vmem:[%s12406_s2 + $0x30] sm:$0xf] }
   0xf   :  { %2586 = vmatpush.bf16.msrb.mxu0 %v8778_v9  ;;  %2915 = vmatpush.bf16.msrb.mxu1 %v8842_v10  ;;  %v8814_v42 = vor.u32 %v9252_v40, %v8813_v39  ;;  %v9234_v44 = vld [vmem:[%s12406_s2 + $0x34] sm:$0xf0]  ;;  %v8805_v45 = vld [vmem:[%s12406_s2 + $0xb0] sm:$0xf]  ;;  %v8733_v50 = vld [vmem:[%s12406_s2 + $0x20] sm:$0xf] }
  0x10   :  { %1929 = vmatpush.bf16.msra.mxu2 %v8766_v28  ;;  %v9250_v46 = vld [vmem:[%s12406_s2 + $0xb4] sm:$0xf0]  ;;  %v8742_v47 = vor.u32 %v9234_v44, %v8741_v43  ;;  %v9169_v49 = vld [vmem:[%s12404_s0 + $0x30] sm:$0xff]  ;;  %v9232_v51 = vld [vmem:[%s12406_s2 + $0x24] sm:$0xf0] }
  0x11   :  { %2258 = vmatpush.bf16.msra.mxu3 %v8830_v29  ;;  %v8806_v48 = vor.u32 %v9250_v46, %v8805_v45  ;;  %v8797_v52 = vld [vmem:[%s12406_s2 + $0xa0] sm:$0xf]  ;;  %v8734_v53 = vor.u32 %v9232_v51, %v8733_v50  ;;  %v9248_v54 = vld [vmem:[%s12406_s2 + $0xa4] sm:$0xf0]  ;;  %v9239_v56 = vld [vmem:[%s12406_s2 + $0x64] sm:$0xf] }
  0x12   :  { %v8798_v55 = vor.u32 %v9248_v54, %v8797_v52  ;;  %v8767_v57 = vld [vmem:[%s12406_s2 + $0x68] sm:$0xf0]  ;;  %v9255_v58 = vld [vmem:[%s12406_s2 + $0xe4] sm:$0xf]  ;;  %v8725_v61 = vld [vmem:[%s12406_s2 + $0x10] sm:$0xf] }
  0x13   :  { %v8770_v59 = vor.u32 %v9239_v56, %v8767_v57  ;;  %v8831_v60 = vld [vmem:[%s12406_s2 + $0xe8] sm:$0xf0]  ;;  %v9230_v62 = vld [vmem:[%s12406_s2 + $0x14] sm:$0xf0]  ;;  %v8789_v1 = vld [vmem:[%s12406_s2 + $0x90] sm:$0xf] }
  0x14   :  { %1930 = vmatpush.bf16.msra.mxu2 %v8758_v34  ;;  %v8834_v63 = vor.u32 %v9255_v58, %v8831_v60  ;;  %v8726_v0 = vor.u32 %v9230_v62, %v8725_v61  ;;  %v9246_v2 = vld [vmem:[%s12406_s2 + $0x94] sm:$0xf0]  ;;  %v8717_v4 = vld [vmem:[%s12406_s2] sm:$0xf]  ;;  %v9228_v5 = vld [vmem:[%s12406_s2 + $0x4] sm:$0xf0] }
  0x15   :  { %2259 = vmatpush.bf16.msra.mxu3 %v8822_v38  ;;  %2587 = vmatpush.bf16.msrb.mxu0 %v8770_v59  ;;  %v8790_v3 = vor.u32 %v9246_v2, %v8789_v1  ;;  %v8781_v6 = vld [vmem:[%s12406_s2 + $0x80] sm:$0xf]  ;;  %v8718_v7 = vor.u32 %v9228_v5, %v8717_v4  ;;  %v9244_v8 = vld [vmem:[%s12406_s2 + $0x84] sm:$0xf0]  ;;  %v8901_v10 = vld [vmem:[%s12407_s3 + $0x70] sm:$0xf] }
  0x16   :  { %2916 = vmatpush.bf16.msrb.mxu1 %v8834_v63  ;;  %v8782_v9 = vor.u32 %v9244_v8, %v8781_v6  ;;  %v9274_v11 = vld [vmem:[%s12407_s3 + $0x74] sm:$0xf0]  ;;  %v8965_v12 = vld [vmem:[%s12407_s3 + $0xf0] sm:$0xf]  ;;  %v9172_v28 = vld [vmem:[%s12404_s0 + $0x48] sm:$0xff] }
  0x17   :  { %v8902_v13 = vor.u32 %v9274_v11, %v8901_v10  ;;  %v9173_v39 = vld [vmem:[%s12404_s0 + $0x50] sm:$0xff]  ;;  %v9174_v50 = vld [vmem:[%s12404_s0 + $0x58] sm:$0xff]  ;;  %v9175_v61 = vld [vmem:[%s12404_s0 + $0x60] sm:$0xff] }
  0x18   :  { %1931 = vmatpush.bf16.msra.mxu2 %v8750_v41  ;;  %v9176_v8 = vld [vmem:[%s12404_s0 + $0x68] sm:$0xff] }
  0x19   :  { %2260 = vmatpush.bf16.msra.mxu3 %v8814_v42 }
  0x1c   :  { %1932 = vmatpush.bf16.msra.mxu2 %v8742_v47 }
  0x1d   :  { %2261 = vmatpush.bf16.msra.mxu3 %v8806_v48 }
  0x1e   :  { %8588 = vmatmul.msk.bf16.gmra.mxu0 %vm494_vm1, %v9164_v14  ;;  %8652 = vmatmul.msk.bf16.gmra.mxu1 %vm494_vm1, %v9164_v14  ;;  %v9290_v14 = vld [vmem:[%s12407_s3 + $0xf4] sm:$0xf0] }
  0x20   :  { %1933 = vmatpush.bf16.msra.mxu2 %v8734_v53 }
  0x21   :  { %2262 = vmatpush.bf16.msra.mxu3 %v8798_v55 }
  0x24   :  { %1934 = vmatpush.bf16.msra.mxu2 %v8726_v0 }
  0x25   :  { %2263 = vmatpush.bf16.msra.mxu3 %v8790_v3 }
  0x28   :  { %1935 = vmatpush.bf16.msra.mxu2 %v8718_v7 }
  0x29   :  { %2264 = vmatpush.bf16.msra.mxu3 %v8782_v9 }
  0x2c   :  { %3820 = vmatpush.bf16.msrb.mxu2 %v8902_v13 }
  0x2e   :  { %8589 = vmatmul.msk.bf16.gmra.mxu0 %vm494_vm1, %v9165_v15  ;;  %8653 = vmatmul.msk.bf16.gmra.mxu1 %vm494_vm1, %v9165_v15  ;;  %v9170_v15 = vld [vmem:[%s12404_s0 + $0x38] sm:$0xff] }
  0x3e   :  { %8590 = vmatmul.msk.bf16.gmra.mxu0 %vm494_vm1, %v9166_v16  ;;  %8654 = vmatmul.msk.bf16.gmra.mxu1 %vm494_vm1, %v9166_v16  ;;  %v8966_v16 = vor.u32 %v9290_v14, %v8965_v12 }
  0x40   :  { %4149 = vmatpush.bf16.msrb.mxu3 %v8966_v16 }
  0x4e   :  { %8591 = vmatmul.msk.bf16.gmra.mxu0 %vm494_vm1, %v9167_v17  ;;  %8655 = vmatmul.msk.bf16.gmra.mxu1 %vm494_vm1, %v9167_v17  ;;  %v9171_v17 = vld [vmem:[%s12404_s0 + $0x40] sm:$0xff] }
  0x5e   :  { %8592 = vmatmul.msk.bf16.gmra.mxu0 %vm494_vm1, %v9168_v30  ;;  %8656 = vmatmul.msk.bf16.gmra.mxu1 %vm494_vm1, %v9168_v30 }
  0x6e   :  { %8593 = vmatmul.msk.bf16.gmra.mxu0 %vm494_vm1, %v9169_v49  ;;  %8657 = vmatmul.msk.bf16.gmra.mxu1 %vm494_vm1, %v9169_v49 }
  0x7e   :  { %8594 = vmatmul.msk.bf16.gmra.mxu0 %vm494_vm1, %v9170_v15  ;;  %8658 = vmatmul.msk.bf16.gmra.mxu1 %vm494_vm1, %v9170_v15 }
  0x8b   :  { %v703_v18 = vpop.f32.mrf.mxu0  ;;  %v1032_v19 = vpop.f32.mrf.mxu1 }
  0x8c   :  { %v1352_v22 = vmax.f32 %v703_v18, 0.0  ;;  %v1353_v23 = vmax.f32 %v1032_v19, 0.0  ;;  %v9177_v19 = vld [vmem:[%s12404_s0 + $0x70] sm:$0xff] }
  0x8e   :  { %8595 = vmatmul.msk.bf16.gmra.mxu0 %vm494_vm1, %v9171_v17  ;;  %8659 = vmatmul.msk.bf16.gmra.mxu1 %vm494_vm1, %v9171_v17 }
  0x93   :  { %v705_v20 = vpop.f32.mrf.mxu0  ;;  %v1034_v21 = vpop.f32.mrf.mxu1 }
  0x94   :  { %v1354_v24 = vmax.f32 %v705_v20, 0.0  ;;  %v1355_v25 = vmax.f32 %v1034_v21, 0.0 }
  0x96   :  { %v9589_v26 = vpack.c.bf16 %v1354_v24, %v1352_v22  ;;  %v9591_v27 = vpack.c.bf16 %v1355_v25, %v1353_v23  ;;  %v9237_v22 = vld [vmem:[%s12406_s2 + $0x54] sm:$0xf]  ;;  %v8759_v23 = vld [vmem:[%s12406_s2 + $0x58] sm:$0xf0] }
  0x97   :  { %v9253_v24 = vld [vmem:[%s12406_s2 + $0xd4] sm:$0xf]  ;;  %v8762_v25 = vor.u32 %v9237_v22, %v8759_v23 }
  0x98   :  { %1936 = vmatmul.bf16.vlgmr.msra.gmra.mxu2 %v9589_v26  ;;  %2265 = vmatmul.bf16.vlgmr.msra.gmra.mxu3 %v9591_v27 }
  0x99   :  { %2588 = vmatpush.bf16.msrb.mxu0 %v8762_v25 }
  0x9b   :  { %v708_v29 = vpop.f32.mrf.mxu0  ;;  %v1037_v30 = vpop.f32.mrf.mxu1 }
  0x9c   :  { %v1356_v33 = vmax.f32 %v708_v29, 0.0  ;;  %v1357_v34 = vmax.f32 %v1037_v30, 0.0 }
  0x9e   :  { %8596 = vmatmul.msk.bf16.gmra.mxu0 %vm494_vm1, %v9172_v28  ;;  %8660 = vmatmul.msk.bf16.gmra.mxu1 %vm494_vm1, %v9172_v28  ;;  %v8823_v28 = vld [vmem:[%s12406_s2 + $0xd8] sm:$0xf0] }
  0x9f   :  { %v8826_v29 = vor.u32 %v9253_v24, %v8823_v28 }
  0xa1   :  { %2917 = vmatpush.bf16.msrb.mxu1 %v8826_v29 }
  0xa3   :  { %v710_v31 = vpop.f32.mrf.mxu0  ;;  %v1039_v32 = vpop.f32.mrf.mxu1 }
  0xa4   :  { %v1358_v35 = vmax.f32 %v710_v31, 0.0  ;;  %v1359_v36 = vmax.f32 %v1039_v32, 0.0 }
  0xa6   :  { %v9600_v37 = vpack.c.bf16 %v1358_v35, %v1356_v33  ;;  %v9602_v38 = vpack.c.bf16 %v1359_v36, %v1357_v34 }
  0xa8   :  { %1941 = vmatmul.bf16.gmra.mxu2 %v9600_v37  ;;  %2270 = vmatmul.bf16.gmra.mxu3 %v9602_v38 }
  0xab   :  { %v713_v40 = vpop.f32.mrf.mxu0  ;;  %v1042_v41 = vpop.f32.mrf.mxu1 }
  0xac   :  { %v1360_v44 = vmax.f32 %v713_v40, 0.0  ;;  %v1361_v45 = vmax.f32 %v1042_v41, 0.0  ;;  %v8893_v40 = vld [vmem:[%s12407_s3 + $0x60] sm:$0xf]  ;;  %v9272_v41 = vld [vmem:[%s12407_s3 + $0x64] sm:$0xf0] }
  0xae   :  { %8597 = vmatmul.msk.bf16.gmra.mxu0 %vm494_vm1, %v9173_v39  ;;  %8661 = vmatmul.msk.bf16.gmra.mxu1 %vm494_vm1, %v9173_v39 }
  0xb3   :  { %v715_v42 = vpop.f32.mrf.mxu0  ;;  %v1044_v43 = vpop.f32.mrf.mxu1 }
  0xb4   :  { %v1362_v46 = vmax.f32 %v715_v42, 0.0  ;;  %v1363_v47 = vmax.f32 %v1044_v43, 0.0  ;;  %v8957_v42 = vld [vmem:[%s12407_s3 + $0xe0] sm:$0xf]  ;;  %v8894_v43 = vor.u32 %v9272_v41, %v8893_v40 }
  0xb6   :  { %v9611_v48 = vpack.c.bf16 %v1362_v46, %v1360_v44  ;;  %v9613_v49 = vpack.c.bf16 %v1363_v47, %v1361_v45  ;;  %v9288_v44 = vld [vmem:[%s12407_s3 + $0xe4] sm:$0xf0]  ;;  %v9178_v45 = vld [vmem:[%s12404_s0 + $0x78] sm:$0xff]  ;;  %3821 = vmatpush.bf16.msrb.mxu2 %v8894_v43 }
  0xb7   :  { %v8958_v46 = vor.u32 %v9288_v44, %v8957_v42 }
  0xb8   :  { %1946 = vmatmul.bf16.gmra.mxu2 %v9611_v48  ;;  %2275 = vmatmul.bf16.gmra.mxu3 %v9613_v49 }
  0xb9   :  { %4150 = vmatpush.bf16.msrb.mxu3 %v8958_v46 }
  0xbb   :  { %v718_v51 = vpop.f32.mrf.mxu0  ;;  %v1047_v52 = vpop.f32.mrf.mxu1 }
  0xbc   :  { %v1364_v55 = vmax.f32 %v718_v51, 0.0  ;;  %v1365_v56 = vmax.f32 %v1047_v52, 0.0 }
  0xbe   :  { %8598 = vmatmul.msk.bf16.gmra.mxu0 %vm494_vm1, %v9174_v50  ;;  %8662 = vmatmul.msk.bf16.gmra.mxu1 %vm494_vm1, %v9174_v50 }
  0xc3   :  { %v720_v53 = vpop.f32.mrf.mxu0  ;;  %v1049_v54 = vpop.f32.mrf.mxu1 }
  0xc4   :  { %v1366_v57 = vmax.f32 %v720_v53, 0.0  ;;  %v1367_v58 = vmax.f32 %v1049_v54, 0.0 }
  0xc6   :  { %v9622_v59 = vpack.c.bf16 %v1366_v57, %v1364_v55  ;;  %v9624_v60 = vpack.c.bf16 %v1367_v58, %v1365_v56 }
  0xc8   :  { %1951 = vmatmul.bf16.gmra.mxu2 %v9622_v59  ;;  %2280 = vmatmul.bf16.gmra.mxu3 %v9624_v60 }
  0xcb   :  { %v723_v62 = vpop.f32.mrf.mxu0  ;;  %v1052_v63 = vpop.f32.mrf.mxu1 }
  0xcc   :  { %v1368_v2 = vmax.f32 %v723_v62, 0.0  ;;  %v1369_v3 = vmax.f32 %v1052_v63, 0.0 }
  0xce   :  { %8599 = vmatmul.msk.bf16.gmra.mxu0 %vm494_vm1, %v9175_v61  ;;  %8663 = vmatmul.msk.bf16.gmra.mxu1 %vm494_vm1, %v9175_v61  ;;  %v9179_v61 = vld [vmem:[%s12404_s0 + $0x80] sm:$0xff] }
  0xd3   :  { %v725_v0 = vpop.f32.mrf.mxu0  ;;  %v1054_v1 = vpop.f32.mrf.mxu1 }
  0xd4   :  { %v1370_v4 = vmax.f32 %v725_v0, 0.0  ;;  %v1371_v5 = vmax.f32 %v1054_v1, 0.0 }
  0xd6   :  { %v9633_v6 = vpack.c.bf16 %v1370_v4, %v1368_v2  ;;  %v9635_v7 = vpack.c.bf16 %v1371_v5, %v1369_v3 }
  0xd8   :  { %1956 = vmatmul.bf16.gmra.mxu2 %v9633_v6  ;;  %2285 = vmatmul.bf16.gmra.mxu3 %v9635_v7 }
  0xdb   :  { %v728_v9 = vpop.f32.mrf.mxu0  ;;  %v1057_v10 = vpop.f32.mrf.mxu1 }
  0xdc   :  { %v1372_v13 = vmax.f32 %v728_v9, 0.0  ;;  %v1373_v14 = vmax.f32 %v1057_v10, 0.0  ;;  %v9180_v10 = vld [vmem:[%s12404_s0 + $0x88] sm:$0xff] }
  0xde   :  { %8600 = vmatmul.msk.bf16.gmra.mxu0 %vm494_vm1, %v9176_v8  ;;  %8664 = vmatmul.msk.bf16.gmra.mxu1 %vm494_vm1, %v9176_v8 }
  0xe3   :  { %v730_v11 = vpop.f32.mrf.mxu0  ;;  %v1059_v12 = vpop.f32.mrf.mxu1 }
  0xe4   :  { %v1374_v15 = vmax.f32 %v730_v11, 0.0  ;;  %v1375_v16 = vmax.f32 %v1059_v12, 0.0 }
  0xe6   :  { %v9644_v17 = vpack.c.bf16 %v1374_v15, %v1372_v13  ;;  %v9646_v18 = vpack.c.bf16 %v1375_v16, %v1373_v14 }
  0xe8   :  { %1961 = vmatmul.bf16.gmra.mxu2 %v9644_v17  ;;  %2290 = vmatmul.bf16.gmra.mxu3 %v9646_v18 }
  0xeb   :  { %v733_v20 = vpop.f32.mrf.mxu0  ;;  %v1062_v21 = vpop.f32.mrf.mxu1 }
  0xec   :  { %v1376_v32 = vmax.f32 %v733_v20, 0.0  ;;  %v1377_v33 = vmax.f32 %v1062_v21, 0.0 }
  0xee   :  { %8601 = vmatmul.msk.bf16.gmra.mxu0 %vm494_vm1, %v9177_v19  ;;  %8665 = vmatmul.msk.bf16.gmra.mxu1 %vm494_vm1, %v9177_v19 }
  0xf3   :  { %v735_v30 = vpop.f32.mrf.mxu0  ;;  %v1064_v31 = vpop.f32.mrf.mxu1 }
  0xf4   :  { %v1378_v34 = vmax.f32 %v735_v30, 0.0  ;;  %v1379_v35 = vmax.f32 %v1064_v31, 0.0 }
  0xf6   :  { %v9667_v36 = vpack.c.bf16 %v1378_v34, %v1376_v32  ;;  %v9669_v39 = vpack.c.bf16 %v1379_v35, %v1377_v33  ;;  %v9181_v34 = vld [vmem:[%s12404_s0 + $0x90] sm:$0xff] }
  0xf8   :  { %1966 = vmatmul.bf16.gmra.mxu2 %v9667_v36  ;;  %2295 = vmatmul.bf16.gmra.mxu3 %v9669_v39 }
  0xfb   :  { %v738_v47 = vpop.f32.mrf.mxu0  ;;  %v1067_v50 = vpop.f32.mrf.mxu1 }
  0xfc   :  { %v1380_v53 = vmax.f32 %v738_v47, 0.0  ;;  %v1381_v54 = vmax.f32 %v1067_v50, 0.0 }
  0xfe   :  { %8602 = vmatmul.msk.bf16.gmra.mxu0 %vm494_vm1, %v9178_v45  ;;  %8666 = vmatmul.msk.bf16.gmra.mxu1 %vm494_vm1, %v9178_v45 }
 0x103   :  { %v740_v51 = vpop.f32.mrf.mxu0  ;;  %v1069_v52 = vpop.f32.mrf.mxu1 }
 0x104   :  { %v1382_v55 = vmax.f32 %v740_v51, 0.0  ;;  %v1383_v56 = vmax.f32 %v1069_v52, 0.0 }
 0x106   :  { %v9690_v57 = vpack.c.bf16 %v1382_v55, %v1380_v53  ;;  %v9692_v58 = vpack.c.bf16 %v1383_v56, %v1381_v54 }
 0x108   :  { %1971 = vmatmul.bf16.gmra.mxu2 %v9690_v57  ;;  %2300 = vmatmul.bf16.gmra.mxu3 %v9692_v58 }
 0x10b   :  { %v743_v62 = vpop.f32.mrf.mxu0  ;;  %v1072_v63 = vpop.f32.mrf.mxu1 }
 0x10c   :  { %v1384_v2 = vmax.f32 %v743_v62, 0.0  ;;  %v1385_v3 = vmax.f32 %v1072_v63, 0.0 }
 0x10e   :  { %8603 = vmatmul.msk.bf16.gmra.mxu0 %vm494_vm1, %v9179_v61  ;;  %8667 = vmatmul.msk.bf16.gmra.mxu1 %vm494_vm1, %v9179_v61 }
 0x113   :  { %v745_v0 = vpop.f32.mrf.mxu0  ;;  %v1074_v1 = vpop.f32.mrf.mxu1 }
 0x114   :  { %v1386_v4 = vmax.f32 %v745_v0, 0.0  ;;  %v1387_v5 = vmax.f32 %v1074_v1, 0.0  ;;  %v9182_v0 = vld [vmem:[%s12404_s0 + $0x98] sm:$0xff] }
 0x116   :  { %v9701_v8 = vpack.c.bf16 %v1386_v4, %v1384_v2  ;;  %v9703_v9 = vpack.c.bf16 %v1387_v5, %v1385_v3 }
 0x118   :  { %1976 = vmatmul.bf16.gmra.mxu2 %v9701_v8  ;;  %2305 = vmatmul.bf16.gmra.mxu3 %v9703_v9 }
 0x11b   :  { %v748_v11 = vpop.f32.mrf.mxu0  ;;  %v1077_v12 = vpop.f32.mrf.mxu1 }
 0x11c   :  { %v1937_v13 = vpop.f32.mrf.mxu2  ;;  %v2266_v14 = vpop.f32.mrf.mxu3  ;;  %v1388_v20 = vmax.f32 %v748_v11, 0.0  ;;  %v1389_v21 = vmax.f32 %v1077_v12, 0.0 }
 0x11d   :  { %v2267_v15 = vadd.f32 %v2266_v14, %v1937_v13 }
 0x11e   :  { %8604 = vmatmul.msk.bf16.gmra.mxu0 %vm494_vm1, %v9180_v10  ;;  %8668 = vmatmul.msk.bf16.gmra.mxu1 %vm494_vm1, %v9180_v10 }
 0x11f   :  { %v3244_v31 = vmax.f32 %v2267_v15, 0.0 }
 0x123   :  { %v750_v16 = vpop.f32.mrf.mxu0  ;;  %v1079_v19 = vpop.f32.mrf.mxu1 }
 0x124   :  { %v1390_v22 = vmax.f32 %v750_v16, 0.0  ;;  %v1391_v23 = vmax.f32 %v1079_v19, 0.0  ;;  %v1939_v24 = vpop.f32.mrf.mxu2  ;;  %v2268_v25 = vpop.f32.mrf.mxu3 }
 0x125   :  { %v2269_v28 = vadd.f32 %v2268_v25, %v1939_v24 }
 0x126   :  { %v9712_v29 = vpack.c.bf16 %v1390_v22, %v1388_v20  ;;  %v9714_v30 = vpack.c.bf16 %v1391_v23, %v1389_v21 }
 0x127   :  { %v3246_v32 = vmax.f32 %v2269_v28, 0.0  ;;  %v9183_v28 = vld [vmem:[%s12404_s0 + $0xa0] sm:$0xff] }
 0x128   :  { %1981 = vmatmul.bf16.gmra.mxu2 %v9712_v29  ;;  %2310 = vmatmul.bf16.gmra.mxu3 %v9714_v30 }
 0x129   :  { %v9718_v33 = vpack.c.bf16 %v3246_v32, %v3244_v31 }
 0x12b   :  { %v753_v35 = vpop.f32.mrf.mxu0  ;;  %v1082_v40 = vpop.f32.mrf.mxu1 }
 0x12c   :  { %v1942_v41 = vpop.f32.mrf.mxu2  ;;  %v2271_v42 = vpop.f32.mrf.mxu3  ;;  %v1392_v46 = vmax.f32 %v753_v35, 0.0  ;;  %v1393_v47 = vmax.f32 %v1082_v40, 0.0 }
 0x12d   :  { %v2272_v43 = vadd.f32 %v2271_v42, %v1942_v41 }
 0x12e   :  { %8605 = vmatmul.msk.bf16.gmra.mxu0 %vm494_vm1, %v9181_v34  ;;  %8669 = vmatmul.msk.bf16.gmra.mxu1 %vm494_vm1, %v9181_v34 }
 0x12f   :  { %v3248_v61 = vmax.f32 %v2272_v43, 0.0 }
 0x133   :  { %v755_v44 = vpop.f32.mrf.mxu0  ;;  %v1084_v45 = vpop.f32.mrf.mxu1 }
 0x134   :  { %v1394_v50 = vmax.f32 %v755_v44, 0.0  ;;  %v1395_v51 = vmax.f32 %v1084_v45, 0.0  ;;  %v1944_v52 = vpop.f32.mrf.mxu2  ;;  %v2273_v53 = vpop.f32.mrf.mxu3 }
 0x135   :  { %v2274_v54 = vadd.f32 %v2273_v53, %v1944_v52 }
 0x136   :  { %v9725_v55 = vpack.c.bf16 %v1394_v50, %v1392_v46  ;;  %v9727_v56 = vpack.c.bf16 %v1395_v51, %v1393_v47 }
 0x137   :  { %v3250_v62 = vmax.f32 %v2274_v54, 0.0 }
 0x138   :  { %1986 = vmatmul.bf16.gmra.mxu2 %v9725_v55  ;;  %2315 = vmatmul.bf16.gmra.mxu3 %v9727_v56 }
 0x139   :  { %v9731_v63 = vpack.c.bf16 %v3250_v62, %v3248_v61 }
 0x13b   :  { %v758_v1 = vpop.f32.mrf.mxu0  ;;  %v1087_v2 = vpop.f32.mrf.mxu1 }
 0x13c   :  { %v1947_v3 = vpop.f32.mrf.mxu2  ;;  %v2276_v4 = vpop.f32.mrf.mxu3  ;;  %v1396_v12 = vmax.f32 %v758_v1, 0.0  ;;  %v1397_v13 = vmax.f32 %v1087_v2, 0.0 }
 0x13d   :  { %v2277_v5 = vadd.f32 %v2276_v4, %v1947_v3 }
 0x13e   :  { %8606 = vmatmul.msk.bf16.gmra.mxu0 %vm494_vm1, %v9182_v0  ;;  %8670 = vmatmul.msk.bf16.gmra.mxu1 %vm494_vm1, %v9182_v0  ;;  %v9184_v0 = vld [vmem:[%s12404_s0 + $0xa8] sm:$0xff] }
 0x13f   :  { %v3252_v23 = vmax.f32 %v2277_v5, 0.0 }
 0x143   :  { %v760_v10 = vpop.f32.mrf.mxu0  ;;  %v1089_v11 = vpop.f32.mrf.mxu1 }
 0x144   :  { %v1398_v14 = vmax.f32 %v760_v10, 0.0  ;;  %v1399_v15 = vmax.f32 %v1089_v11, 0.0  ;;  %v1949_v16 = vpop.f32.mrf.mxu2  ;;  %v2278_v19 = vpop.f32.mrf.mxu3 }
 0x145   :  { %v2279_v20 = vadd.f32 %v2278_v19, %v1949_v16 }
 0x146   :  { %v9738_v21 = vpack.c.bf16 %v1398_v14, %v1396_v12  ;;  %v9740_v22 = vpack.c.bf16 %v1399_v15, %v1397_v13 }
 0x147   :  { %v3254_v24 = vmax.f32 %v2279_v20, 0.0 }
 0x148   :  { %1991 = vmatmul.bf16.gmra.mxu2 %v9738_v21  ;;  %2320 = vmatmul.bf16.gmra.mxu3 %v9740_v22 }
 0x149   :  { %v9744_v25 = vpack.c.bf16 %v3254_v24, %v3252_v23 }
 0x14b   :  { %v763_v31 = vpop.f32.mrf.mxu0  ;;  %v1092_v32 = vpop.f32.mrf.mxu1 }
 0x14c   :  { %v1952_v34 = vpop.f32.mrf.mxu2  ;;  %v2281_v35 = vpop.f32.mrf.mxu3  ;;  %v1400_v43 = vmax.f32 %v763_v31, 0.0  ;;  %v1401_v44 = vmax.f32 %v1092_v32, 0.0 }
 0x14d   :  { %v2282_v40 = vadd.f32 %v2281_v35, %v1952_v34  ;;  %v9185_v34 = vld [vmem:[%s12404_s0 + $0xb0] sm:$0xff] }
 0x14e   :  { %8607 = vmatmul.msk.bf16.gmra.mxu0 %vm494_vm1, %v9183_v28  ;;  %8671 = vmatmul.msk.bf16.gmra.mxu1 %vm494_vm1, %v9183_v28 }
 0x14f   :  { %v3256_v54 = vmax.f32 %v2282_v40, 0.0 }
 0x153   :  { %v765_v41 = vpop.f32.mrf.mxu0  ;;  %v1094_v42 = vpop.f32.mrf.mxu1 }
 0x154   :  { %v1402_v45 = vmax.f32 %v765_v41, 0.0  ;;  %v1403_v46 = vmax.f32 %v1094_v42, 0.0  ;;  %v1954_v47 = vpop.f32.mrf.mxu2  ;;  %v2283_v50 = vpop.f32.mrf.mxu3 }
 0x155   :  { %v2284_v51 = vadd.f32 %v2283_v50, %v1954_v47  ;;  %v9251_v47 = vld [vmem:[%s12406_s2 + $0xc4] sm:$0xf]  ;;  %v8815_v50 = vld [vmem:[%s12406_s2 + $0xc8] sm:$0xf0] }
 0x156   :  { %v9751_v52 = vpack.c.bf16 %v1402_v45, %v1400_v43  ;;  %v9753_v53 = vpack.c.bf16 %v1403_v46, %v1401_v44  ;;  %v9235_v44 = vld [vmem:[%s12406_s2 + $0x44] sm:$0xf]  ;;  %v8751_v45 = vld [vmem:[%s12406_s2 + $0x48] sm:$0xf0] }
 0x157   :  { %v3258_v61 = vmax.f32 %v2284_v51, 0.0  ;;  %v8754_v46 = vor.u32 %v9235_v44, %v8751_v45  ;;  %v8818_v51 = vor.u32 %v9251_v47, %v8815_v50 }
 0x158   :  { %1996 = vmatmul.bf16.gmra.mxu2 %v9751_v52  ;;  %2325 = vmatmul.bf16.gmra.mxu3 %v9753_v53 }
 0x159   :  { %v9757_v62 = vpack.c.bf16 %v3258_v61, %v3256_v54  ;;  %2589 = vmatpush.bf16.msrb.mxu0 %v8754_v46  ;;  %2918 = vmatpush.bf16.msrb.mxu1 %v8818_v51 }
 0x15b   :  { %v768_v1 = vpop.f32.mrf.mxu0  ;;  %v1097_v2 = vpop.f32.mrf.mxu1 }
 0x15c   :  { %v1957_v3 = vpop.f32.mrf.mxu2  ;;  %v2286_v4 = vpop.f32.mrf.mxu3  ;;  %v1404_v12 = vmax.f32 %v768_v1, 0.0  ;;  %v1405_v13 = vmax.f32 %v1097_v2, 0.0 }
 0x15d   :  { %v2287_v5 = vadd.f32 %v2286_v4, %v1957_v3 }
 0x15e   :  { %8608 = vmatmul.msk.bf16.gmra.mxu0 %vm494_vm1, %v9184_v0  ;;  %8672 = vmatmul.msk.bf16.gmra.mxu1 %vm494_vm1, %v9184_v0 }
 0x15f   :  { %v3260_v28 = vmax.f32 %v2287_v5, 0.0 }
 0x163   :  { %v770_v10 = vpop.f32.mrf.mxu0  ;;  %v1099_v11 = vpop.f32.mrf.mxu1 }
 0x164   :  { %v1406_v14 = vmax.f32 %v770_v10, 0.0  ;;  %v1407_v15 = vmax.f32 %v1099_v11, 0.0  ;;  %v1959_v16 = vpop.f32.mrf.mxu2  ;;  %v2288_v19 = vpop.f32.mrf.mxu3 }
 0x165   :  { %v2289_v20 = vadd.f32 %v2288_v19, %v1959_v16  ;;  %v9270_v16 = vld [vmem:[%s12407_s3 + $0x54] sm:$0xf0]  ;;  %v8949_v19 = vld [vmem:[%s12407_s3 + $0xd0] sm:$0xf] }
 0x166   :  { %v9764_v23 = vpack.c.bf16 %v1406_v14, %v1404_v12  ;;  %v9766_v24 = vpack.c.bf16 %v1407_v15, %v1405_v13  ;;  %v8885_v15 = vld [vmem:[%s12407_s3 + $0x50] sm:$0xf] }
 0x167   :  { %v3262_v31 = vmax.f32 %v2289_v20, 0.0  ;;  %v8886_v20 = vor.u32 %v9270_v16, %v8885_v15 }
 0x168   :  { %2001 = vmatmul.bf16.gmra.mxu2 %v9764_v23  ;;  %2330 = vmatmul.bf16.gmra.mxu3 %v9766_v24 }
 0x169   :  { %v9770_v32 = vpack.c.bf16 %v3262_v31, %v3260_v28  ;;  %v9286_v28 = vld [vmem:[%s12407_s3 + $0xd4] sm:$0xf0]  ;;  %3822 = vmatpush.bf16.msrb.mxu2 %v8886_v20 }
 0x16b   :  { %v773_v35 = vpop.f32.mrf.mxu0  ;;  %v1102_v40 = vpop.f32.mrf.mxu1 }
 0x16c   :  { %v1962_v41 = vpop.f32.mrf.mxu2  ;;  %v2291_v42 = vpop.f32.mrf.mxu3  ;;  %v1408_v0 = vmax.f32 %v773_v35, 0.0  ;;  %v1409_v1 = vmax.f32 %v1102_v40, 0.0  ;;  %v8950_v35 = vor.u32 %v9286_v28, %v8949_v19 }
 0x16d   :  { %v2292_v43 = vadd.f32 %v2291_v42, %v1962_v41 }
 0x16e   :  { %8609 = vmatmul.msk.bf16.gmra.mxu0 %vm494_vm1, %v9185_v34  ;;  %8673 = vmatmul.msk.bf16.gmra.mxu1 %vm494_vm1, %v9185_v34  ;;  %v9186_v34 = vld [vmem:[%s12404_s0 + $0xb8] sm:$0xff] }
 0x16f   :  { %v3264_v13 = vmax.f32 %v2292_v43, 0.0  ;;  %4151 = vmatpush.bf16.msrb.mxu3 %v8950_v35 }
 0x173   :  { %v775_v54 = vpop.f32.mrf.mxu0  ;;  %v1104_v61 = vpop.f32.mrf.mxu1 }
 0x174   :  { %v1410_v2 = vmax.f32 %v775_v54, 0.0  ;;  %v1411_v3 = vmax.f32 %v1104_v61, 0.0  ;;  %v1964_v4 = vpop.f32.mrf.mxu2  ;;  %v2293_v5 = vpop.f32.mrf.mxu3 }
 0x175   :  { %v2294_v10 = vadd.f32 %v2293_v5, %v1964_v4 }
 0x176   :  { %v9789_v11 = vpack.c.bf16 %v1410_v2, %v1408_v0  ;;  %v9791_v12 = vpack.c.bf16 %v1411_v3, %v1409_v1 }
 0x177   :  { %v3266_v14 = vmax.f32 %v2294_v10, 0.0 }
 0x178   :  { %2006 = vmatmul.bf16.gmra.mxu2 %v9789_v11  ;;  %2335 = vmatmul.bf16.gmra.mxu3 %v9791_v12 }
 0x179   :  { %v9807_v31 = vpack.c.bf16 %v3266_v14, %v3264_v13  ;;  %v9187_v13 = vld [vmem:[%s12404_s0 + $0xc0] sm:$0xff] }
 0x17b   :  { %v778_v40 = vpop.f32.mrf.mxu0  ;;  %v1107_v41 = vpop.f32.mrf.mxu1 }
 0x17c   :  { %v1967_v42 = vpop.f32.mrf.mxu2  ;;  %v2296_v43 = vpop.f32.mrf.mxu3  ;;  %v1412_v47 = vmax.f32 %v778_v40, 0.0  ;;  %v1413_v50 = vmax.f32 %v1107_v41, 0.0 }
 0x17d   :  { %v2297_v44 = vadd.f32 %v2296_v43, %v1967_v42 }
 0x17e   :  { %8610 = vmatmul.msk.bf16.gmra.mxu0 %vm494_vm1, %v9186_v34  ;;  %8674 = vmatmul.msk.bf16.gmra.mxu1 %vm494_vm1, %v9186_v34 }
 0x17f   :  { %v3268_v4 = vmax.f32 %v2297_v44, 0.0 }
 0x183   :  { %v780_v45 = vpop.f32.mrf.mxu0  ;;  %v1109_v46 = vpop.f32.mrf.mxu1 }
 0x184   :  { %v1414_v51 = vmax.f32 %v780_v45, 0.0  ;;  %v1415_v54 = vmax.f32 %v1109_v46, 0.0  ;;  %v1969_v61 = vpop.f32.mrf.mxu2  ;;  %v2298_v0 = vpop.f32.mrf.mxu3 }
 0x185   :  { %v2299_v1 = vadd.f32 %v2298_v0, %v1969_v61  ;;  %v9188_v61 = vld [vmem:[%s12404_s0 + $0xc8] sm:$0xff] }
 0x186   :  { %v9814_v2 = vpack.c.bf16 %v1414_v51, %v1412_v47  ;;  %v9816_v3 = vpack.c.bf16 %v1415_v54, %v1413_v50 }
 0x187   :  { %v3270_v5 = vmax.f32 %v2299_v1, 0.0 }
 0x188   :  { %2011 = vmatmul.bf16.gmra.mxu2 %v9814_v2  ;;  %2340 = vmatmul.bf16.gmra.mxu3 %v9816_v3 }
 0x189   :  { %v9820_v10 = vpack.c.bf16 %v3270_v5, %v3268_v4 }
 0x18b   :  { %v783_v14 = vpop.f32.mrf.mxu0  ;;  %v1112_v15 = vpop.f32.mrf.mxu1 }
 0x18c   :  { %v1972_v16 = vpop.f32.mrf.mxu2  ;;  %v2301_v19 = vpop.f32.mrf.mxu3  ;;  %v1416_v35 = vmax.f32 %v783_v14, 0.0  ;;  %v1417_v40 = vmax.f32 %v1112_v15, 0.0 }
 0x18d   :  { %v2302_v20 = vadd.f32 %v2301_v19, %v1972_v16 }
 0x18e   :  { %8611 = vmatmul.msk.bf16.gmra.mxu0 %vm494_vm1, %v9187_v13  ;;  %8675 = vmatmul.msk.bf16.gmra.mxu1 %vm494_vm1, %v9187_v13 }
 0x18f   :  { %v3272_v50 = vmax.f32 %v2302_v20, 0.0 }
 0x193   :  { %v785_v28 = vpop.f32.mrf.mxu0  ;;  %v1114_v34 = vpop.f32.mrf.mxu1 }
 0x194   :  { %v1418_v41 = vmax.f32 %v785_v28, 0.0  ;;  %v1419_v42 = vmax.f32 %v1114_v34, 0.0  ;;  %v1974_v43 = vpop.f32.mrf.mxu2  ;;  %v2303_v44 = vpop.f32.mrf.mxu3 }
 0x195   :  { %v2304_v45 = vadd.f32 %v2303_v44, %v1974_v43 }
 0x196   :  { %v9827_v46 = vpack.c.bf16 %v1418_v41, %v1416_v35  ;;  %v9829_v47 = vpack.c.bf16 %v1419_v42, %v1417_v40 }
 0x197   :  { %v3274_v51 = vmax.f32 %v2304_v45, 0.0 }
 0x198   :  { %2016 = vmatmul.bf16.gmra.mxu2 %v9827_v46  ;;  %2345 = vmatmul.bf16.gmra.mxu3 %v9829_v47 }
 0x199   :  { %v9833_v54 = vpack.c.bf16 %v3274_v51, %v3272_v50  ;;  %v9189_v50 = vld [vmem:[%s12404_s0 + $0xd0] sm:$0xff] }
 0x19b   :  { %v788_v0 = vpop.f32.mrf.mxu0  ;;  %v1117_v1 = vpop.f32.mrf.mxu1 }
 0x19c   :  { %v1977_v4 = vpop.f32.mrf.mxu2  ;;  %v2306_v5 = vpop.f32.mrf.mxu3  ;;  %v1420_v16 = vmax.f32 %v788_v0, 0.0  ;;  %v1421_v19 = vmax.f32 %v1117_v1, 0.0 }
 0x19d   :  { %v2307_v13 = vadd.f32 %v2306_v5, %v1977_v4 }
 0x19e   :  { %8612 = vmatmul.msk.bf16.gmra.mxu0 %vm494_vm1, %v9188_v61  ;;  %8676 = vmatmul.msk.bf16.gmra.mxu1 %vm494_vm1, %v9188_v61 }
 0x19f   :  { %v3276_v43 = vmax.f32 %v2307_v13, 0.0 }
 0x1a3   :  { %v790_v14 = vpop.f32.mrf.mxu0  ;;  %v1119_v15 = vpop.f32.mrf.mxu1 }
 0x1a4   :  { %v1422_v20 = vmax.f32 %v790_v14, 0.0  ;;  %v1423_v28 = vmax.f32 %v1119_v15, 0.0  ;;  %v1979_v34 = vpop.f32.mrf.mxu2  ;;  %v2308_v35 = vpop.f32.mrf.mxu3 }
 0x1a5   :  { %v2309_v40 = vadd.f32 %v2308_v35, %v1979_v34 }
 0x1a6   :  { %v9840_v41 = vpack.c.bf16 %v1422_v20, %v1420_v16  ;;  %v9842_v42 = vpack.c.bf16 %v1423_v28, %v1421_v19 }
 0x1a7   :  { %v3278_v44 = vmax.f32 %v2309_v40, 0.0 }
 0x1a8   :  { %12685 = vst [vmem:[#allocation5_spill] sm:$0xff] %v9842_v42  ;;  %2021 = vmatmul.bf16.gmra.mxu2 %v9840_v41  ;;  %2350 = vmatmul.bf16.gmra.mxu3 %v9842_v42 }
 0x1a9   :  { %v9846_v45 = vpack.c.bf16 %v3278_v44, %v3276_v43 }
 0x1ab   :  { %v793_v51 = vpop.f32.mrf.mxu0  ;;  %v1122_v61 = vpop.f32.mrf.mxu1 }
 0x1ac   :  { %v1982_v0 = vpop.f32.mrf.mxu2  ;;  %v2311_v1 = vpop.f32.mrf.mxu3  ;;  %v1424_v14 = vmax.f32 %v793_v51, 0.0  ;;  %v1425_v15 = vmax.f32 %v1122_v61, 0.0  ;;  %v9190_v51 = vld [vmem:[%s12404_s0 + $0xd8] sm:$0xff] }
 0x1ad   :  { %v2312_v4 = vadd.f32 %v2311_v1, %v1982_v0 }
 0x1ae   :  { %8613 = vmatmul.msk.bf16.gmra.mxu0 %vm494_vm1, %v9189_v50  ;;  %8677 = vmatmul.msk.bf16.gmra.mxu1 %vm494_vm1, %v9189_v50 }
 0x1af   :  { %v3280_v43 = vmax.f32 %v2312_v4, 0.0 }
 0x1b3   :  { %v795_v5 = vpop.f32.mrf.mxu0  ;;  %v1124_v13 = vpop.f32.mrf.mxu1 }
 0x1b4   :  { %v1426_v16 = vmax.f32 %v795_v5, 0.0  ;;  %v1427_v19 = vmax.f32 %v1124_v13, 0.0  ;;  %v1984_v20 = vpop.f32.mrf.mxu2  ;;  %v2313_v28 = vpop.f32.mrf.mxu3 }
 0x1b5   :  { %v2314_v34 = vadd.f32 %v2313_v28, %v1984_v20 }
 0x1b6   :  { %v9853_v35 = vpack.c.bf16 %v1426_v16, %v1424_v14  ;;  %v9855_v40 = vpack.c.bf16 %v1427_v19, %v1425_v15 }
 0x1b7   :  { %v3282_v44 = vmax.f32 %v2314_v34, 0.0 }
 0x1b8   :  { %12686 = vst [vmem:[#allocation6_spill] sm:$0xff] %v9853_v35  ;;  %2026 = vmatmul.bf16.gmra.mxu2 %v9853_v35  ;;  %2355 = vmatmul.bf16.gmra.mxu3 %v9855_v40 }
 0x1b9   :  { %12687 = vst [vmem:[#allocation7_spill] sm:$0xff] %v9855_v40  ;;  %v9859_v50 = vpack.c.bf16 %v3282_v44, %v3280_v43 }
 0x1bb   :  { %12688 = vst [vmem:[#allocation8_spill] sm:$0xff] %v9859_v50  ;;  %v798_v61 = vpop.f32.mrf.mxu0  ;;  %v1127_v0 = vpop.f32.mrf.mxu1 }
 0x1bc   :  { %v1987_v1 = vpop.f32.mrf.mxu2  ;;  %v2316_v5 = vpop.f32.mrf.mxu3  ;;  %v1428_v15 = vmax.f32 %v798_v61, 0.0  ;;  %v1429_v16 = vmax.f32 %v1127_v0, 0.0  ;;  %v9191_v61 = vld [vmem:[%s12404_s0 + $0xe0] sm:$0xff] }
 0x1bd   :  { %v2317_v13 = vadd.f32 %v2316_v5, %v1987_v1 }
 0x1be   :  { %8614 = vmatmul.msk.bf16.gmra.mxu0 %vm494_vm1, %v9190_v51  ;;  %8678 = vmatmul.msk.bf16.gmra.mxu1 %vm494_vm1, %v9190_v51 }
 0x1bf   :  { %v3284_v35 = vmax.f32 %v2317_v13, 0.0 }
 0x1c3   :  { %v800_v4 = vpop.f32.mrf.mxu0  ;;  %v1129_v14 = vpop.f32.mrf.mxu1 }
 0x1c4   :  { %v1430_v19 = vmax.f32 %v800_v4, 0.0  ;;  %v1431_v20 = vmax.f32 %v1129_v14, 0.0  ;;  %v1989_v28 = vpop.f32.mrf.mxu2  ;;  %v2318_v34 = vpop.f32.mrf.mxu3 }
 0x1c5   :  { %v2319_v43 = vadd.f32 %v2318_v34, %v1989_v28 }
 0x1c6   :  { %v9866_v44 = vpack.c.bf16 %v1430_v19, %v1428_v15  ;;  %v9868_v40 = vpack.c.bf16 %v1431_v20, %v1429_v16 }
 0x1c7   :  { %v3286_v50 = vmax.f32 %v2319_v43, 0.0 }
 0x1c8   :  { %12689 = vst [vmem:[#allocation9_spill] sm:$0xff] %v9866_v44  ;;  %2031 = vmatmul.bf16.gmra.mxu2 %v9866_v44  ;;  %2360 = vmatmul.bf16.gmra.mxu3 %v9868_v40 }
 0x1c9   :  { %12690 = vst [vmem:[#allocation10_spill] sm:$0xff] %v9868_v40  ;;  %v9872_v51 = vpack.c.bf16 %v3286_v50, %v3284_v35 }
 0x1cb   :  { %12691 = vst [vmem:[#allocation11_spill] sm:$0xff] %v9872_v51  ;;  %v803_v0 = vpop.f32.mrf.mxu0  ;;  %v1132_v1 = vpop.f32.mrf.mxu1 }
 0x1cc   :  { %v1992_v5 = vpop.f32.mrf.mxu2  ;;  %v2321_v4 = vpop.f32.mrf.mxu3  ;;  %v1432_v16 = vmax.f32 %v803_v0, 0.0  ;;  %v1433_v19 = vmax.f32 %v1132_v1, 0.0  ;;  %v9192_v0 = vld [vmem:[%s12404_s0 + $0xe8] sm:$0xff] }
 0x1cd   :  { %v2322_v14 = vadd.f32 %v2321_v4, %v1992_v5 }
 0x1ce   :  { %8615 = vmatmul.msk.bf16.gmra.mxu0 %vm494_vm1, %v9191_v61  ;;  %8679 = vmatmul.msk.bf16.gmra.mxu1 %vm494_vm1, %v9191_v61 }
 0x1cf   :  { %v3288_v44 = vmax.f32 %v2322_v14, 0.0 }
 0x1d3   :  { %v805_v13 = vpop.f32.mrf.mxu0  ;;  %v1134_v15 = vpop.f32.mrf.mxu1 }
 0x1d4   :  { %v1434_v20 = vmax.f32 %v805_v13, 0.0  ;;  %v1435_v35 = vmax.f32 %v1134_v15, 0.0  ;;  %v1994_v50 = vpop.f32.mrf.mxu2  ;;  %v2323_v28 = vpop.f32.mrf.mxu3 }
 0x1d5   :  { %v2324_v34 = vadd.f32 %v2323_v28, %v1994_v50 }
 0x1d6   :  { %v9879_v43 = vpack.c.bf16 %v1434_v20, %v1432_v16  ;;  %v9881_v40 = vpack.c.bf16 %v1435_v35, %v1433_v19 }
 0x1d7   :  { %v3290_v51 = vmax.f32 %v2324_v34, 0.0 }
 0x1d8   :  { %12692 = vst [vmem:[#allocation12_spill] sm:$0xff] %v9879_v43  ;;  %2036 = vmatmul.bf16.gmra.mxu2 %v9879_v43  ;;  %2365 = vmatmul.bf16.gmra.mxu3 %v9881_v40 }
 0x1d9   :  { %12693 = vst [vmem:[#allocation13_spill] sm:$0xff] %v9881_v40  ;;  %v9885_v61 = vpack.c.bf16 %v3290_v51, %v3288_v44 }
 0x1db   :  { %12694 = vst [vmem:[#allocation14_spill] sm:$0xff] %v9885_v61  ;;  %v808_v1 = vpop.f32.mrf.mxu0  ;;  %v1137_v5 = vpop.f32.mrf.mxu1 }
 0x1dc   :  { %v1997_v4 = vpop.f32.mrf.mxu2  ;;  %v2326_v13 = vpop.f32.mrf.mxu3  ;;  %v1436_v19 = vmax.f32 %v808_v1, 0.0  ;;  %v1437_v20 = vmax.f32 %v1137_v5, 0.0  ;;  %v9193_v1 = vld [vmem:[%s12404_s0 + $0xf0] sm:$0xff] }
 0x1dd   :  { %v2327_v15 = vadd.f32 %v2326_v13, %v1997_v4 }
 0x1de   :  { %8616 = vmatmul.msk.bf16.gmra.mxu0 %vm494_vm1, %v9192_v0  ;;  %8680 = vmatmul.msk.bf16.gmra.mxu1 %vm494_vm1, %v9192_v0 }
 0x1df   :  { %v3292_v43 = vmax.f32 %v2327_v15, 0.0  ;;  %v9233_v15 = vld [vmem:[%s12406_s2 + $0x34] sm:$0xf] }
 0x1e3   :  { %v810_v14 = vpop.f32.mrf.mxu0  ;;  %v1139_v16 = vpop.f32.mrf.mxu1 }
 0x1e4   :  { %v1438_v35 = vmax.f32 %v810_v14, 0.0  ;;  %v1439_v44 = vmax.f32 %v1139_v16, 0.0  ;;  %v1999_v51 = vpop.f32.mrf.mxu2  ;;  %v2328_v50 = vpop.f32.mrf.mxu3 }
 0x1e5   :  { %v2329_v28 = vadd.f32 %v2328_v50, %v1999_v51 }
 0x1e6   :  { %v9892_v34 = vpack.c.bf16 %v1438_v35, %v1436_v19  ;;  %v9894_v40 = vpack.c.bf16 %v1439_v44, %v1437_v20  ;;  %v9249_v19 = vld [vmem:[%s12406_s2 + $0xb4] sm:$0xf]  ;;  %v8807_v20 = vld [vmem:[%s12406_s2 + $0xb8] sm:$0xf0] }
 0x1e7   :  { %v3294_v61 = vmax.f32 %v2329_v28, 0.0  ;;  %v8810_v35 = vor.u32 %v9249_v19, %v8807_v20  ;;  %v9194_v20 = vld [vmem:[%s12404_s0 + $0xf8] sm:$0xff] }
 0x1e8   :  { %12695 = vst [vmem:[#allocation15_spill] sm:$0xff] %v9892_v34  ;;  %2041 = vmatmul.bf16.gmra.mxu2 %v9892_v34  ;;  %2370 = vmatmul.bf16.gmra.mxu3 %v9894_v40 }
 0x1e9   :  { %12696 = vst [vmem:[#allocation16_spill] sm:$0xff] %v9894_v40  ;;  %v9898_v0 = vpack.c.bf16 %v3294_v61, %v3292_v43  ;;  %v8743_v43 = vld [vmem:[%s12406_s2 + $0x38] sm:$0xf0]  ;;  %2919 = vmatpush.bf16.msrb.mxu1 %v8810_v35 }
 0x1ea   :  { %v8746_v61 = vor.u32 %v9233_v15, %v8743_v43 }
 0x1eb   :  { %12697 = vst [vmem:[#allocation17_spill] sm:$0xff] %v9898_v0  ;;  %v813_v5 = vpop.f32.mrf.mxu0  ;;  %v1142_v4 = vpop.f32.mrf.mxu1 }
 0x1ec   :  { %v2002_v13 = vpop.f32.mrf.mxu2  ;;  %v2331_v14 = vpop.f32.mrf.mxu3  ;;  %2590 = vmatpush.bf16.msrb.mxu0 %v8746_v61  ;;  %v1440_v50 = vmax.f32 %v813_v5, 0.0  ;;  %v1441_v28 = vmax.f32 %v1142_v4, 0.0  ;;  %v8877_v5 = vld [vmem:[%s12407_s3 + $0x40] sm:$0xf]  ;;  %v9268_v4 = vld [vmem:[%s12407_s3 + $0x44] sm:$0xf0] }
 0x1ed   :  { %v2332_v16 = vadd.f32 %v2331_v14, %v2002_v13  ;;  %v8878_v61 = vor.u32 %v9268_v4, %v8877_v5 }
 0x1ee   :  { %8617 = vmatmul.msk.bf16.gmra.mxu0 %vm494_vm1, %v9193_v1  ;;  %8681 = vmatmul.msk.bf16.gmra.mxu1 %vm494_vm1, %v9193_v1 }
 0x1ef   :  { %v3296_v0 = vmax.f32 %v2332_v16, 0.0  ;;  %v9284_v16 = vld [vmem:[%s12407_s3 + $0xc4] sm:$0xf0]  ;;  %3823 = vmatpush.bf16.msrb.mxu2 %v8878_v61 }
 0x1f3   :  { %v815_v44 = vpop.f32.mrf.mxu0  ;;  %v1144_v51 = vpop.f32.mrf.mxu1 }
 0x1f4   :  { %v1442_v1 = vmax.f32 %v815_v44, 0.0  ;;  %v1443_v13 = vmax.f32 %v1144_v51, 0.0  ;;  %v2004_v14 = vpop.f32.mrf.mxu2  ;;  %v2333_v40 = vpop.f32.mrf.mxu3 }
 0x1f5   :  { %v2334_v15 = vadd.f32 %v2333_v40, %v2004_v14  ;;  %v8941_v40 = vld [vmem:[%s12407_s3 + $0xc0] sm:$0xf] }
 0x1f6   :  { %v9917_v43 = vpack.c.bf16 %v1442_v1, %v1440_v50  ;;  %v9919_v34 = vpack.c.bf16 %v1443_v13, %v1441_v28  ;;  %v8942_v35 = vor.u32 %v9284_v16, %v8941_v40 }
 0x1f7   :  { %v3298_v42 = vmax.f32 %v2334_v15, 0.0 }
 0x1f8   :  { %12698 = vst [vmem:[#allocation18_spill] sm:$0xff] %v9917_v43  ;;  %2046 = vmatmul.bf16.gmra.mxu2 %v9917_v43  ;;  %2375 = vmatmul.bf16.gmra.mxu3 %v9919_v34 }
 0x1f9   :  { %12699 = vst [vmem:[#allocation19_spill] sm:$0xff] %v9919_v34  ;;  %v9935_v19 = vpack.c.bf16 %v3298_v42, %v3296_v0  ;;  %4152 = vmatpush.bf16.msrb.mxu3 %v8942_v35 }
 0x1fb   :  { %12700 = vst [vmem:[#allocation20_spill] sm:$0xff] %v9935_v19  ;;  %v818_v44 = vpop.f32.mrf.mxu0  ;;  %v1147_v51 = vpop.f32.mrf.mxu1 }
 0x1fc   :  { %v2007_v50 = vpop.f32.mrf.mxu2  ;;  %v2336_v28 = vpop.f32.mrf.mxu3  ;;  %v1444_v42 = vmax.f32 %v818_v44, 0.0  ;;  %v1445_v0 = vmax.f32 %v1147_v51, 0.0  ;;  %v9195_v44 = vld [vmem:[%s12404_s0 + $0x100] sm:$0xff] }
 0x1fd   :  { %v2337_v1 = vadd.f32 %v2336_v28, %v2007_v50 }
 0x1fe   :  { %8618 = vmatmul.msk.bf16.gmra.mxu0 %vm494_vm1, %v9194_v20  ;;  %8682 = vmatmul.msk.bf16.gmra.mxu1 %vm494_vm1, %v9194_v20 }
 0x1ff   :  { %v3300_v43 = vmax.f32 %v2337_v1, 0.0 }
 0x203   :  { %v820_v13 = vpop.f32.mrf.mxu0  ;;  %v1149_v14 = vpop.f32.mrf.mxu1 }
 0x204   :  { %v1446_v15 = vmax.f32 %v820_v13, 0.0  ;;  %v1447_v5 = vmax.f32 %v1149_v14, 0.0  ;;  %v2009_v4 = vpop.f32.mrf.mxu2  ;;  %v2338_v34 = vpop.f32.mrf.mxu3 }
 0x205   :  { %v2339_v40 = vadd.f32 %v2338_v34, %v2009_v4 }
 0x206   :  { %v9942_v16 = vpack.c.bf16 %v1446_v15, %v1444_v42  ;;  %v9944_v61 = vpack.c.bf16 %v1447_v5, %v1445_v0 }
 0x207   :  { %v3302_v35 = vmax.f32 %v2339_v40, 0.0 }
 0x208   :  { %12701 = vst [vmem:[#allocation21_spill] sm:$0xff] %v9942_v16  ;;  %2051 = vmatmul.bf16.gmra.mxu2 %v9942_v16  ;;  %2380 = vmatmul.bf16.gmra.mxu3 %v9944_v61 }
 0x209   :  { %12702 = vst [vmem:[#allocation22_spill] sm:$0xff] %v9944_v61  ;;  %v9948_v20 = vpack.c.bf16 %v3302_v35, %v3300_v43 }
 0x20b   :  { %12703 = vst [vmem:[#allocation23_spill] sm:$0xff] %v9948_v20  ;;  %v823_v51 = vpop.f32.mrf.mxu0  ;;  %v1152_v50 = vpop.f32.mrf.mxu1 }
 0x20c   :  { %v2012_v28 = vpop.f32.mrf.mxu2  ;;  %v2341_v34 = vpop.f32.mrf.mxu3  ;;  %v1448_v42 = vmax.f32 %v823_v51, 0.0  ;;  %v1449_v0 = vmax.f32 %v1152_v50, 0.0  ;;  %v9196_v51 = vld [vmem:[%s12404_s0 + $0x108] sm:$0xff] }
 0x20d   :  { %v2342_v13 = vadd.f32 %v2341_v34, %v2012_v28 }
 0x20e   :  { %8619 = vmatmul.msk.bf16.gmra.mxu0 %vm494_vm1, %v9195_v44  ;;  %8683 = vmatmul.msk.bf16.gmra.mxu1 %vm494_vm1, %v9195_v44 }
 0x20f   :  { %v3304_v16 = vmax.f32 %v2342_v13, 0.0 }
 0x213   :  { %v825_v1 = vpop.f32.mrf.mxu0  ;;  %v1154_v14 = vpop.f32.mrf.mxu1 }
 0x214   :  { %v1450_v15 = vmax.f32 %v825_v1, 0.0  ;;  %v1451_v43 = vmax.f32 %v1154_v14, 0.0  ;;  %v2014_v5 = vpop.f32.mrf.mxu2  ;;  %v2343_v4 = vpop.f32.mrf.mxu3 }
 0x215   :  { %v2344_v40 = vadd.f32 %v2343_v4, %v2014_v5 }
 0x216   :  { %v9955_v35 = vpack.c.bf16 %v1450_v15, %v1448_v42  ;;  %v9957_v61 = vpack.c.bf16 %v1451_v43, %v1449_v0 }
 0x217   :  { %v3306_v20 = vmax.f32 %v2344_v40, 0.0 }
 0x218   :  { %12704 = vst [vmem:[#allocation24_spill] sm:$0xff] %v9955_v35  ;;  %2056 = vmatmul.bf16.gmra.mxu2 %v9955_v35  ;;  %2385 = vmatmul.bf16.gmra.mxu3 %v9957_v61 }
 0x219   :  { %12705 = vst [vmem:[#allocation25_spill] sm:$0xff] %v9957_v61  ;;  %v9961_v44 = vpack.c.bf16 %v3306_v20, %v3304_v16 }
 0x21b   :  { %12706 = vst [vmem:[#allocation26_spill] sm:$0xff] %v9961_v44  ;;  %v828_v50 = vpop.f32.mrf.mxu0  ;;  %v1157_v28 = vpop.f32.mrf.mxu1 }
 0x21c   :  { %v2017_v34 = vpop.f32.mrf.mxu2  ;;  %v2346_v1 = vpop.f32.mrf.mxu3  ;;  %v1452_v0 = vmax.f32 %v828_v50, 0.0  ;;  %v1453_v15 = vmax.f32 %v1157_v28, 0.0  ;;  %v9197_v50 = vld [vmem:[%s12404_s0 + $0x110] sm:$0xff] }
 0x21d   :  { %v2347_v14 = vadd.f32 %v2346_v1, %v2017_v34 }
 0x21e   :  { %8620 = vmatmul.msk.bf16.gmra.mxu0 %vm494_vm1, %v9196_v51  ;;  %8684 = vmatmul.msk.bf16.gmra.mxu1 %vm494_vm1, %v9196_v51 }
 0x21f   :  { %v3308_v35 = vmax.f32 %v2347_v14, 0.0 }
 0x223   :  { %v830_v13 = vpop.f32.mrf.mxu0  ;;  %v1159_v42 = vpop.f32.mrf.mxu1 }
 0x224   :  { %v1454_v43 = vmax.f32 %v830_v13, 0.0  ;;  %v1455_v16 = vmax.f32 %v1159_v42, 0.0  ;;  %v2019_v20 = vpop.f32.mrf.mxu2  ;;  %v2348_v5 = vpop.f32.mrf.mxu3 }
 0x225   :  { %v2349_v4 = vadd.f32 %v2348_v5, %v2019_v20 }
 0x226   :  { %v9968_v40 = vpack.c.bf16 %v1454_v43, %v1452_v0  ;;  %v9970_v61 = vpack.c.bf16 %v1455_v16, %v1453_v15 }
 0x227   :  { %v3310_v44 = vmax.f32 %v2349_v4, 0.0 }
 0x228   :  { %12707 = vst [vmem:[#allocation27_spill] sm:$0xff] %v9968_v40  ;;  %2061 = vmatmul.bf16.gmra.mxu2 %v9968_v40  ;;  %2390 = vmatmul.bf16.gmra.mxu3 %v9970_v61 }
 0x229   :  { %12708 = vst [vmem:[#allocation28_spill] sm:$0xff] %v9970_v61  ;;  %v9974_v51 = vpack.c.bf16 %v3310_v44, %v3308_v35 }
 0x22b   :  { %12709 = vst [vmem:[#allocation29_spill] sm:$0xff] %v9974_v51  ;;  %v833_v28 = vpop.f32.mrf.mxu0  ;;  %v1162_v34 = vpop.f32.mrf.mxu1 }
 0x22c   :  { %v2022_v1 = vpop.f32.mrf.mxu2  ;;  %v2351_v13 = vpop.f32.mrf.mxu3  ;;  %v1456_v15 = vmax.f32 %v833_v28, 0.0  ;;  %v1457_v43 = vmax.f32 %v1162_v34, 0.0  ;;  %v9198_v28 = vld [vmem:[%s12404_s0 + $0x118] sm:$0xff] }
 0x22d   :  { %v2352_v42 = vadd.f32 %v2351_v13, %v2022_v1 }
 0x22e   :  { %8621 = vmatmul.msk.bf16.gmra.mxu0 %vm494_vm1, %v9197_v50  ;;  %8685 = vmatmul.msk.bf16.gmra.mxu1 %vm494_vm1, %v9197_v50 }
 0x22f   :  { %v3312_v40 = vmax.f32 %v2352_v42, 0.0 }
 0x233   :  { %v835_v14 = vpop.f32.mrf.mxu0  ;;  %v1164_v0 = vpop.f32.mrf.mxu1 }
 0x234   :  { %v1458_v16 = vmax.f32 %v835_v14, 0.0  ;;  %v1459_v35 = vmax.f32 %v1164_v0, 0.0  ;;  %v2024_v44 = vpop.f32.mrf.mxu2  ;;  %v2353_v20 = vpop.f32.mrf.mxu3 }
 0x235   :  { %v2354_v5 = vadd.f32 %v2353_v20, %v2024_v44 }
 0x236   :  { %v9981_v4 = vpack.c.bf16 %v1458_v16, %v1456_v15  ;;  %v9983_v61 = vpack.c.bf16 %v1459_v35, %v1457_v43 }
 0x237   :  { %v3314_v51 = vmax.f32 %v2354_v5, 0.0 }
 0x238   :  { %12710 = vst [vmem:[#allocation30_spill] sm:$0xff] %v9981_v4  ;;  %2066 = vmatmul.bf16.gmra.mxu2 %v9981_v4  ;;  %2395 = vmatmul.bf16.gmra.mxu3 %v9983_v61 }
 0x239   :  { %12711 = vst [vmem:[#allocation31_spill] sm:$0xff] %v9983_v61  ;;  %v9987_v50 = vpack.c.bf16 %v3314_v51, %v3312_v40 }
 0x23b   :  { %12712 = vst [vmem:[#allocation32_spill] sm:$0xff] %v9987_v50  ;;  %v838_v34 = vpop.f32.mrf.mxu0  ;;  %v1167_v1 = vpop.f32.mrf.mxu1 }
 0x23c   :  { %v2027_v13 = vpop.f32.mrf.mxu2  ;;  %v2356_v14 = vpop.f32.mrf.mxu3  ;;  %v1460_v43 = vmax.f32 %v838_v34, 0.0  ;;  %v1461_v16 = vmax.f32 %v1167_v1, 0.0  ;;  %v9199_v34 = vld [vmem:[%s12404_s0 + $0x120] sm:$0xff] }
 0x23d   :  { %v2357_v0 = vadd.f32 %v2356_v14, %v2027_v13 }
 0x23e   :  { %8622 = vmatmul.msk.bf16.gmra.mxu0 %vm494_vm1, %v9198_v28  ;;  %8686 = vmatmul.msk.bf16.gmra.mxu1 %vm494_vm1, %v9198_v28 }
 0x23f   :  { %v3316_v4 = vmax.f32 %v2357_v0, 0.0 }
 0x243   :  { %v840_v42 = vpop.f32.mrf.mxu0  ;;  %v1169_v15 = vpop.f32.mrf.mxu1 }
 0x244   :  { %v1462_v35 = vmax.f32 %v840_v42, 0.0  ;;  %v1463_v40 = vmax.f32 %v1169_v15, 0.0  ;;  %v2029_v51 = vpop.f32.mrf.mxu2  ;;  %v2358_v44 = vpop.f32.mrf.mxu3 }
 0x245   :  { %v2359_v20 = vadd.f32 %v2358_v44, %v2029_v51 }
 0x246   :  { %v9994_v5 = vpack.c.bf16 %v1462_v35, %v1460_v43  ;;  %v9996_v61 = vpack.c.bf16 %v1463_v40, %v1461_v16 }
 0x247   :  { %v3318_v50 = vmax.f32 %v2359_v20, 0.0 }
 0x248   :  { %12713 = vst [vmem:[#allocation33_spill] sm:$0xff] %v9994_v5  ;;  %2071 = vmatmul.bf16.gmra.mxu2 %v9994_v5  ;;  %2400 = vmatmul.bf16.gmra.mxu3 %v9996_v61 }
 0x249   :  { %12714 = vst [vmem:[#allocation34_spill] sm:$0xff] %v9996_v61  ;;  %v10000_v28 = vpack.c.bf16 %v3318_v50, %v3316_v4 }
 0x24b   :  { %12715 = vst [vmem:[#allocation35_spill] sm:$0xff] %v10000_v28  ;;  %v843_v1 = vpop.f32.mrf.mxu0  ;;  %v1172_v13 = vpop.f32.mrf.mxu1 }
 0x24c   :  { %v2032_v14 = vpop.f32.mrf.mxu2  ;;  %v2361_v42 = vpop.f32.mrf.mxu3  ;;  %v1464_v16 = vmax.f32 %v843_v1, 0.0  ;;  %v1465_v35 = vmax.f32 %v1172_v13, 0.0  ;;  %v9200_v1 = vld [vmem:[%s12404_s0 + $0x128] sm:$0xff] }
 0x24d   :  { %v2362_v15 = vadd.f32 %v2361_v42, %v2032_v14 }
 0x24e   :  { %8623 = vmatmul.msk.bf16.gmra.mxu0 %vm494_vm1, %v9199_v34  ;;  %8687 = vmatmul.msk.bf16.gmra.mxu1 %vm494_vm1, %v9199_v34 }
 0x24f   :  { %v3320_v5 = vmax.f32 %v2362_v15, 0.0 }
 0x253   :  { %v845_v0 = vpop.f32.mrf.mxu0  ;;  %v1174_v43 = vpop.f32.mrf.mxu1 }
 0x254   :  { %v1466_v40 = vmax.f32 %v845_v0, 0.0  ;;  %v1467_v4 = vmax.f32 %v1174_v43, 0.0  ;;  %v2034_v50 = vpop.f32.mrf.mxu2  ;;  %v2363_v51 = vpop.f32.mrf.mxu3 }
 0x255   :  { %v2364_v44 = vadd.f32 %v2363_v51, %v2034_v50 }
 0x256   :  { %v10007_v20 = vpack.c.bf16 %v1466_v40, %v1464_v16  ;;  %v10009_v61 = vpack.c.bf16 %v1467_v4, %v1465_v35 }
 0x257   :  { %v3322_v28 = vmax.f32 %v2364_v44, 0.0 }
 0x258   :  { %12716 = vst [vmem:[#allocation36_spill] sm:$0xff] %v10007_v20  ;;  %2076 = vmatmul.bf16.gmra.mxu2 %v10007_v20  ;;  %2405 = vmatmul.bf16.gmra.mxu3 %v10009_v61 }
 0x259   :  { %12717 = vst [vmem:[#allocation37_spill] sm:$0xff] %v10009_v61  ;;  %v10013_v34 = vpack.c.bf16 %v3322_v28, %v3320_v5 }
 0x25b   :  { %12718 = vst [vmem:[#allocation38_spill] sm:$0xff] %v10013_v34  ;;  %v848_v13 = vpop.f32.mrf.mxu0  ;;  %v1177_v14 = vpop.f32.mrf.mxu1 }
 0x25c   :  { %v2037_v42 = vpop.f32.mrf.mxu2  ;;  %v2366_v0 = vpop.f32.mrf.mxu3  ;;  %v1468_v35 = vmax.f32 %v848_v13, 0.0  ;;  %v1469_v40 = vmax.f32 %v1177_v14, 0.0  ;;  %v9201_v13 = vld [vmem:[%s12404_s0 + $0x130] sm:$0xff] }
 0x25d   :  { %v2367_v43 = vadd.f32 %v2366_v0, %v2037_v42 }
 0x25e   :  { %8624 = vmatmul.msk.bf16.gmra.mxu0 %vm494_vm1, %v9200_v1  ;;  %8688 = vmatmul.msk.bf16.gmra.mxu1 %vm494_vm1, %v9200_v1 }
 0x25f   :  { %v3324_v20 = vmax.f32 %v2367_v43, 0.0  ;;  %v9231_v43 = vld [vmem:[%s12406_s2 + $0x24] sm:$0xf] }
 0x263   :  { %v850_v15 = vpop.f32.mrf.mxu0  ;;  %v1179_v16 = vpop.f32.mrf.mxu1 }
 0x264   :  { %v1470_v4 = vmax.f32 %v850_v15, 0.0  ;;  %v1471_v5 = vmax.f32 %v1179_v16, 0.0  ;;  %v2039_v28 = vpop.f32.mrf.mxu2  ;;  %v2368_v50 = vpop.f32.mrf.mxu3 }
 0x265   :  { %v2369_v51 = vadd.f32 %v2368_v50, %v2039_v28 }
 0x266   :  { %v10020_v44 = vpack.c.bf16 %v1470_v4, %v1468_v35  ;;  %v10022_v61 = vpack.c.bf16 %v1471_v5, %v1469_v40  ;;  %v9247_v35 = vld [vmem:[%s12406_s2 + $0xa4] sm:$0xf]  ;;  %v8799_v40 = vld [vmem:[%s12406_s2 + $0xa8] sm:$0xf0] }
 0x267   :  { %v3326_v34 = vmax.f32 %v2369_v51, 0.0  ;;  %v8802_v4 = vor.u32 %v9247_v35, %v8799_v40  ;;  %v9202_v40 = vld [vmem:[%s12404_s0 + $0x138] sm:$0xff] }
 0x268   :  { %12719 = vst [vmem:[#allocation39_spill] sm:$0xff] %v10020_v44  ;;  %2081 = vmatmul.bf16.gmra.mxu2 %v10020_v44  ;;  %2410 = vmatmul.bf16.gmra.mxu3 %v10022_v61 }
 0x269   :  { %12720 = vst [vmem:[#allocation40_spill] sm:$0xff] %v10022_v61  ;;  %v10026_v1 = vpack.c.bf16 %v3326_v34, %v3324_v20  ;;  %v8735_v20 = vld [vmem:[%s12406_s2 + $0x28] sm:$0xf0]  ;;  %2920 = vmatpush.bf16.msrb.mxu1 %v8802_v4 }
 0x26a   :  { %v8738_v34 = vor.u32 %v9231_v43, %v8735_v20 }
 0x26b   :  { %12721 = vst [vmem:[#allocation41_spill] sm:$0xff] %v10026_v1  ;;  %v853_v14 = vpop.f32.mrf.mxu0  ;;  %v1182_v42 = vpop.f32.mrf.mxu1 }
 0x26c   :  { %v2042_v0 = vpop.f32.mrf.mxu2  ;;  %v2371_v15 = vpop.f32.mrf.mxu3  ;;  %2591 = vmatpush.bf16.msrb.mxu0 %v8738_v34  ;;  %v1472_v50 = vmax.f32 %v853_v14, 0.0  ;;  %v1473_v51 = vmax.f32 %v1182_v42, 0.0  ;;  %v8869_v14 = vld [vmem:[%s12407_s3 + $0x30] sm:$0xf]  ;;  %v9266_v42 = vld [vmem:[%s12407_s3 + $0x34] sm:$0xf0] }
 0x26d   :  { %v2372_v16 = vadd.f32 %v2371_v15, %v2042_v0  ;;  %v8870_v34 = vor.u32 %v9266_v42, %v8869_v14 }
 0x26e   :  { %8625 = vmatmul.msk.bf16.gmra.mxu0 %vm494_vm1, %v9201_v13  ;;  %8689 = vmatmul.msk.bf16.gmra.mxu1 %vm494_vm1, %v9201_v13 }
 0x26f   :  { %v3328_v1 = vmax.f32 %v2372_v16, 0.0  ;;  %v9282_v16 = vld [vmem:[%s12407_s3 + $0xb4] sm:$0xf0]  ;;  %3824 = vmatpush.bf16.msrb.mxu2 %v8870_v34 }
 0x273   :  { %v855_v5 = vpop.f32.mrf.mxu0  ;;  %v1184_v28 = vpop.f32.mrf.mxu1 }
 0x274   :  { %v1474_v13 = vmax.f32 %v855_v5, 0.0  ;;  %v1475_v0 = vmax.f32 %v1184_v28, 0.0  ;;  %v2044_v15 = vpop.f32.mrf.mxu2  ;;  %v2373_v61 = vpop.f32.mrf.mxu3 }
 0x275   :  { %v2374_v43 = vadd.f32 %v2373_v61, %v2044_v15  ;;  %v8933_v61 = vld [vmem:[%s12407_s3 + $0xb0] sm:$0xf] }
 0x276   :  { %v10045_v20 = vpack.c.bf16 %v1474_v13, %v1472_v50  ;;  %v10047_v44 = vpack.c.bf16 %v1475_v0, %v1473_v51  ;;  %v8934_v4 = vor.u32 %v9282_v16, %v8933_v61 }
 0x277   :  { %v3330_v19 = vmax.f32 %v2374_v43, 0.0 }
 0x278   :  { %12722 = vst [vmem:[#allocation42_spill] sm:$0xff] %v10045_v20  ;;  %2086 = vmatmul.bf16.gmra.mxu2 %v10045_v20  ;;  %2415 = vmatmul.bf16.gmra.mxu3 %v10047_v44 }
 0x279   :  { %12723 = vst [vmem:[#allocation43_spill] sm:$0xff] %v10047_v44  ;;  %v10063_v35 = vpack.c.bf16 %v3330_v19, %v3328_v1  ;;  %4153 = vmatpush.bf16.msrb.mxu3 %v8934_v4 }
 0x27b   :  { %12724 = vst [vmem:[#allocation44_spill] sm:$0xff] %v10063_v35  ;;  %v858_v5 = vpop.f32.mrf.mxu0  ;;  %v1187_v28 = vpop.f32.mrf.mxu1 }
 0x27c   :  { %v2047_v50 = vpop.f32.mrf.mxu2  ;;  %v2376_v51 = vpop.f32.mrf.mxu3  ;;  %v1476_v19 = vmax.f32 %v858_v5, 0.0  ;;  %v1477_v1 = vmax.f32 %v1187_v28, 0.0  ;;  %v9203_v5 = vld [vmem:[%s12404_s0 + $0x140] sm:$0xff] }
 0x27d   :  { %v2377_v13 = vadd.f32 %v2376_v51, %v2047_v50 }
 0x27e   :  { %8626 = vmatmul.msk.bf16.gmra.mxu0 %vm494_vm1, %v9202_v40  ;;  %8690 = vmatmul.msk.bf16.gmra.mxu1 %vm494_vm1, %v9202_v40 }
 0x27f   :  { %v3332_v20 = vmax.f32 %v2377_v13, 0.0 }
 0x283   :  { %v860_v0 = vpop.f32.mrf.mxu0  ;;  %v1189_v15 = vpop.f32.mrf.mxu1 }
 0x284   :  { %v1478_v43 = vmax.f32 %v860_v0, 0.0  ;;  %v1479_v14 = vmax.f32 %v1189_v15, 0.0  ;;  %v2049_v42 = vpop.f32.mrf.mxu2  ;;  %v2378_v44 = vpop.f32.mrf.mxu3 }
 0x285   :  { %v2379_v61 = vadd.f32 %v2378_v44, %v2049_v42 }
 0x286   :  { %v10070_v16 = vpack.c.bf16 %v1478_v43, %v1476_v19  ;;  %v10072_v34 = vpack.c.bf16 %v1479_v14, %v1477_v1 }
 0x287   :  { %v3334_v4 = vmax.f32 %v2379_v61, 0.0 }
 0x288   :  { %12725 = vst [vmem:[#allocation45_spill] sm:$0xff] %v10070_v16  ;;  %2091 = vmatmul.bf16.gmra.mxu2 %v10070_v16  ;;  %2420 = vmatmul.bf16.gmra.mxu3 %v10072_v34 }
 0x289   :  { %12726 = vst [vmem:[#allocation46_spill] sm:$0xff] %v10072_v34  ;;  %v10076_v40 = vpack.c.bf16 %v3334_v4, %v3332_v20 }
 0x28b   :  { %12727 = vst [vmem:[#allocation47_spill] sm:$0xff] %v10076_v40  ;;  %v863_v28 = vpop.f32.mrf.mxu0  ;;  %v1192_v50 = vpop.f32.mrf.mxu1 }
 0x28c   :  { %v2052_v51 = vpop.f32.mrf.mxu2  ;;  %v2381_v44 = vpop.f32.mrf.mxu3  ;;  %v1480_v19 = vmax.f32 %v863_v28, 0.0  ;;  %v1481_v1 = vmax.f32 %v1192_v50, 0.0  ;;  %v9204_v28 = vld [vmem:[%s12404_s0 + $0x148] sm:$0xff] }
 0x28d   :  { %v2382_v0 = vadd.f32 %v2381_v44, %v2052_v51 }
 0x28e   :  { %8627 = vmatmul.msk.bf16.gmra.mxu0 %vm494_vm1, %v9203_v5  ;;  %8691 = vmatmul.msk.bf16.gmra.mxu1 %vm494_vm1, %v9203_v5 }
 0x28f   :  { %v3336_v16 = vmax.f32 %v2382_v0, 0.0 }
 0x293   :  { %v865_v13 = vpop.f32.mrf.mxu0  ;;  %v1194_v15 = vpop.f32.mrf.mxu1 }
 0x294   :  { %v1482_v43 = vmax.f32 %v865_v13, 0.0  ;;  %v1483_v20 = vmax.f32 %v1194_v15, 0.0  ;;  %v2054_v14 = vpop.f32.mrf.mxu2  ;;  %v2383_v42 = vpop.f32.mrf.mxu3 }
 0x295   :  { %v2384_v61 = vadd.f32 %v2383_v42, %v2054_v14 }
 0x296   :  { %v10083_v4 = vpack.c.bf16 %v1482_v43, %v1480_v19  ;;  %v10085_v34 = vpack.c.bf16 %v1483_v20, %v1481_v1 }
 0x297   :  { %v3338_v40 = vmax.f32 %v2384_v61, 0.0 }
 0x298   :  { %12728 = vst [vmem:[#allocation48_spill] sm:$0xff] %v10083_v4  ;;  %2096 = vmatmul.bf16.gmra.mxu2 %v10083_v4  ;;  %2425 = vmatmul.bf16.gmra.mxu3 %v10085_v34 }
 0x299   :  { %12729 = vst [vmem:[#allocation49_spill] sm:$0xff] %v10085_v34  ;;  %v10089_v5 = vpack.c.bf16 %v3338_v40, %v3336_v16 }
 0x29b   :  { %12730 = vst [vmem:[#allocation50_spill] sm:$0xff] %v10089_v5  ;;  %v868_v50 = vpop.f32.mrf.mxu0  ;;  %v1197_v51 = vpop.f32.mrf.mxu1 }
 0x29c   :  { %v2057_v44 = vpop.f32.mrf.mxu2  ;;  %v2386_v13 = vpop.f32.mrf.mxu3  ;;  %v1484_v1 = vmax.f32 %v868_v50, 0.0  ;;  %v1485_v43 = vmax.f32 %v1197_v51, 0.0  ;;  %v9205_v50 = vld [vmem:[%s12404_s0 + $0x150] sm:$0xff] }
 0x29d   :  { %v2387_v15 = vadd.f32 %v2386_v13, %v2057_v44 }
 0x29e   :  { %8628 = vmatmul.msk.bf16.gmra.mxu0 %vm494_vm1, %v9204_v28  ;;  %8692 = vmatmul.msk.bf16.gmra.mxu1 %vm494_vm1, %v9204_v28 }
 0x29f   :  { %v3340_v4 = vmax.f32 %v2387_v15, 0.0 }
 0x2a3   :  { %v870_v0 = vpop.f32.mrf.mxu0  ;;  %v1199_v19 = vpop.f32.mrf.mxu1 }
 0x2a4   :  { %v1486_v20 = vmax.f32 %v870_v0, 0.0  ;;  %v1487_v16 = vmax.f32 %v1199_v19, 0.0  ;;  %v2059_v40 = vpop.f32.mrf.mxu2  ;;  %v2388_v14 = vpop.f32.mrf.mxu3 }
 0x2a5   :  { %v2389_v42 = vadd.f32 %v2388_v14, %v2059_v40 }
 0x2a6   :  { %v10096_v61 = vpack.c.bf16 %v1486_v20, %v1484_v1  ;;  %v10098_v34 = vpack.c.bf16 %v1487_v16, %v1485_v43 }
 0x2a7   :  { %v3342_v5 = vmax.f32 %v2389_v42, 0.0 }
 0x2a8   :  { %12731 = vst [vmem:[#allocation51_spill] sm:$0xff] %v10096_v61  ;;  %2101 = vmatmul.bf16.gmra.mxu2 %v10096_v61  ;;  %2430 = vmatmul.bf16.gmra.mxu3 %v10098_v34 }
 0x2a9   :  { %12732 = vst [vmem:[#allocation52_spill] sm:$0xff] %v10098_v34  ;;  %v10102_v28 = vpack.c.bf16 %v3342_v5, %v3340_v4 }
 0x2ab   :  { %12733 = vst [vmem:[#allocation53_spill] sm:$0xff] %v10102_v28  ;;  %v873_v51 = vpop.f32.mrf.mxu0  ;;  %v1202_v44 = vpop.f32.mrf.mxu1 }
 0x2ac   :  { %v2062_v13 = vpop.f32.mrf.mxu2  ;;  %v2391_v0 = vpop.f32.mrf.mxu3  ;;  %v1488_v43 = vmax.f32 %v873_v51, 0.0  ;;  %v1489_v20 = vmax.f32 %v1202_v44, 0.0  ;;  %v9206_v51 = vld [vmem:[%s12404_s0 + $0x158] sm:$0xff] }
 0x2ad   :  { %v2392_v19 = vadd.f32 %v2391_v0, %v2062_v13 }
 0x2ae   :  { %8629 = vmatmul.msk.bf16.gmra.mxu0 %vm494_vm1, %v9205_v50  ;;  %8693 = vmatmul.msk.bf16.gmra.mxu1 %vm494_vm1, %v9205_v50 }
 0x2af   :  { %v3344_v61 = vmax.f32 %v2392_v19, 0.0 }
 0x2b3   :  { %v875_v15 = vpop.f32.mrf.mxu0  ;;  %v1204_v1 = vpop.f32.mrf.mxu1 }
 0x2b4   :  { %v1490_v16 = vmax.f32 %v875_v15, 0.0  ;;  %v1491_v4 = vmax.f32 %v1204_v1, 0.0  ;;  %v2064_v5 = vpop.f32.mrf.mxu2  ;;  %v2393_v40 = vpop.f32.mrf.mxu3 }
 0x2b5   :  { %v2394_v14 = vadd.f32 %v2393_v40, %v2064_v5 }
 0x2b6   :  { %v10109_v42 = vpack.c.bf16 %v1490_v16, %v1488_v43  ;;  %v10111_v34 = vpack.c.bf16 %v1491_v4, %v1489_v20 }
 0x2b7   :  { %v3346_v28 = vmax.f32 %v2394_v14, 0.0 }
 0x2b8   :  { %12734 = vst [vmem:[#allocation54_spill] sm:$0xff] %v10109_v42  ;;  %2106 = vmatmul.bf16.gmra.mxu2 %v10109_v42  ;;  %2435 = vmatmul.bf16.gmra.mxu3 %v10111_v34 }
 0x2b9   :  { %12735 = vst [vmem:[#allocation55_spill] sm:$0xff] %v10111_v34  ;;  %v10115_v50 = vpack.c.bf16 %v3346_v28, %v3344_v61 }
 0x2bb   :  { %12736 = vst [vmem:[#allocation56_spill] sm:$0xff] %v10115_v50  ;;  %v878_v44 = vpop.f32.mrf.mxu0  ;;  %v1207_v13 = vpop.f32.mrf.mxu1 }
 0x2bc   :  { %v2067_v0 = vpop.f32.mrf.mxu2  ;;  %v2396_v15 = vpop.f32.mrf.mxu3  ;;  %v1492_v20 = vmax.f32 %v878_v44, 0.0  ;;  %v1493_v16 = vmax.f32 %v1207_v13, 0.0  ;;  %v9207_v44 = vld [vmem:[%s12404_s0 + $0x160] sm:$0xff] }
 0x2bd   :  { %v2397_v1 = vadd.f32 %v2396_v15, %v2067_v0 }
 0x2be   :  { %8630 = vmatmul.msk.bf16.gmra.mxu0 %vm494_vm1, %v9206_v51  ;;  %8694 = vmatmul.msk.bf16.gmra.mxu1 %vm494_vm1, %v9206_v51 }
 0x2bf   :  { %v3348_v42 = vmax.f32 %v2397_v1, 0.0 }
 0x2c3   :  { %v880_v19 = vpop.f32.mrf.mxu0  ;;  %v1209_v43 = vpop.f32.mrf.mxu1 }
 0x2c4   :  { %v1494_v4 = vmax.f32 %v880_v19, 0.0  ;;  %v1495_v61 = vmax.f32 %v1209_v43, 0.0  ;;  %v2069_v28 = vpop.f32.mrf.mxu2  ;;  %v2398_v5 = vpop.f32.mrf.mxu3 }
 0x2c5   :  { %v2399_v40 = vadd.f32 %v2398_v5, %v2069_v28 }
 0x2c6   :  { %v10122_v14 = vpack.c.bf16 %v1494_v4, %v1492_v20  ;;  %v10124_v34 = vpack.c.bf16 %v1495_v61, %v1493_v16 }
 0x2c7   :  { %v3350_v50 = vmax.f32 %v2399_v40, 0.0 }
 0x2c8   :  { %12737 = vst [vmem:[#allocation57_spill] sm:$0xff] %v10122_v14  ;;  %2111 = vmatmul.bf16.gmra.mxu2 %v10122_v14  ;;  %2440 = vmatmul.bf16.gmra.mxu3 %v10124_v34 }
 0x2c9   :  { %12738 = vst [vmem:[#allocation58_spill] sm:$0xff] %v10124_v34  ;;  %v10128_v51 = vpack.c.bf16 %v3350_v50, %v3348_v42 }
 0x2cb   :  { %12739 = vst [vmem:[#allocation59_spill] sm:$0xff] %v10128_v51  ;;  %v883_v13 = vpop.f32.mrf.mxu0  ;;  %v1212_v0 = vpop.f32.mrf.mxu1 }
 0x2cc   :  { %v2072_v15 = vpop.f32.mrf.mxu2  ;;  %v2401_v19 = vpop.f32.mrf.mxu3  ;;  %v1496_v16 = vmax.f32 %v883_v13, 0.0  ;;  %v1497_v4 = vmax.f32 %v1212_v0, 0.0  ;;  %v9208_v13 = vld [vmem:[%s12404_s0 + $0x168] sm:$0xff] }
 0x2cd   :  { %v2402_v43 = vadd.f32 %v2401_v19, %v2072_v15 }
 0x2ce   :  { %8631 = vmatmul.msk.bf16.gmra.mxu0 %vm494_vm1, %v9207_v44  ;;  %8695 = vmatmul.msk.bf16.gmra.mxu1 %vm494_vm1, %v9207_v44 }
 0x2cf   :  { %v3352_v14 = vmax.f32 %v2402_v43, 0.0 }
 0x2d3   :  { %v885_v1 = vpop.f32.mrf.mxu0  ;;  %v1214_v20 = vpop.f32.mrf.mxu1 }
 0x2d4   :  { %v1498_v61 = vmax.f32 %v885_v1, 0.0  ;;  %v1499_v42 = vmax.f32 %v1214_v20, 0.0  ;;  %v2074_v50 = vpop.f32.mrf.mxu2  ;;  %v2403_v28 = vpop.f32.mrf.mxu3 }
 0x2d5   :  { %v2404_v5 = vadd.f32 %v2403_v28, %v2074_v50 }
 0x2d6   :  { %v10135_v40 = vpack.c.bf16 %v1498_v61, %v1496_v16  ;;  %v10137_v34 = vpack.c.bf16 %v1499_v42, %v1497_v4 }
 0x2d7   :  { %v3354_v51 = vmax.f32 %v2404_v5, 0.0 }
 0x2d8   :  { %12740 = vst [vmem:[#allocation60_spill] sm:$0xff] %v10135_v40  ;;  %2116 = vmatmul.bf16.gmra.mxu2 %v10135_v40  ;;  %2445 = vmatmul.bf16.gmra.mxu3 %v10137_v34 }
 0x2d9   :  { %12741 = vst [vmem:[#allocation61_spill] sm:$0xff] %v10137_v34  ;;  %v10141_v44 = vpack.c.bf16 %v3354_v51, %v3352_v14 }
 0x2db   :  { %12742 = vst [vmem:[#allocation62_spill] sm:$0xff] %v10141_v44  ;;  %v888_v0 = vpop.f32.mrf.mxu0  ;;  %v1217_v15 = vpop.f32.mrf.mxu1 }
 0x2dc   :  { %v2077_v19 = vpop.f32.mrf.mxu2  ;;  %v2406_v1 = vpop.f32.mrf.mxu3  ;;  %v1500_v4 = vmax.f32 %v888_v0, 0.0  ;;  %v1501_v61 = vmax.f32 %v1217_v15, 0.0  ;;  %v9209_v0 = vld [vmem:[%s12404_s0 + $0x170] sm:$0xff] }
 0x2dd   :  { %v2407_v20 = vadd.f32 %v2406_v1, %v2077_v19 }
 0x2de   :  { %8632 = vmatmul.msk.bf16.gmra.mxu0 %vm494_vm1, %v9208_v13  ;;  %8696 = vmatmul.msk.bf16.gmra.mxu1 %vm494_vm1, %v9208_v13 }
 0x2df   :  { %v3356_v40 = vmax.f32 %v2407_v20, 0.0  ;;  %v9229_v20 = vld [vmem:[%s12406_s2 + $0x14] sm:$0xf] }
 0x2e3   :  { %v890_v43 = vpop.f32.mrf.mxu0  ;;  %v1219_v16 = vpop.f32.mrf.mxu1 }
 0x2e4   :  { %v1502_v42 = vmax.f32 %v890_v43, 0.0  ;;  %v1503_v14 = vmax.f32 %v1219_v16, 0.0  ;;  %v2079_v51 = vpop.f32.mrf.mxu2  ;;  %v2408_v50 = vpop.f32.mrf.mxu3 }
 0x2e5   :  { %v2409_v28 = vadd.f32 %v2408_v50, %v2079_v51 }
 0x2e6   :  { %v10148_v5 = vpack.c.bf16 %v1502_v42, %v1500_v4  ;;  %v10150_v34 = vpack.c.bf16 %v1503_v14, %v1501_v61  ;;  %v9245_v4 = vld [vmem:[%s12406_s2 + $0x94] sm:$0xf]  ;;  %v8791_v61 = vld [vmem:[%s12406_s2 + $0x98] sm:$0xf0] }
 0x2e7   :  { %v3358_v44 = vmax.f32 %v2409_v28, 0.0  ;;  %v8794_v42 = vor.u32 %v9245_v4, %v8791_v61  ;;  %v9210_v61 = vld [vmem:[%s12404_s0 + $0x178] sm:$0xff] }
 0x2e8   :  { %12743 = vst [vmem:[#allocation63_spill] sm:$0xff] %v10148_v5  ;;  %2121 = vmatmul.bf16.gmra.mxu2 %v10148_v5  ;;  %2450 = vmatmul.bf16.gmra.mxu3 %v10150_v34 }
 0x2e9   :  { %12744 = vst [vmem:[#allocation64_spill] sm:$0xff] %v10150_v34  ;;  %v10154_v13 = vpack.c.bf16 %v3358_v44, %v3356_v40  ;;  %v8727_v40 = vld [vmem:[%s12406_s2 + $0x18] sm:$0xf0]  ;;  %2921 = vmatpush.bf16.msrb.mxu1 %v8794_v42 }
 0x2ea   :  { %v8730_v44 = vor.u32 %v9229_v20, %v8727_v40 }
 0x2eb   :  { %12745 = vst [vmem:[#allocation65_spill] sm:$0xff] %v10154_v13  ;;  %v893_v15 = vpop.f32.mrf.mxu0  ;;  %v1222_v19 = vpop.f32.mrf.mxu1 }
 0x2ec   :  { %v2082_v1 = vpop.f32.mrf.mxu2  ;;  %v2411_v43 = vpop.f32.mrf.mxu3  ;;  %2592 = vmatpush.bf16.msrb.mxu0 %v8730_v44  ;;  %v1504_v50 = vmax.f32 %v893_v15, 0.0  ;;  %v1505_v28 = vmax.f32 %v1222_v19, 0.0  ;;  %v8861_v15 = vld [vmem:[%s12407_s3 + $0x20] sm:$0xf]  ;;  %v9264_v19 = vld [vmem:[%s12407_s3 + $0x24] sm:$0xf0] }
 0x2ed   :  { %v2412_v16 = vadd.f32 %v2411_v43, %v2082_v1  ;;  %v8862_v44 = vor.u32 %v9264_v19, %v8861_v15 }
 0x2ee   :  { %8633 = vmatmul.msk.bf16.gmra.mxu0 %vm494_vm1, %v9209_v0  ;;  %8697 = vmatmul.msk.bf16.gmra.mxu1 %vm494_vm1, %v9209_v0 }
 0x2ef   :  { %v3360_v13 = vmax.f32 %v2412_v16, 0.0  ;;  %v9280_v16 = vld [vmem:[%s12407_s3 + $0xa4] sm:$0xf0]  ;;  %3825 = vmatpush.bf16.msrb.mxu2 %v8862_v44 }
 0x2f3   :  { %v895_v14 = vpop.f32.mrf.mxu0  ;;  %v1224_v51 = vpop.f32.mrf.mxu1 }
 0x2f4   :  { %v1506_v0 = vmax.f32 %v895_v14, 0.0  ;;  %v1507_v1 = vmax.f32 %v1224_v51, 0.0  ;;  %v2084_v43 = vpop.f32.mrf.mxu2  ;;  %v2413_v34 = vpop.f32.mrf.mxu3 }
 0x2f5   :  { %v2414_v20 = vadd.f32 %v2413_v34, %v2084_v43  ;;  %v8925_v34 = vld [vmem:[%s12407_s3 + $0xa0] sm:$0xf] }
 0x2f6   :  { %v10173_v40 = vpack.c.bf16 %v1506_v0, %v1504_v50  ;;  %v10175_v5 = vpack.c.bf16 %v1507_v1, %v1505_v28  ;;  %v8926_v42 = vor.u32 %v9280_v16, %v8925_v34 }
 0x2f7   :  { %v3362_v35 = vmax.f32 %v2414_v20, 0.0 }
 0x2f8   :  { %12746 = vst [vmem:[#allocation66_spill] sm:$0xff] %v10173_v40  ;;  %2126 = vmatmul.bf16.gmra.mxu2 %v10173_v40  ;;  %2455 = vmatmul.bf16.gmra.mxu3 %v10175_v5 }
 0x2f9   :  { %12747 = vst [vmem:[#allocation67_spill] sm:$0xff] %v10175_v5  ;;  %v10191_v4 = vpack.c.bf16 %v3362_v35, %v3360_v13  ;;  %4154 = vmatpush.bf16.msrb.mxu3 %v8926_v42 }
 0x2fb   :  { %12748 = vst [vmem:[#allocation68_spill] sm:$0xff] %v10191_v4  ;;  %v898_v14 = vpop.f32.mrf.mxu0  ;;  %v1227_v51 = vpop.f32.mrf.mxu1 }
 0x2fc   :  { %v2087_v50 = vpop.f32.mrf.mxu2  ;;  %v2416_v28 = vpop.f32.mrf.mxu3  ;;  %v1508_v35 = vmax.f32 %v898_v14, 0.0  ;;  %v1509_v13 = vmax.f32 %v1227_v51, 0.0  ;;  %v9211_v14 = vld [vmem:[%s12404_s0 + $0x180] sm:$0xff] }
 0x2fd   :  { %v2417_v0 = vadd.f32 %v2416_v28, %v2087_v50 }
 0x2fe   :  { %8634 = vmatmul.msk.bf16.gmra.mxu0 %vm494_vm1, %v9210_v61  ;;  %8698 = vmatmul.msk.bf16.gmra.mxu1 %vm494_vm1, %v9210_v61 }
 0x2ff   :  { %v3364_v40 = vmax.f32 %v2417_v0, 0.0 }
 0x303   :  { %v900_v1 = vpop.f32.mrf.mxu0  ;;  %v1229_v43 = vpop.f32.mrf.mxu1 }
 0x304   :  { %v1510_v20 = vmax.f32 %v900_v1, 0.0  ;;  %v1511_v15 = vmax.f32 %v1229_v43, 0.0  ;;  %v2089_v19 = vpop.f32.mrf.mxu2  ;;  %v2418_v5 = vpop.f32.mrf.mxu3 }
 0x305   :  { %v2419_v34 = vadd.f32 %v2418_v5, %v2089_v19 }
 0x306   :  { %v10198_v16 = vpack.c.bf16 %v1510_v20, %v1508_v35  ;;  %v10200_v44 = vpack.c.bf16 %v1511_v15, %v1509_v13 }
 0x307   :  { %v3366_v42 = vmax.f32 %v2419_v34, 0.0 }
 0x308   :  { %12749 = vst [vmem:[#allocation69_spill] sm:$0xff] %v10198_v16  ;;  %2131 = vmatmul.bf16.gmra.mxu2 %v10198_v16  ;;  %2460 = vmatmul.bf16.gmra.mxu3 %v10200_v44 }
 0x309   :  { %12750 = vst [vmem:[#allocation70_spill] sm:$0xff] %v10200_v44  ;;  %v10204_v61 = vpack.c.bf16 %v3366_v42, %v3364_v40 }
 0x30b   :  { %12751 = vst [vmem:[#allocation71_spill] sm:$0xff] %v10204_v61  ;;  %v903_v51 = vpop.f32.mrf.mxu0  ;;  %v1232_v50 = vpop.f32.mrf.mxu1 }
 0x30c   :  { %v2092_v28 = vpop.f32.mrf.mxu2  ;;  %v2421_v5 = vpop.f32.mrf.mxu3  ;;  %v1512_v35 = vmax.f32 %v903_v51, 0.0  ;;  %v1513_v13 = vmax.f32 %v1232_v50, 0.0  ;;  %v9212_v51 = vld [vmem:[%s12404_s0 + $0x188] sm:$0xff] }
 0x30d   :  { %v2422_v1 = vadd.f32 %v2421_v5, %v2092_v28 }
 0x30e   :  { %8635 = vmatmul.msk.bf16.gmra.mxu0 %vm494_vm1, %v9211_v14  ;;  %8699 = vmatmul.msk.bf16.gmra.mxu1 %vm494_vm1, %v9211_v14 }
 0x30f   :  { %v3368_v16 = vmax.f32 %v2422_v1, 0.0 }
 0x313   :  { %v905_v0 = vpop.f32.mrf.mxu0  ;;  %v1234_v43 = vpop.f32.mrf.mxu1 }
 0x314   :  { %v1514_v20 = vmax.f32 %v905_v0, 0.0  ;;  %v1515_v40 = vmax.f32 %v1234_v43, 0.0  ;;  %v2094_v15 = vpop.f32.mrf.mxu2  ;;  %v2423_v19 = vpop.f32.mrf.mxu3 }
 0x315   :  { %v2424_v34 = vadd.f32 %v2423_v19, %v2094_v15 }
 0x316   :  { %v10211_v42 = vpack.c.bf16 %v1514_v20, %v1512_v35  ;;  %v10213_v44 = vpack.c.bf16 %v1515_v40, %v1513_v13 }
 0x317   :  { %v3370_v61 = vmax.f32 %v2424_v34, 0.0 }
 0x318   :  { %12752 = vst [vmem:[#allocation72_spill] sm:$0xff] %v10211_v42  ;;  %2136 = vmatmul.bf16.gmra.mxu2 %v10211_v42  ;;  %2465 = vmatmul.bf16.gmra.mxu3 %v10213_v44 }
 0x319   :  { %12753 = vst [vmem:[#allocation73_spill] sm:$0xff] %v10213_v44  ;;  %v10217_v14 = vpack.c.bf16 %v3370_v61, %v3368_v16 }
 0x31b   :  { %12754 = vst [vmem:[#allocation74_spill] sm:$0xff] %v10217_v14  ;;  %v908_v50 = vpop.f32.mrf.mxu0  ;;  %v1237_v28 = vpop.f32.mrf.mxu1 }
 0x31c   :  { %v2097_v5 = vpop.f32.mrf.mxu2  ;;  %v2426_v0 = vpop.f32.mrf.mxu3  ;;  %v1516_v13 = vmax.f32 %v908_v50, 0.0  ;;  %v1517_v20 = vmax.f32 %v1237_v28, 0.0  ;;  %v9213_v50 = vld [vmem:[%s12404_s0 + $0x190] sm:$0xff] }
 0x31d   :  { %v2427_v43 = vadd.f32 %v2426_v0, %v2097_v5 }
 0x31e   :  { %8636 = vmatmul.msk.bf16.gmra.mxu0 %vm494_vm1, %v9212_v51  ;;  %8700 = vmatmul.msk.bf16.gmra.mxu1 %vm494_vm1, %v9212_v51 }
 0x31f   :  { %v3372_v42 = vmax.f32 %v2427_v43, 0.0 }
 0x323   :  { %v910_v1 = vpop.f32.mrf.mxu0  ;;  %v1239_v35 = vpop.f32.mrf.mxu1 }
 0x324   :  { %v1518_v40 = vmax.f32 %v910_v1, 0.0  ;;  %v1519_v16 = vmax.f32 %v1239_v35, 0.0  ;;  %v2099_v61 = vpop.f32.mrf.mxu2  ;;  %v2428_v15 = vpop.f32.mrf.mxu3 }
 0x325   :  { %v2429_v19 = vadd.f32 %v2428_v15, %v2099_v61 }
 0x326   :  { %v10224_v34 = vpack.c.bf16 %v1518_v40, %v1516_v13  ;;  %v10226_v44 = vpack.c.bf16 %v1519_v16, %v1517_v20 }
 0x327   :  { %v3374_v14 = vmax.f32 %v2429_v19, 0.0 }
 0x328   :  { %12755 = vst [vmem:[#allocation75_spill] sm:$0xff] %v10224_v34  ;;  %2141 = vmatmul.bf16.gmra.mxu2 %v10224_v34  ;;  %2470 = vmatmul.bf16.gmra.mxu3 %v10226_v44 }
 0x329   :  { %12756 = vst [vmem:[#allocation76_spill] sm:$0xff] %v10226_v44  ;;  %v10230_v51 = vpack.c.bf16 %v3374_v14, %v3372_v42 }
 0x32b   :  { %12757 = vst [vmem:[#allocation77_spill] sm:$0xff] %v10230_v51  ;;  %v913_v28 = vpop.f32.mrf.mxu0  ;;  %v1242_v5 = vpop.f32.mrf.mxu1 }
 0x32c   :  { %v2102_v0 = vpop.f32.mrf.mxu2  ;;  %v2431_v1 = vpop.f32.mrf.mxu3  ;;  %v1520_v20 = vmax.f32 %v913_v28, 0.0  ;;  %v1521_v40 = vmax.f32 %v1242_v5, 0.0  ;;  %v9214_v28 = vld [vmem:[%s12404_s0 + $0x198] sm:$0xff] }
 0x32d   :  { %v2432_v35 = vadd.f32 %v2431_v1, %v2102_v0 }
 0x32e   :  { %8637 = vmatmul.msk.bf16.gmra.mxu0 %vm494_vm1, %v9213_v50  ;;  %8701 = vmatmul.msk.bf16.gmra.mxu1 %vm494_vm1, %v9213_v50 }
 0x32f   :  { %v3376_v34 = vmax.f32 %v2432_v35, 0.0 }
 0x333   :  { %v915_v43 = vpop.f32.mrf.mxu0  ;;  %v1244_v13 = vpop.f32.mrf.mxu1 }
 0x334   :  { %v1522_v16 = vmax.f32 %v915_v43, 0.0  ;;  %v1523_v42 = vmax.f32 %v1244_v13, 0.0  ;;  %v2104_v14 = vpop.f32.mrf.mxu2  ;;  %v2433_v61 = vpop.f32.mrf.mxu3 }
 0x335   :  { %v2434_v15 = vadd.f32 %v2433_v61, %v2104_v14 }
 0x336   :  { %v10237_v19 = vpack.c.bf16 %v1522_v16, %v1520_v20  ;;  %v10239_v44 = vpack.c.bf16 %v1523_v42, %v1521_v40 }
 0x337   :  { %v3378_v51 = vmax.f32 %v2434_v15, 0.0 }
 0x338   :  { %12758 = vst [vmem:[#allocation78_spill] sm:$0xff] %v10237_v19  ;;  %2146 = vmatmul.bf16.gmra.mxu2 %v10237_v19  ;;  %2475 = vmatmul.bf16.gmra.mxu3 %v10239_v44 }
 0x339   :  { %12759 = vst [vmem:[#allocation79_spill] sm:$0xff] %v10239_v44  ;;  %v10243_v50 = vpack.c.bf16 %v3378_v51, %v3376_v34 }
 0x33b   :  { %12760 = vst [vmem:[#allocation80_spill] sm:$0xff] %v10243_v50  ;;  %v918_v5 = vpop.f32.mrf.mxu0  ;;  %v1247_v0 = vpop.f32.mrf.mxu1 }
 0x33c   :  { %v2107_v1 = vpop.f32.mrf.mxu2  ;;  %v2436_v43 = vpop.f32.mrf.mxu3  ;;  %v1524_v40 = vmax.f32 %v918_v5, 0.0  ;;  %v1525_v16 = vmax.f32 %v1247_v0, 0.0  ;;  %v9215_v5 = vld [vmem:[%s12404_s0 + $0x1a0] sm:$0xff] }
 0x33d   :  { %v2437_v13 = vadd.f32 %v2436_v43, %v2107_v1 }
 0x33e   :  { %8638 = vmatmul.msk.bf16.gmra.mxu0 %vm494_vm1, %v9214_v28  ;;  %8702 = vmatmul.msk.bf16.gmra.mxu1 %vm494_vm1, %v9214_v28 }
 0x33f   :  { %v3380_v19 = vmax.f32 %v2437_v13, 0.0 }
 0x343   :  { %v920_v35 = vpop.f32.mrf.mxu0  ;;  %v1249_v20 = vpop.f32.mrf.mxu1 }
 0x344   :  { %v1526_v42 = vmax.f32 %v920_v35, 0.0  ;;  %v1527_v34 = vmax.f32 %v1249_v20, 0.0  ;;  %v2109_v51 = vpop.f32.mrf.mxu2  ;;  %v2438_v14 = vpop.f32.mrf.mxu3 }
 0x345   :  { %v2439_v61 = vadd.f32 %v2438_v14, %v2109_v51 }
 0x346   :  { %v10250_v15 = vpack.c.bf16 %v1526_v42, %v1524_v40  ;;  %v10252_v44 = vpack.c.bf16 %v1527_v34, %v1525_v16 }
 0x347   :  { %v3382_v50 = vmax.f32 %v2439_v61, 0.0 }
 0x348   :  { %12761 = vst [vmem:[#allocation81_spill] sm:$0xff] %v10250_v15  ;;  %2151 = vmatmul.bf16.gmra.mxu2 %v10250_v15  ;;  %2480 = vmatmul.bf16.gmra.mxu3 %v10252_v44 }
 0x349   :  { %12762 = vst [vmem:[#allocation82_spill] sm:$0xff] %v10252_v44  ;;  %v10256_v28 = vpack.c.bf16 %v3382_v50, %v3380_v19 }
 0x34b   :  { %12763 = vst [vmem:[#allocation83_spill] sm:$0xff] %v10256_v28  ;;  %v923_v0 = vpop.f32.mrf.mxu0  ;;  %v1252_v1 = vpop.f32.mrf.mxu1 }
 0x34c   :  { %v2112_v43 = vpop.f32.mrf.mxu2  ;;  %v2441_v35 = vpop.f32.mrf.mxu3  ;;  %v1528_v16 = vmax.f32 %v923_v0, 0.0  ;;  %v1529_v42 = vmax.f32 %v1252_v1, 0.0  ;;  %v9216_v0 = vld [vmem:[%s12404_s0 + $0x1a8] sm:$0xff] }
 0x34d   :  { %v2442_v20 = vadd.f32 %v2441_v35, %v2112_v43 }
 0x34e   :  { %8639 = vmatmul.msk.bf16.gmra.mxu0 %vm494_vm1, %v9215_v5  ;;  %8703 = vmatmul.msk.bf16.gmra.mxu1 %vm494_vm1, %v9215_v5 }
 0x34f   :  { %v3384_v15 = vmax.f32 %v2442_v20, 0.0 }
 0x353   :  { %v925_v13 = vpop.f32.mrf.mxu0  ;;  %v1254_v40 = vpop.f32.mrf.mxu1 }
 0x354   :  { %v1530_v34 = vmax.f32 %v925_v13, 0.0  ;;  %v1531_v19 = vmax.f32 %v1254_v40, 0.0  ;;  %v2114_v50 = vpop.f32.mrf.mxu2  ;;  %v2443_v51 = vpop.f32.mrf.mxu3 }
 0x355   :  { %v2444_v14 = vadd.f32 %v2443_v51, %v2114_v50 }
 0x356   :  { %v10263_v61 = vpack.c.bf16 %v1530_v34, %v1528_v16  ;;  %v10265_v44 = vpack.c.bf16 %v1531_v19, %v1529_v42 }
 0x357   :  { %v3386_v28 = vmax.f32 %v2444_v14, 0.0 }
 0x358   :  { %12764 = vst [vmem:[#allocation84_spill] sm:$0xff] %v10263_v61  ;;  %2156 = vmatmul.bf16.gmra.mxu2 %v10263_v61  ;;  %2485 = vmatmul.bf16.gmra.mxu3 %v10265_v44 }
 0x359   :  { %12765 = vst [vmem:[#allocation85_spill] sm:$0xff] %v10265_v44  ;;  %v10269_v5 = vpack.c.bf16 %v3386_v28, %v3384_v15 }
 0x35b   :  { %12766 = vst [vmem:[#allocation86_spill] sm:$0xff] %v10269_v5  ;;  %v928_v1 = vpop.f32.mrf.mxu0  ;;  %v1257_v43 = vpop.f32.mrf.mxu1 }
 0x35c   :  { %v2117_v35 = vpop.f32.mrf.mxu2  ;;  %v2446_v13 = vpop.f32.mrf.mxu3  ;;  %v1532_v42 = vmax.f32 %v928_v1, 0.0  ;;  %v1533_v34 = vmax.f32 %v1257_v43, 0.0  ;;  %v9217_v1 = vld [vmem:[%s12404_s0 + $0x1b0] sm:$0xff] }
 0x35d   :  { %v2447_v40 = vadd.f32 %v2446_v13, %v2117_v35 }
 0x35e   :  { %8640 = vmatmul.msk.bf16.gmra.mxu0 %vm494_vm1, %v9216_v0  ;;  %8704 = vmatmul.msk.bf16.gmra.mxu1 %vm494_vm1, %v9216_v0 }
 0x35f   :  { %v3388_v61 = vmax.f32 %v2447_v40, 0.0  ;;  %v9227_v40 = vld [vmem:[%s12406_s2 + $0x4] sm:$0xf] }
 0x363   :  { %v930_v20 = vpop.f32.mrf.mxu0  ;;  %v1259_v16 = vpop.f32.mrf.mxu1 }
 0x364   :  { %v1534_v19 = vmax.f32 %v930_v20, 0.0  ;;  %v1535_v15 = vmax.f32 %v1259_v16, 0.0  ;;  %v2119_v28 = vpop.f32.mrf.mxu2  ;;  %v2448_v50 = vpop.f32.mrf.mxu3 }
 0x365   :  { %v2449_v51 = vadd.f32 %v2448_v50, %v2119_v28 }
 0x366   :  { %v10276_v14 = vpack.c.bf16 %v1534_v19, %v1532_v42  ;;  %v10278_v44 = vpack.c.bf16 %v1535_v15, %v1533_v34  ;;  %v9243_v42 = vld [vmem:[%s12406_s2 + $0x84] sm:$0xf]  ;;  %v8783_v34 = vld [vmem:[%s12406_s2 + $0x88] sm:$0xf0] }
 0x367   :  { %v3390_v5 = vmax.f32 %v2449_v51, 0.0  ;;  %v8786_v19 = vor.u32 %v9243_v42, %v8783_v34  ;;  %v9218_v34 = vld [vmem:[%s12404_s0 + $0x1b8] sm:$0xff] }
 0x368   :  { %12767 = vst [vmem:[#allocation87_spill] sm:$0xff] %v10276_v14  ;;  %2161 = vmatmul.bf16.gmra.mxu2 %v10276_v14  ;;  %2490 = vmatmul.bf16.gmra.mxu3 %v10278_v44 }
 0x369   :  { %12768 = vst [vmem:[#allocation88_spill] sm:$0xff] %v10278_v44  ;;  %v10282_v0 = vpack.c.bf16 %v3390_v5, %v3388_v61  ;;  %v8719_v61 = vld [vmem:[%s12406_s2 + $0x8] sm:$0xf0]  ;;  %2922 = vmatpush.bf16.msrb.mxu1 %v8786_v19 }
 0x36a   :  { %v8722_v5 = vor.u32 %v9227_v40, %v8719_v61 }
 0x36b   :  { %12769 = vst [vmem:[#allocation89_spill] sm:$0xff] %v10282_v0  ;;  %v933_v43 = vpop.f32.mrf.mxu0  ;;  %v1262_v35 = vpop.f32.mrf.mxu1 }
 0x36c   :  { %v2122_v13 = vpop.f32.mrf.mxu2  ;;  %v2451_v20 = vpop.f32.mrf.mxu3  ;;  %2593 = vmatpush.bf16.msrb.mxu0 %v8722_v5  ;;  %v1536_v50 = vmax.f32 %v933_v43, 0.0  ;;  %v1537_v51 = vmax.f32 %v1262_v35, 0.0  ;;  %v8853_v43 = vld [vmem:[%s12407_s3 + $0x10] sm:$0xf]  ;;  %v9262_v35 = vld [vmem:[%s12407_s3 + $0x14] sm:$0xf0] }
 0x36d   :  { %v2452_v16 = vadd.f32 %v2451_v20, %v2122_v13  ;;  %v8854_v5 = vor.u32 %v9262_v35, %v8853_v43 }
 0x36e   :  { %8641 = vmatmul.msk.bf16.gmra.mxu0 %vm494_vm1, %v9217_v1  ;;  %8705 = vmatmul.msk.bf16.gmra.mxu1 %vm494_vm1, %v9217_v1 }
 0x36f   :  { %v3392_v0 = vmax.f32 %v2452_v16, 0.0  ;;  %v9278_v16 = vld [vmem:[%s12407_s3 + $0x94] sm:$0xf0]  ;;  %3826 = vmatpush.bf16.msrb.mxu2 %v8854_v5 }
 0x373   :  { %v935_v15 = vpop.f32.mrf.mxu0  ;;  %v1264_v28 = vpop.f32.mrf.mxu1 }
 0x374   :  { %v1538_v1 = vmax.f32 %v935_v15, 0.0  ;;  %v1539_v13 = vmax.f32 %v1264_v28, 0.0  ;;  %v2124_v20 = vpop.f32.mrf.mxu2  ;;  %v2453_v44 = vpop.f32.mrf.mxu3 }
 0x375   :  { %v2454_v40 = vadd.f32 %v2453_v44, %v2124_v20  ;;  %v8917_v44 = vld [vmem:[%s12407_s3 + $0x90] sm:$0xf] }
 0x376   :  { %v10301_v61 = vpack.c.bf16 %v1538_v1, %v1536_v50  ;;  %v10303_v14 = vpack.c.bf16 %v1539_v13, %v1537_v51  ;;  %v8918_v19 = vor.u32 %v9278_v16, %v8917_v44 }
 0x377   :  { %v3394_v4 = vmax.f32 %v2454_v40, 0.0 }
 0x378   :  { %12770 = vst [vmem:[#allocation90_spill] sm:$0xff] %v10301_v61  ;;  %2166 = vmatmul.bf16.gmra.mxu2 %v10301_v61  ;;  %2495 = vmatmul.bf16.gmra.mxu3 %v10303_v14 }
 0x379   :  { %12771 = vst [vmem:[#allocation91_spill] sm:$0xff] %v10303_v14  ;;  %v10319_v42 = vpack.c.bf16 %v3394_v4, %v3392_v0  ;;  %4155 = vmatpush.bf16.msrb.mxu3 %v8918_v19 }
 0x37b   :  { %12772 = vst [vmem:[#allocation92_spill] sm:$0xff] %v10319_v42  ;;  %v938_v15 = vpop.f32.mrf.mxu0  ;;  %v1267_v28 = vpop.f32.mrf.mxu1 }
 0x37c   :  { %v2127_v50 = vpop.f32.mrf.mxu2  ;;  %v2456_v51 = vpop.f32.mrf.mxu3  ;;  %v1540_v4 = vmax.f32 %v938_v15, 0.0  ;;  %v1541_v0 = vmax.f32 %v1267_v28, 0.0  ;;  %v9219_v15 = vld [vmem:[%s12404_s0 + $0x1c0] sm:$0xff] }
 0x37d   :  { %v2457_v1 = vadd.f32 %v2456_v51, %v2127_v50 }
 0x37e   :  { %8642 = vmatmul.msk.bf16.gmra.mxu0 %vm494_vm1, %v9218_v34  ;;  %8706 = vmatmul.msk.bf16.gmra.mxu1 %vm494_vm1, %v9218_v34 }
 0x37f   :  { %v3396_v61 = vmax.f32 %v2457_v1, 0.0 }
 0x383   :  { %v940_v13 = vpop.f32.mrf.mxu0  ;;  %v1269_v20 = vpop.f32.mrf.mxu1 }
 0x384   :  { %v1542_v40 = vmax.f32 %v940_v13, 0.0  ;;  %v1543_v43 = vmax.f32 %v1269_v20, 0.0  ;;  %v2129_v35 = vpop.f32.mrf.mxu2  ;;  %v2458_v14 = vpop.f32.mrf.mxu3 }
 0x385   :  { %v2459_v44 = vadd.f32 %v2458_v14, %v2129_v35 }
 0x386   :  { %v10326_v16 = vpack.c.bf16 %v1542_v40, %v1540_v4  ;;  %v10328_v5 = vpack.c.bf16 %v1543_v43, %v1541_v0 }
 0x387   :  { %v3398_v19 = vmax.f32 %v2459_v44, 0.0 }
 0x388   :  { %12773 = vst [vmem:[#allocation93_spill] sm:$0xff] %v10326_v16  ;;  %2171 = vmatmul.bf16.gmra.mxu2 %v10326_v16  ;;  %2500 = vmatmul.bf16.gmra.mxu3 %v10328_v5 }
 0x389   :  { %12774 = vst [vmem:[#allocation94_spill] sm:$0xff] %v10328_v5  ;;  %v10332_v34 = vpack.c.bf16 %v3398_v19, %v3396_v61 }
 0x38b   :  { %12775 = vst [vmem:[#allocation95_spill] sm:$0xff] %v10332_v34  ;;  %v943_v28 = vpop.f32.mrf.mxu0  ;;  %v1272_v50 = vpop.f32.mrf.mxu1 }
 0x38c   :  { %v2132_v51 = vpop.f32.mrf.mxu2  ;;  %v2461_v14 = vpop.f32.mrf.mxu3  ;;  %v1544_v4 = vmax.f32 %v943_v28, 0.0  ;;  %v1545_v0 = vmax.f32 %v1272_v50, 0.0  ;;  %v9220_v28 = vld [vmem:[%s12404_s0 + $0x1c8] sm:$0xff] }
 0x38d   :  { %v2462_v13 = vadd.f32 %v2461_v14, %v2132_v51 }
 0x38e   :  { %8643 = vmatmul.msk.bf16.gmra.mxu0 %vm494_vm1, %v9219_v15  ;;  %8707 = vmatmul.msk.bf16.gmra.mxu1 %vm494_vm1, %v9219_v15 }
 0x38f   :  { %v3400_v16 = vmax.f32 %v2462_v13, 0.0 }
 0x393   :  { %v945_v1 = vpop.f32.mrf.mxu0  ;;  %v1274_v20 = vpop.f32.mrf.mxu1 }
 0x394   :  { %v1546_v40 = vmax.f32 %v945_v1, 0.0  ;;  %v1547_v61 = vmax.f32 %v1274_v20, 0.0  ;;  %v2134_v43 = vpop.f32.mrf.mxu2  ;;  %v2463_v35 = vpop.f32.mrf.mxu3 }
 0x395   :  { %v2464_v44 = vadd.f32 %v2463_v35, %v2134_v43 }
 0x396   :  { %v10339_v19 = vpack.c.bf16 %v1546_v40, %v1544_v4  ;;  %v10341_v5 = vpack.c.bf16 %v1547_v61, %v1545_v0 }
 0x397   :  { %v3402_v34 = vmax.f32 %v2464_v44, 0.0 }
 0x398   :  { %12776 = vst [vmem:[#allocation96_spill] sm:$0xff] %v10339_v19  ;;  %2176 = vmatmul.bf16.gmra.mxu2 %v10339_v19  ;;  %2505 = vmatmul.bf16.gmra.mxu3 %v10341_v5 }
 0x399   :  { %12777 = vst [vmem:[#allocation97_spill] sm:$0xff] %v10341_v5  ;;  %v10345_v15 = vpack.c.bf16 %v3402_v34, %v3400_v16 }
 0x39b   :  { %12778 = vst [vmem:[#allocation98_spill] sm:$0xff] %v10345_v15  ;;  %v948_v50 = vpop.f32.mrf.mxu0  ;;  %v1277_v51 = vpop.f32.mrf.mxu1 }
 0x39c   :  { %v2137_v14 = vpop.f32.mrf.mxu2  ;;  %v2466_v1 = vpop.f32.mrf.mxu3  ;;  %v1548_v0 = vmax.f32 %v948_v50, 0.0  ;;  %v1549_v40 = vmax.f32 %v1277_v51, 0.0  ;;  %v9221_v50 = vld [vmem:[%s12404_s0 + $0x1d0] sm:$0xff] }
 0x39d   :  { %v2467_v20 = vadd.f32 %v2466_v1, %v2137_v14 }
 0x39e   :  { %8644 = vmatmul.msk.bf16.gmra.mxu0 %vm494_vm1, %v9220_v28  ;;  %8708 = vmatmul.msk.bf16.gmra.mxu1 %vm494_vm1, %v9220_v28 }
 0x39f   :  { %v3404_v19 = vmax.f32 %v2467_v20, 0.0 }
 0x3a3   :  { %v950_v13 = vpop.f32.mrf.mxu0  ;;  %v1279_v4 = vpop.f32.mrf.mxu1 }
 0x3a4   :  { %v1550_v61 = vmax.f32 %v950_v13, 0.0  ;;  %v1551_v16 = vmax.f32 %v1279_v4, 0.0  ;;  %v2139_v34 = vpop.f32.mrf.mxu2  ;;  %v2468_v43 = vpop.f32.mrf.mxu3 }
 0x3a5   :  { %v2469_v35 = vadd.f32 %v2468_v43, %v2139_v34 }
 0x3a6   :  { %v10352_v44 = vpack.c.bf16 %v1550_v61, %v1548_v0  ;;  %v10354_v5 = vpack.c.bf16 %v1551_v16, %v1549_v40 }
 0x3a7   :  { %v3406_v15 = vmax.f32 %v2469_v35, 0.0 }
 0x3a8   :  { %12779 = vst [vmem:[#allocation99_spill] sm:$0xff] %v10352_v44  ;;  %2181 = vmatmul.bf16.gmra.mxu2 %v10352_v44  ;;  %2510 = vmatmul.bf16.gmra.mxu3 %v10354_v5 }
 0x3a9   :  { %12780 = vst [vmem:[#allocation100_spill] sm:$0xff] %v10354_v5  ;;  %v10358_v28 = vpack.c.bf16 %v3406_v15, %v3404_v19 }
 0x3ab   :  { %12781 = vst [vmem:[#allocation101_spill] sm:$0xff] %v10358_v28  ;;  %v953_v51 = vpop.f32.mrf.mxu0  ;;  %v1282_v14 = vpop.f32.mrf.mxu1 }
 0x3ac   :  { %v2142_v1 = vpop.f32.mrf.mxu2  ;;  %v2471_v13 = vpop.f32.mrf.mxu3  ;;  %v1552_v40 = vmax.f32 %v953_v51, 0.0  ;;  %v1553_v61 = vmax.f32 %v1282_v14, 0.0  ;;  %v9222_v51 = vld [vmem:[%s12404_s0 + $0x1d8] sm:$0xff] }
 0x3ad   :  { %v2472_v4 = vadd.f32 %v2471_v13, %v2142_v1 }
 0x3ae   :  { %8645 = vmatmul.msk.bf16.gmra.mxu0 %vm494_vm1, %v9221_v50  ;;  %8709 = vmatmul.msk.bf16.gmra.mxu1 %vm494_vm1, %v9221_v50 }
 0x3af   :  { %v3408_v44 = vmax.f32 %v2472_v4, 0.0 }
 0x3b3   :  { %v955_v20 = vpop.f32.mrf.mxu0  ;;  %v1284_v0 = vpop.f32.mrf.mxu1 }
 0x3b4   :  { %v1554_v16 = vmax.f32 %v955_v20, 0.0  ;;  %v1555_v19 = vmax.f32 %v1284_v0, 0.0  ;;  %v2144_v15 = vpop.f32.mrf.mxu2  ;;  %v2473_v34 = vpop.f32.mrf.mxu3 }
 0x3b5   :  { %v2474_v43 = vadd.f32 %v2473_v34, %v2144_v15 }
 0x3b6   :  { %v10365_v35 = vpack.c.bf16 %v1554_v16, %v1552_v40  ;;  %v10367_v5 = vpack.c.bf16 %v1555_v19, %v1553_v61 }
 0x3b7   :  { %v3410_v28 = vmax.f32 %v2474_v43, 0.0 }
 0x3b8   :  { %12782 = vst [vmem:[#allocation102_spill] sm:$0xff] %v10365_v35  ;;  %2186 = vmatmul.bf16.gmra.mxu2 %v10365_v35  ;;  %2515 = vmatmul.bf16.gmra.mxu3 %v10367_v5 }
 0x3b9   :  { %12783 = vst [vmem:[#allocation103_spill] sm:$0xff] %v10367_v5  ;;  %v10371_v50 = vpack.c.bf16 %v3410_v28, %v3408_v44 }
 0x3bb   :  { %12784 = vst [vmem:[#allocation104_spill] sm:$0xff] %v10371_v50  ;;  %v958_v14 = vpop.f32.mrf.mxu0  ;;  %v1287_v1 = vpop.f32.mrf.mxu1 }
 0x3bc   :  { %v2147_v13 = vpop.f32.mrf.mxu2  ;;  %v2476_v20 = vpop.f32.mrf.mxu3  ;;  %v1556_v61 = vmax.f32 %v958_v14, 0.0  ;;  %v1557_v16 = vmax.f32 %v1287_v1, 0.0  ;;  %v9223_v14 = vld [vmem:[%s12404_s0 + $0x1e0] sm:$0xff] }
 0x3bd   :  { %v2477_v0 = vadd.f32 %v2476_v20, %v2147_v13 }
 0x3be   :  { %8646 = vmatmul.msk.bf16.gmra.mxu0 %vm494_vm1, %v9222_v51  ;;  %8710 = vmatmul.msk.bf16.gmra.mxu1 %vm494_vm1, %v9222_v51 }
 0x3bf   :  { %v3412_v35 = vmax.f32 %v2477_v0, 0.0 }
 0x3c3   :  { %v960_v4 = vpop.f32.mrf.mxu0  ;;  %v1289_v40 = vpop.f32.mrf.mxu1 }
 0x3c4   :  { %v1558_v19 = vmax.f32 %v960_v4, 0.0  ;;  %v1559_v44 = vmax.f32 %v1289_v40, 0.0  ;;  %v2149_v28 = vpop.f32.mrf.mxu2  ;;  %v2478_v15 = vpop.f32.mrf.mxu3 }
 0x3c5   :  { %v2479_v34 = vadd.f32 %v2478_v15, %v2149_v28 }
 0x3c6   :  { %v10378_v43 = vpack.c.bf16 %v1558_v19, %v1556_v61  ;;  %v10380_v5 = vpack.c.bf16 %v1559_v44, %v1557_v16 }
 0x3c7   :  { %v3414_v50 = vmax.f32 %v2479_v34, 0.0 }
 0x3c8   :  { %12785 = vst [vmem:[#allocation105_spill] sm:$0xff] %v10378_v43  ;;  %2191 = vmatmul.bf16.gmra.mxu2 %v10378_v43  ;;  %2520 = vmatmul.bf16.gmra.mxu3 %v10380_v5 }
 0x3c9   :  { %12786 = vst [vmem:[#allocation106_spill] sm:$0xff] %v10380_v5  ;;  %v10384_v51 = vpack.c.bf16 %v3414_v50, %v3412_v35 }
 0x3cb   :  { %12787 = vst [vmem:[#allocation107_spill] sm:$0xff] %v10384_v51  ;;  %v963_v1 = vpop.f32.mrf.mxu0  ;;  %v1292_v13 = vpop.f32.mrf.mxu1 }
 0x3cc   :  { %v2152_v20 = vpop.f32.mrf.mxu2  ;;  %v2481_v4 = vpop.f32.mrf.mxu3  ;;  %v1560_v16 = vmax.f32 %v963_v1, 0.0  ;;  %v1561_v19 = vmax.f32 %v1292_v13, 0.0  ;;  %v9224_v1 = vld [vmem:[%s12404_s0 + $0x1e8] sm:$0xff] }
 0x3cd   :  { %v2482_v40 = vadd.f32 %v2481_v4, %v2152_v20 }
 0x3ce   :  { %8647 = vmatmul.msk.bf16.gmra.mxu0 %vm494_vm1, %v9223_v14  ;;  %8711 = vmatmul.msk.bf16.gmra.mxu1 %vm494_vm1, %v9223_v14 }
 0x3cf   :  { %v3416_v43 = vmax.f32 %v2482_v40, 0.0 }
 0x3d3   :  { %v965_v0 = vpop.f32.mrf.mxu0  ;;  %v1294_v61 = vpop.f32.mrf.mxu1 }
 0x3d4   :  { %v1562_v44 = vmax.f32 %v965_v0, 0.0  ;;  %v1563_v35 = vmax.f32 %v1294_v61, 0.0  ;;  %v2154_v50 = vpop.f32.mrf.mxu2  ;;  %v2483_v28 = vpop.f32.mrf.mxu3 }
 0x3d5   :  { %v2484_v15 = vadd.f32 %v2483_v28, %v2154_v50 }
 0x3d6   :  { %v10391_v34 = vpack.c.bf16 %v1562_v44, %v1560_v16  ;;  %v10393_v5 = vpack.c.bf16 %v1563_v35, %v1561_v19 }
 0x3d7   :  { %v3418_v51 = vmax.f32 %v2484_v15, 0.0 }
 0x3d8   :  { %12788 = vst [vmem:[#allocation108_spill] sm:$0xff] %v10391_v34  ;;  %2196 = vmatmul.bf16.gmra.mxu2 %v10391_v34  ;;  %2525 = vmatmul.bf16.gmra.mxu3 %v10393_v5 }
 0x3d9   :  { %12789 = vst [vmem:[#allocation109_spill] sm:$0xff] %v10393_v5  ;;  %v10397_v14 = vpack.c.bf16 %v3418_v51, %v3416_v43 }
 0x3db   :  { %12790 = vst [vmem:[#allocation110_spill] sm:$0xff] %v10397_v14  ;;  %v968_v13 = vpop.f32.mrf.mxu0  ;;  %v1297_v20 = vpop.f32.mrf.mxu1 }
 0x3dc   :  { %v2157_v4 = vpop.f32.mrf.mxu2  ;;  %v2486_v0 = vpop.f32.mrf.mxu3  ;;  %v1564_v19 = vmax.f32 %v968_v13, 0.0  ;;  %v1565_v44 = vmax.f32 %v1297_v20, 0.0  ;;  %v9225_v13 = vld [vmem:[%s12404_s0 + $0x1f0] sm:$0xff] }
 0x3dd   :  { %v2487_v61 = vadd.f32 %v2486_v0, %v2157_v4 }
 0x3de   :  { %8648 = vmatmul.msk.bf16.gmra.mxu0 %vm494_vm1, %v9224_v1  ;;  %8712 = vmatmul.msk.bf16.gmra.mxu1 %vm494_vm1, %v9224_v1 }
 0x3df   :  { %v3420_v34 = vmax.f32 %v2487_v61, 0.0  ;;  %v9273_v61 = vld [vmem:[%s12407_s3 + $0x74] sm:$0xf] }
 0x3e3   :  { %v970_v40 = vpop.f32.mrf.mxu0  ;;  %v1299_v16 = vpop.f32.mrf.mxu1 }
 0x3e4   :  { %v1566_v35 = vmax.f32 %v970_v40, 0.0  ;;  %v1567_v43 = vmax.f32 %v1299_v16, 0.0  ;;  %v2159_v51 = vpop.f32.mrf.mxu2  ;;  %v2488_v50 = vpop.f32.mrf.mxu3 }
 0x3e5   :  { %v2489_v28 = vadd.f32 %v2488_v50, %v2159_v51 }
 0x3e6   :  { %v10404_v15 = vpack.c.bf16 %v1566_v35, %v1564_v19  ;;  %v10406_v5 = vpack.c.bf16 %v1567_v43, %v1565_v44  ;;  %v9289_v19 = vld [vmem:[%s12407_s3 + $0xf4] sm:$0xf]  ;;  %v8967_v44 = vld [vmem:[%s12407_s3 + $0xf8] sm:$0xf0] }
 0x3e7   :  { %v3422_v14 = vmax.f32 %v2489_v28, 0.0  ;;  %v8970_v35 = vor.u32 %v9289_v19, %v8967_v44  ;;  %v9226_v44 = vld [vmem:[%s12404_s0 + $0x1f8] sm:$0xff] }
 0x3e8   :  { %12791 = vst [vmem:[#allocation111_spill] sm:$0xff] %v10404_v15  ;;  %2201 = vmatmul.bf16.gmra.mxu2 %v10404_v15  ;;  %2530 = vmatmul.bf16.gmra.mxu3 %v10406_v5 }
 0x3e9   :  { %12792 = vst [vmem:[#allocation112_spill] sm:$0xff] %v10406_v5  ;;  %v10410_v1 = vpack.c.bf16 %v3422_v14, %v3420_v34  ;;  %v8903_v34 = vld [vmem:[%s12407_s3 + $0x78] sm:$0xf0]  ;;  %4807 = vmatpush.bf16.msra.mxu1 %v8970_v35 }
 0x3ea   :  { %v8906_v14 = vor.u32 %v9273_v61, %v8903_v34 }
 0x3eb   :  { %12793 = vst [vmem:[#allocation113_spill] sm:$0xff] %v10410_v1  ;;  %v973_v20 = vpop.f32.mrf.mxu0  ;;  %v1302_v4 = vpop.f32.mrf.mxu1 }
 0x3ec   :  { %v2162_v0 = vpop.f32.mrf.mxu2  ;;  %v2491_v40 = vpop.f32.mrf.mxu3  ;;  %4478 = vmatpush.bf16.msra.mxu0 %v8906_v14  ;;  %v1568_v50 = vmax.f32 %v973_v20, 0.0  ;;  %v1569_v28 = vmax.f32 %v1302_v4, 0.0  ;;  %v8845_v20 = vld [vmem:[%s12407_s3] sm:$0xf]  ;;  %v9260_v4 = vld [vmem:[%s12407_s3 + $0x4] sm:$0xf0] }
 0x3ed   :  { %v2492_v16 = vadd.f32 %v2491_v40, %v2162_v0  ;;  %v8846_v14 = vor.u32 %v9260_v4, %v8845_v20 }
 0x3ee   :  { %8649 = vmatmul.msk.bf16.gmra.mxu0 %vm494_vm1, %v9225_v13  ;;  %8713 = vmatmul.msk.bf16.gmra.mxu1 %vm494_vm1, %v9225_v13 }
 0x3ef   :  { %v3424_v1 = vmax.f32 %v2492_v16, 0.0  ;;  %v9276_v16 = vld [vmem:[%s12407_s3 + $0x84] sm:$0xf0]  ;;  %3827 = vmatpush.bf16.msrb.mxu2 %v8846_v14 }
 0x3f3   :  { %v975_v43 = vpop.f32.mrf.mxu0  ;;  %v1304_v51 = vpop.f32.mrf.mxu1 }
 0x3f4   :  { %v1570_v13 = vmax.f32 %v975_v43, 0.0  ;;  %v1571_v0 = vmax.f32 %v1304_v51, 0.0  ;;  %v2164_v40 = vpop.f32.mrf.mxu2  ;;  %v2493_v5 = vpop.f32.mrf.mxu3 }
 0x3f5   :  { %v2494_v61 = vadd.f32 %v2493_v5, %v2164_v40  ;;  %v8909_v5 = vld [vmem:[%s12407_s3 + $0x80] sm:$0xf] }
 0x3f6   :  { %v10429_v34 = vpack.c.bf16 %v1570_v13, %v1568_v50  ;;  %v10431_v15 = vpack.c.bf16 %v1571_v0, %v1569_v28  ;;  %v8910_v35 = vor.u32 %v9276_v16, %v8909_v5 }
 0x3f7   :  { %v3426_v42 = vmax.f32 %v2494_v61, 0.0 }
 0x3f8   :  { %12794 = vst [vmem:[#allocation114_spill] sm:$0xff] %v10429_v34  ;;  %2206 = vmatmul.bf16.gmra.mxu2 %v10429_v34  ;;  %2535 = vmatmul.bf16.gmra.mxu3 %v10431_v15 }
 0x3f9   :  { %12795 = vst [vmem:[#allocation115_spill] sm:$0xff] %v10431_v15  ;;  %v10447_v19 = vpack.c.bf16 %v3426_v42, %v3424_v1  ;;  %4156 = vmatpush.bf16.msrb.mxu3 %v8910_v35 }
 0x3fb   :  { %12796 = vst [vmem:[#allocation116_spill] sm:$0xff] %v10447_v19  ;;  %v978_v43 = vpop.f32.mrf.mxu0  ;;  %v1307_v51 = vpop.f32.mrf.mxu1 }
 0x3fc   :  { %v2167_v50 = vpop.f32.mrf.mxu2  ;;  %v2496_v28 = vpop.f32.mrf.mxu3  ;;  %v1572_v42 = vmax.f32 %v978_v43, 0.0  ;;  %v1573_v1 = vmax.f32 %v1307_v51, 0.0 }
 0x3fd   :  { %v2497_v13 = vadd.f32 %v2496_v28, %v2167_v50 }
 0x3fe   :  { %8650 = vmatmul.msk.bf16.gmra.mxu0 %vm494_vm1, %v9226_v44  ;;  %8714 = vmatmul.msk.bf16.gmra.mxu1 %vm494_vm1, %v9226_v44 }
 0x3ff   :  { %v3428_v34 = vmax.f32 %v2497_v13, 0.0 }
 0x403   :  { %v980_v0 = vpop.f32.mrf.mxu0  ;;  %v1309_v40 = vpop.f32.mrf.mxu1 }
 0x404   :  { %v1574_v61 = vmax.f32 %v980_v0, 0.0  ;;  %v1575_v20 = vmax.f32 %v1309_v40, 0.0  ;;  %v2169_v4 = vpop.f32.mrf.mxu2  ;;  %v2498_v15 = vpop.f32.mrf.mxu3 }
 0x405   :  { %v2499_v5 = vadd.f32 %v2498_v15, %v2169_v4 }
 0x406   :  { %v10454_v16 = vpack.c.bf16 %v1574_v61, %v1572_v42  ;;  %v10456_v14 = vpack.c.bf16 %v1575_v20, %v1573_v1 }
 0x407   :  { %v3430_v35 = vmax.f32 %v2499_v5, 0.0 }
 0x408   :  { %12797 = vst [vmem:[#allocation117_spill] sm:$0xff] %v10454_v16  ;;  %2211 = vmatmul.bf16.gmra.mxu2 %v10454_v16  ;;  %2540 = vmatmul.bf16.gmra.mxu3 %v10456_v14 }
 0x409   :  { %12798 = vst [vmem:[#allocation118_spill] sm:$0xff] %v10456_v14  ;;  %v10460_v44 = vpack.c.bf16 %v3430_v35, %v3428_v34 }
 0x40b   :  { %12799 = vst [vmem:[#allocation119_spill] sm:$0xff] %v10460_v44  ;;  %v983_v50 = vpop.f32.mrf.mxu0  ;;  %v1312_v43 = vpop.f32.mrf.mxu1 }
 0x40c   :  { %v2172_v51 = vpop.f32.mrf.mxu2  ;;  %v2501_v28 = vpop.f32.mrf.mxu3  ;;  %v1576_v42 = vmax.f32 %v983_v50, 0.0  ;;  %v1577_v13 = vmax.f32 %v1312_v43, 0.0 }
 0x40d   :  { %v2502_v0 = vadd.f32 %v2501_v28, %v2172_v51 }
 0x40e   :  { %2594 = vmatmul.bf16.vlgmr.msrb.gmra.mxu0 %v9589_v26  ;;  %2923 = vmatmul.bf16.vlgmr.msrb.gmra.mxu1 %v9591_v27 }
 0x40f   :  { %v3432_v14 = vmax.f32 %v2502_v0, 0.0 }
 0x413   :  { %v985_v15 = vpop.f32.mrf.mxu0  ;;  %v1314_v40 = vpop.f32.mrf.mxu1 }
 0x414   :  { %v1578_v1 = vmax.f32 %v985_v15, 0.0  ;;  %v1579_v61 = vmax.f32 %v1314_v40, 0.0  ;;  %v2174_v20 = vpop.f32.mrf.mxu2  ;;  %v2503_v4 = vpop.f32.mrf.mxu3 }
 0x415   :  { %v2504_v5 = vadd.f32 %v2503_v4, %v2174_v20 }
 0x416   :  { %v10464_v34 = vpack.c.bf16 %v1578_v1, %v1576_v42  ;;  %v10466_v35 = vpack.c.bf16 %v1579_v61, %v1577_v13 }
 0x417   :  { %v3434_v16 = vmax.f32 %v2504_v5, 0.0 }
 0x418   :  { %12800 = vst [vmem:[#allocation120_spill] sm:$0xff] %v10466_v35  ;;  %2216 = vmatmul.bf16.gmra.mxu2 %v10464_v34  ;;  %2545 = vmatmul.bf16.gmra.mxu3 %v10466_v35 }
 0x419   :  { %v10470_v26 = vpack.c.bf16 %v3434_v16, %v3432_v14 }
 0x41b   :  { %v988_v27 = vpop.f32.mrf.mxu0  ;;  %v1317_v50 = vpop.f32.mrf.mxu1 }
 0x41c   :  { %v2177_v43 = vpop.f32.mrf.mxu2  ;;  %v2506_v51 = vpop.f32.mrf.mxu3  ;;  %v1580_v42 = vmax.f32 %v988_v27, 0.0  ;;  %v1581_v0 = vmax.f32 %v1317_v50, 0.0 }
 0x41d   :  { %v2507_v28 = vadd.f32 %v2506_v51, %v2177_v43 }
 0x41e   :  { %2599 = vmatmul.bf16.gmra.mxu0 %v9600_v37  ;;  %2928 = vmatmul.bf16.gmra.mxu1 %v9602_v38 }
 0x41f   :  { %v3436_v5 = vmax.f32 %v2507_v28, 0.0 }
 0x423   :  { %v990_v15 = vpop.f32.mrf.mxu0  ;;  %v1319_v40 = vpop.f32.mrf.mxu1 }
 0x424   :  { %v1582_v13 = vmax.f32 %v990_v15, 0.0  ;;  %v1583_v1 = vmax.f32 %v1319_v40, 0.0  ;;  %v2179_v61 = vpop.f32.mrf.mxu2  ;;  %v2508_v20 = vpop.f32.mrf.mxu3 }
 0x425   :  { %v2509_v4 = vadd.f32 %v2508_v20, %v2179_v61 }
 0x426   :  { %v10474_v16 = vpack.c.bf16 %v1582_v13, %v1580_v42  ;;  %v10476_v14 = vpack.c.bf16 %v1583_v1, %v1581_v0 }
 0x427   :  { %v3438_v35 = vmax.f32 %v2509_v4, 0.0 }
 0x428   :  { %12801 = vst [vmem:[#allocation121_spill] sm:$0xff] %v10476_v14  ;;  %2221 = vmatmul.bf16.gmra.mxu2 %v10474_v16  ;;  %2550 = vmatmul.bf16.gmra.mxu3 %v10476_v14 }
 0x429   :  { %v10480_v37 = vpack.c.bf16 %v3438_v35, %v3436_v5 }
 0x42b   :  { %v993_v38 = vpop.f32.mrf.mxu0  ;;  %v1322_v27 = vpop.f32.mrf.mxu1 }
 0x42c   :  { %v2182_v50 = vpop.f32.mrf.mxu2  ;;  %v2511_v43 = vpop.f32.mrf.mxu3  ;;  %v1584_v42 = vmax.f32 %v993_v38, 0.0  ;;  %v1585_v28 = vmax.f32 %v1322_v27, 0.0 }
 0x42d   :  { %v2512_v51 = vadd.f32 %v2511_v43, %v2182_v50 }
 0x42e   :  { %2604 = vmatmul.bf16.gmra.mxu0 %v9611_v48  ;;  %2933 = vmatmul.bf16.gmra.mxu1 %v9613_v49 }
 0x42f   :  { %v3440_v5 = vmax.f32 %v2512_v51, 0.0 }
 0x433   :  { %v995_v15 = vpop.f32.mrf.mxu0  ;;  %v1324_v40 = vpop.f32.mrf.mxu1 }
 0x434   :  { %v1586_v0 = vmax.f32 %v995_v15, 0.0  ;;  %v1587_v13 = vmax.f32 %v1324_v40, 0.0  ;;  %v2184_v1 = vpop.f32.mrf.mxu2  ;;  %v2513_v61 = vpop.f32.mrf.mxu3 }
 0x435   :  { %v2514_v20 = vadd.f32 %v2513_v61, %v2184_v1 }
 0x436   :  { %v10484_v35 = vpack.c.bf16 %v1586_v0, %v1584_v42  ;;  %v10486_v4 = vpack.c.bf16 %v1587_v13, %v1585_v28 }
 0x437   :  { %v3442_v14 = vmax.f32 %v2514_v20, 0.0 }
 0x438   :  { %12802 = vst [vmem:[#allocation122_spill] sm:$0xff] %v10486_v4  ;;  %2226 = vmatmul.bf16.gmra.mxu2 %v10484_v35  ;;  %2555 = vmatmul.bf16.gmra.mxu3 %v10486_v4 }
 0x439   :  { %v10490_v48 = vpack.c.bf16 %v3442_v14, %v3440_v5 }
 0x43b   :  { %v998_v49 = vpop.f32.mrf.mxu0  ;;  %v1327_v38 = vpop.f32.mrf.mxu1 }
 0x43c   :  { %v2187_v27 = vpop.f32.mrf.mxu2  ;;  %v2516_v50 = vpop.f32.mrf.mxu3  ;;  %v1588_v42 = vmax.f32 %v998_v49, 0.0  ;;  %v1589_v51 = vmax.f32 %v1327_v38, 0.0 }
 0x43d   :  { %v2517_v43 = vadd.f32 %v2516_v50, %v2187_v27 }
 0x43e   :  { %2609 = vmatmul.bf16.gmra.mxu0 %v9622_v59  ;;  %2938 = vmatmul.bf16.gmra.mxu1 %v9624_v60 }
 0x43f   :  { %v3444_v5 = vmax.f32 %v2517_v43, 0.0 }
 0x443   :  { %v1000_v15 = vpop.f32.mrf.mxu0  ;;  %v1329_v40 = vpop.f32.mrf.mxu1 }
 0x444   :  { %v1590_v28 = vmax.f32 %v1000_v15, 0.0  ;;  %v1591_v0 = vmax.f32 %v1329_v40, 0.0  ;;  %v2189_v13 = vpop.f32.mrf.mxu2  ;;  %v2518_v1 = vpop.f32.mrf.mxu3 }
 0x445   :  { %v2519_v61 = vadd.f32 %v2518_v1, %v2189_v13 }
 0x446   :  { %v10494_v14 = vpack.c.bf16 %v1590_v28, %v1588_v42  ;;  %v10496_v20 = vpack.c.bf16 %v1591_v0, %v1589_v51 }
 0x447   :  { %v3446_v4 = vmax.f32 %v2519_v61, 0.0 }
 0x448   :  { %12803 = vst [vmem:[#allocation123_spill] sm:$0xff] %v10496_v20  ;;  %2231 = vmatmul.bf16.gmra.mxu2 %v10494_v14  ;;  %2560 = vmatmul.bf16.gmra.mxu3 %v10496_v20 }
 0x449   :  { %v10500_v59 = vpack.c.bf16 %v3446_v4, %v3444_v5 }
 0x44b   :  { %v1003_v60 = vpop.f32.mrf.mxu0  ;;  %v1332_v49 = vpop.f32.mrf.mxu1 }
 0x44c   :  { %v2192_v38 = vpop.f32.mrf.mxu2  ;;  %v2521_v27 = vpop.f32.mrf.mxu3  ;;  %v1592_v42 = vmax.f32 %v1003_v60, 0.0  ;;  %v1593_v43 = vmax.f32 %v1332_v49, 0.0 }
 0x44d   :  { %v2522_v50 = vadd.f32 %v2521_v27, %v2192_v38 }
 0x44e   :  { %2614 = vmatmul.bf16.gmra.mxu0 %v9633_v6  ;;  %2943 = vmatmul.bf16.gmra.mxu1 %v9635_v7 }
 0x44f   :  { %v3448_v5 = vmax.f32 %v2522_v50, 0.0 }
 0x453   :  { %v1005_v15 = vpop.f32.mrf.mxu0  ;;  %v1334_v40 = vpop.f32.mrf.mxu1 }
 0x454   :  { %v1594_v51 = vmax.f32 %v1005_v15, 0.0  ;;  %v1595_v28 = vmax.f32 %v1334_v40, 0.0  ;;  %v2194_v0 = vpop.f32.mrf.mxu2  ;;  %v2523_v13 = vpop.f32.mrf.mxu3 }
 0x455   :  { %v2524_v1 = vadd.f32 %v2523_v13, %v2194_v0 }
 0x456   :  { %v10504_v4 = vpack.c.bf16 %v1594_v51, %v1592_v42  ;;  %v10506_v61 = vpack.c.bf16 %v1595_v28, %v1593_v43 }
 0x457   :  { %v3450_v20 = vmax.f32 %v2524_v1, 0.0 }
 0x458   :  { %12804 = vst [vmem:[#allocation124_spill] sm:$0xff] %v10506_v61  ;;  %2236 = vmatmul.bf16.gmra.mxu2 %v10504_v4  ;;  %2565 = vmatmul.bf16.gmra.mxu3 %v10506_v61 }
 0x459   :  { %v10510_v6 = vpack.c.bf16 %v3450_v20, %v3448_v5 }
 0x45b   :  { %v1008_v7 = vpop.f32.mrf.mxu0  ;;  %v1337_v60 = vpop.f32.mrf.mxu1 }
 0x45c   :  { %v2197_v49 = vpop.f32.mrf.mxu2  ;;  %v2526_v38 = vpop.f32.mrf.mxu3  ;;  %v1596_v42 = vmax.f32 %v1008_v7, 0.0  ;;  %v1597_v50 = vmax.f32 %v1337_v60, 0.0 }
 0x45d   :  { %v2527_v27 = vadd.f32 %v2526_v38, %v2197_v49 }
 0x45e   :  { %2619 = vmatmul.bf16.gmra.mxu0 %v9644_v17  ;;  %2948 = vmatmul.bf16.gmra.mxu1 %v9646_v18 }
 0x45f   :  { %v3452_v5 = vmax.f32 %v2527_v27, 0.0  ;;  %v9271_v27 = vld [vmem:[%s12407_s3 + $0x64] sm:$0xf] }
 0x463   :  { %v1010_v15 = vpop.f32.mrf.mxu0  ;;  %v1339_v40 = vpop.f32.mrf.mxu1 }
 0x464   :  { %v1598_v43 = vmax.f32 %v1010_v15, 0.0  ;;  %v1599_v51 = vmax.f32 %v1339_v40, 0.0  ;;  %v2199_v28 = vpop.f32.mrf.mxu2  ;;  %v2528_v0 = vpop.f32.mrf.mxu3  ;;  %v8895_v15 = vld [vmem:[%s12407_s3 + $0x68] sm:$0xf0] }
 0x465   :  { %v2529_v13 = vadd.f32 %v2528_v0, %v2199_v28  ;;  %v8898_v40 = vor.u32 %v9271_v27, %v8895_v15 }
 0x466   :  { %v10514_v20 = vpack.c.bf16 %v1598_v43, %v1596_v42  ;;  %v10516_v1 = vpack.c.bf16 %v1599_v51, %v1597_v50  ;;  %v8959_v42 = vld [vmem:[%s12407_s3 + $0xe8] sm:$0xf0] }
 0x467   :  { %v3454_v61 = vmax.f32 %v2529_v13, 0.0  ;;  %4479 = vmatpush.bf16.msra.mxu0 %v8898_v40 }
 0x468   :  { %12805 = vst [vmem:[#allocation125_spill] sm:$0xff] %v10516_v1  ;;  %2241 = vmatmul.bf16.gmra.mxu2 %v10514_v20  ;;  %2570 = vmatmul.bf16.gmra.mxu3 %v10516_v1 }
 0x469   :  { %v10520_v17 = vpack.c.bf16 %v3454_v61, %v3452_v5  ;;  %v9287_v61 = vld [vmem:[%s12407_s3 + $0xe4] sm:$0xf] }
 0x46b   :  { %12806 = vst [vmem:[#allocation126_spill] sm:$0xff] %v10520_v17  ;;  %v1013_v18 = vpop.f32.mrf.mxu0  ;;  %v1342_v7 = vpop.f32.mrf.mxu1 }
 0x46c   :  { %v2202_v60 = vpop.f32.mrf.mxu2  ;;  %v2531_v49 = vpop.f32.mrf.mxu3  ;;  %v1600_v43 = vmax.f32 %v1013_v18, 0.0  ;;  %v1601_v51 = vmax.f32 %v1342_v7, 0.0  ;;  %v9306_v18 = vld [vmem:[#allocation2 + $0x74] sm:$0xf0]  ;;  %v9093_v7 = vld [vmem:[#allocation2 + $0xf0] sm:$0xf] }
 0x46d   :  { %v2532_v38 = vadd.f32 %v2531_v49, %v2202_v60 }
 0x46e   :  { %2624 = vmatmul.bf16.gmra.mxu0 %v9667_v36  ;;  %2953 = vmatmul.bf16.gmra.mxu1 %v9669_v39  ;;  %v8962_v36 = vor.u32 %v9287_v61, %v8959_v42  ;;  %v9029_v61 = vld [vmem:[#allocation2 + $0x70] sm:$0xf] }
 0x46f   :  { %v3456_v15 = vmax.f32 %v2532_v38, 0.0 }
 0x470   :  { %4808 = vmatpush.bf16.msra.mxu1 %v8962_v36 }
 0x473   :  { %v1015_v39 = vpop.f32.mrf.mxu0  ;;  %v1344_v50 = vpop.f32.mrf.mxu1 }
 0x474   :  { %v1602_v28 = vmax.f32 %v1015_v39, 0.0  ;;  %v1603_v0 = vmax.f32 %v1344_v50, 0.0  ;;  %v2204_v13 = vpop.f32.mrf.mxu2  ;;  %v2533_v5 = vpop.f32.mrf.mxu3  ;;  %v9030_v39 = vor.u32 %v9306_v18, %v9029_v61  ;;  %v9322_v50 = vld [vmem:[#allocation2 + $0xf4] sm:$0xf0] }
 0x475   :  { %v2534_v60 = vadd.f32 %v2533_v5, %v2204_v13 }
 0x476   :  { %v10536_v49 = vpack.c.bf16 %v1602_v28, %v1600_v43  ;;  %v10538_v27 = vpack.c.bf16 %v1603_v0, %v1601_v51  ;;  %v9094_v28 = vor.u32 %v9322_v50, %v9093_v7  ;;  %5712 = vmatpush.bf16.msra.mxu2 %v9030_v39 }
 0x477   :  { %v3458_v1 = vmax.f32 %v2534_v60, 0.0 }
 0x478   :  { %12807 = vst [vmem:[#allocation127_spill] sm:$0xff] %v10536_v49  ;;  %2246 = vmatmul.bf16.gmra.mxu2 %v10536_v49  ;;  %2575 = vmatmul.bf16.gmra.mxu3 %v10538_v27 }
 0x479   :  { %12808 = vst [vmem:[#allocation128_spill] sm:$0xff] %v10538_v27  ;;  %v10542_v40 = vpack.c.bf16 %v3458_v1, %v3456_v15  ;;  %6041 = vmatpush.bf16.msra.mxu3 %v9094_v28 }
 0x47b   :  { %12809 = vst [vmem:[#allocation129_spill] sm:$0xff] %v10542_v40  ;;  %v1018_v42 = vpop.f32.mrf.mxu0  ;;  %v1347_v36 = vpop.f32.mrf.mxu1 }
 0x47c   :  { %v2207_v13 = vpop.f32.mrf.mxu2  ;;  %v2536_v43 = vpop.f32.mrf.mxu3  ;;  %v1604_v0 = vmax.f32 %v1018_v42, 0.0  ;;  %v1605_v5 = vmax.f32 %v1347_v36, 0.0 }
 0x47d   :  { %v2537_v51 = vadd.f32 %v2536_v43, %v2207_v13 }
 0x47e   :  { %2629 = vmatmul.bf16.gmra.mxu0 %v9690_v57  ;;  %2958 = vmatmul.bf16.gmra.mxu1 %v9692_v58 }
 0x47f   :  { %v3460_v7 = vmax.f32 %v2537_v51, 0.0 }
 0x483   :  { %v1020_v38 = vpop.f32.mrf.mxu0  ;;  %v1349_v1 = vpop.f32.mrf.mxu1 }
 0x484   :  { %v1606_v60 = vmax.f32 %v1020_v38, 0.0  ;;  %v1607_v15 = vmax.f32 %v1349_v1, 0.0  ;;  %v2209_v27 = vpop.f32.mrf.mxu2  ;;  %v2538_v49 = vpop.f32.mrf.mxu3 }
 0x485   :  { %v2539_v61 = vadd.f32 %v2538_v49, %v2209_v27 }
 0x486   :  { %v10546_v18 = vpack.c.bf16 %v1606_v60, %v1604_v0  ;;  %v10548_v40 = vpack.c.bf16 %v1607_v15, %v1605_v5 }
 0x487   :  { %v3462_v39 = vmax.f32 %v2539_v61, 0.0 }
 0x488   :  { %2251 = vmatmul.bf16.gmra.mxu2 %v10546_v18  ;;  %2580 = vmatmul.bf16.gmra.mxu3 %v10548_v40 }
 0x489   :  { %v10552_v57 = vpack.c.bf16 %v3462_v39, %v3460_v7 }
 0x48b   :  { %v2595_v58 = vpop.f32.mrf.mxu0  ;;  %v2924_v42 = vpop.f32.mrf.mxu1 }
 0x48c   :  { %v2212_v36 = vpop.f32.mrf.mxu2  ;;  %v2541_v50 = vpop.f32.mrf.mxu3  ;;  %v2925_v49 = vadd.f32 %v2924_v42, %v2595_v58 }
 0x48d   :  { %v2542_v13 = vadd.f32 %v2541_v50, %v2212_v36 }
 0x48e   :  { %2634 = vmatmul.bf16.gmra.mxu0 %v9701_v8  ;;  %2963 = vmatmul.bf16.gmra.mxu1 %v9703_v9  ;;  %v3245_v0 = vmax.f32 %v2925_v49, 0.0 }
 0x48f   :  { %v3464_v60 = vmax.f32 %v2542_v13, 0.0 }
 0x493   :  { %v2597_v27 = vpop.f32.mrf.mxu0  ;;  %v2926_v43 = vpop.f32.mrf.mxu1 }
 0x494   :  { %v2214_v28 = vpop.f32.mrf.mxu2  ;;  %v2543_v51 = vpop.f32.mrf.mxu3  ;;  %v2927_v38 = vadd.f32 %v2926_v43, %v2597_v27 }
 0x495   :  { %v2544_v1 = vadd.f32 %v2543_v51, %v2214_v28 }
 0x496   :  { %v3247_v5 = vmax.f32 %v2927_v38, 0.0 }
 0x497   :  { %v3466_v15 = vmax.f32 %v2544_v1, 0.0 }
 0x498   :  { %v10556_v61 = vpack.c.bf16 %v3247_v5, %v3245_v0  ;;  %3828 = vmatmul.bf16.vlgmr.msrb.gmra.mxu2 %v9718_v33 }
 0x499   :  { %v10559_v7 = vpack.c.bf16 %v3466_v15, %v3464_v60 }
 0x49a   :  { %4157 = vmatmul.bf16.vlgmr.msrb.gmra.mxu3 %v10556_v61 }
 0x49b   :  { %v2600_v8 = vpop.f32.mrf.mxu0  ;;  %v2929_v9 = vpop.f32.mrf.mxu1 }
 0x49c   :  { %v2217_v39 = vpop.f32.mrf.mxu2  ;;  %v2546_v58 = vpop.f32.mrf.mxu3  ;;  %v2930_v36 = vadd.f32 %v2929_v9, %v2600_v8 }
 0x49d   :  { %v2547_v42 = vadd.f32 %v2546_v58, %v2217_v39 }
 0x49e   :  { %2639 = vmatmul.bf16.gmra.mxu0 %v9712_v29  ;;  %2968 = vmatmul.bf16.gmra.mxu1 %v9714_v30  ;;  %v3249_v51 = vmax.f32 %v2930_v36, 0.0 }
 0x49f   :  { %v3468_v1 = vmax.f32 %v2547_v42, 0.0 }
 0x4a3   :  { %v2602_v50 = vpop.f32.mrf.mxu0  ;;  %v2931_v13 = vpop.f32.mrf.mxu1 }
 0x4a4   :  { %v2219_v49 = vpop.f32.mrf.mxu2  ;;  %v2548_v27 = vpop.f32.mrf.mxu3  ;;  %v2932_v43 = vadd.f32 %v2931_v13, %v2602_v50 }
 0x4a5   :  { %v2549_v28 = vadd.f32 %v2548_v27, %v2219_v49 }
 0x4a6   :  { %v3251_v38 = vmax.f32 %v2932_v43, 0.0 }
 0x4a7   :  { %v3470_v0 = vmax.f32 %v2549_v28, 0.0 }
 0x4a8   :  { %3833 = vmatmul.bf16.gmra.mxu2 %v9731_v63  ;;  %v10565_v5 = vpack.c.bf16 %v3251_v38, %v3249_v51 }
 0x4a9   :  { %v10567_v60 = vpack.c.bf16 %v3470_v0, %v3468_v1 }
 0x4aa   :  { %4162 = vmatmul.bf16.gmra.mxu3 %v10565_v5 }
 0x4ab   :  { %v2605_v29 = vpop.f32.mrf.mxu0  ;;  %v2934_v30 = vpop.f32.mrf.mxu1 }
 0x4ac   :  { %v2222_v15 = vpop.f32.mrf.mxu2  ;;  %v2551_v8 = vpop.f32.mrf.mxu3  ;;  %v2935_v39 = vadd.f32 %v2934_v30, %v2605_v29 }
 0x4ad   :  { %v2552_v9 = vadd.f32 %v2551_v8, %v2222_v15 }
 0x4ae   :  { %2644 = vmatmul.bf16.gmra.mxu0 %v9725_v55  ;;  %2973 = vmatmul.bf16.gmra.mxu1 %v9727_v56  ;;  %v3253_v27 = vmax.f32 %v2935_v39, 0.0 }
 0x4af   :  { %v3472_v28 = vmax.f32 %v2552_v9, 0.0 }
 0x4b3   :  { %v2607_v58 = vpop.f32.mrf.mxu0  ;;  %v2936_v42 = vpop.f32.mrf.mxu1 }
 0x4b4   :  { %v2224_v36 = vpop.f32.mrf.mxu2  ;;  %v2553_v50 = vpop.f32.mrf.mxu3  ;;  %v2937_v13 = vadd.f32 %v2936_v42, %v2607_v58 }
 0x4b5   :  { %v2554_v49 = vadd.f32 %v2553_v50, %v2224_v36 }
 0x4b6   :  { %v3255_v43 = vmax.f32 %v2937_v13, 0.0 }
 0x4b7   :  { %v3474_v51 = vmax.f32 %v2554_v49, 0.0 }
 0x4b8   :  { %3838 = vmatmul.bf16.gmra.mxu2 %v9744_v25  ;;  %v10573_v38 = vpack.c.bf16 %v3255_v43, %v3253_v27 }
 0x4b9   :  { %v10575_v1 = vpack.c.bf16 %v3474_v51, %v3472_v28 }
 0x4ba   :  { %4167 = vmatmul.bf16.gmra.mxu3 %v10573_v38 }
 0x4bb   :  { %v2610_v55 = vpop.f32.mrf.mxu0  ;;  %v2939_v56 = vpop.f32.mrf.mxu1 }
 0x4bc   :  { %v2227_v0 = vpop.f32.mrf.mxu2  ;;  %v2556_v29 = vpop.f32.mrf.mxu3  ;;  %v2940_v15 = vadd.f32 %v2939_v56, %v2610_v55 }
 0x4bd   :  { %v2557_v30 = vadd.f32 %v2556_v29, %v2227_v0 }
 0x4be   :  { %2649 = vmatmul.bf16.gmra.mxu0 %v9738_v21  ;;  %2978 = vmatmul.bf16.gmra.mxu1 %v9740_v22  ;;  %v3257_v50 = vmax.f32 %v2940_v15, 0.0 }
 0x4bf   :  { %v3476_v49 = vmax.f32 %v2557_v30, 0.0 }
 0x4c3   :  { %v2612_v8 = vpop.f32.mrf.mxu0  ;;  %v2941_v9 = vpop.f32.mrf.mxu1 }
 0x4c4   :  { %v2229_v39 = vpop.f32.mrf.mxu2  ;;  %v2558_v58 = vpop.f32.mrf.mxu3  ;;  %v2942_v42 = vadd.f32 %v2941_v9, %v2612_v8 }
 0x4c5   :  { %v2559_v36 = vadd.f32 %v2558_v58, %v2229_v39 }
 0x4c6   :  { %v3259_v13 = vmax.f32 %v2942_v42, 0.0 }
 0x4c7   :  { %v3478_v27 = vmax.f32 %v2559_v36, 0.0 }
 0x4c8   :  { %3843 = vmatmul.bf16.gmra.mxu2 %v9757_v62  ;;  %v10581_v43 = vpack.c.bf16 %v3259_v13, %v3257_v50 }
 0x4c9   :  { %v10583_v28 = vpack.c.bf16 %v3478_v27, %v3476_v49 }
 0x4ca   :  { %4172 = vmatmul.bf16.gmra.mxu3 %v10581_v43 }
 0x4cb   :  { %v2615_v21 = vpop.f32.mrf.mxu0  ;;  %v2944_v22 = vpop.f32.mrf.mxu1 }
 0x4cc   :  { %v2232_v51 = vpop.f32.mrf.mxu2  ;;  %v2561_v55 = vpop.f32.mrf.mxu3  ;;  %v2945_v0 = vadd.f32 %v2944_v22, %v2615_v21 }
 0x4cd   :  { %v2562_v56 = vadd.f32 %v2561_v55, %v2232_v51 }
 0x4ce   :  { %2654 = vmatmul.bf16.gmra.mxu0 %v9751_v52  ;;  %2983 = vmatmul.bf16.gmra.mxu1 %v9753_v53  ;;  %v3261_v58 = vmax.f32 %v2945_v0, 0.0 }
 0x4cf   :  { %v3480_v36 = vmax.f32 %v2562_v56, 0.0 }
 0x4d3   :  { %v2617_v29 = vpop.f32.mrf.mxu0  ;;  %v2946_v30 = vpop.f32.mrf.mxu1 }
 0x4d4   :  { %v2234_v15 = vpop.f32.mrf.mxu2  ;;  %v2563_v8 = vpop.f32.mrf.mxu3  ;;  %v2947_v9 = vadd.f32 %v2946_v30, %v2617_v29 }
 0x4d5   :  { %v2564_v39 = vadd.f32 %v2563_v8, %v2234_v15 }
 0x4d6   :  { %v3263_v42 = vmax.f32 %v2947_v9, 0.0 }
 0x4d7   :  { %v3482_v50 = vmax.f32 %v2564_v39, 0.0 }
 0x4d8   :  { %3848 = vmatmul.bf16.gmra.mxu2 %v9770_v32  ;;  %v10589_v13 = vpack.c.bf16 %v3263_v42, %v3261_v58 }
 0x4d9   :  { %v10591_v49 = vpack.c.bf16 %v3482_v50, %v3480_v36 }
 0x4da   :  { %4177 = vmatmul.bf16.gmra.mxu3 %v10589_v13 }
 0x4db   :  { %v2620_v52 = vpop.f32.mrf.mxu0  ;;  %v2949_v53 = vpop.f32.mrf.mxu1 }
 0x4dc   :  { %v2237_v27 = vpop.f32.mrf.mxu2  ;;  %v2566_v21 = vpop.f32.mrf.mxu3  ;;  %v2950_v51 = vadd.f32 %v2949_v53, %v2620_v52 }
 0x4dd   :  { %v2567_v22 = vadd.f32 %v2566_v21, %v2237_v27  ;;  %v9269_v27 = vld [vmem:[%s12407_s3 + $0x54] sm:$0xf]  ;;  %v8887_v21 = vld [vmem:[%s12407_s3 + $0x58] sm:$0xf0] }
 0x4de   :  { %2659 = vmatmul.bf16.gmra.mxu0 %v9764_v23  ;;  %2988 = vmatmul.bf16.gmra.mxu1 %v9766_v24  ;;  %v3265_v8 = vmax.f32 %v2950_v51, 0.0  ;;  %v9285_v51 = vld [vmem:[%s12407_s3 + $0xd4] sm:$0xf] }
 0x4df   :  { %v3484_v39 = vmax.f32 %v2567_v22, 0.0  ;;  %v8890_v22 = vor.u32 %v9269_v27, %v8887_v21  ;;  %v9085_v21 = vld [vmem:[#allocation2 + $0xe0] sm:$0xf] }
 0x4e1   :  { %4480 = vmatpush.bf16.msra.mxu0 %v8890_v22 }
 0x4e3   :  { %v2622_v55 = vpop.f32.mrf.mxu0  ;;  %v2951_v56 = vpop.f32.mrf.mxu1 }
 0x4e4   :  { %v2239_v0 = vpop.f32.mrf.mxu2  ;;  %v2568_v29 = vpop.f32.mrf.mxu3  ;;  %v2952_v30 = vadd.f32 %v2951_v56, %v2622_v55  ;;  %v8951_v55 = vld [vmem:[%s12407_s3 + $0xd8] sm:$0xf0] }
 0x4e5   :  { %v2569_v15 = vadd.f32 %v2568_v29, %v2239_v0 }
 0x4e6   :  { %v3267_v9 = vmax.f32 %v2952_v30, 0.0 }
 0x4e7   :  { %v3486_v58 = vmax.f32 %v2569_v15, 0.0 }
 0x4e8   :  { %3853 = vmatmul.bf16.gmra.mxu2 %v9807_v31  ;;  %v10597_v42 = vpack.c.bf16 %v3267_v9, %v3265_v8 }
 0x4e9   :  { %v10599_v36 = vpack.c.bf16 %v3486_v58, %v3484_v39 }
 0x4ea   :  { %4182 = vmatmul.bf16.gmra.mxu3 %v10597_v42 }
 0x4eb   :  { %v2625_v23 = vpop.f32.mrf.mxu0  ;;  %v2954_v24 = vpop.f32.mrf.mxu1 }
 0x4ec   :  { %v2242_v50 = vpop.f32.mrf.mxu2  ;;  %v2571_v52 = vpop.f32.mrf.mxu3  ;;  %v2955_v56 = vadd.f32 %v2954_v24, %v2625_v23  ;;  %v9021_v23 = vld [vmem:[#allocation2 + $0x60] sm:$0xf]  ;;  %v9304_v24 = vld [vmem:[#allocation2 + $0x64] sm:$0xf0] }
 0x4ed   :  { %v2572_v53 = vadd.f32 %v2571_v52, %v2242_v50 }
 0x4ee   :  { %2664 = vmatmul.bf16.gmra.mxu0 %v9789_v11  ;;  %2993 = vmatmul.bf16.gmra.mxu1 %v9791_v12  ;;  %v8954_v11 = vor.u32 %v9285_v51, %v8951_v55  ;;  %v3269_v9 = vmax.f32 %v2955_v56, 0.0  ;;  %v9022_v55 = vor.u32 %v9304_v24, %v9021_v23 }
 0x4ef   :  { %v3488_v58 = vmax.f32 %v2572_v53, 0.0 }
 0x4f0   :  { %4809 = vmatpush.bf16.msra.mxu1 %v8954_v11  ;;  %v9320_v11 = vld [vmem:[#allocation2 + $0xe4] sm:$0xf0]  ;;  %5713 = vmatpush.bf16.msra.mxu2 %v9022_v55 }
 0x4f3   :  { %v2627_v12 = vpop.f32.mrf.mxu0  ;;  %v2956_v0 = vpop.f32.mrf.mxu1 }
 0x4f4   :  { %v2244_v29 = vpop.f32.mrf.mxu2  ;;  %v2573_v30 = vpop.f32.mrf.mxu3  ;;  %v2957_v15 = vadd.f32 %v2956_v0, %v2627_v12  ;;  %v9086_v0 = vor.u32 %v9320_v11, %v9085_v21 }
 0x4f5   :  { %v2574_v8 = vadd.f32 %v2573_v30, %v2244_v29 }
 0x4f6   :  { %v3271_v39 = vmax.f32 %v2957_v15, 0.0  ;;  %6042 = vmatpush.bf16.msra.mxu3 %v9086_v0 }
 0x4f7   :  { %v3490_v50 = vmax.f32 %v2574_v8, 0.0 }
 0x4f8   :  { %3858 = vmatmul.bf16.gmra.mxu2 %v9820_v10  ;;  %v10617_v52 = vpack.c.bf16 %v3271_v39, %v3269_v9 }
 0x4f9   :  { %v10619_v27 = vpack.c.bf16 %v3490_v50, %v3488_v58 }
 0x4fa   :  { %12810 = vst [vmem:[#allocation130_spill] sm:$0xff] %v10617_v52  ;;  %4187 = vmatmul.bf16.gmra.mxu3 %v10617_v52 }
 0x4fb   :  { %v2630_v22 = vpop.f32.mrf.mxu0  ;;  %v2959_v51 = vpop.f32.mrf.mxu1 }
 0x4fc   :  { %v2247_v12 = vpop.f32.mrf.mxu2  ;;  %v2576_v56 = vpop.f32.mrf.mxu3  ;;  %v2960_v29 = vadd.f32 %v2959_v51, %v2630_v22 }
 0x4fd   :  { %v2577_v53 = vadd.f32 %v2576_v56, %v2247_v12 }
 0x4fe   :  { %2669 = vmatmul.bf16.gmra.mxu0 %v9814_v2  ;;  %2998 = vmatmul.bf16.gmra.mxu1 %v9816_v3  ;;  %v3273_v50 = vmax.f32 %v2960_v29, 0.0 }
 0x4ff   :  { %v3492_v24 = vmax.f32 %v2577_v53, 0.0 }
 0x503   :  { %v2632_v30 = vpop.f32.mrf.mxu0  ;;  %v2961_v15 = vpop.f32.mrf.mxu1 }
 0x504   :  { %v2249_v8 = vpop.f32.mrf.mxu2  ;;  %v2578_v9 = vpop.f32.mrf.mxu3  ;;  %v2962_v39 = vadd.f32 %v2961_v15, %v2632_v30 }
 0x505   :  { %v2579_v58 = vadd.f32 %v2578_v9, %v2249_v8 }
 0x506   :  { %v3275_v23 = vmax.f32 %v2962_v39, 0.0 }
 0x507   :  { %v3494_v52 = vmax.f32 %v2579_v58, 0.0 }
 0x508   :  { %3863 = vmatmul.bf16.gmra.mxu2 %v9833_v54  ;;  %v10625_v21 = vpack.c.bf16 %v3275_v23, %v3273_v50 }
 0x509   :  { %v10627_v55 = vpack.c.bf16 %v3494_v52, %v3492_v24 }
 0x50a   :  { %4192 = vmatmul.bf16.gmra.mxu3 %v10625_v21 }
 0x50b   :  { %v2635_v2 = vpop.f32.mrf.mxu0  ;;  %v2964_v3 = vpop.f32.mrf.mxu1 }
 0x50c   :  { %v2252_v22 = vpop.f32.mrf.mxu2  ;;  %v2581_v51 = vpop.f32.mrf.mxu3  ;;  %v2965_v12 = vadd.f32 %v2964_v3, %v2635_v2  ;;  %v12813_v3 = vld [vmem:[#allocation5_spill] sm:$0xff] }
 0x50d   :  { %v2582_v11 = vadd.f32 %v2581_v51, %v2252_v22 }
 0x50e   :  { %2674 = vmatmul.bf16.gmra.mxu0 %v9827_v46  ;;  %3003 = vmatmul.bf16.gmra.mxu1 %v9829_v47  ;;  %v3277_v52 = vmax.f32 %v2965_v12, 0.0 }
 0x50f   :  { %v3496_v9 = vmax.f32 %v2582_v11, 0.0 }
 0x513   :  { %v2637_v56 = vpop.f32.mrf.mxu0  ;;  %v2966_v0 = vpop.f32.mrf.mxu1 }
 0x514   :  { %v2254_v53 = vpop.f32.mrf.mxu2  ;;  %v2583_v29 = vpop.f32.mrf.mxu3  ;;  %v2967_v30 = vadd.f32 %v2966_v0, %v2637_v56 }
 0x515   :  { %v2584_v15 = vadd.f32 %v2583_v29, %v2254_v53 }
 0x516   :  { %v3279_v8 = vmax.f32 %v2967_v30, 0.0 }
 0x517   :  { %v3498_v39 = vmax.f32 %v2584_v15, 0.0 }
 0x518   :  { %3868 = vmatmul.bf16.gmra.mxu2 %v9846_v45  ;;  %v10633_v58 = vpack.c.bf16 %v3279_v8, %v3277_v52  ;;  %v12814_v8 = vld [vmem:[#allocation8_spill] sm:$0xff] }
 0x519   :  { %v10635_v50 = vpack.c.bf16 %v3498_v39, %v3496_v9 }
 0x51a   :  { %12811 = vst [vmem:[#allocation131_spill] sm:$0xff] %v10633_v58  ;;  %4197 = vmatmul.bf16.gmra.mxu3 %v10633_v58 }
 0x51b   :  { %12812 = vst [vmem:[#allocation132_spill] sm:$0xff] %v10635_v50  ;;  %v2640_v46 = vpop.f32.mrf.mxu0  ;;  %v2969_v47 = vpop.f32.mrf.mxu1 }
 0x51c   :  { %v3829_v23 = vpop.f32.mrf.mxu2  ;;  %v2970_v22 = vadd.f32 %v2969_v47, %v2640_v46 }
 0x51d   :  { %v4158_v24 = vpop.f32.mrf.mxu3 }
 0x51e   :  { %v4159_v2 = vadd.f32 %v4158_v24, %v3829_v23  ;;  %2679 = vmatmul.bf16.gmra.mxu0 %v9840_v41  ;;  %3008 = vmatmul.bf16.gmra.mxu1 %v12813_v3  ;;  %v3281_v53 = vmax.f32 %v2970_v22, 0.0  ;;  %v12817_v3 = vld [vmem:[#allocation6_spill] sm:$0xff]  ;;  %v12818_v22 = vld [vmem:[#allocation7_spill] sm:$0xff] }
 0x520   :  { %v5136_v15 = vmax.f32 %v4159_v2, 0.0 }
 0x523   :  { %v2642_v51 = vpop.f32.mrf.mxu0  ;;  %v2971_v11 = vpop.f32.mrf.mxu1 }
 0x524   :  { %v2972_v12 = vadd.f32 %v2971_v11, %v2642_v51  ;;  %v3831_v56 = vpop.f32.mrf.mxu2 }
 0x525   :  { %v4160_v0 = vpop.f32.mrf.mxu3 }
 0x526   :  { %v3283_v29 = vmax.f32 %v2972_v12, 0.0  ;;  %v4161_v30 = vadd.f32 %v4160_v0, %v3831_v56 }
 0x528   :  { %v5138_v52 = vmax.f32 %v4161_v30, 0.0  ;;  %3873 = vmatmul.bf16.gmra.mxu2 %v12814_v8  ;;  %v10641_v9 = vpack.c.bf16 %v3283_v29, %v3281_v53 }
 0x52a   :  { %12815 = vst [vmem:[#allocation5_spill] sm:$0xff] %v10641_v9  ;;  %v10643_v39 = vpack.c.bf16 %v5138_v52, %v5136_v15  ;;  %4202 = vmatmul.bf16.gmra.mxu3 %v10641_v9  ;;  %v12819_v9 = vld [vmem:[#allocation11_spill] sm:$0xff] }
 0x52b   :  { %v2645_v41 = vpop.f32.mrf.mxu0  ;;  %v2974_v46 = vpop.f32.mrf.mxu1 }
 0x52c   :  { %12816 = vst [vmem:[#allocation133_spill] sm:$0xff] %v10643_v39  ;;  %v3834_v47 = vpop.f32.mrf.mxu2  ;;  %v2975_v51 = vadd.f32 %v2974_v46, %v2645_v41 }
 0x52d   :  { %v4163_v23 = vpop.f32.mrf.mxu3 }
 0x52e   :  { %v4164_v24 = vadd.f32 %v4163_v23, %v3834_v47  ;;  %2684 = vmatmul.bf16.gmra.mxu0 %v12817_v3  ;;  %3013 = vmatmul.bf16.gmra.mxu1 %v12818_v22  ;;  %v3285_v53 = vmax.f32 %v2975_v51, 0.0  ;;  %v12823_v51 = vld [vmem:[#allocation10_spill] sm:$0xff] }
 0x530   :  { %v5140_v15 = vmax.f32 %v4164_v24, 0.0 }
 0x533   :  { %v2647_v2 = vpop.f32.mrf.mxu0  ;;  %v2976_v11 = vpop.f32.mrf.mxu1 }
 0x534   :  { %v2977_v12 = vadd.f32 %v2976_v11, %v2647_v2  ;;  %v3836_v56 = vpop.f32.mrf.mxu2  ;;  %v12822_v2 = vld [vmem:[#allocation9_spill] sm:$0xff] }
 0x535   :  { %v4165_v0 = vpop.f32.mrf.mxu3 }
 0x536   :  { %v3287_v29 = vmax.f32 %v2977_v12, 0.0  ;;  %v4166_v30 = vadd.f32 %v4165_v0, %v3836_v56 }
 0x538   :  { %v5142_v52 = vmax.f32 %v4166_v30, 0.0  ;;  %3878 = vmatmul.bf16.gmra.mxu2 %v12819_v9  ;;  %v10649_v8 = vpack.c.bf16 %v3287_v29, %v3285_v53  ;;  %v12824_v9 = vld [vmem:[#allocation14_spill] sm:$0xff] }
 0x53a   :  { %12820 = vst [vmem:[#allocation6_spill] sm:$0xff] %v10649_v8  ;;  %4207 = vmatmul.bf16.gmra.mxu3 %v10649_v8  ;;  %v10652_v47 = vpack.c.bf16 %v5142_v52, %v5140_v15 }
 0x53b   :  { %v2650_v23 = vpop.f32.mrf.mxu0  ;;  %v2979_v41 = vpop.f32.mrf.mxu1 }
 0x53c   :  { %12821 = vst [vmem:[#allocation7_spill] sm:$0xff] %v10652_v47  ;;  %v3839_v46 = vpop.f32.mrf.mxu2  ;;  %v2980_v11 = vadd.f32 %v2979_v41, %v2650_v23 }
 0x53d   :  { %v4168_v3 = vpop.f32.mrf.mxu3 }
 0x53e   :  { %v4169_v22 = vadd.f32 %v4168_v3, %v3839_v46  ;;  %2689 = vmatmul.bf16.gmra.mxu0 %v12822_v2  ;;  %3018 = vmatmul.bf16.gmra.mxu1 %v12823_v51  ;;  %v3289_v29 = vmax.f32 %v2980_v11, 0.0  ;;  %v12828_v11 = vld [vmem:[#allocation13_spill] sm:$0xff] }
 0x540   :  { %v5144_v15 = vmax.f32 %v4169_v22, 0.0 }
 0x543   :  { %v2652_v24 = vpop.f32.mrf.mxu0  ;;  %v2981_v12 = vpop.f32.mrf.mxu1 }
 0x544   :  { %v2982_v56 = vadd.f32 %v2981_v12, %v2652_v24  ;;  %v3841_v0 = vpop.f32.mrf.mxu2  ;;  %v12827_v24 = vld [vmem:[#allocation12_spill] sm:$0xff] }
 0x545   :  { %v4170_v53 = vpop.f32.mrf.mxu3 }
 0x546   :  { %v3291_v30 = vmax.f32 %v2982_v56, 0.0  ;;  %v4171_v8 = vadd.f32 %v4170_v53, %v3841_v0 }
 0x548   :  { %v5146_v52 = vmax.f32 %v4171_v8, 0.0  ;;  %3883 = vmatmul.bf16.gmra.mxu2 %v12824_v9  ;;  %v10657_v47 = vpack.c.bf16 %v3291_v30, %v3289_v29  ;;  %v12829_v9 = vld [vmem:[#allocation17_spill] sm:$0xff] }
 0x54a   :  { %12825 = vst [vmem:[#allocation9_spill] sm:$0xff] %v10657_v47  ;;  %4212 = vmatmul.bf16.gmra.mxu3 %v10657_v47  ;;  %v10660_v46 = vpack.c.bf16 %v5146_v52, %v5144_v15 }
 0x54b   :  { %v2655_v3 = vpop.f32.mrf.mxu0  ;;  %v2984_v23 = vpop.f32.mrf.mxu1 }
 0x54c   :  { %12826 = vst [vmem:[#allocation10_spill] sm:$0xff] %v10660_v46  ;;  %v3844_v41 = vpop.f32.mrf.mxu2  ;;  %v2985_v12 = vadd.f32 %v2984_v23, %v2655_v3 }
 0x54d   :  { %v4173_v2 = vpop.f32.mrf.mxu3 }
 0x54e   :  { %v4174_v51 = vadd.f32 %v4173_v2, %v3844_v41  ;;  %2694 = vmatmul.bf16.gmra.mxu0 %v12827_v24  ;;  %3023 = vmatmul.bf16.gmra.mxu1 %v12828_v11  ;;  %v3293_v29 = vmax.f32 %v2985_v12, 0.0  ;;  %v12833_v12 = vld [vmem:[#allocation16_spill] sm:$0xff] }
 0x550   :  { %v5148_v15 = vmax.f32 %v4174_v51, 0.0 }
 0x553   :  { %v2657_v22 = vpop.f32.mrf.mxu0  ;;  %v2986_v8 = vpop.f32.mrf.mxu1 }
 0x554   :  { %v2987_v56 = vadd.f32 %v2986_v8, %v2657_v22  ;;  %v3846_v0 = vpop.f32.mrf.mxu2  ;;  %v12832_v22 = vld [vmem:[#allocation15_spill] sm:$0xff] }
 0x555   :  { %v4175_v53 = vpop.f32.mrf.mxu3 }
 0x556   :  { %v3295_v30 = vmax.f32 %v2987_v56, 0.0  ;;  %v4176_v47 = vadd.f32 %v4175_v53, %v3846_v0 }
 0x558   :  { %v5150_v52 = vmax.f32 %v4176_v47, 0.0  ;;  %3888 = vmatmul.bf16.gmra.mxu2 %v12829_v9  ;;  %v10665_v46 = vpack.c.bf16 %v3295_v30, %v3293_v29  ;;  %v12834_v9 = vld [vmem:[#allocation20_spill] sm:$0xff] }
 0x55a   :  { %12830 = vst [vmem:[#allocation12_spill] sm:$0xff] %v10665_v46  ;;  %4217 = vmatmul.bf16.gmra.mxu3 %v10665_v46  ;;  %v10668_v41 = vpack.c.bf16 %v5150_v52, %v5148_v15 }
 0x55b   :  { %v2660_v2 = vpop.f32.mrf.mxu0  ;;  %v2989_v3 = vpop.f32.mrf.mxu1 }
 0x55c   :  { %12831 = vst [vmem:[#allocation13_spill] sm:$0xff] %v10668_v41  ;;  %v3849_v23 = vpop.f32.mrf.mxu2  ;;  %v2990_v8 = vadd.f32 %v2989_v3, %v2660_v2 }
 0x55d   :  { %v4178_v24 = vpop.f32.mrf.mxu3 }
 0x55e   :  { %v4179_v11 = vadd.f32 %v4178_v24, %v3849_v23  ;;  %2699 = vmatmul.bf16.gmra.mxu0 %v12832_v22  ;;  %3028 = vmatmul.bf16.gmra.mxu1 %v12833_v12  ;;  %v3297_v29 = vmax.f32 %v2990_v8, 0.0  ;;  %v12838_v8 = vld [vmem:[#allocation19_spill] sm:$0xff] }
 0x560   :  { %v5152_v15 = vmax.f32 %v4179_v11, 0.0  ;;  %v8879_v11 = vld [vmem:[%s12407_s3 + $0x48] sm:$0xf0] }
 0x563   :  { %v2662_v51 = vpop.f32.mrf.mxu0  ;;  %v2991_v47 = vpop.f32.mrf.mxu1 }
 0x564   :  { %v2992_v56 = vadd.f32 %v2991_v47, %v2662_v51  ;;  %v3851_v0 = vpop.f32.mrf.mxu2  ;;  %v12837_v51 = vld [vmem:[#allocation18_spill] sm:$0xff] }
 0x565   :  { %v4180_v53 = vpop.f32.mrf.mxu3 }
 0x566   :  { %v3299_v30 = vmax.f32 %v2992_v56, 0.0  ;;  %v4181_v46 = vadd.f32 %v4180_v53, %v3851_v0  ;;  %v9283_v56 = vld [vmem:[%s12407_s3 + $0xc4] sm:$0xf]  ;;  %v8943_v0 = vld [vmem:[%s12407_s3 + $0xc8] sm:$0xf0] }
 0x568   :  { %v5154_v52 = vmax.f32 %v4181_v46, 0.0  ;;  %3893 = vmatmul.bf16.gmra.mxu2 %v12834_v9  ;;  %v10673_v41 = vpack.c.bf16 %v3299_v30, %v3297_v29  ;;  %v9267_v46 = vld [vmem:[%s12407_s3 + $0x44] sm:$0xf]  ;;  %v8946_v29 = vor.u32 %v9283_v56, %v8943_v0  ;;  %v12839_v9 = vld [vmem:[#allocation23_spill] sm:$0xff] }
 0x569   :  { %v8882_v47 = vor.u32 %v9267_v46, %v8879_v11  ;;  %v9077_v56 = vld [vmem:[#allocation2 + $0xd0] sm:$0xf] }
 0x56a   :  { %12835 = vst [vmem:[#allocation15_spill] sm:$0xff] %v10673_v41  ;;  %4222 = vmatmul.bf16.gmra.mxu3 %v10673_v41  ;;  %v10676_v23 = vpack.c.bf16 %v5154_v52, %v5152_v15  ;;  %4810 = vmatpush.bf16.msra.mxu1 %v8946_v29 }
 0x56b   :  { %v2665_v24 = vpop.f32.mrf.mxu0  ;;  %v2994_v2 = vpop.f32.mrf.mxu1  ;;  %4481 = vmatpush.bf16.msra.mxu0 %v8882_v47 }
 0x56c   :  { %12836 = vst [vmem:[#allocation16_spill] sm:$0xff] %v10676_v23  ;;  %v3854_v3 = vpop.f32.mrf.mxu2  ;;  %v2995_v53 = vadd.f32 %v2994_v2, %v2665_v24  ;;  %v9013_v24 = vld [vmem:[#allocation2 + $0x50] sm:$0xf]  ;;  %v9302_v2 = vld [vmem:[#allocation2 + $0x54] sm:$0xf0] }
 0x56d   :  { %v4183_v22 = vpop.f32.mrf.mxu3  ;;  %v9014_v29 = vor.u32 %v9302_v2, %v9013_v24 }
 0x56e   :  { %v4184_v12 = vadd.f32 %v4183_v22, %v3854_v3  ;;  %2704 = vmatmul.bf16.gmra.mxu0 %v12837_v51  ;;  %3033 = vmatmul.bf16.gmra.mxu1 %v12838_v8  ;;  %v3301_v51 = vmax.f32 %v2995_v53, 0.0 }
 0x56f   :  { %5714 = vmatpush.bf16.msra.mxu2 %v9014_v29 }
 0x570   :  { %v5156_v11 = vmax.f32 %v4184_v12, 0.0 }
 0x573   :  { %v2667_v30 = vpop.f32.mrf.mxu0  ;;  %v2996_v15 = vpop.f32.mrf.mxu1 }
 0x574   :  { %v2997_v52 = vadd.f32 %v2996_v15, %v2667_v30  ;;  %v3856_v3 = vpop.f32.mrf.mxu2  ;;  %v9318_v15 = vld [vmem:[#allocation2 + $0xd4] sm:$0xf0] }
 0x575   :  { %v4185_v22 = vpop.f32.mrf.mxu3 }
 0x576   :  { %v3303_v8 = vmax.f32 %v2997_v52, 0.0  ;;  %v4186_v46 = vadd.f32 %v4185_v22, %v3856_v3  ;;  %v9078_v52 = vor.u32 %v9318_v15, %v9077_v56  ;;  %v12842_v22 = vld [vmem:[#allocation21_spill] sm:$0xff]  ;;  %v12844_v56 = vld [vmem:[#allocation26_spill] sm:$0xff] }
 0x578   :  { %v5158_v41 = vmax.f32 %v4186_v46, 0.0  ;;  %3898 = vmatmul.bf16.gmra.mxu2 %v12839_v9  ;;  %v10693_v23 = vpack.c.bf16 %v3303_v8, %v3301_v51  ;;  %v12843_v51 = vld [vmem:[#allocation22_spill] sm:$0xff]  ;;  %6043 = vmatpush.bf16.msra.mxu3 %v9078_v52 }
 0x57a   :  { %12840 = vst [vmem:[#allocation18_spill] sm:$0xff] %v10693_v23  ;;  %4227 = vmatmul.bf16.gmra.mxu3 %v10693_v23  ;;  %v10696_v0 = vpack.c.bf16 %v5158_v41, %v5156_v11 }
 0x57b   :  { %v2670_v47 = vpop.f32.mrf.mxu0  ;;  %v2999_v30 = vpop.f32.mrf.mxu1 }
 0x57c   :  { %12841 = vst [vmem:[#allocation19_spill] sm:$0xff] %v10696_v0  ;;  %v3859_v53 = vpop.f32.mrf.mxu2  ;;  %v3000_v8 = vadd.f32 %v2999_v30, %v2670_v47 }
 0x57d   :  { %v4188_v3 = vpop.f32.mrf.mxu3 }
 0x57e   :  { %v4189_v12 = vadd.f32 %v4188_v3, %v3859_v53  ;;  %2709 = vmatmul.bf16.gmra.mxu0 %v12842_v22  ;;  %3038 = vmatmul.bf16.gmra.mxu1 %v12843_v51  ;;  %v3305_v0 = vmax.f32 %v3000_v8, 0.0  ;;  %v12847_v3 = vld [vmem:[#allocation24_spill] sm:$0xff]  ;;  %v12848_v22 = vld [vmem:[#allocation25_spill] sm:$0xff] }
 0x580   :  { %v5160_v2 = vmax.f32 %v4189_v12, 0.0 }
 0x583   :  { %v2672_v46 = vpop.f32.mrf.mxu0  ;;  %v3001_v23 = vpop.f32.mrf.mxu1 }
 0x584   :  { %v3002_v9 = vadd.f32 %v3001_v23, %v2672_v46  ;;  %v3861_v41 = vpop.f32.mrf.mxu2 }
 0x585   :  { %v4190_v11 = vpop.f32.mrf.mxu3 }
 0x586   :  { %v3307_v39 = vmax.f32 %v3002_v9, 0.0  ;;  %v4191_v24 = vadd.f32 %v4190_v11, %v3861_v41 }
 0x588   :  { %v5162_v58 = vmax.f32 %v4191_v24, 0.0  ;;  %3903 = vmatmul.bf16.gmra.mxu2 %v12844_v56  ;;  %v10701_v29 = vpack.c.bf16 %v3307_v39, %v3305_v0 }
 0x58a   :  { %12845 = vst [vmem:[#allocation21_spill] sm:$0xff] %v10701_v29  ;;  %4232 = vmatmul.bf16.gmra.mxu3 %v10701_v29  ;;  %v10704_v15 = vpack.c.bf16 %v5162_v58, %v5160_v2  ;;  %v12849_v2 = vld [vmem:[#allocation29_spill] sm:$0xff] }
 0x58b   :  { %v2675_v53 = vpop.f32.mrf.mxu0  ;;  %v3004_v47 = vpop.f32.mrf.mxu1 }
 0x58c   :  { %12846 = vst [vmem:[#allocation22_spill] sm:$0xff] %v10704_v15  ;;  %v3864_v30 = vpop.f32.mrf.mxu2  ;;  %v3005_v9 = vadd.f32 %v3004_v47, %v2675_v53 }
 0x58d   :  { %v4193_v52 = vpop.f32.mrf.mxu3 }
 0x58e   :  { %v4194_v23 = vadd.f32 %v4193_v52, %v3864_v30  ;;  %2714 = vmatmul.bf16.gmra.mxu0 %v12847_v3  ;;  %3043 = vmatmul.bf16.gmra.mxu1 %v12848_v22  ;;  %v3309_v0 = vmax.f32 %v3005_v9, 0.0  ;;  %v12853_v9 = vld [vmem:[#allocation28_spill] sm:$0xff] }
 0x590   :  { %v5164_v58 = vmax.f32 %v4194_v23, 0.0 }
 0x593   :  { %v2677_v12 = vpop.f32.mrf.mxu0  ;;  %v3006_v51 = vpop.f32.mrf.mxu1 }
 0x594   :  { %v3007_v8 = vadd.f32 %v3006_v51, %v2677_v12  ;;  %v3866_v46 = vpop.f32.mrf.mxu2  ;;  %v12852_v12 = vld [vmem:[#allocation27_spill] sm:$0xff] }
 0x595   :  { %v4195_v39 = vpop.f32.mrf.mxu3 }
 0x596   :  { %v3311_v41 = vmax.f32 %v3007_v8, 0.0  ;;  %v4196_v11 = vadd.f32 %v4195_v39, %v3866_v46 }
 0x598   :  { %v5166_v24 = vmax.f32 %v4196_v11, 0.0  ;;  %3908 = vmatmul.bf16.gmra.mxu2 %v12849_v2  ;;  %v10709_v29 = vpack.c.bf16 %v3311_v41, %v3309_v0  ;;  %v12854_v2 = vld [vmem:[#allocation32_spill] sm:$0xff] }
 0x59a   :  { %12850 = vst [vmem:[#allocation24_spill] sm:$0xff] %v10709_v29  ;;  %4237 = vmatmul.bf16.gmra.mxu3 %v10709_v29  ;;  %v10712_v30 = vpack.c.bf16 %v5166_v24, %v5164_v58 }
 0x59b   :  { %v2680_v52 = vpop.f32.mrf.mxu0  ;;  %v3009_v53 = vpop.f32.mrf.mxu1 }
 0x59c   :  { %12851 = vst [vmem:[#allocation25_spill] sm:$0xff] %v10712_v30  ;;  %v3869_v47 = vpop.f32.mrf.mxu2  ;;  %v3010_v51 = vadd.f32 %v3009_v53, %v2680_v52 }
 0x59d   :  { %v4198_v3 = vpop.f32.mrf.mxu3 }
 0x59e   :  { %v4199_v22 = vadd.f32 %v4198_v3, %v3869_v47  ;;  %2719 = vmatmul.bf16.gmra.mxu0 %v12852_v12  ;;  %3048 = vmatmul.bf16.gmra.mxu1 %v12853_v9  ;;  %v3313_v41 = vmax.f32 %v3010_v51, 0.0  ;;  %v12858_v51 = vld [vmem:[#allocation31_spill] sm:$0xff] }
 0x5a0   :  { %v5168_v58 = vmax.f32 %v4199_v22, 0.0 }
 0x5a3   :  { %v2682_v23 = vpop.f32.mrf.mxu0  ;;  %v3011_v8 = vpop.f32.mrf.mxu1 }
 0x5a4   :  { %v3012_v46 = vadd.f32 %v3011_v8, %v2682_v23  ;;  %v3871_v39 = vpop.f32.mrf.mxu2  ;;  %v12857_v23 = vld [vmem:[#allocation30_spill] sm:$0xff] }
 0x5a5   :  { %v4200_v0 = vpop.f32.mrf.mxu3 }
 0x5a6   :  { %v3315_v11 = vmax.f32 %v3012_v46, 0.0  ;;  %v4201_v29 = vadd.f32 %v4200_v0, %v3871_v39 }
 0x5a8   :  { %v5170_v24 = vmax.f32 %v4201_v29, 0.0  ;;  %3913 = vmatmul.bf16.gmra.mxu2 %v12854_v2  ;;  %v10717_v30 = vpack.c.bf16 %v3315_v11, %v3313_v41  ;;  %v12859_v2 = vld [vmem:[#allocation35_spill] sm:$0xff] }
 0x5aa   :  { %12855 = vst [vmem:[#allocation27_spill] sm:$0xff] %v10717_v30  ;;  %4242 = vmatmul.bf16.gmra.mxu3 %v10717_v30  ;;  %v10720_v47 = vpack.c.bf16 %v5170_v24, %v5168_v58 }
 0x5ab   :  { %v2685_v3 = vpop.f32.mrf.mxu0  ;;  %v3014_v52 = vpop.f32.mrf.mxu1 }
 0x5ac   :  { %12856 = vst [vmem:[#allocation28_spill] sm:$0xff] %v10720_v47  ;;  %v3874_v53 = vpop.f32.mrf.mxu2  ;;  %v3015_v8 = vadd.f32 %v3014_v52, %v2685_v3 }
 0x5ad   :  { %v4203_v12 = vpop.f32.mrf.mxu3 }
 0x5ae   :  { %v4204_v9 = vadd.f32 %v4203_v12, %v3874_v53  ;;  %2724 = vmatmul.bf16.gmra.mxu0 %v12857_v23  ;;  %3053 = vmatmul.bf16.gmra.mxu1 %v12858_v51  ;;  %v3317_v41 = vmax.f32 %v3015_v8, 0.0  ;;  %v12863_v8 = vld [vmem:[#allocation34_spill] sm:$0xff] }
 0x5b0   :  { %v5172_v58 = vmax.f32 %v4204_v9, 0.0 }
 0x5b3   :  { %v2687_v22 = vpop.f32.mrf.mxu0  ;;  %v3016_v29 = vpop.f32.mrf.mxu1 }
 0x5b4   :  { %v3017_v46 = vadd.f32 %v3016_v29, %v2687_v22  ;;  %v3876_v39 = vpop.f32.mrf.mxu2  ;;  %v12862_v22 = vld [vmem:[#allocation33_spill] sm:$0xff] }
 0x5b5   :  { %v4205_v0 = vpop.f32.mrf.mxu3 }
 0x5b6   :  { %v3319_v11 = vmax.f32 %v3017_v46, 0.0  ;;  %v4206_v30 = vadd.f32 %v4205_v0, %v3876_v39 }
 0x5b8   :  { %v5174_v24 = vmax.f32 %v4206_v30, 0.0  ;;  %3918 = vmatmul.bf16.gmra.mxu2 %v12859_v2  ;;  %v10725_v47 = vpack.c.bf16 %v3319_v11, %v3317_v41  ;;  %v12864_v2 = vld [vmem:[#allocation38_spill] sm:$0xff] }
 0x5ba   :  { %12860 = vst [vmem:[#allocation30_spill] sm:$0xff] %v10725_v47  ;;  %4247 = vmatmul.bf16.gmra.mxu3 %v10725_v47  ;;  %v10728_v53 = vpack.c.bf16 %v5174_v24, %v5172_v58 }
 0x5bb   :  { %v2690_v12 = vpop.f32.mrf.mxu0  ;;  %v3019_v3 = vpop.f32.mrf.mxu1 }
 0x5bc   :  { %12861 = vst [vmem:[#allocation31_spill] sm:$0xff] %v10728_v53  ;;  %v3879_v52 = vpop.f32.mrf.mxu2  ;;  %v3020_v29 = vadd.f32 %v3019_v3, %v2690_v12 }
 0x5bd   :  { %v4208_v23 = vpop.f32.mrf.mxu3 }
 0x5be   :  { %v4209_v51 = vadd.f32 %v4208_v23, %v3879_v52  ;;  %2729 = vmatmul.bf16.gmra.mxu0 %v12862_v22  ;;  %3058 = vmatmul.bf16.gmra.mxu1 %v12863_v8  ;;  %v3321_v41 = vmax.f32 %v3020_v29, 0.0  ;;  %v12868_v29 = vld [vmem:[#allocation37_spill] sm:$0xff] }
 0x5c0   :  { %v5176_v58 = vmax.f32 %v4209_v51, 0.0 }
 0x5c3   :  { %v2692_v9 = vpop.f32.mrf.mxu0  ;;  %v3021_v30 = vpop.f32.mrf.mxu1 }
 0x5c4   :  { %v3022_v46 = vadd.f32 %v3021_v30, %v2692_v9  ;;  %v3881_v39 = vpop.f32.mrf.mxu2  ;;  %v12867_v9 = vld [vmem:[#allocation36_spill] sm:$0xff] }
 0x5c5   :  { %v4210_v0 = vpop.f32.mrf.mxu3 }
 0x5c6   :  { %v3323_v11 = vmax.f32 %v3022_v46, 0.0  ;;  %v4211_v47 = vadd.f32 %v4210_v0, %v3881_v39 }
 0x5c8   :  { %v5178_v24 = vmax.f32 %v4211_v47, 0.0  ;;  %3923 = vmatmul.bf16.gmra.mxu2 %v12864_v2  ;;  %v10733_v53 = vpack.c.bf16 %v3323_v11, %v3321_v41  ;;  %v12869_v2 = vld [vmem:[#allocation41_spill] sm:$0xff] }
 0x5ca   :  { %12865 = vst [vmem:[#allocation33_spill] sm:$0xff] %v10733_v53  ;;  %4252 = vmatmul.bf16.gmra.mxu3 %v10733_v53  ;;  %v10736_v52 = vpack.c.bf16 %v5178_v24, %v5176_v58 }
 0x5cb   :  { %v2695_v23 = vpop.f32.mrf.mxu0  ;;  %v3024_v12 = vpop.f32.mrf.mxu1 }
 0x5cc   :  { %12866 = vst [vmem:[#allocation34_spill] sm:$0xff] %v10736_v52  ;;  %v3884_v3 = vpop.f32.mrf.mxu2  ;;  %v3025_v30 = vadd.f32 %v3024_v12, %v2695_v23 }
 0x5cd   :  { %v4213_v22 = vpop.f32.mrf.mxu3 }
 0x5ce   :  { %v4214_v8 = vadd.f32 %v4213_v22, %v3884_v3  ;;  %2734 = vmatmul.bf16.gmra.mxu0 %v12867_v9  ;;  %3063 = vmatmul.bf16.gmra.mxu1 %v12868_v29  ;;  %v3325_v41 = vmax.f32 %v3025_v30, 0.0  ;;  %v12873_v30 = vld [vmem:[#allocation40_spill] sm:$0xff] }
 0x5d0   :  { %v5180_v58 = vmax.f32 %v4214_v8, 0.0 }
 0x5d3   :  { %v2697_v51 = vpop.f32.mrf.mxu0  ;;  %v3026_v47 = vpop.f32.mrf.mxu1 }
 0x5d4   :  { %v3027_v46 = vadd.f32 %v3026_v47, %v2697_v51  ;;  %v3886_v39 = vpop.f32.mrf.mxu2  ;;  %v12872_v51 = vld [vmem:[#allocation39_spill] sm:$0xff] }
 0x5d5   :  { %v4215_v0 = vpop.f32.mrf.mxu3 }
 0x5d6   :  { %v3327_v11 = vmax.f32 %v3027_v46, 0.0  ;;  %v4216_v53 = vadd.f32 %v4215_v0, %v3886_v39 }
 0x5d8   :  { %v5182_v24 = vmax.f32 %v4216_v53, 0.0  ;;  %3928 = vmatmul.bf16.gmra.mxu2 %v12869_v2  ;;  %v10741_v52 = vpack.c.bf16 %v3327_v11, %v3325_v41  ;;  %v12874_v2 = vld [vmem:[#allocation44_spill] sm:$0xff] }
 0x5da   :  { %12870 = vst [vmem:[#allocation36_spill] sm:$0xff] %v10741_v52  ;;  %4257 = vmatmul.bf16.gmra.mxu3 %v10741_v52  ;;  %v10744_v3 = vpack.c.bf16 %v5182_v24, %v5180_v58 }
 0x5db   :  { %v2700_v22 = vpop.f32.mrf.mxu0  ;;  %v3029_v23 = vpop.f32.mrf.mxu1 }
 0x5dc   :  { %12871 = vst [vmem:[#allocation37_spill] sm:$0xff] %v10744_v3  ;;  %v3889_v12 = vpop.f32.mrf.mxu2  ;;  %v3030_v47 = vadd.f32 %v3029_v23, %v2700_v22 }
 0x5dd   :  { %v4218_v9 = vpop.f32.mrf.mxu3 }
 0x5de   :  { %v4219_v29 = vadd.f32 %v4218_v9, %v3889_v12  ;;  %2739 = vmatmul.bf16.gmra.mxu0 %v12872_v51  ;;  %3068 = vmatmul.bf16.gmra.mxu1 %v12873_v30  ;;  %v3329_v41 = vmax.f32 %v3030_v47, 0.0  ;;  %v12878_v47 = vld [vmem:[#allocation43_spill] sm:$0xff] }
 0x5e0   :  { %v5184_v58 = vmax.f32 %v4219_v29, 0.0  ;;  %v8871_v29 = vld [vmem:[%s12407_s3 + $0x38] sm:$0xf0] }
 0x5e3   :  { %v2702_v8 = vpop.f32.mrf.mxu0  ;;  %v3031_v53 = vpop.f32.mrf.mxu1 }
 0x5e4   :  { %v3032_v46 = vadd.f32 %v3031_v53, %v2702_v8  ;;  %v3891_v39 = vpop.f32.mrf.mxu2  ;;  %v12877_v8 = vld [vmem:[#allocation42_spill] sm:$0xff] }
 0x5e5   :  { %v4220_v0 = vpop.f32.mrf.mxu3 }
 0x5e6   :  { %v3331_v11 = vmax.f32 %v3032_v46, 0.0  ;;  %v4221_v52 = vadd.f32 %v4220_v0, %v3891_v39  ;;  %v9281_v46 = vld [vmem:[%s12407_s3 + $0xb4] sm:$0xf]  ;;  %v8935_v39 = vld [vmem:[%s12407_s3 + $0xb8] sm:$0xf0] }
 0x5e8   :  { %v5186_v24 = vmax.f32 %v4221_v52, 0.0  ;;  %3933 = vmatmul.bf16.gmra.mxu2 %v12874_v2  ;;  %v10749_v3 = vpack.c.bf16 %v3331_v11, %v3329_v41  ;;  %v9265_v52 = vld [vmem:[%s12407_s3 + $0x34] sm:$0xf]  ;;  %v8938_v41 = vor.u32 %v9281_v46, %v8935_v39  ;;  %v9069_v46 = vld [vmem:[#allocation2 + $0xc0] sm:$0xf] }
 0x5e9   :  { %v8874_v53 = vor.u32 %v9265_v52, %v8871_v29  ;;  %v12879_v2 = vld [vmem:[#allocation47_spill] sm:$0xff] }
 0x5ea   :  { %12875 = vst [vmem:[#allocation39_spill] sm:$0xff] %v10749_v3  ;;  %4262 = vmatmul.bf16.gmra.mxu3 %v10749_v3  ;;  %v10752_v12 = vpack.c.bf16 %v5186_v24, %v5184_v58  ;;  %4811 = vmatpush.bf16.msra.mxu1 %v8938_v41 }
 0x5eb   :  { %v2705_v9 = vpop.f32.mrf.mxu0  ;;  %v3034_v22 = vpop.f32.mrf.mxu1  ;;  %4482 = vmatpush.bf16.msra.mxu0 %v8874_v53 }
 0x5ec   :  { %12876 = vst [vmem:[#allocation40_spill] sm:$0xff] %v10752_v12  ;;  %v3894_v23 = vpop.f32.mrf.mxu2  ;;  %v3035_v0 = vadd.f32 %v3034_v22, %v2705_v9  ;;  %v9005_v9 = vld [vmem:[#allocation2 + $0x40] sm:$0xf]  ;;  %v9300_v22 = vld [vmem:[#allocation2 + $0x44] sm:$0xf0] }
 0x5ed   :  { %v4223_v51 = vpop.f32.mrf.mxu3  ;;  %v9006_v41 = vor.u32 %v9300_v22, %v9005_v9 }
 0x5ee   :  { %v4224_v30 = vadd.f32 %v4223_v51, %v3894_v23  ;;  %2744 = vmatmul.bf16.gmra.mxu0 %v12877_v8  ;;  %3073 = vmatmul.bf16.gmra.mxu1 %v12878_v47  ;;  %v3333_v8 = vmax.f32 %v3035_v0, 0.0 }
 0x5ef   :  { %5715 = vmatpush.bf16.msra.mxu2 %v9006_v41 }
 0x5f0   :  { %v5188_v29 = vmax.f32 %v4224_v30, 0.0 }
 0x5f3   :  { %v2707_v11 = vpop.f32.mrf.mxu0  ;;  %v3036_v58 = vpop.f32.mrf.mxu1 }
 0x5f4   :  { %v3037_v24 = vadd.f32 %v3036_v58, %v2707_v11  ;;  %v3896_v23 = vpop.f32.mrf.mxu2  ;;  %v9316_v58 = vld [vmem:[#allocation2 + $0xc4] sm:$0xf0] }
 0x5f5   :  { %v4225_v51 = vpop.f32.mrf.mxu3 }
 0x5f6   :  { %v3335_v47 = vmax.f32 %v3037_v24, 0.0  ;;  %v4226_v52 = vadd.f32 %v4225_v51, %v3896_v23  ;;  %v9070_v24 = vor.u32 %v9316_v58, %v9069_v46  ;;  %v12882_v51 = vld [vmem:[#allocation45_spill] sm:$0xff]  ;;  %v12884_v46 = vld [vmem:[#allocation50_spill] sm:$0xff] }
 0x5f8   :  { %v5190_v3 = vmax.f32 %v4226_v52, 0.0  ;;  %3938 = vmatmul.bf16.gmra.mxu2 %v12879_v2  ;;  %v10769_v12 = vpack.c.bf16 %v3335_v47, %v3333_v8  ;;  %v12883_v8 = vld [vmem:[#allocation46_spill] sm:$0xff]  ;;  %6044 = vmatpush.bf16.msra.mxu3 %v9070_v24 }
 0x5fa   :  { %12880 = vst [vmem:[#allocation42_spill] sm:$0xff] %v10769_v12  ;;  %4267 = vmatmul.bf16.gmra.mxu3 %v10769_v12  ;;  %v10772_v39 = vpack.c.bf16 %v5190_v3, %v5188_v29 }
 0x5fb   :  { %v2710_v53 = vpop.f32.mrf.mxu0  ;;  %v3039_v11 = vpop.f32.mrf.mxu1 }
 0x5fc   :  { %12881 = vst [vmem:[#allocation43_spill] sm:$0xff] %v10772_v39  ;;  %v3899_v0 = vpop.f32.mrf.mxu2  ;;  %v3040_v47 = vadd.f32 %v3039_v11, %v2710_v53 }
 0x5fd   :  { %v4228_v23 = vpop.f32.mrf.mxu3 }
 0x5fe   :  { %v4229_v30 = vadd.f32 %v4228_v23, %v3899_v0  ;;  %2749 = vmatmul.bf16.gmra.mxu0 %v12882_v51  ;;  %3078 = vmatmul.bf16.gmra.mxu1 %v12883_v8  ;;  %v3337_v39 = vmax.f32 %v3040_v47, 0.0  ;;  %v12887_v23 = vld [vmem:[#allocation48_spill] sm:$0xff]  ;;  %v12888_v51 = vld [vmem:[#allocation49_spill] sm:$0xff] }
 0x600   :  { %v5192_v22 = vmax.f32 %v4229_v30, 0.0 }
 0x603   :  { %v2712_v52 = vpop.f32.mrf.mxu0  ;;  %v3041_v12 = vpop.f32.mrf.mxu1 }
 0x604   :  { %v3042_v2 = vadd.f32 %v3041_v12, %v2712_v52  ;;  %v3901_v3 = vpop.f32.mrf.mxu2 }
 0x605   :  { %v4230_v29 = vpop.f32.mrf.mxu3 }
 0x606   :  { %v3339_v56 = vmax.f32 %v3042_v2, 0.0  ;;  %v4231_v9 = vadd.f32 %v4230_v29, %v3901_v3 }
 0x608   :  { %v5194_v15 = vmax.f32 %v4231_v9, 0.0  ;;  %3943 = vmatmul.bf16.gmra.mxu2 %v12884_v46  ;;  %v10777_v41 = vpack.c.bf16 %v3339_v56, %v3337_v39 }
 0x60a   :  { %12885 = vst [vmem:[#allocation45_spill] sm:$0xff] %v10777_v41  ;;  %4272 = vmatmul.bf16.gmra.mxu3 %v10777_v41  ;;  %v10780_v58 = vpack.c.bf16 %v5194_v15, %v5192_v22  ;;  %v12889_v22 = vld [vmem:[#allocation53_spill] sm:$0xff] }
 0x60b   :  { %v2715_v0 = vpop.f32.mrf.mxu0  ;;  %v3044_v53 = vpop.f32.mrf.mxu1 }
 0x60c   :  { %12886 = vst [vmem:[#allocation46_spill] sm:$0xff] %v10780_v58  ;;  %v3904_v11 = vpop.f32.mrf.mxu2  ;;  %v3045_v2 = vadd.f32 %v3044_v53, %v2715_v0 }
 0x60d   :  { %v4233_v24 = vpop.f32.mrf.mxu3 }
 0x60e   :  { %v4234_v12 = vadd.f32 %v4233_v24, %v3904_v11  ;;  %2754 = vmatmul.bf16.gmra.mxu0 %v12887_v23  ;;  %3083 = vmatmul.bf16.gmra.mxu1 %v12888_v51  ;;  %v3341_v39 = vmax.f32 %v3045_v2, 0.0  ;;  %v12893_v2 = vld [vmem:[#allocation52_spill] sm:$0xff] }
 0x610   :  { %v5196_v15 = vmax.f32 %v4234_v12, 0.0 }
 0x613   :  { %v2717_v30 = vpop.f32.mrf.mxu0  ;;  %v3046_v8 = vpop.f32.mrf.mxu1 }
 0x614   :  { %v3047_v47 = vadd.f32 %v3046_v8, %v2717_v30  ;;  %v3906_v52 = vpop.f32.mrf.mxu2  ;;  %v12892_v30 = vld [vmem:[#allocation51_spill] sm:$0xff] }
 0x615   :  { %v4235_v56 = vpop.f32.mrf.mxu3 }
 0x616   :  { %v3343_v3 = vmax.f32 %v3047_v47, 0.0  ;;  %v4236_v29 = vadd.f32 %v4235_v56, %v3906_v52 }
 0x618   :  { %v5198_v9 = vmax.f32 %v4236_v29, 0.0  ;;  %3948 = vmatmul.bf16.gmra.mxu2 %v12889_v22  ;;  %v10785_v41 = vpack.c.bf16 %v3343_v3, %v3341_v39  ;;  %v12894_v22 = vld [vmem:[#allocation56_spill] sm:$0xff] }
 0x61a   :  { %12890 = vst [vmem:[#allocation48_spill] sm:$0xff] %v10785_v41  ;;  %4277 = vmatmul.bf16.gmra.mxu3 %v10785_v41  ;;  %v10788_v11 = vpack.c.bf16 %v5198_v9, %v5196_v15 }
 0x61b   :  { %v2720_v24 = vpop.f32.mrf.mxu0  ;;  %v3049_v0 = vpop.f32.mrf.mxu1 }
 0x61c   :  { %12891 = vst [vmem:[#allocation49_spill] sm:$0xff] %v10788_v11  ;;  %v3909_v53 = vpop.f32.mrf.mxu2  ;;  %v3050_v8 = vadd.f32 %v3049_v0, %v2720_v24 }
 0x61d   :  { %v4238_v23 = vpop.f32.mrf.mxu3 }
 0x61e   :  { %v4239_v51 = vadd.f32 %v4238_v23, %v3909_v53  ;;  %2759 = vmatmul.bf16.gmra.mxu0 %v12892_v30  ;;  %3088 = vmatmul.bf16.gmra.mxu1 %v12893_v2  ;;  %v3345_v3 = vmax.f32 %v3050_v8, 0.0  ;;  %v12898_v8 = vld [vmem:[#allocation55_spill] sm:$0xff] }
 0x620   :  { %v5200_v15 = vmax.f32 %v4239_v51, 0.0 }
 0x623   :  { %v2722_v12 = vpop.f32.mrf.mxu0  ;;  %v3051_v47 = vpop.f32.mrf.mxu1 }
 0x624   :  { %v3052_v52 = vadd.f32 %v3051_v47, %v2722_v12  ;;  %v3911_v56 = vpop.f32.mrf.mxu2  ;;  %v12897_v12 = vld [vmem:[#allocation54_spill] sm:$0xff] }
 0x625   :  { %v4240_v39 = vpop.f32.mrf.mxu3 }
 0x626   :  { %v3347_v29 = vmax.f32 %v3052_v52, 0.0  ;;  %v4241_v41 = vadd.f32 %v4240_v39, %v3911_v56 }
 0x628   :  { %v5202_v9 = vmax.f32 %v4241_v41, 0.0  ;;  %3953 = vmatmul.bf16.gmra.mxu2 %v12894_v22  ;;  %v10793_v11 = vpack.c.bf16 %v3347_v29, %v3345_v3  ;;  %v12899_v22 = vld [vmem:[#allocation59_spill] sm:$0xff] }
 0x62a   :  { %12895 = vst [vmem:[#allocation51_spill] sm:$0xff] %v10793_v11  ;;  %4282 = vmatmul.bf16.gmra.mxu3 %v10793_v11  ;;  %v10796_v53 = vpack.c.bf16 %v5202_v9, %v5200_v15 }
 0x62b   :  { %v2725_v23 = vpop.f32.mrf.mxu0  ;;  %v3054_v24 = vpop.f32.mrf.mxu1 }
 0x62c   :  { %12896 = vst [vmem:[#allocation52_spill] sm:$0xff] %v10796_v53  ;;  %v3914_v0 = vpop.f32.mrf.mxu2  ;;  %v3055_v47 = vadd.f32 %v3054_v24, %v2725_v23 }
 0x62d   :  { %v4243_v30 = vpop.f32.mrf.mxu3 }
 0x62e   :  { %v4244_v2 = vadd.f32 %v4243_v30, %v3914_v0  ;;  %2764 = vmatmul.bf16.gmra.mxu0 %v12897_v12  ;;  %3093 = vmatmul.bf16.gmra.mxu1 %v12898_v8  ;;  %v3349_v3 = vmax.f32 %v3055_v47, 0.0  ;;  %v12903_v47 = vld [vmem:[#allocation58_spill] sm:$0xff] }
 0x630   :  { %v5204_v15 = vmax.f32 %v4244_v2, 0.0 }
 0x633   :  { %v2727_v51 = vpop.f32.mrf.mxu0  ;;  %v3056_v41 = vpop.f32.mrf.mxu1 }
 0x634   :  { %v3057_v52 = vadd.f32 %v3056_v41, %v2727_v51  ;;  %v3916_v56 = vpop.f32.mrf.mxu2  ;;  %v12902_v51 = vld [vmem:[#allocation57_spill] sm:$0xff] }
 0x635   :  { %v4245_v39 = vpop.f32.mrf.mxu3 }
 0x636   :  { %v3351_v29 = vmax.f32 %v3057_v52, 0.0  ;;  %v4246_v11 = vadd.f32 %v4245_v39, %v3916_v56 }
 0x638   :  { %v5206_v9 = vmax.f32 %v4246_v11, 0.0  ;;  %3958 = vmatmul.bf16.gmra.mxu2 %v12899_v22  ;;  %v10801_v53 = vpack.c.bf16 %v3351_v29, %v3349_v3  ;;  %v12904_v22 = vld [vmem:[#allocation62_spill] sm:$0xff] }
 0x63a   :  { %12900 = vst [vmem:[#allocation54_spill] sm:$0xff] %v10801_v53  ;;  %4287 = vmatmul.bf16.gmra.mxu3 %v10801_v53  ;;  %v10804_v0 = vpack.c.bf16 %v5206_v9, %v5204_v15 }
 0x63b   :  { %v2730_v30 = vpop.f32.mrf.mxu0  ;;  %v3059_v23 = vpop.f32.mrf.mxu1 }
 0x63c   :  { %12901 = vst [vmem:[#allocation55_spill] sm:$0xff] %v10804_v0  ;;  %v3919_v24 = vpop.f32.mrf.mxu2  ;;  %v3060_v41 = vadd.f32 %v3059_v23, %v2730_v30 }
 0x63d   :  { %v4248_v12 = vpop.f32.mrf.mxu3 }
 0x63e   :  { %v4249_v8 = vadd.f32 %v4248_v12, %v3919_v24  ;;  %2769 = vmatmul.bf16.gmra.mxu0 %v12902_v51  ;;  %3098 = vmatmul.bf16.gmra.mxu1 %v12903_v47  ;;  %v3353_v3 = vmax.f32 %v3060_v41, 0.0  ;;  %v12908_v41 = vld [vmem:[#allocation61_spill] sm:$0xff] }
 0x640   :  { %v5208_v15 = vmax.f32 %v4249_v8, 0.0 }
 0x643   :  { %v2732_v2 = vpop.f32.mrf.mxu0  ;;  %v3061_v11 = vpop.f32.mrf.mxu1 }
 0x644   :  { %v3062_v52 = vadd.f32 %v3061_v11, %v2732_v2  ;;  %v3921_v56 = vpop.f32.mrf.mxu2  ;;  %v12907_v2 = vld [vmem:[#allocation60_spill] sm:$0xff] }
 0x645   :  { %v4250_v39 = vpop.f32.mrf.mxu3 }
 0x646   :  { %v3355_v29 = vmax.f32 %v3062_v52, 0.0  ;;  %v4251_v53 = vadd.f32 %v4250_v39, %v3921_v56 }
 0x648   :  { %v5210_v9 = vmax.f32 %v4251_v53, 0.0  ;;  %3963 = vmatmul.bf16.gmra.mxu2 %v12904_v22  ;;  %v10809_v0 = vpack.c.bf16 %v3355_v29, %v3353_v3  ;;  %v12909_v22 = vld [vmem:[#allocation65_spill] sm:$0xff] }
 0x64a   :  { %12905 = vst [vmem:[#allocation57_spill] sm:$0xff] %v10809_v0  ;;  %4292 = vmatmul.bf16.gmra.mxu3 %v10809_v0  ;;  %v10812_v24 = vpack.c.bf16 %v5210_v9, %v5208_v15 }
 0x64b   :  { %v2735_v12 = vpop.f32.mrf.mxu0  ;;  %v3064_v30 = vpop.f32.mrf.mxu1 }
 0x64c   :  { %12906 = vst [vmem:[#allocation58_spill] sm:$0xff] %v10812_v24  ;;  %v3924_v23 = vpop.f32.mrf.mxu2  ;;  %v3065_v11 = vadd.f32 %v3064_v30, %v2735_v12 }
 0x64d   :  { %v4253_v51 = vpop.f32.mrf.mxu3 }
 0x64e   :  { %v4254_v47 = vadd.f32 %v4253_v51, %v3924_v23  ;;  %2774 = vmatmul.bf16.gmra.mxu0 %v12907_v2  ;;  %3103 = vmatmul.bf16.gmra.mxu1 %v12908_v41  ;;  %v3357_v3 = vmax.f32 %v3065_v11, 0.0  ;;  %v12913_v11 = vld [vmem:[#allocation64_spill] sm:$0xff] }
 0x650   :  { %v5212_v15 = vmax.f32 %v4254_v47, 0.0 }
 0x653   :  { %v2737_v8 = vpop.f32.mrf.mxu0  ;;  %v3066_v53 = vpop.f32.mrf.mxu1 }
 0x654   :  { %v3067_v52 = vadd.f32 %v3066_v53, %v2737_v8  ;;  %v3926_v56 = vpop.f32.mrf.mxu2  ;;  %v12912_v8 = vld [vmem:[#allocation63_spill] sm:$0xff] }
 0x655   :  { %v4255_v39 = vpop.f32.mrf.mxu3 }
 0x656   :  { %v3359_v29 = vmax.f32 %v3067_v52, 0.0  ;;  %v4256_v0 = vadd.f32 %v4255_v39, %v3926_v56 }
 0x658   :  { %v5214_v9 = vmax.f32 %v4256_v0, 0.0  ;;  %3968 = vmatmul.bf16.gmra.mxu2 %v12909_v22  ;;  %v10817_v24 = vpack.c.bf16 %v3359_v29, %v3357_v3  ;;  %v12914_v22 = vld [vmem:[#allocation68_spill] sm:$0xff] }
 0x65a   :  { %12910 = vst [vmem:[#allocation60_spill] sm:$0xff] %v10817_v24  ;;  %4297 = vmatmul.bf16.gmra.mxu3 %v10817_v24  ;;  %v10820_v23 = vpack.c.bf16 %v5214_v9, %v5212_v15 }
 0x65b   :  { %v2740_v51 = vpop.f32.mrf.mxu0  ;;  %v3069_v12 = vpop.f32.mrf.mxu1 }
 0x65c   :  { %12911 = vst [vmem:[#allocation61_spill] sm:$0xff] %v10820_v23  ;;  %v3929_v30 = vpop.f32.mrf.mxu2  ;;  %v3070_v53 = vadd.f32 %v3069_v12, %v2740_v51 }
 0x65d   :  { %v4258_v2 = vpop.f32.mrf.mxu3 }
 0x65e   :  { %v4259_v41 = vadd.f32 %v4258_v2, %v3929_v30  ;;  %2779 = vmatmul.bf16.gmra.mxu0 %v12912_v8  ;;  %3108 = vmatmul.bf16.gmra.mxu1 %v12913_v11  ;;  %v3361_v3 = vmax.f32 %v3070_v53, 0.0  ;;  %v12918_v53 = vld [vmem:[#allocation67_spill] sm:$0xff] }
 0x660   :  { %v5216_v15 = vmax.f32 %v4259_v41, 0.0  ;;  %v8863_v41 = vld [vmem:[%s12407_s3 + $0x28] sm:$0xf0] }
 0x663   :  { %v2742_v47 = vpop.f32.mrf.mxu0  ;;  %v3071_v0 = vpop.f32.mrf.mxu1 }
 0x664   :  { %v3072_v52 = vadd.f32 %v3071_v0, %v2742_v47  ;;  %v3931_v56 = vpop.f32.mrf.mxu2  ;;  %v12917_v47 = vld [vmem:[#allocation66_spill] sm:$0xff] }
 0x665   :  { %v4260_v39 = vpop.f32.mrf.mxu3 }
 0x666   :  { %v3363_v29 = vmax.f32 %v3072_v52, 0.0  ;;  %v4261_v24 = vadd.f32 %v4260_v39, %v3931_v56  ;;  %v9279_v52 = vld [vmem:[%s12407_s3 + $0xa4] sm:$0xf]  ;;  %v8927_v56 = vld [vmem:[%s12407_s3 + $0xa8] sm:$0xf0] }
 0x668   :  { %v5218_v9 = vmax.f32 %v4261_v24, 0.0  ;;  %3973 = vmatmul.bf16.gmra.mxu2 %v12914_v22  ;;  %v10825_v23 = vpack.c.bf16 %v3363_v29, %v3361_v3  ;;  %v9263_v24 = vld [vmem:[%s12407_s3 + $0x24] sm:$0xf]  ;;  %v8930_v3 = vor.u32 %v9279_v52, %v8927_v56  ;;  %v12919_v22 = vld [vmem:[#allocation71_spill] sm:$0xff] }
 0x669   :  { %v8866_v0 = vor.u32 %v9263_v24, %v8863_v41  ;;  %v9061_v52 = vld [vmem:[#allocation2 + $0xb0] sm:$0xf] }
 0x66a   :  { %12915 = vst [vmem:[#allocation63_spill] sm:$0xff] %v10825_v23  ;;  %4302 = vmatmul.bf16.gmra.mxu3 %v10825_v23  ;;  %v10828_v30 = vpack.c.bf16 %v5218_v9, %v5216_v15  ;;  %4812 = vmatpush.bf16.msra.mxu1 %v8930_v3 }
 0x66b   :  { %v2745_v2 = vpop.f32.mrf.mxu0  ;;  %v3074_v51 = vpop.f32.mrf.mxu1  ;;  %4483 = vmatpush.bf16.msra.mxu0 %v8866_v0 }
 0x66c   :  { %12916 = vst [vmem:[#allocation64_spill] sm:$0xff] %v10828_v30  ;;  %v3934_v12 = vpop.f32.mrf.mxu2  ;;  %v3075_v39 = vadd.f32 %v3074_v51, %v2745_v2  ;;  %v8997_v2 = vld [vmem:[#allocation2 + $0x30] sm:$0xf]  ;;  %v9298_v51 = vld [vmem:[#allocation2 + $0x34] sm:$0xf0] }
 0x66d   :  { %v4263_v8 = vpop.f32.mrf.mxu3  ;;  %v8998_v3 = vor.u32 %v9298_v51, %v8997_v2 }
 0x66e   :  { %v4264_v11 = vadd.f32 %v4263_v8, %v3934_v12  ;;  %2784 = vmatmul.bf16.gmra.mxu0 %v12917_v47  ;;  %3113 = vmatmul.bf16.gmra.mxu1 %v12918_v53  ;;  %v3365_v47 = vmax.f32 %v3075_v39, 0.0 }
 0x66f   :  { %5716 = vmatpush.bf16.msra.mxu2 %v8998_v3 }
 0x670   :  { %v5220_v41 = vmax.f32 %v4264_v11, 0.0 }
 0x673   :  { %v2747_v29 = vpop.f32.mrf.mxu0  ;;  %v3076_v15 = vpop.f32.mrf.mxu1 }
 0x674   :  { %v3077_v9 = vadd.f32 %v3076_v15, %v2747_v29  ;;  %v3936_v12 = vpop.f32.mrf.mxu2  ;;  %v9314_v15 = vld [vmem:[#allocation2 + $0xb4] sm:$0xf0] }
 0x675   :  { %v4265_v8 = vpop.f32.mrf.mxu3 }
 0x676   :  { %v3367_v53 = vmax.f32 %v3077_v9, 0.0  ;;  %v4266_v24 = vadd.f32 %v4265_v8, %v3936_v12  ;;  %v9062_v9 = vor.u32 %v9314_v15, %v9061_v52  ;;  %v12922_v8 = vld [vmem:[#allocation69_spill] sm:$0xff]  ;;  %v12924_v52 = vld [vmem:[#allocation74_spill] sm:$0xff] }
 0x678   :  { %v5222_v23 = vmax.f32 %v4266_v24, 0.0  ;;  %3978 = vmatmul.bf16.gmra.mxu2 %v12919_v22  ;;  %v10845_v30 = vpack.c.bf16 %v3367_v53, %v3365_v47  ;;  %v12923_v47 = vld [vmem:[#allocation70_spill] sm:$0xff]  ;;  %6045 = vmatpush.bf16.msra.mxu3 %v9062_v9 }
 0x67a   :  { %12920 = vst [vmem:[#allocation66_spill] sm:$0xff] %v10845_v30  ;;  %4307 = vmatmul.bf16.gmra.mxu3 %v10845_v30  ;;  %v10848_v56 = vpack.c.bf16 %v5222_v23, %v5220_v41 }
 0x67b   :  { %v2750_v0 = vpop.f32.mrf.mxu0  ;;  %v3079_v29 = vpop.f32.mrf.mxu1 }
 0x67c   :  { %12921 = vst [vmem:[#allocation67_spill] sm:$0xff] %v10848_v56  ;;  %v3939_v39 = vpop.f32.mrf.mxu2  ;;  %v3080_v53 = vadd.f32 %v3079_v29, %v2750_v0 }
 0x67d   :  { %v4268_v12 = vpop.f32.mrf.mxu3 }
 0x67e   :  { %v4269_v11 = vadd.f32 %v4268_v12, %v3939_v39  ;;  %2789 = vmatmul.bf16.gmra.mxu0 %v12922_v8  ;;  %3118 = vmatmul.bf16.gmra.mxu1 %v12923_v47  ;;  %v3369_v56 = vmax.f32 %v3080_v53, 0.0  ;;  %v12927_v12 = vld [vmem:[#allocation72_spill] sm:$0xff]  ;;  %v12928_v8 = vld [vmem:[#allocation73_spill] sm:$0xff] }
 0x680   :  { %v5224_v51 = vmax.f32 %v4269_v11, 0.0 }
 0x683   :  { %v2752_v24 = vpop.f32.mrf.mxu0  ;;  %v3081_v30 = vpop.f32.mrf.mxu1 }
 0x684   :  { %v3082_v22 = vadd.f32 %v3081_v30, %v2752_v24  ;;  %v3941_v23 = vpop.f32.mrf.mxu2 }
 0x685   :  { %v4270_v41 = vpop.f32.mrf.mxu3 }
 0x686   :  { %v3371_v46 = vmax.f32 %v3082_v22, 0.0  ;;  %v4271_v2 = vadd.f32 %v4270_v41, %v3941_v23 }
 0x688   :  { %v5226_v58 = vmax.f32 %v4271_v2, 0.0  ;;  %3983 = vmatmul.bf16.gmra.mxu2 %v12924_v52  ;;  %v10853_v3 = vpack.c.bf16 %v3371_v46, %v3369_v56 }
 0x68a   :  { %12925 = vst [vmem:[#allocation69_spill] sm:$0xff] %v10853_v3  ;;  %4312 = vmatmul.bf16.gmra.mxu3 %v10853_v3  ;;  %v10856_v15 = vpack.c.bf16 %v5226_v58, %v5224_v51  ;;  %v12929_v51 = vld [vmem:[#allocation77_spill] sm:$0xff] }
 0x68b   :  { %v2755_v39 = vpop.f32.mrf.mxu0  ;;  %v3084_v0 = vpop.f32.mrf.mxu1 }
 0x68c   :  { %12926 = vst [vmem:[#allocation70_spill] sm:$0xff] %v10856_v15  ;;  %v3944_v29 = vpop.f32.mrf.mxu2  ;;  %v3085_v22 = vadd.f32 %v3084_v0, %v2755_v39 }
 0x68d   :  { %v4273_v9 = vpop.f32.mrf.mxu3 }
 0x68e   :  { %v4274_v30 = vadd.f32 %v4273_v9, %v3944_v29  ;;  %2794 = vmatmul.bf16.gmra.mxu0 %v12927_v12  ;;  %3123 = vmatmul.bf16.gmra.mxu1 %v12928_v8  ;;  %v3373_v56 = vmax.f32 %v3085_v22, 0.0  ;;  %v12933_v22 = vld [vmem:[#allocation76_spill] sm:$0xff] }
 0x690   :  { %v5228_v58 = vmax.f32 %v4274_v30, 0.0 }
 0x693   :  { %v2757_v11 = vpop.f32.mrf.mxu0  ;;  %v3086_v47 = vpop.f32.mrf.mxu1 }
 0x694   :  { %v3087_v53 = vadd.f32 %v3086_v47, %v2757_v11  ;;  %v3946_v24 = vpop.f32.mrf.mxu2  ;;  %v12932_v11 = vld [vmem:[#allocation75_spill] sm:$0xff] }
 0x695   :  { %v4275_v46 = vpop.f32.mrf.mxu3 }
 0x696   :  { %v3375_v23 = vmax.f32 %v3087_v53, 0.0  ;;  %v4276_v41 = vadd.f32 %v4275_v46, %v3946_v24 }
 0x698   :  { %v5230_v2 = vmax.f32 %v4276_v41, 0.0  ;;  %3988 = vmatmul.bf16.gmra.mxu2 %v12929_v51  ;;  %v10861_v3 = vpack.c.bf16 %v3375_v23, %v3373_v56  ;;  %v12934_v51 = vld [vmem:[#allocation80_spill] sm:$0xff] }
 0x69a   :  { %12930 = vst [vmem:[#allocation72_spill] sm:$0xff] %v10861_v3  ;;  %4317 = vmatmul.bf16.gmra.mxu3 %v10861_v3  ;;  %v10864_v29 = vpack.c.bf16 %v5230_v2, %v5228_v58 }
 0x69b   :  { %v2760_v9 = vpop.f32.mrf.mxu0  ;;  %v3089_v39 = vpop.f32.mrf.mxu1 }
 0x69c   :  { %12931 = vst [vmem:[#allocation73_spill] sm:$0xff] %v10864_v29  ;;  %v3949_v0 = vpop.f32.mrf.mxu2  ;;  %v3090_v47 = vadd.f32 %v3089_v39, %v2760_v9 }
 0x69d   :  { %v4278_v12 = vpop.f32.mrf.mxu3 }
 0x69e   :  { %v4279_v8 = vadd.f32 %v4278_v12, %v3949_v0  ;;  %2799 = vmatmul.bf16.gmra.mxu0 %v12932_v11  ;;  %3128 = vmatmul.bf16.gmra.mxu1 %v12933_v22  ;;  %v3377_v23 = vmax.f32 %v3090_v47, 0.0  ;;  %v12938_v47 = vld [vmem:[#allocation79_spill] sm:$0xff] }
 0x6a0   :  { %v5232_v58 = vmax.f32 %v4279_v8, 0.0 }
 0x6a3   :  { %v2762_v30 = vpop.f32.mrf.mxu0  ;;  %v3091_v53 = vpop.f32.mrf.mxu1 }
 0x6a4   :  { %v3092_v24 = vadd.f32 %v3091_v53, %v2762_v30  ;;  %v3951_v46 = vpop.f32.mrf.mxu2  ;;  %v12937_v30 = vld [vmem:[#allocation78_spill] sm:$0xff] }
 0x6a5   :  { %v4280_v56 = vpop.f32.mrf.mxu3 }
 0x6a6   :  { %v3379_v41 = vmax.f32 %v3092_v24, 0.0  ;;  %v4281_v3 = vadd.f32 %v4280_v56, %v3951_v46 }
 0x6a8   :  { %v5234_v2 = vmax.f32 %v4281_v3, 0.0  ;;  %3993 = vmatmul.bf16.gmra.mxu2 %v12934_v51  ;;  %v10869_v29 = vpack.c.bf16 %v3379_v41, %v3377_v23  ;;  %v12939_v51 = vld [vmem:[#allocation83_spill] sm:$0xff] }
 0x6aa   :  { %12935 = vst [vmem:[#allocation75_spill] sm:$0xff] %v10869_v29  ;;  %4322 = vmatmul.bf16.gmra.mxu3 %v10869_v29  ;;  %v10872_v0 = vpack.c.bf16 %v5234_v2, %v5232_v58 }
 0x6ab   :  { %v2765_v12 = vpop.f32.mrf.mxu0  ;;  %v3094_v9 = vpop.f32.mrf.mxu1 }
 0x6ac   :  { %12936 = vst [vmem:[#allocation76_spill] sm:$0xff] %v10872_v0  ;;  %v3954_v39 = vpop.f32.mrf.mxu2  ;;  %v3095_v53 = vadd.f32 %v3094_v9, %v2765_v12 }
 0x6ad   :  { %v4283_v11 = vpop.f32.mrf.mxu3 }
 0x6ae   :  { %v4284_v22 = vadd.f32 %v4283_v11, %v3954_v39  ;;  %2804 = vmatmul.bf16.gmra.mxu0 %v12937_v30  ;;  %3133 = vmatmul.bf16.gmra.mxu1 %v12938_v47  ;;  %v3381_v23 = vmax.f32 %v3095_v53, 0.0  ;;  %v12943_v53 = vld [vmem:[#allocation82_spill] sm:$0xff] }
 0x6b0   :  { %v5236_v58 = vmax.f32 %v4284_v22, 0.0 }
 0x6b3   :  { %v2767_v8 = vpop.f32.mrf.mxu0  ;;  %v3096_v3 = vpop.f32.mrf.mxu1 }
 0x6b4   :  { %v3097_v24 = vadd.f32 %v3096_v3, %v2767_v8  ;;  %v3956_v46 = vpop.f32.mrf.mxu2  ;;  %v12942_v8 = vld [vmem:[#allocation81_spill] sm:$0xff] }
 0x6b5   :  { %v4285_v56 = vpop.f32.mrf.mxu3 }
 0x6b6   :  { %v3383_v41 = vmax.f32 %v3097_v24, 0.0  ;;  %v4286_v29 = vadd.f32 %v4285_v56, %v3956_v46 }
 0x6b8   :  { %v5238_v2 = vmax.f32 %v4286_v29, 0.0  ;;  %3998 = vmatmul.bf16.gmra.mxu2 %v12939_v51  ;;  %v10877_v0 = vpack.c.bf16 %v3383_v41, %v3381_v23  ;;  %v12944_v51 = vld [vmem:[#allocation86_spill] sm:$0xff] }
 0x6ba   :  { %12940 = vst [vmem:[#allocation78_spill] sm:$0xff] %v10877_v0  ;;  %4327 = vmatmul.bf16.gmra.mxu3 %v10877_v0  ;;  %v10880_v39 = vpack.c.bf16 %v5238_v2, %v5236_v58 }
 0x6bb   :  { %v2770_v11 = vpop.f32.mrf.mxu0  ;;  %v3099_v12 = vpop.f32.mrf.mxu1 }
 0x6bc   :  { %12941 = vst [vmem:[#allocation79_spill] sm:$0xff] %v10880_v39  ;;  %v3959_v9 = vpop.f32.mrf.mxu2  ;;  %v3100_v3 = vadd.f32 %v3099_v12, %v2770_v11 }
 0x6bd   :  { %v4288_v30 = vpop.f32.mrf.mxu3 }
 0x6be   :  { %v4289_v47 = vadd.f32 %v4288_v30, %v3959_v9  ;;  %2809 = vmatmul.bf16.gmra.mxu0 %v12942_v8  ;;  %3138 = vmatmul.bf16.gmra.mxu1 %v12943_v53  ;;  %v3385_v23 = vmax.f32 %v3100_v3, 0.0  ;;  %v12948_v3 = vld [vmem:[#allocation85_spill] sm:$0xff] }
 0x6c0   :  { %v5240_v58 = vmax.f32 %v4289_v47, 0.0 }
 0x6c3   :  { %v2772_v22 = vpop.f32.mrf.mxu0  ;;  %v3101_v29 = vpop.f32.mrf.mxu1 }
 0x6c4   :  { %v3102_v24 = vadd.f32 %v3101_v29, %v2772_v22  ;;  %v3961_v46 = vpop.f32.mrf.mxu2  ;;  %v12947_v22 = vld [vmem:[#allocation84_spill] sm:$0xff] }
 0x6c5   :  { %v4290_v56 = vpop.f32.mrf.mxu3 }
 0x6c6   :  { %v3387_v41 = vmax.f32 %v3102_v24, 0.0  ;;  %v4291_v0 = vadd.f32 %v4290_v56, %v3961_v46 }
 0x6c8   :  { %v5242_v2 = vmax.f32 %v4291_v0, 0.0  ;;  %4003 = vmatmul.bf16.gmra.mxu2 %v12944_v51  ;;  %v10885_v39 = vpack.c.bf16 %v3387_v41, %v3385_v23  ;;  %v12949_v51 = vld [vmem:[#allocation89_spill] sm:$0xff] }
 0x6ca   :  { %12945 = vst [vmem:[#allocation81_spill] sm:$0xff] %v10885_v39  ;;  %4332 = vmatmul.bf16.gmra.mxu3 %v10885_v39  ;;  %v10888_v9 = vpack.c.bf16 %v5242_v2, %v5240_v58 }
 0x6cb   :  { %v2775_v30 = vpop.f32.mrf.mxu0  ;;  %v3104_v11 = vpop.f32.mrf.mxu1 }
 0x6cc   :  { %12946 = vst [vmem:[#allocation82_spill] sm:$0xff] %v10888_v9  ;;  %v3964_v12 = vpop.f32.mrf.mxu2  ;;  %v3105_v29 = vadd.f32 %v3104_v11, %v2775_v30 }
 0x6cd   :  { %v4293_v8 = vpop.f32.mrf.mxu3 }
 0x6ce   :  { %v4294_v53 = vadd.f32 %v4293_v8, %v3964_v12  ;;  %2814 = vmatmul.bf16.gmra.mxu0 %v12947_v22  ;;  %3143 = vmatmul.bf16.gmra.mxu1 %v12948_v3  ;;  %v3389_v23 = vmax.f32 %v3105_v29, 0.0  ;;  %v12953_v29 = vld [vmem:[#allocation88_spill] sm:$0xff] }
 0x6d0   :  { %v5244_v58 = vmax.f32 %v4294_v53, 0.0 }
 0x6d3   :  { %v2777_v47 = vpop.f32.mrf.mxu0  ;;  %v3106_v0 = vpop.f32.mrf.mxu1 }
 0x6d4   :  { %v3107_v24 = vadd.f32 %v3106_v0, %v2777_v47  ;;  %v3966_v46 = vpop.f32.mrf.mxu2  ;;  %v12952_v47 = vld [vmem:[#allocation87_spill] sm:$0xff] }
 0x6d5   :  { %v4295_v56 = vpop.f32.mrf.mxu3 }
 0x6d6   :  { %v3391_v41 = vmax.f32 %v3107_v24, 0.0  ;;  %v4296_v39 = vadd.f32 %v4295_v56, %v3966_v46 }
 0x6d8   :  { %v5246_v2 = vmax.f32 %v4296_v39, 0.0  ;;  %4008 = vmatmul.bf16.gmra.mxu2 %v12949_v51  ;;  %v10893_v9 = vpack.c.bf16 %v3391_v41, %v3389_v23  ;;  %v12954_v51 = vld [vmem:[#allocation92_spill] sm:$0xff] }
 0x6da   :  { %12950 = vst [vmem:[#allocation84_spill] sm:$0xff] %v10893_v9  ;;  %4337 = vmatmul.bf16.gmra.mxu3 %v10893_v9  ;;  %v10896_v12 = vpack.c.bf16 %v5246_v2, %v5244_v58 }
 0x6db   :  { %v2780_v8 = vpop.f32.mrf.mxu0  ;;  %v3109_v30 = vpop.f32.mrf.mxu1 }
 0x6dc   :  { %12951 = vst [vmem:[#allocation85_spill] sm:$0xff] %v10896_v12  ;;  %v3969_v11 = vpop.f32.mrf.mxu2  ;;  %v3110_v0 = vadd.f32 %v3109_v30, %v2780_v8 }
 0x6dd   :  { %v4298_v22 = vpop.f32.mrf.mxu3 }
 0x6de   :  { %v4299_v3 = vadd.f32 %v4298_v22, %v3969_v11  ;;  %2819 = vmatmul.bf16.gmra.mxu0 %v12952_v47  ;;  %3148 = vmatmul.bf16.gmra.mxu1 %v12953_v29  ;;  %v3393_v23 = vmax.f32 %v3110_v0, 0.0  ;;  %v12958_v0 = vld [vmem:[#allocation91_spill] sm:$0xff] }
 0x6e0   :  { %v5248_v58 = vmax.f32 %v4299_v3, 0.0  ;;  %v8855_v3 = vld [vmem:[%s12407_s3 + $0x18] sm:$0xf0] }
 0x6e3   :  { %v2782_v53 = vpop.f32.mrf.mxu0  ;;  %v3111_v39 = vpop.f32.mrf.mxu1 }
 0x6e4   :  { %v3112_v24 = vadd.f32 %v3111_v39, %v2782_v53  ;;  %v3971_v46 = vpop.f32.mrf.mxu2  ;;  %v12957_v53 = vld [vmem:[#allocation90_spill] sm:$0xff] }
 0x6e5   :  { %v4300_v56 = vpop.f32.mrf.mxu3 }
 0x6e6   :  { %v3395_v41 = vmax.f32 %v3112_v24, 0.0  ;;  %v4301_v9 = vadd.f32 %v4300_v56, %v3971_v46  ;;  %v9277_v24 = vld [vmem:[%s12407_s3 + $0x94] sm:$0xf]  ;;  %v8919_v46 = vld [vmem:[%s12407_s3 + $0x98] sm:$0xf0] }
 0x6e8   :  { %v5250_v2 = vmax.f32 %v4301_v9, 0.0  ;;  %4013 = vmatmul.bf16.gmra.mxu2 %v12954_v51  ;;  %v10901_v12 = vpack.c.bf16 %v3395_v41, %v3393_v23  ;;  %v9261_v9 = vld [vmem:[%s12407_s3 + $0x14] sm:$0xf]  ;;  %v8922_v23 = vor.u32 %v9277_v24, %v8919_v46  ;;  %v9053_v24 = vld [vmem:[#allocation2 + $0xa0] sm:$0xf] }
 0x6e9   :  { %v8858_v39 = vor.u32 %v9261_v9, %v8855_v3  ;;  %v12959_v51 = vld [vmem:[#allocation95_spill] sm:$0xff] }
 0x6ea   :  { %12955 = vst [vmem:[#allocation87_spill] sm:$0xff] %v10901_v12  ;;  %4342 = vmatmul.bf16.gmra.mxu3 %v10901_v12  ;;  %v10904_v11 = vpack.c.bf16 %v5250_v2, %v5248_v58  ;;  %4813 = vmatpush.bf16.msra.mxu1 %v8922_v23 }
 0x6eb   :  { %v2785_v22 = vpop.f32.mrf.mxu0  ;;  %v3114_v8 = vpop.f32.mrf.mxu1  ;;  %4484 = vmatpush.bf16.msra.mxu0 %v8858_v39 }
 0x6ec   :  { %12956 = vst [vmem:[#allocation88_spill] sm:$0xff] %v10904_v11  ;;  %v3974_v30 = vpop.f32.mrf.mxu2  ;;  %v3115_v56 = vadd.f32 %v3114_v8, %v2785_v22  ;;  %v8989_v22 = vld [vmem:[#allocation2 + $0x20] sm:$0xf]  ;;  %v9296_v8 = vld [vmem:[#allocation2 + $0x24] sm:$0xf0] }
 0x6ed   :  { %v4303_v47 = vpop.f32.mrf.mxu3  ;;  %v8990_v23 = vor.u32 %v9296_v8, %v8989_v22 }
 0x6ee   :  { %v4304_v29 = vadd.f32 %v4303_v47, %v3974_v30  ;;  %2824 = vmatmul.bf16.gmra.mxu0 %v12957_v53  ;;  %3153 = vmatmul.bf16.gmra.mxu1 %v12958_v0  ;;  %v3397_v53 = vmax.f32 %v3115_v56, 0.0 }
 0x6ef   :  { %5717 = vmatpush.bf16.msra.mxu2 %v8990_v23 }
 0x6f0   :  { %v5252_v3 = vmax.f32 %v4304_v29, 0.0 }
 0x6f3   :  { %v2787_v41 = vpop.f32.mrf.mxu0  ;;  %v3116_v58 = vpop.f32.mrf.mxu1 }
 0x6f4   :  { %v3117_v2 = vadd.f32 %v3116_v58, %v2787_v41  ;;  %v3976_v30 = vpop.f32.mrf.mxu2  ;;  %v9312_v58 = vld [vmem:[#allocation2 + $0xa4] sm:$0xf0] }
 0x6f5   :  { %v4305_v47 = vpop.f32.mrf.mxu3 }
 0x6f6   :  { %v3399_v0 = vmax.f32 %v3117_v2, 0.0  ;;  %v4306_v9 = vadd.f32 %v4305_v47, %v3976_v30  ;;  %v9054_v2 = vor.u32 %v9312_v58, %v9053_v24  ;;  %v12962_v47 = vld [vmem:[#allocation93_spill] sm:$0xff]  ;;  %v12964_v24 = vld [vmem:[#allocation98_spill] sm:$0xff] }
 0x6f8   :  { %v5254_v12 = vmax.f32 %v4306_v9, 0.0  ;;  %4018 = vmatmul.bf16.gmra.mxu2 %v12959_v51  ;;  %v10921_v11 = vpack.c.bf16 %v3399_v0, %v3397_v53  ;;  %v12963_v53 = vld [vmem:[#allocation94_spill] sm:$0xff]  ;;  %6046 = vmatpush.bf16.msra.mxu3 %v9054_v2 }
 0x6fa   :  { %12960 = vst [vmem:[#allocation90_spill] sm:$0xff] %v10921_v11  ;;  %4347 = vmatmul.bf16.gmra.mxu3 %v10921_v11  ;;  %v10924_v46 = vpack.c.bf16 %v5254_v12, %v5252_v3 }
 0x6fb   :  { %v2790_v39 = vpop.f32.mrf.mxu0  ;;  %v3119_v41 = vpop.f32.mrf.mxu1 }
 0x6fc   :  { %12961 = vst [vmem:[#allocation91_spill] sm:$0xff] %v10924_v46  ;;  %v3979_v56 = vpop.f32.mrf.mxu2  ;;  %v3120_v0 = vadd.f32 %v3119_v41, %v2790_v39 }
 0x6fd   :  { %v4308_v30 = vpop.f32.mrf.mxu3 }
 0x6fe   :  { %v4309_v29 = vadd.f32 %v4308_v30, %v3979_v56  ;;  %2829 = vmatmul.bf16.gmra.mxu0 %v12962_v47  ;;  %3158 = vmatmul.bf16.gmra.mxu1 %v12963_v53  ;;  %v3401_v46 = vmax.f32 %v3120_v0, 0.0  ;;  %v12966_v30 = vld [vmem:[#allocation96_spill] sm:$0xff]  ;;  %v12967_v47 = vld [vmem:[#allocation97_spill] sm:$0xff] }
 0x700   :  { %v5256_v8 = vmax.f32 %v4309_v29, 0.0 }
 0x703   :  { %v2792_v9 = vpop.f32.mrf.mxu0  ;;  %v3121_v11 = vpop.f32.mrf.mxu1 }
 0x704   :  { %v3122_v51 = vadd.f32 %v3121_v11, %v2792_v9  ;;  %v3981_v12 = vpop.f32.mrf.mxu2 }
 0x705   :  { %v4310_v3 = vpop.f32.mrf.mxu3 }
 0x706   :  { %v3403_v52 = vmax.f32 %v3122_v51, 0.0  ;;  %v4311_v22 = vadd.f32 %v4310_v3, %v3981_v12 }
 0x708   :  { %v5258_v15 = vmax.f32 %v4311_v22, 0.0  ;;  %4023 = vmatmul.bf16.gmra.mxu2 %v12964_v24  ;;  %v10929_v23 = vpack.c.bf16 %v3403_v52, %v3401_v46 }
 0x70a   :  { %12965 = vst [vmem:[#allocation93_spill] sm:$0xff] %v10929_v23  ;;  %4352 = vmatmul.bf16.gmra.mxu3 %v10929_v23  ;;  %v10932_v58 = vpack.c.bf16 %v5258_v15, %v5256_v8  ;;  %v12968_v8 = vld [vmem:[#allocation101_spill] sm:$0xff] }
 0x70b   :  { %v2795_v56 = vpop.f32.mrf.mxu0  ;;  %v3124_v39 = vpop.f32.mrf.mxu1 }
 0x70c   :  { %v3984_v41 = vpop.f32.mrf.mxu2  ;;  %v3125_v51 = vadd.f32 %v3124_v39, %v2795_v56 }
 0x70d   :  { %v4313_v2 = vpop.f32.mrf.mxu3 }
 0x70e   :  { %v4314_v11 = vadd.f32 %v4313_v2, %v3984_v41  ;;  %2834 = vmatmul.bf16.gmra.mxu0 %v12966_v30  ;;  %3163 = vmatmul.bf16.gmra.mxu1 %v12967_v47  ;;  %v3405_v46 = vmax.f32 %v3125_v51, 0.0  ;;  %v12972_v51 = vld [vmem:[#allocation100_spill] sm:$0xff] }
 0x710   :  { %v5260_v15 = vmax.f32 %v4314_v11, 0.0 }
 0x713   :  { %v2797_v29 = vpop.f32.mrf.mxu0  ;;  %v3126_v53 = vpop.f32.mrf.mxu1 }
 0x714   :  { %v3127_v0 = vadd.f32 %v3126_v53, %v2797_v29  ;;  %v3986_v9 = vpop.f32.mrf.mxu2  ;;  %v12971_v29 = vld [vmem:[#allocation99_spill] sm:$0xff] }
 0x715   :  { %v4315_v52 = vpop.f32.mrf.mxu3 }
 0x716   :  { %v3407_v12 = vmax.f32 %v3127_v0, 0.0  ;;  %v4316_v3 = vadd.f32 %v4315_v52, %v3986_v9 }
 0x718   :  { %v5262_v22 = vmax.f32 %v4316_v3, 0.0  ;;  %4028 = vmatmul.bf16.gmra.mxu2 %v12968_v8  ;;  %v10937_v23 = vpack.c.bf16 %v3407_v12, %v3405_v46  ;;  %v12973_v8 = vld [vmem:[#allocation104_spill] sm:$0xff] }
 0x71a   :  { %12969 = vst [vmem:[#allocation94_spill] sm:$0xff] %v10937_v23  ;;  %4357 = vmatmul.bf16.gmra.mxu3 %v10937_v23  ;;  %v10940_v41 = vpack.c.bf16 %v5262_v22, %v5260_v15 }
 0x71b   :  { %v2800_v2 = vpop.f32.mrf.mxu0  ;;  %v3129_v56 = vpop.f32.mrf.mxu1 }
 0x71c   :  { %12970 = vst [vmem:[#allocation98_spill] sm:$0xff] %v10940_v41  ;;  %v3989_v39 = vpop.f32.mrf.mxu2  ;;  %v3130_v53 = vadd.f32 %v3129_v56, %v2800_v2 }
 0x71d   :  { %v4318_v30 = vpop.f32.mrf.mxu3 }
 0x71e   :  { %v4319_v47 = vadd.f32 %v4318_v30, %v3989_v39  ;;  %2839 = vmatmul.bf16.gmra.mxu0 %v12971_v29  ;;  %3168 = vmatmul.bf16.gmra.mxu1 %v12972_v51  ;;  %v3409_v12 = vmax.f32 %v3130_v53, 0.0  ;;  %v12977_v53 = vld [vmem:[#allocation103_spill] sm:$0xff] }
 0x720   :  { %v5264_v15 = vmax.f32 %v4319_v47, 0.0 }
 0x723   :  { %v2802_v11 = vpop.f32.mrf.mxu0  ;;  %v3131_v0 = vpop.f32.mrf.mxu1 }
 0x724   :  { %v3132_v9 = vadd.f32 %v3131_v0, %v2802_v11  ;;  %v3991_v52 = vpop.f32.mrf.mxu2  ;;  %v12976_v11 = vld [vmem:[#allocation102_spill] sm:$0xff] }
 0x725   :  { %v4320_v46 = vpop.f32.mrf.mxu3 }
 0x726   :  { %v3411_v3 = vmax.f32 %v3132_v9, 0.0  ;;  %v4321_v23 = vadd.f32 %v4320_v46, %v3991_v52 }
 0x728   :  { %v5266_v22 = vmax.f32 %v4321_v23, 0.0  ;;  %4033 = vmatmul.bf16.gmra.mxu2 %v12973_v8  ;;  %v10945_v41 = vpack.c.bf16 %v3411_v3, %v3409_v12  ;;  %v12978_v8 = vld [vmem:[#allocation107_spill] sm:$0xff] }
 0x72a   :  { %12974 = vst [vmem:[#allocation96_spill] sm:$0xff] %v10945_v41  ;;  %4362 = vmatmul.bf16.gmra.mxu3 %v10945_v41  ;;  %v10948_v39 = vpack.c.bf16 %v5266_v22, %v5264_v15 }
 0x72b   :  { %v2805_v30 = vpop.f32.mrf.mxu0  ;;  %v3134_v2 = vpop.f32.mrf.mxu1 }
 0x72c   :  { %12975 = vst [vmem:[#allocation97_spill] sm:$0xff] %v10948_v39  ;;  %v3994_v56 = vpop.f32.mrf.mxu2  ;;  %v3135_v0 = vadd.f32 %v3134_v2, %v2805_v30 }
 0x72d   :  { %v4323_v29 = vpop.f32.mrf.mxu3 }
 0x72e   :  { %v4324_v51 = vadd.f32 %v4323_v29, %v3994_v56  ;;  %2844 = vmatmul.bf16.gmra.mxu0 %v12976_v11  ;;  %3173 = vmatmul.bf16.gmra.mxu1 %v12977_v53  ;;  %v3413_v12 = vmax.f32 %v3135_v0, 0.0  ;;  %v12982_v0 = vld [vmem:[#allocation106_spill] sm:$0xff] }
 0x730   :  { %v5268_v15 = vmax.f32 %v4324_v51, 0.0 }
 0x733   :  { %v2807_v47 = vpop.f32.mrf.mxu0  ;;  %v3136_v23 = vpop.f32.mrf.mxu1 }
 0x734   :  { %v3137_v9 = vadd.f32 %v3136_v23, %v2807_v47  ;;  %v3996_v52 = vpop.f32.mrf.mxu2  ;;  %v12981_v47 = vld [vmem:[#allocation105_spill] sm:$0xff] }
 0x735   :  { %v4325_v46 = vpop.f32.mrf.mxu3 }
 0x736   :  { %v3415_v3 = vmax.f32 %v3137_v9, 0.0  ;;  %v4326_v41 = vadd.f32 %v4325_v46, %v3996_v52 }
 0x738   :  { %v5270_v22 = vmax.f32 %v4326_v41, 0.0  ;;  %4038 = vmatmul.bf16.gmra.mxu2 %v12978_v8  ;;  %v10953_v39 = vpack.c.bf16 %v3415_v3, %v3413_v12  ;;  %v12983_v8 = vld [vmem:[#allocation110_spill] sm:$0xff] }
 0x73a   :  { %12979 = vst [vmem:[#allocation99_spill] sm:$0xff] %v10953_v39  ;;  %4367 = vmatmul.bf16.gmra.mxu3 %v10953_v39  ;;  %v10956_v56 = vpack.c.bf16 %v5270_v22, %v5268_v15 }
 0x73b   :  { %v2810_v29 = vpop.f32.mrf.mxu0  ;;  %v3139_v30 = vpop.f32.mrf.mxu1 }
 0x73c   :  { %12980 = vst [vmem:[#allocation100_spill] sm:$0xff] %v10956_v56  ;;  %v3999_v2 = vpop.f32.mrf.mxu2  ;;  %v3140_v23 = vadd.f32 %v3139_v30, %v2810_v29 }
 0x73d   :  { %v4328_v11 = vpop.f32.mrf.mxu3 }
 0x73e   :  { %v4329_v53 = vadd.f32 %v4328_v11, %v3999_v2  ;;  %2849 = vmatmul.bf16.gmra.mxu0 %v12981_v47  ;;  %3178 = vmatmul.bf16.gmra.mxu1 %v12982_v0  ;;  %v3417_v12 = vmax.f32 %v3140_v23, 0.0  ;;  %v12987_v23 = vld [vmem:[#allocation109_spill] sm:$0xff] }
 0x740   :  { %v5272_v15 = vmax.f32 %v4329_v53, 0.0 }
 0x743   :  { %v2812_v51 = vpop.f32.mrf.mxu0  ;;  %v3141_v41 = vpop.f32.mrf.mxu1 }
 0x744   :  { %v3142_v9 = vadd.f32 %v3141_v41, %v2812_v51  ;;  %v4001_v52 = vpop.f32.mrf.mxu2  ;;  %v12986_v51 = vld [vmem:[#allocation108_spill] sm:$0xff] }
 0x745   :  { %v4330_v46 = vpop.f32.mrf.mxu3 }
 0x746   :  { %v3419_v3 = vmax.f32 %v3142_v9, 0.0  ;;  %v4331_v39 = vadd.f32 %v4330_v46, %v4001_v52 }
 0x748   :  { %v5274_v22 = vmax.f32 %v4331_v39, 0.0  ;;  %4043 = vmatmul.bf16.gmra.mxu2 %v12983_v8  ;;  %v10961_v56 = vpack.c.bf16 %v3419_v3, %v3417_v12  ;;  %v12988_v8 = vld [vmem:[#allocation113_spill] sm:$0xff] }
 0x74a   :  { %12984 = vst [vmem:[#allocation102_spill] sm:$0xff] %v10961_v56  ;;  %4372 = vmatmul.bf16.gmra.mxu3 %v10961_v56  ;;  %v10964_v2 = vpack.c.bf16 %v5274_v22, %v5272_v15 }
 0x74b   :  { %v2815_v11 = vpop.f32.mrf.mxu0  ;;  %v3144_v29 = vpop.f32.mrf.mxu1 }
 0x74c   :  { %12985 = vst [vmem:[#allocation103_spill] sm:$0xff] %v10964_v2  ;;  %v4004_v30 = vpop.f32.mrf.mxu2  ;;  %v3145_v41 = vadd.f32 %v3144_v29, %v2815_v11 }
 0x74d   :  { %v4333_v47 = vpop.f32.mrf.mxu3 }
 0x74e   :  { %v4334_v0 = vadd.f32 %v4333_v47, %v4004_v30  ;;  %2854 = vmatmul.bf16.gmra.mxu0 %v12986_v51  ;;  %3183 = vmatmul.bf16.gmra.mxu1 %v12987_v23  ;;  %v3421_v12 = vmax.f32 %v3145_v41, 0.0  ;;  %v12992_v41 = vld [vmem:[#allocation112_spill] sm:$0xff] }
 0x750   :  { %v5276_v15 = vmax.f32 %v4334_v0, 0.0 }
 0x753   :  { %v2817_v53 = vpop.f32.mrf.mxu0  ;;  %v3146_v39 = vpop.f32.mrf.mxu1 }
 0x754   :  { %v3147_v9 = vadd.f32 %v3146_v39, %v2817_v53  ;;  %v4006_v52 = vpop.f32.mrf.mxu2  ;;  %v12991_v53 = vld [vmem:[#allocation111_spill] sm:$0xff] }
 0x755   :  { %v4335_v46 = vpop.f32.mrf.mxu3 }
 0x756   :  { %v3423_v3 = vmax.f32 %v3147_v9, 0.0  ;;  %v4336_v56 = vadd.f32 %v4335_v46, %v4006_v52 }
 0x758   :  { %v5278_v22 = vmax.f32 %v4336_v56, 0.0  ;;  %4048 = vmatmul.bf16.gmra.mxu2 %v12988_v8  ;;  %v10969_v2 = vpack.c.bf16 %v3423_v3, %v3421_v12 }
 0x75a   :  { %12989 = vst [vmem:[#allocation105_spill] sm:$0xff] %v10969_v2  ;;  %4377 = vmatmul.bf16.gmra.mxu3 %v10969_v2  ;;  %v10972_v30 = vpack.c.bf16 %v5278_v22, %v5276_v15 }
 0x75b   :  { %v2820_v47 = vpop.f32.mrf.mxu0  ;;  %v3149_v11 = vpop.f32.mrf.mxu1 }
 0x75c   :  { %12990 = vst [vmem:[#allocation106_spill] sm:$0xff] %v10972_v30  ;;  %v4009_v29 = vpop.f32.mrf.mxu2  ;;  %v3150_v39 = vadd.f32 %v3149_v11, %v2820_v47 }
 0x75d   :  { %v4338_v51 = vpop.f32.mrf.mxu3 }
 0x75e   :  { %v4339_v23 = vadd.f32 %v4338_v51, %v4009_v29  ;;  %2859 = vmatmul.bf16.gmra.mxu0 %v12991_v53  ;;  %3188 = vmatmul.bf16.gmra.mxu1 %v12992_v41  ;;  %v3425_v12 = vmax.f32 %v3150_v39, 0.0  ;;  %v12996_v39 = vld [vmem:[#allocation115_spill] sm:$0xff] }
 0x760   :  { %v5280_v15 = vmax.f32 %v4339_v23, 0.0  ;;  %v8847_v23 = vld [vmem:[%s12407_s3 + $0x8] sm:$0xf0] }
 0x763   :  { %v2822_v0 = vpop.f32.mrf.mxu0  ;;  %v3151_v56 = vpop.f32.mrf.mxu1 }
 0x764   :  { %v3152_v9 = vadd.f32 %v3151_v56, %v2822_v0  ;;  %v4011_v52 = vpop.f32.mrf.mxu2  ;;  %v12995_v0 = vld [vmem:[#allocation114_spill] sm:$0xff] }
 0x765   :  { %v4340_v46 = vpop.f32.mrf.mxu3 }
 0x766   :  { %v3427_v3 = vmax.f32 %v3152_v9, 0.0  ;;  %v4341_v2 = vadd.f32 %v4340_v46, %v4011_v52  ;;  %v9275_v9 = vld [vmem:[%s12407_s3 + $0x84] sm:$0xf]  ;;  %v8911_v52 = vld [vmem:[%s12407_s3 + $0x88] sm:$0xf0] }
 0x768   :  { %v5282_v22 = vmax.f32 %v4341_v2, 0.0  ;;  %4053 = vmatmul.bf16.gmra.mxu2 %v10447_v19  ;;  %v10977_v8 = vpack.c.bf16 %v3427_v3, %v3425_v12  ;;  %v9259_v2 = vld [vmem:[%s12407_s3 + $0x4] sm:$0xf]  ;;  %v8914_v12 = vor.u32 %v9275_v9, %v8911_v52  ;;  %v9045_v9 = vld [vmem:[#allocation2 + $0x90] sm:$0xf] }
 0x769   :  { %v8850_v56 = vor.u32 %v9259_v2, %v8847_v23 }
 0x76a   :  { %12993 = vst [vmem:[#allocation108_spill] sm:$0xff] %v10977_v8  ;;  %4382 = vmatmul.bf16.gmra.mxu3 %v10977_v8  ;;  %v10980_v29 = vpack.c.bf16 %v5282_v22, %v5280_v15  ;;  %4814 = vmatpush.bf16.msra.mxu1 %v8914_v12 }
 0x76b   :  { %v2825_v51 = vpop.f32.mrf.mxu0  ;;  %v3154_v47 = vpop.f32.mrf.mxu1  ;;  %4485 = vmatpush.bf16.msra.mxu0 %v8850_v56 }
 0x76c   :  { %12994 = vst [vmem:[#allocation109_spill] sm:$0xff] %v10980_v29  ;;  %v4014_v11 = vpop.f32.mrf.mxu2  ;;  %v3155_v46 = vadd.f32 %v3154_v47, %v2825_v51  ;;  %v8981_v51 = vld [vmem:[#allocation2 + $0x10] sm:$0xf]  ;;  %v9294_v47 = vld [vmem:[#allocation2 + $0x14] sm:$0xf0] }
 0x76d   :  { %v4343_v53 = vpop.f32.mrf.mxu3  ;;  %v8982_v12 = vor.u32 %v9294_v47, %v8981_v51 }
 0x76e   :  { %v4344_v41 = vadd.f32 %v4343_v53, %v4014_v11  ;;  %2864 = vmatmul.bf16.gmra.mxu0 %v12995_v0  ;;  %3193 = vmatmul.bf16.gmra.mxu1 %v12996_v39  ;;  %v3429_v0 = vmax.f32 %v3155_v46, 0.0 }
 0x76f   :  { %5718 = vmatpush.bf16.msra.mxu2 %v8982_v12 }
 0x770   :  { %v5284_v23 = vmax.f32 %v4344_v41, 0.0 }
 0x773   :  { %v2827_v3 = vpop.f32.mrf.mxu0  ;;  %v3156_v15 = vpop.f32.mrf.mxu1 }
 0x774   :  { %v3157_v22 = vadd.f32 %v3156_v15, %v2827_v3  ;;  %v4016_v11 = vpop.f32.mrf.mxu2  ;;  %v9310_v15 = vld [vmem:[#allocation2 + $0x94] sm:$0xf0] }
 0x775   :  { %v4345_v53 = vpop.f32.mrf.mxu3 }
 0x776   :  { %v3431_v39 = vmax.f32 %v3157_v22, 0.0  ;;  %v4346_v2 = vadd.f32 %v4345_v53, %v4016_v11  ;;  %v9046_v22 = vor.u32 %v9310_v15, %v9045_v9  ;;  %v12999_v53 = vld [vmem:[#allocation117_spill] sm:$0xff] }
 0x778   :  { %v5286_v8 = vmax.f32 %v4346_v2, 0.0  ;;  %4058 = vmatmul.bf16.gmra.mxu2 %v10460_v44  ;;  %v10997_v19 = vpack.c.bf16 %v3431_v39, %v3429_v0  ;;  %v13000_v0 = vld [vmem:[#allocation118_spill] sm:$0xff]  ;;  %6047 = vmatpush.bf16.msra.mxu3 %v9046_v22  ;;  %v13001_v22 = vld [vmem:[#allocation120_spill] sm:$0xff] }
 0x77a   :  { %12997 = vst [vmem:[#allocation111_spill] sm:$0xff] %v10997_v19  ;;  %4387 = vmatmul.bf16.gmra.mxu3 %v10997_v19  ;;  %v11000_v52 = vpack.c.bf16 %v5286_v8, %v5284_v23 }
 0x77b   :  { %v2830_v56 = vpop.f32.mrf.mxu0  ;;  %v3159_v3 = vpop.f32.mrf.mxu1 }
 0x77c   :  { %12998 = vst [vmem:[#allocation112_spill] sm:$0xff] %v11000_v52  ;;  %v4019_v46 = vpop.f32.mrf.mxu2  ;;  %v3160_v39 = vadd.f32 %v3159_v3, %v2830_v56 }
 0x77d   :  { %v4348_v11 = vpop.f32.mrf.mxu3 }
 0x77e   :  { %v4349_v41 = vadd.f32 %v4348_v11, %v4019_v46  ;;  %2869 = vmatmul.bf16.gmra.mxu0 %v12999_v53  ;;  %3198 = vmatmul.bf16.gmra.mxu1 %v13000_v0  ;;  %v3433_v52 = vmax.f32 %v3160_v39, 0.0 }
 0x780   :  { %v5288_v47 = vmax.f32 %v4349_v41, 0.0 }
 0x783   :  { %v2832_v2 = vpop.f32.mrf.mxu0  ;;  %v3161_v19 = vpop.f32.mrf.mxu1 }
 0x784   :  { %v3162_v44 = vadd.f32 %v3161_v19, %v2832_v2  ;;  %v4021_v8 = vpop.f32.mrf.mxu2 }
 0x785   :  { %v4350_v23 = vpop.f32.mrf.mxu3 }
 0x786   :  { %v3435_v29 = vmax.f32 %v3162_v44, 0.0  ;;  %v4351_v51 = vadd.f32 %v4350_v23, %v4021_v8 }
 0x788   :  { %v5290_v30 = vmax.f32 %v4351_v51, 0.0  ;;  %4063 = vmatmul.bf16.gmra.mxu2 %v10470_v26  ;;  %v11005_v9 = vpack.c.bf16 %v3435_v29, %v3433_v52 }
 0x78a   :  { %4392 = vmatmul.bf16.gmra.mxu3 %v11005_v9  ;;  %v11008_v12 = vpack.c.bf16 %v5290_v30, %v5288_v47 }
 0x78b   :  { %v2835_v15 = vpop.f32.mrf.mxu0  ;;  %v3164_v56 = vpop.f32.mrf.mxu1 }
 0x78c   :  { %v4024_v3 = vpop.f32.mrf.mxu2  ;;  %v3165_v44 = vadd.f32 %v3164_v56, %v2835_v15 }
 0x78d   :  { %v4353_v46 = vpop.f32.mrf.mxu3 }
 0x78e   :  { %v4354_v19 = vadd.f32 %v4353_v46, %v4024_v3  ;;  %2874 = vmatmul.bf16.gmra.mxu0 %v10464_v34  ;;  %3203 = vmatmul.bf16.gmra.mxu1 %v13001_v22  ;;  %v3437_v52 = vmax.f32 %v3165_v44, 0.0  ;;  %v13002_v46 = vld [vmem:[#allocation121_spill] sm:$0xff] }
 0x790   :  { %v5292_v30 = vmax.f32 %v4354_v19, 0.0 }
 0x793   :  { %v2837_v11 = vpop.f32.mrf.mxu0  ;;  %v3166_v41 = vpop.f32.mrf.mxu1 }
 0x794   :  { %v3167_v53 = vadd.f32 %v3166_v41, %v2837_v11  ;;  %v4026_v0 = vpop.f32.mrf.mxu2 }
 0x795   :  { %v4355_v29 = vpop.f32.mrf.mxu3 }
 0x796   :  { %v3439_v39 = vmax.f32 %v3167_v53, 0.0  ;;  %v4356_v2 = vadd.f32 %v4355_v29, %v4026_v0 }
 0x798   :  { %v5294_v8 = vmax.f32 %v4356_v2, 0.0  ;;  %4068 = vmatmul.bf16.gmra.mxu2 %v10480_v37  ;;  %v11013_v23 = vpack.c.bf16 %v3439_v39, %v3437_v52 }
 0x79a   :  { %4397 = vmatmul.bf16.gmra.mxu3 %v11013_v23  ;;  %v11016_v34 = vpack.c.bf16 %v5294_v8, %v5292_v30 }
 0x79b   :  { %v2840_v51 = vpop.f32.mrf.mxu0  ;;  %v3169_v47 = vpop.f32.mrf.mxu1 }
 0x79c   :  { %v4029_v15 = vpop.f32.mrf.mxu2  ;;  %v3170_v22 = vadd.f32 %v3169_v47, %v2840_v51 }
 0x79d   :  { %v4358_v56 = vpop.f32.mrf.mxu3 }
 0x79e   :  { %v4359_v3 = vadd.f32 %v4358_v56, %v4029_v15  ;;  %2879 = vmatmul.bf16.gmra.mxu0 %v10474_v16  ;;  %3208 = vmatmul.bf16.gmra.mxu1 %v13002_v46  ;;  %v3441_v0 = vmax.f32 %v3170_v22, 0.0  ;;  %v13003_v46 = vld [vmem:[#allocation122_spill] sm:$0xff] }
 0x7a0   :  { %v5296_v39 = vmax.f32 %v4359_v3, 0.0 }
 0x7a3   :  { %v2842_v19 = vpop.f32.mrf.mxu0  ;;  %v3171_v44 = vpop.f32.mrf.mxu1 }
 0x7a4   :  { %v3172_v11 = vadd.f32 %v3171_v44, %v2842_v19  ;;  %v4031_v41 = vpop.f32.mrf.mxu2 }
 0x7a5   :  { %v4360_v53 = vpop.f32.mrf.mxu3 }
 0x7a6   :  { %v3443_v29 = vmax.f32 %v3172_v11, 0.0  ;;  %v4361_v52 = vadd.f32 %v4360_v53, %v4031_v41 }
 0x7a8   :  { %v5298_v2 = vmax.f32 %v4361_v52, 0.0  ;;  %4073 = vmatmul.bf16.gmra.mxu2 %v10490_v48  ;;  %v11021_v30 = vpack.c.bf16 %v3443_v29, %v3441_v0 }
 0x7aa   :  { %4402 = vmatmul.bf16.gmra.mxu3 %v11021_v30  ;;  %v11024_v16 = vpack.c.bf16 %v5298_v2, %v5296_v39 }
 0x7ab   :  { %v2845_v8 = vpop.f32.mrf.mxu0  ;;  %v3174_v51 = vpop.f32.mrf.mxu1 }
 0x7ac   :  { %v4034_v47 = vpop.f32.mrf.mxu2  ;;  %v3175_v22 = vadd.f32 %v3174_v51, %v2845_v8 }
 0x7ad   :  { %v4363_v15 = vpop.f32.mrf.mxu3 }
 0x7ae   :  { %v4364_v56 = vadd.f32 %v4363_v15, %v4034_v47  ;;  %2884 = vmatmul.bf16.gmra.mxu0 %v10484_v35  ;;  %3213 = vmatmul.bf16.gmra.mxu1 %v13003_v46  ;;  %v3445_v53 = vmax.f32 %v3175_v22, 0.0  ;;  %v13005_v22 = vld [vmem:[#allocation123_spill] sm:$0xff] }
 0x7b0   :  { %v5300_v52 = vmax.f32 %v4364_v56, 0.0 }
 0x7b3   :  { %v2847_v3 = vpop.f32.mrf.mxu0  ;;  %v3176_v19 = vpop.f32.mrf.mxu1 }
 0x7b4   :  { %v3177_v44 = vadd.f32 %v3176_v19, %v2847_v3  ;;  %v4036_v11 = vpop.f32.mrf.mxu2 }
 0x7b5   :  { %v4365_v41 = vpop.f32.mrf.mxu3 }
 0x7b6   :  { %v3447_v0 = vmax.f32 %v3177_v44, 0.0  ;;  %v4366_v29 = vadd.f32 %v4365_v41, %v4036_v11 }
 0x7b8   :  { %v5302_v39 = vmax.f32 %v4366_v29, 0.0  ;;  %4078 = vmatmul.bf16.gmra.mxu2 %v10500_v59  ;;  %v11029_v2 = vpack.c.bf16 %v3447_v0, %v3445_v53 }
 0x7ba   :  { %13004 = vst [vmem:[#allocation114_spill] sm:$0xff] %v11029_v2  ;;  %4407 = vmatmul.bf16.gmra.mxu3 %v11029_v2  ;;  %v11032_v35 = vpack.c.bf16 %v5302_v39, %v5300_v52 }
 0x7bb   :  { %v2850_v47 = vpop.f32.mrf.mxu0  ;;  %v3179_v8 = vpop.f32.mrf.mxu1 }
 0x7bc   :  { %v4039_v51 = vpop.f32.mrf.mxu2  ;;  %v3180_v3 = vadd.f32 %v3179_v8, %v2850_v47 }
 0x7bd   :  { %v4368_v15 = vpop.f32.mrf.mxu3 }
 0x7be   :  { %v4369_v46 = vadd.f32 %v4368_v15, %v4039_v51  ;;  %2889 = vmatmul.bf16.gmra.mxu0 %v10494_v14  ;;  %3218 = vmatmul.bf16.gmra.mxu1 %v13005_v22  ;;  %v3449_v53 = vmax.f32 %v3180_v3, 0.0  ;;  %v13007_v3 = vld [vmem:[#allocation124_spill] sm:$0xff] }
 0x7c0   :  { %v5304_v52 = vmax.f32 %v4369_v46, 0.0 }
 0x7c3   :  { %v2852_v56 = vpop.f32.mrf.mxu0  ;;  %v3181_v19 = vpop.f32.mrf.mxu1 }
 0x7c4   :  { %v3182_v44 = vadd.f32 %v3181_v19, %v2852_v56  ;;  %v4041_v11 = vpop.f32.mrf.mxu2 }
 0x7c5   :  { %v4370_v41 = vpop.f32.mrf.mxu3 }
 0x7c6   :  { %v3451_v0 = vmax.f32 %v3182_v44, 0.0  ;;  %v4371_v29 = vadd.f32 %v4370_v41, %v4041_v11 }
 0x7c8   :  { %v5306_v39 = vmax.f32 %v4371_v29, 0.0  ;;  %4083 = vmatmul.bf16.gmra.mxu2 %v10510_v6  ;;  %v11037_v2 = vpack.c.bf16 %v3451_v0, %v3449_v53 }
 0x7ca   :  { %13006 = vst [vmem:[#allocation115_spill] sm:$0xff] %v11037_v2  ;;  %4412 = vmatmul.bf16.gmra.mxu3 %v11037_v2  ;;  %v11040_v14 = vpack.c.bf16 %v5306_v39, %v5304_v52 }
 0x7cb   :  { %v2855_v51 = vpop.f32.mrf.mxu0  ;;  %v3184_v47 = vpop.f32.mrf.mxu1 }
 0x7cc   :  { %v4044_v8 = vpop.f32.mrf.mxu2  ;;  %v3185_v56 = vadd.f32 %v3184_v47, %v2855_v51 }
 0x7cd   :  { %v4373_v15 = vpop.f32.mrf.mxu3 }
 0x7ce   :  { %v4374_v22 = vadd.f32 %v4373_v15, %v4044_v8  ;;  %2894 = vmatmul.bf16.gmra.mxu0 %v10504_v4  ;;  %3223 = vmatmul.bf16.gmra.mxu1 %v13007_v3  ;;  %v3453_v53 = vmax.f32 %v3185_v56, 0.0  ;;  %v13010_v56 = vld [vmem:[#allocation125_spill] sm:$0xff] }
 0x7d0   :  { %v5308_v52 = vmax.f32 %v4374_v22, 0.0 }
 0x7d3   :  { %v2857_v46 = vpop.f32.mrf.mxu0  ;;  %v3186_v19 = vpop.f32.mrf.mxu1 }
 0x7d4   :  { %v3187_v44 = vadd.f32 %v3186_v19, %v2857_v46  ;;  %v4046_v11 = vpop.f32.mrf.mxu2 }
 0x7d5   :  { %v4375_v41 = vpop.f32.mrf.mxu3 }
 0x7d6   :  { %v3455_v0 = vmax.f32 %v3187_v44, 0.0  ;;  %v4376_v29 = vadd.f32 %v4375_v41, %v4046_v11 }
 0x7d8   :  { %v5310_v39 = vmax.f32 %v4376_v29, 0.0  ;;  %4088 = vmatmul.bf16.gmra.mxu2 %v10520_v17  ;;  %v11045_v2 = vpack.c.bf16 %v3455_v0, %v3453_v53 }
 0x7da   :  { %13008 = vst [vmem:[#allocation117_spill] sm:$0xff] %v11045_v2  ;;  %4417 = vmatmul.bf16.gmra.mxu3 %v11045_v2  ;;  %v11048_v4 = vpack.c.bf16 %v5310_v39, %v5308_v52  ;;  %v13011_v2 = vld [vmem:[#allocation129_spill] sm:$0xff] }
 0x7db   :  { %v2860_v8 = vpop.f32.mrf.mxu0  ;;  %v3189_v51 = vpop.f32.mrf.mxu1 }
 0x7dc   :  { %13009 = vst [vmem:[#allocation118_spill] sm:$0xff] %v11048_v4  ;;  %v4049_v47 = vpop.f32.mrf.mxu2  ;;  %v3190_v46 = vadd.f32 %v3189_v51, %v2860_v8 }
 0x7dd   :  { %v4378_v15 = vpop.f32.mrf.mxu3 }
 0x7de   :  { %v4379_v3 = vadd.f32 %v4378_v15, %v4049_v47  ;;  %2899 = vmatmul.bf16.gmra.mxu0 %v10514_v20  ;;  %3228 = vmatmul.bf16.gmra.mxu1 %v13010_v56  ;;  %v3457_v53 = vmax.f32 %v3190_v46, 0.0  ;;  %v13015_v46 = vld [vmem:[#allocation128_spill] sm:$0xff] }
 0x7e0   :  { %v5312_v52 = vmax.f32 %v4379_v3, 0.0  ;;  %v9031_v3 = vld [vmem:[#allocation2 + $0x78] sm:$0xf0] }
 0x7e3   :  { %v2862_v22 = vpop.f32.mrf.mxu0  ;;  %v3191_v19 = vpop.f32.mrf.mxu1 }
 0x7e4   :  { %v3192_v44 = vadd.f32 %v3191_v19, %v2862_v22  ;;  %v4051_v11 = vpop.f32.mrf.mxu2  ;;  %v13014_v22 = vld [vmem:[#allocation127_spill] sm:$0xff] }
 0x7e5   :  { %v4380_v41 = vpop.f32.mrf.mxu3  ;;  %v9305_v19 = vld [vmem:[#allocation2 + $0x74] sm:$0xf] }
 0x7e6   :  { %v3459_v0 = vmax.f32 %v3192_v44, 0.0  ;;  %v4381_v29 = vadd.f32 %v4380_v41, %v4051_v11  ;;  %v9034_v44 = vor.u32 %v9305_v19, %v9031_v3  ;;  %v9321_v11 = vld [vmem:[#allocation2 + $0xf4] sm:$0xf]  ;;  %v9095_v41 = vld [vmem:[#allocation2 + $0xf8] sm:$0xf0] }
 0x7e7   :  { %v9037_v19 = vld [vmem:[#allocation2 + $0x80] sm:$0xf] }
 0x7e8   :  { %v5314_v39 = vmax.f32 %v4381_v29, 0.0  ;;  %4093 = vmatmul.bf16.gmra.mxu2 %v13011_v2  ;;  %v11053_v17 = vpack.c.bf16 %v3459_v0, %v3457_v53  ;;  %v9098_v0 = vor.u32 %v9321_v11, %v9095_v41  ;;  %6370 = vmatpush.bf16.msrb.mxu0 %v9034_v44  ;;  %v9308_v41 = vld [vmem:[#allocation2 + $0x84] sm:$0xf0] }
 0x7ea   :  { %13012 = vst [vmem:[#allocation120_spill] sm:$0xff] %v11053_v17  ;;  %4422 = vmatmul.bf16.gmra.mxu3 %v11053_v17  ;;  %v11056_v20 = vpack.c.bf16 %v5314_v39, %v5312_v52  ;;  %6699 = vmatpush.bf16.msrb.mxu1 %v9098_v0  ;;  %v9038_v0 = vor.u32 %v9308_v41, %v9037_v19 }
 0x7eb   :  { %v2865_v47 = vpop.f32.mrf.mxu0  ;;  %v3194_v8 = vpop.f32.mrf.mxu1 }
 0x7ec   :  { %13013 = vst [vmem:[#allocation121_spill] sm:$0xff] %v11056_v20  ;;  %v4054_v51 = vpop.f32.mrf.mxu2  ;;  %v3195_v53 = vadd.f32 %v3194_v8, %v2865_v47  ;;  %v8973_v47 = vld [vmem:[#allocation2] sm:$0xf]  ;;  %v9292_v8 = vld [vmem:[#allocation2 + $0x4] sm:$0xf0]  ;;  %6048 = vmatpush.bf16.msra.mxu3 %v9038_v0 }
 0x7ed   :  { %v4383_v15 = vpop.f32.mrf.mxu3  ;;  %v8974_v11 = vor.u32 %v9292_v8, %v8973_v47 }
 0x7ee   :  { %v4384_v56 = vadd.f32 %v4383_v15, %v4054_v51  ;;  %2904 = vmatmul.bf16.gmra.mxu0 %v13014_v22  ;;  %3233 = vmatmul.bf16.gmra.mxu1 %v13015_v46  ;;  %v3461_v20 = vmax.f32 %v3195_v53, 0.0 }
 0x7ef   :  { %5719 = vmatpush.bf16.msra.mxu2 %v8974_v11 }
 0x7f0   :  { %v5316_v22 = vmax.f32 %v4384_v56, 0.0 }
 0x7f3   :  { %v2867_v29 = vpop.f32.mrf.mxu0  ;;  %v3196_v17 = vpop.f32.mrf.mxu1 }
 0x7f4   :  { %v3197_v52 = vadd.f32 %v3196_v17, %v2867_v29  ;;  %v4056_v39 = vpop.f32.mrf.mxu2 }
 0x7f5   :  { %v4385_v2 = vpop.f32.mrf.mxu3 }
 0x7f6   :  { %v3463_v51 = vmax.f32 %v3197_v52, 0.0  ;;  %v4386_v15 = vadd.f32 %v4385_v2, %v4056_v39 }
 0x7f8   :  { %v5318_v4 = vmax.f32 %v4386_v15, 0.0  ;;  %4098 = vmatmul.bf16.gmra.mxu2 %v10552_v57  ;;  %v11061_v46 = vpack.c.bf16 %v3463_v51, %v3461_v20 }
 0x7fa   :  { %13016 = vst [vmem:[#allocation122_spill] sm:$0xff] %v11061_v46  ;;  %4427 = vmatmul.bf16.gmra.mxu3 %v11061_v46  ;;  %v11064_v3 = vpack.c.bf16 %v5318_v4, %v5316_v22 }
 0x7fb   :  { %v2870_v17 = vpop.f32.mrf.mxu0  ;;  %v3199_v44 = vpop.f32.mrf.mxu1 }
 0x7fc   :  { %13017 = vst [vmem:[#allocation123_spill] sm:$0xff] %v11064_v3  ;;  %v4059_v53 = vpop.f32.mrf.mxu2  ;;  %v3200_v20 = vadd.f32 %v3199_v44, %v2870_v17 }
 0x7fd   :  { %v4388_v2 = vpop.f32.mrf.mxu3 }
 0x7fe   :  { %v4389_v56 = vadd.f32 %v4388_v2, %v4059_v53  ;;  %2909 = vmatmul.bf16.gmra.mxu0 %v10546_v18  ;;  %3238 = vmatmul.bf16.gmra.mxu1 %v10548_v40  ;;  %v3465_v15 = vmax.f32 %v3200_v20, 0.0 }
 0x800   :  { %v5320_v8 = vmax.f32 %v4389_v56, 0.0 }
 0x803   :  { %v2872_v29 = vpop.f32.mrf.mxu0  ;;  %v3201_v52 = vpop.f32.mrf.mxu1 }
 0x804   :  { %v3202_v39 = vadd.f32 %v3201_v52, %v2872_v29  ;;  %v4061_v4 = vpop.f32.mrf.mxu2 }
 0x805   :  { %v4390_v51 = vpop.f32.mrf.mxu3 }
 0x806   :  { %v3467_v22 = vmax.f32 %v3202_v39, 0.0  ;;  %v4391_v47 = vadd.f32 %v4390_v51, %v4061_v4 }
 0x808   :  { %v5322_v46 = vmax.f32 %v4391_v47, 0.0  ;;  %4103 = vmatmul.bf16.gmra.mxu2 %v10559_v7  ;;  %v11069_v19 = vpack.c.bf16 %v3467_v22, %v3465_v15 }
 0x80a   :  { %4432 = vmatmul.bf16.gmra.mxu3 %v11069_v19  ;;  %v11072_v18 = vpack.c.bf16 %v5322_v46, %v5320_v8 }
 0x80b   :  { %v2875_v40 = vpop.f32.mrf.mxu0  ;;  %v3204_v17 = vpop.f32.mrf.mxu1 }
 0x80c   :  { %v4064_v44 = vpop.f32.mrf.mxu2  ;;  %v3205_v53 = vadd.f32 %v3204_v17, %v2875_v40 }
 0x80d   :  { %v4393_v11 = vpop.f32.mrf.mxu3 }
 0x80e   :  { %v4394_v41 = vadd.f32 %v4393_v11, %v4064_v44  ;;  %4486 = vmatmul.bf16.vlgmr.msra.gmra.mxu0 %v9718_v33  ;;  %4815 = vmatmul.bf16.vlgmr.msra.gmra.mxu1 %v10556_v61  ;;  %v3469_v52 = vmax.f32 %v3205_v53, 0.0 }
 0x810   :  { %v5324_v46 = vmax.f32 %v4394_v41, 0.0 }
 0x813   :  { %v2877_v0 = vpop.f32.mrf.mxu0  ;;  %v3206_v2 = vpop.f32.mrf.mxu1 }
 0x814   :  { %v3207_v56 = vadd.f32 %v3206_v2, %v2877_v0  ;;  %v4066_v20 = vpop.f32.mrf.mxu2 }
 0x815   :  { %v4395_v29 = vpop.f32.mrf.mxu3 }
 0x816   :  { %v3471_v39 = vmax.f32 %v3207_v56, 0.0  ;;  %v4396_v4 = vadd.f32 %v4395_v29, %v4066_v20 }
 0x818   :  { %v5326_v51 = vmax.f32 %v4396_v4, 0.0  ;;  %4108 = vmatmul.bf16.gmra.mxu2 %v10567_v60  ;;  %v11077_v15 = vpack.c.bf16 %v3471_v39, %v3469_v52 }
 0x81a   :  { %4437 = vmatmul.bf16.gmra.mxu3 %v11077_v15  ;;  %v11080_v33 = vpack.c.bf16 %v5326_v51, %v5324_v46 }
 0x81b   :  { %v2880_v61 = vpop.f32.mrf.mxu0  ;;  %v3209_v22 = vpop.f32.mrf.mxu1 }
 0x81c   :  { %v4069_v47 = vpop.f32.mrf.mxu2  ;;  %v3210_v17 = vadd.f32 %v3209_v22, %v2880_v61 }
 0x81d   :  { %v4398_v8 = vpop.f32.mrf.mxu3 }
 0x81e   :  { %v4399_v40 = vadd.f32 %v4398_v8, %v4069_v47  ;;  %4491 = vmatmul.bf16.gmra.mxu0 %v9731_v63  ;;  %4820 = vmatmul.bf16.gmra.mxu1 %v10565_v5  ;;  %v3473_v2 = vmax.f32 %v3210_v17, 0.0 }
 0x820   :  { %v5328_v29 = vmax.f32 %v4399_v40, 0.0 }
 0x823   :  { %v2882_v44 = vpop.f32.mrf.mxu0  ;;  %v3211_v11 = vpop.f32.mrf.mxu1 }
 0x824   :  { %v3212_v41 = vadd.f32 %v3211_v11, %v2882_v44  ;;  %v4071_v53 = vpop.f32.mrf.mxu2 }
 0x825   :  { %v4400_v0 = vpop.f32.mrf.mxu3 }
 0x826   :  { %v3475_v56 = vmax.f32 %v3212_v41, 0.0  ;;  %v4401_v20 = vadd.f32 %v4400_v0, %v4071_v53 }
 0x828   :  { %v5330_v52 = vmax.f32 %v4401_v20, 0.0  ;;  %4113 = vmatmul.bf16.gmra.mxu2 %v10575_v1  ;;  %v11085_v39 = vpack.c.bf16 %v3475_v56, %v3473_v2 }
 0x82a   :  { %4442 = vmatmul.bf16.gmra.mxu3 %v11085_v39  ;;  %v11088_v63 = vpack.c.bf16 %v5330_v52, %v5328_v29 }
 0x82b   :  { %v2885_v5 = vpop.f32.mrf.mxu0  ;;  %v3214_v4 = vpop.f32.mrf.mxu1 }
 0x82c   :  { %v4074_v46 = vpop.f32.mrf.mxu2  ;;  %v3215_v22 = vadd.f32 %v3214_v4, %v2885_v5 }
 0x82d   :  { %v4403_v51 = vpop.f32.mrf.mxu3 }
 0x82e   :  { %v4404_v61 = vadd.f32 %v4403_v51, %v4074_v46  ;;  %4496 = vmatmul.bf16.gmra.mxu0 %v9744_v25  ;;  %4825 = vmatmul.bf16.gmra.mxu1 %v10573_v38  ;;  %v3477_v11 = vmax.f32 %v3215_v22, 0.0 }
 0x830   :  { %v5332_v0 = vmax.f32 %v4404_v61, 0.0 }
 0x833   :  { %v2887_v47 = vpop.f32.mrf.mxu0  ;;  %v3216_v8 = vpop.f32.mrf.mxu1 }
 0x834   :  { %v3217_v40 = vadd.f32 %v3216_v8, %v2887_v47  ;;  %v4076_v17 = vpop.f32.mrf.mxu2 }
 0x835   :  { %v4405_v44 = vpop.f32.mrf.mxu3 }
 0x836   :  { %v3479_v41 = vmax.f32 %v3217_v40, 0.0  ;;  %v4406_v53 = vadd.f32 %v4405_v44, %v4076_v17 }
 0x838   :  { %v5334_v2 = vmax.f32 %v4406_v53, 0.0  ;;  %4118 = vmatmul.bf16.gmra.mxu2 %v10583_v28  ;;  %v11093_v56 = vpack.c.bf16 %v3479_v41, %v3477_v11 }
 0x83a   :  { %4447 = vmatmul.bf16.gmra.mxu3 %v11093_v56  ;;  %v11096_v25 = vpack.c.bf16 %v5334_v2, %v5332_v0 }
 0x83b   :  { %v2890_v38 = vpop.f32.mrf.mxu0  ;;  %v3219_v20 = vpop.f32.mrf.mxu1 }
 0x83c   :  { %v4079_v29 = vpop.f32.mrf.mxu2  ;;  %v3220_v4 = vadd.f32 %v3219_v20, %v2890_v38 }
 0x83d   :  { %v4408_v52 = vpop.f32.mrf.mxu3 }
 0x83e   :  { %v4409_v5 = vadd.f32 %v4408_v52, %v4079_v29  ;;  %4501 = vmatmul.bf16.gmra.mxu0 %v9757_v62  ;;  %4830 = vmatmul.bf16.gmra.mxu1 %v10581_v43  ;;  %v3481_v8 = vmax.f32 %v3220_v4, 0.0 }
 0x840   :  { %v5336_v44 = vmax.f32 %v4409_v5, 0.0 }
 0x843   :  { %v2892_v46 = vpop.f32.mrf.mxu0  ;;  %v3221_v51 = vpop.f32.mrf.mxu1 }
 0x844   :  { %v3222_v61 = vadd.f32 %v3221_v51, %v2892_v46  ;;  %v4081_v22 = vpop.f32.mrf.mxu2 }
 0x845   :  { %v4410_v47 = vpop.f32.mrf.mxu3 }
 0x846   :  { %v3483_v40 = vmax.f32 %v3222_v61, 0.0  ;;  %v4411_v17 = vadd.f32 %v4410_v47, %v4081_v22 }
 0x848   :  { %v5338_v11 = vmax.f32 %v4411_v17, 0.0  ;;  %4123 = vmatmul.bf16.gmra.mxu2 %v10591_v49  ;;  %v11101_v41 = vpack.c.bf16 %v3483_v40, %v3481_v8 }
 0x84a   :  { %4452 = vmatmul.bf16.gmra.mxu3 %v11101_v41  ;;  %v11104_v62 = vpack.c.bf16 %v5338_v11, %v5336_v44 }
 0x84b   :  { %v2895_v43 = vpop.f32.mrf.mxu0  ;;  %v3224_v53 = vpop.f32.mrf.mxu1 }
 0x84c   :  { %v4084_v0 = vpop.f32.mrf.mxu2  ;;  %v3225_v20 = vadd.f32 %v3224_v53, %v2895_v43 }
 0x84d   :  { %v4413_v2 = vpop.f32.mrf.mxu3 }
 0x84e   :  { %v4414_v38 = vadd.f32 %v4413_v2, %v4084_v0  ;;  %4506 = vmatmul.bf16.gmra.mxu0 %v9770_v32  ;;  %4835 = vmatmul.bf16.gmra.mxu1 %v10589_v13  ;;  %v3485_v51 = vmax.f32 %v3225_v20, 0.0 }
 0x850   :  { %v5340_v47 = vmax.f32 %v4414_v38, 0.0 }
 0x853   :  { %v2897_v29 = vpop.f32.mrf.mxu0  ;;  %v3226_v52 = vpop.f32.mrf.mxu1 }
 0x854   :  { %v3227_v5 = vadd.f32 %v3226_v52, %v2897_v29  ;;  %v4086_v4 = vpop.f32.mrf.mxu2 }
 0x855   :  { %v4415_v46 = vpop.f32.mrf.mxu3 }
 0x856   :  { %v3487_v61 = vmax.f32 %v3227_v5, 0.0  ;;  %v4416_v22 = vadd.f32 %v4415_v46, %v4086_v4 }
 0x858   :  { %v5342_v8 = vmax.f32 %v4416_v22, 0.0  ;;  %4128 = vmatmul.bf16.gmra.mxu2 %v10599_v36  ;;  %v11109_v40 = vpack.c.bf16 %v3487_v61, %v3485_v51 }
 0x85a   :  { %4457 = vmatmul.bf16.gmra.mxu3 %v11109_v40  ;;  %v11112_v32 = vpack.c.bf16 %v5342_v8, %v5340_v47 }
 0x85b   :  { %v2900_v13 = vpop.f32.mrf.mxu0  ;;  %v3229_v17 = vpop.f32.mrf.mxu1 }
 0x85c   :  { %v4089_v44 = vpop.f32.mrf.mxu2  ;;  %v3230_v53 = vadd.f32 %v3229_v17, %v2900_v13  ;;  %v13018_v17 = vld [vmem:[#allocation130_spill] sm:$0xff] }
 0x85d   :  { %v4418_v11 = vpop.f32.mrf.mxu3 }
 0x85e   :  { %v4419_v43 = vadd.f32 %v4418_v11, %v4089_v44  ;;  %4511 = vmatmul.bf16.gmra.mxu0 %v9807_v31  ;;  %4840 = vmatmul.bf16.gmra.mxu1 %v10597_v42  ;;  %v3489_v52 = vmax.f32 %v3230_v53, 0.0  ;;  %v9303_v44 = vld [vmem:[#allocation2 + $0x64] sm:$0xf]  ;;  %v9023_v11 = vld [vmem:[#allocation2 + $0x68] sm:$0xf0] }
 0x85f   :  { %v9319_v53 = vld [vmem:[#allocation2 + $0xe4] sm:$0xf] }
 0x860   :  { %v5344_v46 = vmax.f32 %v4419_v43, 0.0  ;;  %v9026_v43 = vor.u32 %v9303_v44, %v9023_v11 }
 0x862   :  { %6371 = vmatpush.bf16.msrb.mxu0 %v9026_v43 }
 0x863   :  { %v2902_v0 = vpop.f32.mrf.mxu0  ;;  %v3231_v2 = vpop.f32.mrf.mxu1 }
 0x864   :  { %v3232_v38 = vadd.f32 %v3231_v2, %v2902_v0  ;;  %v4091_v20 = vpop.f32.mrf.mxu2  ;;  %v9087_v0 = vld [vmem:[#allocation2 + $0xe8] sm:$0xf0] }
 0x865   :  { %v4420_v29 = vpop.f32.mrf.mxu3 }
 0x866   :  { %v3491_v5 = vmax.f32 %v3232_v38, 0.0  ;;  %v4421_v4 = vadd.f32 %v4420_v29, %v4091_v20  ;;  %v9090_v38 = vor.u32 %v9319_v53, %v9087_v0 }
 0x868   :  { %v5346_v51 = vmax.f32 %v4421_v4, 0.0  ;;  %4133 = vmatmul.bf16.gmra.mxu2 %v10619_v27  ;;  %v11117_v61 = vpack.c.bf16 %v3491_v5, %v3489_v52  ;;  %6700 = vmatpush.bf16.msrb.mxu1 %v9090_v38 }
 0x86a   :  { %4462 = vmatmul.bf16.gmra.mxu3 %v11117_v61  ;;  %v11120_v31 = vpack.c.bf16 %v5346_v51, %v5344_v46 }
 0x86b   :  { %v2905_v42 = vpop.f32.mrf.mxu0  ;;  %v3234_v22 = vpop.f32.mrf.mxu1 }
 0x86c   :  { %v4094_v47 = vpop.f32.mrf.mxu2  ;;  %v3235_v2 = vadd.f32 %v3234_v22, %v2905_v42  ;;  %v9330_v42 = vld [vmem:[%s12409_s5 + $0x38] sm:$0xff] }
 0x86d   :  { %v4423_v8 = vpop.f32.mrf.mxu3  ;;  %v9338_v22 = vld [vmem:[%s12409_s5 + $0x78] sm:$0xff]  ;;  %7540 = vmatpush.bf16.msrb.mxu2 %v9330_v42 }
 0x86e   :  { %v4424_v13 = vadd.f32 %v4423_v8, %v4094_v47  ;;  %4516 = vmatmul.bf16.gmra.mxu0 %v9820_v10  ;;  %4845 = vmatmul.bf16.gmra.mxu1 %v13018_v17  ;;  %v3493_v46 = vmax.f32 %v3235_v2, 0.0 }
 0x86f   :  { %7869 = vmatpush.bf16.msrb.mxu3 %v9338_v22 }
 0x870   :  { %v5348_v10 = vmax.f32 %v4424_v13, 0.0 }
 0x873   :  { %v2907_v20 = vpop.f32.mrf.mxu0  ;;  %v3236_v29 = vpop.f32.mrf.mxu1 }
 0x874   :  { %v3237_v52 = vadd.f32 %v3236_v29, %v2907_v20  ;;  %v4096_v5 = vpop.f32.mrf.mxu2 }
 0x875   :  { %v4425_v4 = vpop.f32.mrf.mxu3 }
 0x876   :  { %v3495_v51 = vmax.f32 %v3237_v52, 0.0  ;;  %v4426_v47 = vadd.f32 %v4425_v4, %v4096_v5 }
 0x878   :  { %v5350_v8 = vmax.f32 %v4426_v47, 0.0  ;;  %4138 = vmatmul.bf16.gmra.mxu2 %v10627_v55  ;;  %v11125_v17 = vpack.c.bf16 %v3495_v51, %v3493_v46 }
 0x87a   :  { %4467 = vmatmul.bf16.gmra.mxu3 %v11125_v17  ;;  %v11134_v44 = vpack.c.bf16 %v5350_v8, %v5348_v10 }
 0x87b   :  { %v2910_v11 = vpop.f32.mrf.mxu0  ;;  %v3239_v43 = vpop.f32.mrf.mxu1 }
 0x87c   :  { %v4099_v13 = vpop.f32.mrf.mxu2  ;;  %v3240_v2 = vadd.f32 %v3239_v43, %v2910_v11 }
 0x87d   :  { %v4428_v53 = vpop.f32.mrf.mxu3 }
 0x87e   :  { %v4429_v0 = vadd.f32 %v4428_v53, %v4099_v13  ;;  %4521 = vmatmul.bf16.gmra.mxu0 %v9833_v54  ;;  %4850 = vmatmul.bf16.gmra.mxu1 %v10625_v21  ;;  %v3497_v4 = vmax.f32 %v3240_v2, 0.0  ;;  %v13021_v13 = vld [vmem:[#allocation131_spill] sm:$0xff] }
 0x880   :  { %v5352_v47 = vmax.f32 %v4429_v0, 0.0 }
 0x883   :  { %v2912_v38 = vpop.f32.mrf.mxu0  ;;  %v3241_v20 = vpop.f32.mrf.mxu1 }
 0x884   :  { %v3242_v29 = vadd.f32 %v3241_v20, %v2912_v38  ;;  %v4101_v52 = vpop.f32.mrf.mxu2 }
 0x885   :  { %v4430_v5 = vpop.f32.mrf.mxu3 }
 0x886   :  { %v3499_v46 = vmax.f32 %v3242_v29, 0.0  ;;  %v4431_v51 = vadd.f32 %v4430_v5, %v4101_v52 }
 0x888   :  { %v5354_v10 = vmax.f32 %v4431_v51, 0.0  ;;  %4143 = vmatmul.bf16.gmra.mxu2 %v10635_v50  ;;  %v11139_v8 = vpack.c.bf16 %v3499_v46, %v3497_v4 }
 0x88a   :  { %13019 = vst [vmem:[#allocation124_spill] sm:$0xff] %v11139_v8  ;;  %4472 = vmatmul.bf16.gmra.mxu3 %v11139_v8  ;;  %v11142_v54 = vpack.c.bf16 %v5354_v10, %v5352_v47  ;;  %v13023_v10 = vld [vmem:[#allocation133_spill] sm:$0xff] }
 0x88b   :  { %v4487_v21 = vpop.f32.mrf.mxu0  ;;  %v4816_v42 = vpop.f32.mrf.mxu1 }
 0x88c   :  { %13020 = vst [vmem:[#allocation125_spill] sm:$0xff] %v11142_v54  ;;  %v4104_v22 = vpop.f32.mrf.mxu2  ;;  %v4817_v53 = vadd.f32 %v4816_v42, %v4487_v21 }
 0x88d   :  { %v4433_v11 = vpop.f32.mrf.mxu3 }
 0x88e   :  { %v4434_v43 = vadd.f32 %v4433_v11, %v4104_v22  ;;  %4526 = vmatmul.bf16.gmra.mxu0 %v9846_v45  ;;  %4855 = vmatmul.bf16.gmra.mxu1 %v13021_v13  ;;  %v5137_v52 = vmax.f32 %v4817_v53, 0.0  ;;  %v13026_v53 = vld [vmem:[#allocation5_spill] sm:$0xff] }
 0x890   :  { %v5356_v46 = vmax.f32 %v4434_v43, 0.0 }
 0x893   :  { %v4489_v0 = vpop.f32.mrf.mxu0  ;;  %v4818_v2 = vpop.f32.mrf.mxu1 }
 0x894   :  { %v4106_v38 = vpop.f32.mrf.mxu2  ;;  %v4819_v20 = vadd.f32 %v4818_v2, %v4489_v0  ;;  %v13025_v0 = vld [vmem:[#allocation8_spill] sm:$0xff] }
 0x895   :  { %v4435_v29 = vpop.f32.mrf.mxu3 }
 0x896   :  { %v5139_v5 = vmax.f32 %v4819_v20, 0.0  ;;  %v4436_v4 = vadd.f32 %v4435_v29, %v4106_v38 }
 0x898   :  { %v11146_v51 = vpack.c.bf16 %v5139_v5, %v5137_v52  ;;  %v5358_v47 = vmax.f32 %v4436_v4, 0.0  ;;  %5720 = vmatmul.bf16.vlgmr.msra.gmra.mxu2 %v13023_v10  ;;  %v13027_v10 = vld [vmem:[#allocation7_spill] sm:$0xff] }
 0x89a   :  { %13022 = vst [vmem:[#allocation127_spill] sm:$0xff] %v11146_v51  ;;  %6049 = vmatmul.bf16.vlgmr.msra.gmra.mxu3 %v11146_v51  ;;  %v11150_v45 = vpack.c.bf16 %v5358_v47, %v5356_v46 }
 0x89b   :  { %v4492_v22 = vpop.f32.mrf.mxu0  ;;  %v4821_v21 = vpop.f32.mrf.mxu1 }
 0x89c   :  { %13024 = vst [vmem:[#allocation128_spill] sm:$0xff] %v11150_v45  ;;  %v4109_v42 = vpop.f32.mrf.mxu2  ;;  %v4822_v2 = vadd.f32 %v4821_v21, %v4492_v22 }
 0x89d   :  { %v4438_v11 = vpop.f32.mrf.mxu3 }
 0x89e   :  { %v4439_v13 = vadd.f32 %v4438_v11, %v4109_v42  ;;  %4531 = vmatmul.bf16.gmra.mxu0 %v13025_v0  ;;  %4860 = vmatmul.bf16.gmra.mxu1 %v13026_v53  ;;  %v5141_v5 = vmax.f32 %v4822_v2, 0.0  ;;  %v13031_v2 = vld [vmem:[#allocation6_spill] sm:$0xff] }
 0x8a0   :  { %v5360_v46 = vmax.f32 %v4439_v13, 0.0 }
 0x8a3   :  { %v4494_v43 = vpop.f32.mrf.mxu0  ;;  %v4823_v38 = vpop.f32.mrf.mxu1 }
 0x8a4   :  { %v4111_v20 = vpop.f32.mrf.mxu2  ;;  %v4824_v29 = vadd.f32 %v4823_v38, %v4494_v43  ;;  %v13030_v43 = vld [vmem:[#allocation11_spill] sm:$0xff] }
 0x8a5   :  { %v4440_v52 = vpop.f32.mrf.mxu3 }
 0x8a6   :  { %v5143_v4 = vmax.f32 %v4824_v29, 0.0  ;;  %v4441_v51 = vadd.f32 %v4440_v52, %v4111_v20 }
 0x8a8   :  { %v5362_v47 = vmax.f32 %v4441_v51, 0.0  ;;  %5725 = vmatmul.bf16.gmra.mxu2 %v13027_v10  ;;  %v11155_v45 = vpack.c.bf16 %v5143_v4, %v5141_v5  ;;  %v13032_v10 = vld [vmem:[#allocation10_spill] sm:$0xff] }
 0x8aa   :  { %13028 = vst [vmem:[#allocation130_spill] sm:$0xff] %v11155_v45  ;;  %6054 = vmatmul.bf16.gmra.mxu3 %v11155_v45  ;;  %v11158_v42 = vpack.c.bf16 %v5362_v47, %v5360_v46 }
 0x8ab   :  { %v4497_v11 = vpop.f32.mrf.mxu0  ;;  %v4826_v22 = vpop.f32.mrf.mxu1 }
 0x8ac   :  { %13029 = vst [vmem:[#allocation131_spill] sm:$0xff] %v11158_v42  ;;  %v4114_v21 = vpop.f32.mrf.mxu2  ;;  %v4827_v38 = vadd.f32 %v4826_v22, %v4497_v11 }
 0x8ad   :  { %v4443_v0 = vpop.f32.mrf.mxu3 }
 0x8ae   :  { %v4444_v53 = vadd.f32 %v4443_v0, %v4114_v21  ;;  %4536 = vmatmul.bf16.gmra.mxu0 %v13030_v43  ;;  %4865 = vmatmul.bf16.gmra.mxu1 %v13031_v2  ;;  %v5145_v5 = vmax.f32 %v4827_v38, 0.0  ;;  %v13036_v38 = vld [vmem:[#allocation9_spill] sm:$0xff] }
 0x8b0   :  { %v5364_v46 = vmax.f32 %v4444_v53, 0.0 }
 0x8b3   :  { %v4499_v13 = vpop.f32.mrf.mxu0  ;;  %v4828_v51 = vpop.f32.mrf.mxu1 }
 0x8b4   :  { %v4116_v20 = vpop.f32.mrf.mxu2  ;;  %v4829_v29 = vadd.f32 %v4828_v51, %v4499_v13  ;;  %v13035_v13 = vld [vmem:[#allocation14_spill] sm:$0xff] }
 0x8b5   :  { %v4445_v52 = vpop.f32.mrf.mxu3 }
 0x8b6   :  { %v5147_v4 = vmax.f32 %v4829_v29, 0.0  ;;  %v4446_v45 = vadd.f32 %v4445_v52, %v4116_v20 }
 0x8b8   :  { %v5366_v47 = vmax.f32 %v4446_v45, 0.0  ;;  %5730 = vmatmul.bf16.gmra.mxu2 %v13032_v10  ;;  %v11163_v42 = vpack.c.bf16 %v5147_v4, %v5145_v5  ;;  %v13037_v10 = vld [vmem:[#allocation13_spill] sm:$0xff] }
 0x8ba   :  { %13033 = vst [vmem:[#allocation8_spill] sm:$0xff] %v11163_v42  ;;  %6059 = vmatmul.bf16.gmra.mxu3 %v11163_v42  ;;  %v11166_v21 = vpack.c.bf16 %v5366_v47, %v5364_v46 }
 0x8bb   :  { %v4502_v0 = vpop.f32.mrf.mxu0  ;;  %v4831_v11 = vpop.f32.mrf.mxu1 }
 0x8bc   :  { %13034 = vst [vmem:[#allocation5_spill] sm:$0xff] %v11166_v21  ;;  %v4119_v22 = vpop.f32.mrf.mxu2  ;;  %v4832_v51 = vadd.f32 %v4831_v11, %v4502_v0 }
 0x8bd   :  { %v4448_v43 = vpop.f32.mrf.mxu3 }
 0x8be   :  { %v4449_v2 = vadd.f32 %v4448_v43, %v4119_v22  ;;  %4541 = vmatmul.bf16.gmra.mxu0 %v13035_v13  ;;  %4870 = vmatmul.bf16.gmra.mxu1 %v13036_v38  ;;  %v5149_v5 = vmax.f32 %v4832_v51, 0.0  ;;  %v13041_v51 = vld [vmem:[#allocation12_spill] sm:$0xff] }
 0x8c0   :  { %v5368_v46 = vmax.f32 %v4449_v2, 0.0 }
 0x8c3   :  { %v4504_v53 = vpop.f32.mrf.mxu0  ;;  %v4833_v45 = vpop.f32.mrf.mxu1 }
 0x8c4   :  { %v4121_v20 = vpop.f32.mrf.mxu2  ;;  %v4834_v29 = vadd.f32 %v4833_v45, %v4504_v53  ;;  %v13040_v53 = vld [vmem:[#allocation17_spill] sm:$0xff] }
 0x8c5   :  { %v4450_v52 = vpop.f32.mrf.mxu3 }
 0x8c6   :  { %v5151_v4 = vmax.f32 %v4834_v29, 0.0  ;;  %v4451_v42 = vadd.f32 %v4450_v52, %v4121_v20 }
 0x8c8   :  { %v5370_v47 = vmax.f32 %v4451_v42, 0.0  ;;  %5735 = vmatmul.bf16.gmra.mxu2 %v13037_v10  ;;  %v11171_v21 = vpack.c.bf16 %v5151_v4, %v5149_v5  ;;  %v13042_v10 = vld [vmem:[#allocation16_spill] sm:$0xff] }
 0x8ca   :  { %13038 = vst [vmem:[#allocation11_spill] sm:$0xff] %v11171_v21  ;;  %6064 = vmatmul.bf16.gmra.mxu3 %v11171_v21  ;;  %v11174_v22 = vpack.c.bf16 %v5370_v47, %v5368_v46 }
 0x8cb   :  { %v4507_v43 = vpop.f32.mrf.mxu0  ;;  %v4836_v0 = vpop.f32.mrf.mxu1 }
 0x8cc   :  { %13039 = vst [vmem:[#allocation6_spill] sm:$0xff] %v11174_v22  ;;  %v4124_v11 = vpop.f32.mrf.mxu2  ;;  %v4837_v45 = vadd.f32 %v4836_v0, %v4507_v43 }
 0x8cd   :  { %v4453_v13 = vpop.f32.mrf.mxu3 }
 0x8ce   :  { %v4454_v38 = vadd.f32 %v4453_v13, %v4124_v11  ;;  %4546 = vmatmul.bf16.gmra.mxu0 %v13040_v53  ;;  %4875 = vmatmul.bf16.gmra.mxu1 %v13041_v51  ;;  %v5153_v5 = vmax.f32 %v4837_v45, 0.0  ;;  %v13046_v45 = vld [vmem:[#allocation15_spill] sm:$0xff] }
 0x8d0   :  { %v5372_v46 = vmax.f32 %v4454_v38, 0.0 }
 0x8d3   :  { %v4509_v2 = vpop.f32.mrf.mxu0  ;;  %v4838_v42 = vpop.f32.mrf.mxu1 }
 0x8d4   :  { %v4126_v20 = vpop.f32.mrf.mxu2  ;;  %v4839_v29 = vadd.f32 %v4838_v42, %v4509_v2  ;;  %v13045_v2 = vld [vmem:[#allocation20_spill] sm:$0xff] }
 0x8d5   :  { %v4455_v52 = vpop.f32.mrf.mxu3 }
 0x8d6   :  { %v5155_v4 = vmax.f32 %v4839_v29, 0.0  ;;  %v4456_v21 = vadd.f32 %v4455_v52, %v4126_v20 }
 0x8d8   :  { %v5374_v47 = vmax.f32 %v4456_v21, 0.0  ;;  %5740 = vmatmul.bf16.gmra.mxu2 %v13042_v10  ;;  %v11179_v22 = vpack.c.bf16 %v5155_v4, %v5153_v5  ;;  %v13047_v10 = vld [vmem:[#allocation19_spill] sm:$0xff] }
 0x8da   :  { %13043 = vst [vmem:[#allocation14_spill] sm:$0xff] %v11179_v22  ;;  %6069 = vmatmul.bf16.gmra.mxu3 %v11179_v22  ;;  %v11182_v11 = vpack.c.bf16 %v5374_v47, %v5372_v46 }
 0x8db   :  { %v4512_v13 = vpop.f32.mrf.mxu0  ;;  %v4841_v43 = vpop.f32.mrf.mxu1 }
 0x8dc   :  { %13044 = vst [vmem:[#allocation9_spill] sm:$0xff] %v11182_v11  ;;  %v4129_v0 = vpop.f32.mrf.mxu2  ;;  %v4842_v42 = vadd.f32 %v4841_v43, %v4512_v13 }
 0x8dd   :  { %v4458_v53 = vpop.f32.mrf.mxu3 }
 0x8de   :  { %v4459_v51 = vadd.f32 %v4458_v53, %v4129_v0  ;;  %4551 = vmatmul.bf16.gmra.mxu0 %v13045_v2  ;;  %4880 = vmatmul.bf16.gmra.mxu1 %v13046_v45  ;;  %v5157_v5 = vmax.f32 %v4842_v42, 0.0  ;;  %v13051_v42 = vld [vmem:[#allocation18_spill] sm:$0xff] }
 0x8e0   :  { %v5376_v46 = vmax.f32 %v4459_v51, 0.0  ;;  %v9015_v51 = vld [vmem:[#allocation2 + $0x58] sm:$0xf0] }
 0x8e3   :  { %v4514_v38 = vpop.f32.mrf.mxu0  ;;  %v4843_v21 = vpop.f32.mrf.mxu1 }
 0x8e4   :  { %v4131_v20 = vpop.f32.mrf.mxu2  ;;  %v4844_v29 = vadd.f32 %v4843_v21, %v4514_v38  ;;  %v13050_v38 = vld [vmem:[#allocation23_spill] sm:$0xff] }
 0x8e5   :  { %v4460_v52 = vpop.f32.mrf.mxu3  ;;  %v9301_v21 = vld [vmem:[#allocation2 + $0x54] sm:$0xf] }
 0x8e6   :  { %v5159_v4 = vmax.f32 %v4844_v29, 0.0  ;;  %v4461_v22 = vadd.f32 %v4460_v52, %v4131_v20  ;;  %v9317_v20 = vld [vmem:[#allocation2 + $0xd4] sm:$0xf]  ;;  %v9079_v29 = vld [vmem:[#allocation2 + $0xd8] sm:$0xf0] }
 0x8e8   :  { %v5378_v47 = vmax.f32 %v4461_v22, 0.0  ;;  %5745 = vmatmul.bf16.gmra.mxu2 %v13047_v10  ;;  %v11187_v11 = vpack.c.bf16 %v5159_v4, %v5157_v5  ;;  %v9018_v22 = vor.u32 %v9301_v21, %v9015_v51  ;;  %v9082_v5 = vor.u32 %v9317_v20, %v9079_v29  ;;  %v13056_v20 = vld [vmem:[#allocation21_spill] sm:$0xff] }
 0x8ea   :  { %13048 = vst [vmem:[#allocation17_spill] sm:$0xff] %v11187_v11  ;;  %6074 = vmatmul.bf16.gmra.mxu3 %v11187_v11  ;;  %v11190_v0 = vpack.c.bf16 %v5378_v47, %v5376_v46  ;;  %6372 = vmatpush.bf16.msrb.mxu0 %v9018_v22  ;;  %v13055_v22 = vld [vmem:[#allocation26_spill] sm:$0xff] }
 0x8eb   :  { %v4517_v53 = vpop.f32.mrf.mxu0  ;;  %v4846_v13 = vpop.f32.mrf.mxu1  ;;  %6701 = vmatpush.bf16.msrb.mxu1 %v9082_v5 }
 0x8ec   :  { %13049 = vst [vmem:[#allocation12_spill] sm:$0xff] %v11190_v0  ;;  %v4134_v43 = vpop.f32.mrf.mxu2  ;;  %v4847_v52 = vadd.f32 %v4846_v13, %v4517_v53  ;;  %v9329_v53 = vld [vmem:[%s12409_s5 + $0x30] sm:$0xff] }
 0x8ed   :  { %v4463_v2 = vpop.f32.mrf.mxu3  ;;  %7541 = vmatpush.bf16.msrb.mxu2 %v9329_v53 }
 0x8ee   :  { %v4464_v45 = vadd.f32 %v4463_v2, %v4134_v43  ;;  %4556 = vmatmul.bf16.gmra.mxu0 %v13050_v38  ;;  %4885 = vmatmul.bf16.gmra.mxu1 %v13051_v42  ;;  %v5161_v0 = vmax.f32 %v4847_v52, 0.0  ;;  %v13052_v42 = vld [vmem:[#allocation22_spill] sm:$0xff] }
 0x8f0   :  { %v5380_v38 = vmax.f32 %v4464_v45, 0.0 }
 0x8f3   :  { %v4519_v4 = vpop.f32.mrf.mxu0  ;;  %v4848_v11 = vpop.f32.mrf.mxu1 }
 0x8f4   :  { %v4136_v46 = vpop.f32.mrf.mxu2  ;;  %v4849_v47 = vadd.f32 %v4848_v11, %v4519_v4  ;;  %v9337_v11 = vld [vmem:[%s12409_s5 + $0x70] sm:$0xff] }
 0x8f5   :  { %v4465_v10 = vpop.f32.mrf.mxu3  ;;  %7870 = vmatpush.bf16.msrb.mxu3 %v9337_v11 }
 0x8f6   :  { %v5163_v43 = vmax.f32 %v4849_v47, 0.0  ;;  %v4466_v2 = vadd.f32 %v4465_v10, %v4136_v46 }
 0x8f8   :  { %v5382_v8 = vmax.f32 %v4466_v2, 0.0  ;;  %5750 = vmatmul.bf16.gmra.mxu2 %v13052_v42  ;;  %v11195_v50 = vpack.c.bf16 %v5163_v43, %v5161_v0  ;;  %v13057_v42 = vld [vmem:[#allocation25_spill] sm:$0xff] }
 0x8fa   :  { %13053 = vst [vmem:[#allocation20_spill] sm:$0xff] %v11195_v50  ;;  %6079 = vmatmul.bf16.gmra.mxu3 %v11195_v50  ;;  %v11204_v13 = vpack.c.bf16 %v5382_v8, %v5380_v38 }
 0x8fb   :  { %v4522_v21 = vpop.f32.mrf.mxu0  ;;  %v4851_v10 = vpop.f32.mrf.mxu1 }
 0x8fc   :  { %13054 = vst [vmem:[#allocation15_spill] sm:$0xff] %v11204_v13  ;;  %v4139_v45 = vpop.f32.mrf.mxu2  ;;  %v4852_v29 = vadd.f32 %v4851_v10, %v4522_v21 }
 0x8fd   :  { %v4468_v51 = vpop.f32.mrf.mxu3 }
 0x8fe   :  { %v4469_v0 = vadd.f32 %v4468_v51, %v4139_v45  ;;  %4561 = vmatmul.bf16.gmra.mxu0 %v13055_v22  ;;  %4890 = vmatmul.bf16.gmra.mxu1 %v13056_v20  ;;  %v5165_v43 = vmax.f32 %v4852_v29, 0.0  ;;  %v13060_v20 = vld [vmem:[#allocation29_spill] sm:$0xff]  ;;  %v13061_v29 = vld [vmem:[#allocation24_spill] sm:$0xff] }
 0x900   :  { %v5384_v38 = vmax.f32 %v4469_v0, 0.0 }
 0x903   :  { %v4524_v52 = vpop.f32.mrf.mxu0  ;;  %v4853_v5 = vpop.f32.mrf.mxu1 }
 0x904   :  { %v4141_v4 = vpop.f32.mrf.mxu2  ;;  %v4854_v46 = vadd.f32 %v4853_v5, %v4524_v52 }
 0x905   :  { %v4470_v47 = vpop.f32.mrf.mxu3 }
 0x906   :  { %v5167_v8 = vmax.f32 %v4854_v46, 0.0  ;;  %v4471_v2 = vadd.f32 %v4470_v47, %v4141_v4 }
 0x908   :  { %v5386_v50 = vmax.f32 %v4471_v2, 0.0  ;;  %5755 = vmatmul.bf16.gmra.mxu2 %v13057_v42  ;;  %v11209_v53 = vpack.c.bf16 %v5167_v8, %v5165_v43 }
 0x90a   :  { %13058 = vst [vmem:[#allocation23_spill] sm:$0xff] %v11209_v53  ;;  %6084 = vmatmul.bf16.gmra.mxu3 %v11209_v53  ;;  %v11212_v11 = vpack.c.bf16 %v5386_v50, %v5384_v38  ;;  %v13062_v53 = vld [vmem:[#allocation28_spill] sm:$0xff] }
 0x90b   :  { %v4527_v45 = vpop.f32.mrf.mxu0  ;;  %v4856_v21 = vpop.f32.mrf.mxu1 }
 0x90c   :  { %13059 = vst [vmem:[#allocation18_spill] sm:$0xff] %v11212_v11  ;;  %v4144_v10 = vpop.f32.mrf.mxu2  ;;  %v4857_v52 = vadd.f32 %v4856_v21, %v4527_v45 }
 0x90d   :  { %v4473_v51 = vpop.f32.mrf.mxu3 }
 0x90e   :  { %v4474_v22 = vadd.f32 %v4473_v51, %v4144_v10  ;;  %4566 = vmatmul.bf16.gmra.mxu0 %v13060_v20  ;;  %4895 = vmatmul.bf16.gmra.mxu1 %v13061_v29  ;;  %v5169_v43 = vmax.f32 %v4857_v52, 0.0  ;;  %v13066_v52 = vld [vmem:[#allocation27_spill] sm:$0xff] }
 0x910   :  { %v5388_v50 = vmax.f32 %v4474_v22, 0.0 }
 0x913   :  { %v4529_v0 = vpop.f32.mrf.mxu0  ;;  %v4858_v5 = vpop.f32.mrf.mxu1 }
 0x914   :  { %v4146_v4 = vpop.f32.mrf.mxu2  ;;  %v4859_v46 = vadd.f32 %v4858_v5, %v4529_v0  ;;  %v13065_v0 = vld [vmem:[#allocation32_spill] sm:$0xff] }
 0x915   :  { %v4475_v47 = vpop.f32.mrf.mxu3 }
 0x916   :  { %v5171_v8 = vmax.f32 %v4859_v46, 0.0  ;;  %v4476_v2 = vadd.f32 %v4475_v47, %v4146_v4 }
 0x918   :  { %v5390_v38 = vmax.f32 %v4476_v2, 0.0  ;;  %5760 = vmatmul.bf16.gmra.mxu2 %v13062_v53  ;;  %v11217_v42 = vpack.c.bf16 %v5171_v8, %v5169_v43  ;;  %v13067_v53 = vld [vmem:[#allocation31_spill] sm:$0xff] }
 0x91a   :  { %13063 = vst [vmem:[#allocation26_spill] sm:$0xff] %v11217_v42  ;;  %6089 = vmatmul.bf16.gmra.mxu3 %v11217_v42  ;;  %v11220_v10 = vpack.c.bf16 %v5390_v38, %v5388_v50 }
 0x91b   :  { %v4532_v51 = vpop.f32.mrf.mxu0  ;;  %v4861_v45 = vpop.f32.mrf.mxu1 }
 0x91c   :  { %13064 = vst [vmem:[#allocation21_spill] sm:$0xff] %v11220_v10  ;;  %v5721_v21 = vpop.f32.mrf.mxu2  ;;  %v4862_v5 = vadd.f32 %v4861_v45, %v4532_v51 }
 0x91d   :  { %v6050_v20 = vpop.f32.mrf.mxu3 }
 0x91e   :  { %v6051_v29 = vadd.f32 %v6050_v20, %v5721_v21  ;;  %4571 = vmatmul.bf16.gmra.mxu0 %v13065_v0  ;;  %4900 = vmatmul.bf16.gmra.mxu1 %v13066_v52  ;;  %v5173_v8 = vmax.f32 %v4862_v5, 0.0  ;;  %v13071_v5 = vld [vmem:[#allocation30_spill] sm:$0xff] }
 0x920   :  { %v7028_v50 = vmax.f32 %v6051_v29, 0.0 }
 0x923   :  { %v4534_v22 = vpop.f32.mrf.mxu0  ;;  %v4863_v4 = vpop.f32.mrf.mxu1 }
 0x924   :  { %v4864_v46 = vadd.f32 %v4863_v4, %v4534_v22  ;;  %v5723_v47 = vpop.f32.mrf.mxu2  ;;  %v13070_v22 = vld [vmem:[#allocation35_spill] sm:$0xff] }
 0x925   :  { %v6052_v43 = vpop.f32.mrf.mxu3 }
 0x926   :  { %v5175_v2 = vmax.f32 %v4864_v46, 0.0  ;;  %v6053_v42 = vadd.f32 %v6052_v43, %v5723_v47 }
 0x928   :  { %v7030_v38 = vmax.f32 %v6053_v42, 0.0  ;;  %5765 = vmatmul.bf16.gmra.mxu2 %v13067_v53  ;;  %v11225_v10 = vpack.c.bf16 %v5175_v2, %v5173_v8  ;;  %v13072_v53 = vld [vmem:[#allocation34_spill] sm:$0xff] }
 0x92a   :  { %13068 = vst [vmem:[#allocation29_spill] sm:$0xff] %v11225_v10  ;;  %v11227_v21 = vpack.c.bf16 %v7030_v38, %v7028_v50  ;;  %6094 = vmatmul.bf16.gmra.mxu3 %v11225_v10 }
 0x92b   :  { %v4537_v20 = vpop.f32.mrf.mxu0  ;;  %v4866_v51 = vpop.f32.mrf.mxu1 }
 0x92c   :  { %13069 = vst [vmem:[#allocation24_spill] sm:$0xff] %v11227_v21  ;;  %v5726_v45 = vpop.f32.mrf.mxu2  ;;  %v4867_v4 = vadd.f32 %v4866_v51, %v4537_v20 }
 0x92d   :  { %v6055_v0 = vpop.f32.mrf.mxu3 }
 0x92e   :  { %v6056_v52 = vadd.f32 %v6055_v0, %v5726_v45  ;;  %4576 = vmatmul.bf16.gmra.mxu0 %v13070_v22  ;;  %4905 = vmatmul.bf16.gmra.mxu1 %v13071_v5  ;;  %v5177_v8 = vmax.f32 %v4867_v4, 0.0  ;;  %v13076_v4 = vld [vmem:[#allocation33_spill] sm:$0xff] }
 0x930   :  { %v7032_v38 = vmax.f32 %v6056_v52, 0.0 }
 0x933   :  { %v4539_v29 = vpop.f32.mrf.mxu0  ;;  %v4868_v42 = vpop.f32.mrf.mxu1 }
 0x934   :  { %v4869_v46 = vadd.f32 %v4868_v42, %v4539_v29  ;;  %v5728_v47 = vpop.f32.mrf.mxu2  ;;  %v13075_v29 = vld [vmem:[#allocation38_spill] sm:$0xff] }
 0x935   :  { %v6057_v43 = vpop.f32.mrf.mxu3 }
 0x936   :  { %v5179_v2 = vmax.f32 %v4869_v46, 0.0  ;;  %v6058_v50 = vadd.f32 %v6057_v43, %v5728_v47 }
 0x938   :  { %v7034_v10 = vmax.f32 %v6058_v50, 0.0  ;;  %5770 = vmatmul.bf16.gmra.mxu2 %v13072_v53  ;;  %v11233_v21 = vpack.c.bf16 %v5179_v2, %v5177_v8  ;;  %v13077_v53 = vld [vmem:[#allocation37_spill] sm:$0xff] }
 0x93a   :  { %13073 = vst [vmem:[#allocation32_spill] sm:$0xff] %v11233_v21  ;;  %6099 = vmatmul.bf16.gmra.mxu3 %v11233_v21  ;;  %v11236_v45 = vpack.c.bf16 %v7034_v10, %v7032_v38 }
 0x93b   :  { %v4542_v0 = vpop.f32.mrf.mxu0  ;;  %v4871_v20 = vpop.f32.mrf.mxu1 }
 0x93c   :  { %13074 = vst [vmem:[#allocation27_spill] sm:$0xff] %v11236_v45  ;;  %v5731_v51 = vpop.f32.mrf.mxu2  ;;  %v4872_v42 = vadd.f32 %v4871_v20, %v4542_v0 }
 0x93d   :  { %v6060_v22 = vpop.f32.mrf.mxu3 }
 0x93e   :  { %v6061_v5 = vadd.f32 %v6060_v22, %v5731_v51  ;;  %4581 = vmatmul.bf16.gmra.mxu0 %v13075_v29  ;;  %4910 = vmatmul.bf16.gmra.mxu1 %v13076_v4  ;;  %v5181_v2 = vmax.f32 %v4872_v42, 0.0  ;;  %v13081_v42 = vld [vmem:[#allocation36_spill] sm:$0xff] }
 0x940   :  { %v7036_v10 = vmax.f32 %v6061_v5, 0.0 }
 0x943   :  { %v4544_v52 = vpop.f32.mrf.mxu0  ;;  %v4873_v46 = vpop.f32.mrf.mxu1 }
 0x944   :  { %v4874_v47 = vadd.f32 %v4873_v46, %v4544_v52  ;;  %v5733_v43 = vpop.f32.mrf.mxu2  ;;  %v13080_v52 = vld [vmem:[#allocation41_spill] sm:$0xff] }
 0x945   :  { %v6062_v8 = vpop.f32.mrf.mxu3 }
 0x946   :  { %v5183_v50 = vmax.f32 %v4874_v47, 0.0  ;;  %v6063_v21 = vadd.f32 %v6062_v8, %v5733_v43 }
 0x948   :  { %v7038_v38 = vmax.f32 %v6063_v21, 0.0  ;;  %5775 = vmatmul.bf16.gmra.mxu2 %v13077_v53  ;;  %v11241_v45 = vpack.c.bf16 %v5183_v50, %v5181_v2  ;;  %v13082_v53 = vld [vmem:[#allocation40_spill] sm:$0xff] }
 0x94a   :  { %13078 = vst [vmem:[#allocation35_spill] sm:$0xff] %v11241_v45  ;;  %6104 = vmatmul.bf16.gmra.mxu3 %v11241_v45  ;;  %v11244_v51 = vpack.c.bf16 %v7038_v38, %v7036_v10 }
 0x94b   :  { %v4547_v22 = vpop.f32.mrf.mxu0  ;;  %v4876_v0 = vpop.f32.mrf.mxu1 }
 0x94c   :  { %13079 = vst [vmem:[#allocation30_spill] sm:$0xff] %v11244_v51  ;;  %v5736_v20 = vpop.f32.mrf.mxu2  ;;  %v4877_v46 = vadd.f32 %v4876_v0, %v4547_v22 }
 0x94d   :  { %v6065_v29 = vpop.f32.mrf.mxu3 }
 0x94e   :  { %v6066_v4 = vadd.f32 %v6065_v29, %v5736_v20  ;;  %4586 = vmatmul.bf16.gmra.mxu0 %v13080_v52  ;;  %4915 = vmatmul.bf16.gmra.mxu1 %v13081_v42  ;;  %v5185_v2 = vmax.f32 %v4877_v46, 0.0  ;;  %v13086_v46 = vld [vmem:[#allocation39_spill] sm:$0xff] }
 0x950   :  { %v7040_v10 = vmax.f32 %v6066_v4, 0.0 }
 0x953   :  { %v4549_v5 = vpop.f32.mrf.mxu0  ;;  %v4878_v21 = vpop.f32.mrf.mxu1 }
 0x954   :  { %v4879_v47 = vadd.f32 %v4878_v21, %v4549_v5  ;;  %v5738_v43 = vpop.f32.mrf.mxu2  ;;  %v13085_v5 = vld [vmem:[#allocation44_spill] sm:$0xff] }
 0x955   :  { %v6067_v8 = vpop.f32.mrf.mxu3 }
 0x956   :  { %v5187_v50 = vmax.f32 %v4879_v47, 0.0  ;;  %v6068_v45 = vadd.f32 %v6067_v8, %v5738_v43 }
 0x958   :  { %v7042_v38 = vmax.f32 %v6068_v45, 0.0  ;;  %5780 = vmatmul.bf16.gmra.mxu2 %v13082_v53  ;;  %v11249_v51 = vpack.c.bf16 %v5187_v50, %v5185_v2  ;;  %v13087_v53 = vld [vmem:[#allocation43_spill] sm:$0xff] }
 0x95a   :  { %13083 = vst [vmem:[#allocation38_spill] sm:$0xff] %v11249_v51  ;;  %6109 = vmatmul.bf16.gmra.mxu3 %v11249_v51  ;;  %v11252_v20 = vpack.c.bf16 %v7042_v38, %v7040_v10 }
 0x95b   :  { %v4552_v29 = vpop.f32.mrf.mxu0  ;;  %v4881_v22 = vpop.f32.mrf.mxu1 }
 0x95c   :  { %13084 = vst [vmem:[#allocation33_spill] sm:$0xff] %v11252_v20  ;;  %v5741_v0 = vpop.f32.mrf.mxu2  ;;  %v4882_v21 = vadd.f32 %v4881_v22, %v4552_v29 }
 0x95d   :  { %v6070_v52 = vpop.f32.mrf.mxu3 }
 0x95e   :  { %v6071_v42 = vadd.f32 %v6070_v52, %v5741_v0  ;;  %4591 = vmatmul.bf16.gmra.mxu0 %v13085_v5  ;;  %4920 = vmatmul.bf16.gmra.mxu1 %v13086_v46  ;;  %v5189_v2 = vmax.f32 %v4882_v21, 0.0  ;;  %v13091_v21 = vld [vmem:[#allocation42_spill] sm:$0xff] }
 0x960   :  { %v7044_v10 = vmax.f32 %v6071_v42, 0.0  ;;  %v9007_v42 = vld [vmem:[#allocation2 + $0x48] sm:$0xf0] }
 0x963   :  { %v4554_v4 = vpop.f32.mrf.mxu0  ;;  %v4883_v45 = vpop.f32.mrf.mxu1 }
 0x964   :  { %v4884_v47 = vadd.f32 %v4883_v45, %v4554_v4  ;;  %v5743_v43 = vpop.f32.mrf.mxu2  ;;  %v13090_v4 = vld [vmem:[#allocation47_spill] sm:$0xff]  ;;  %v9299_v45 = vld [vmem:[#allocation2 + $0x44] sm:$0xf] }
 0x965   :  { %v6072_v8 = vpop.f32.mrf.mxu3 }
 0x966   :  { %v5191_v50 = vmax.f32 %v4884_v47, 0.0  ;;  %v6073_v51 = vadd.f32 %v6072_v8, %v5743_v43  ;;  %v9315_v47 = vld [vmem:[#allocation2 + $0xc4] sm:$0xf]  ;;  %v9071_v43 = vld [vmem:[#allocation2 + $0xc8] sm:$0xf0] }
 0x968   :  { %v7046_v38 = vmax.f32 %v6073_v51, 0.0  ;;  %5785 = vmatmul.bf16.gmra.mxu2 %v13087_v53  ;;  %v11257_v20 = vpack.c.bf16 %v5191_v50, %v5189_v2  ;;  %v9010_v51 = vor.u32 %v9299_v45, %v9007_v42  ;;  %v9074_v2 = vor.u32 %v9315_v47, %v9071_v43  ;;  %v13096_v47 = vld [vmem:[#allocation45_spill] sm:$0xff] }
 0x96a   :  { %13088 = vst [vmem:[#allocation41_spill] sm:$0xff] %v11257_v20  ;;  %6114 = vmatmul.bf16.gmra.mxu3 %v11257_v20  ;;  %v11260_v0 = vpack.c.bf16 %v7046_v38, %v7044_v10  ;;  %6373 = vmatpush.bf16.msrb.mxu0 %v9010_v51  ;;  %v13095_v51 = vld [vmem:[#allocation50_spill] sm:$0xff] }
 0x96b   :  { %v4557_v52 = vpop.f32.mrf.mxu0  ;;  %v4886_v29 = vpop.f32.mrf.mxu1  ;;  %6702 = vmatpush.bf16.msrb.mxu1 %v9074_v2 }
 0x96c   :  { %13089 = vst [vmem:[#allocation36_spill] sm:$0xff] %v11260_v0  ;;  %v5746_v22 = vpop.f32.mrf.mxu2  ;;  %v4887_v8 = vadd.f32 %v4886_v29, %v4557_v52  ;;  %v9328_v52 = vld [vmem:[%s12409_s5 + $0x28] sm:$0xff] }
 0x96d   :  { %v6075_v5 = vpop.f32.mrf.mxu3  ;;  %7542 = vmatpush.bf16.msrb.mxu2 %v9328_v52 }
 0x96e   :  { %v6076_v46 = vadd.f32 %v6075_v5, %v5746_v22  ;;  %4596 = vmatmul.bf16.gmra.mxu0 %v13090_v4  ;;  %4925 = vmatmul.bf16.gmra.mxu1 %v13091_v21  ;;  %v5193_v0 = vmax.f32 %v4887_v8, 0.0  ;;  %v13092_v21 = vld [vmem:[#allocation46_spill] sm:$0xff] }
 0x970   :  { %v7048_v4 = vmax.f32 %v6076_v46, 0.0 }
 0x973   :  { %v4559_v50 = vpop.f32.mrf.mxu0  ;;  %v4888_v20 = vpop.f32.mrf.mxu1 }
 0x974   :  { %v4889_v10 = vadd.f32 %v4888_v20, %v4559_v50  ;;  %v5748_v38 = vpop.f32.mrf.mxu2  ;;  %v9336_v20 = vld [vmem:[%s12409_s5 + $0x68] sm:$0xff] }
 0x975   :  { %v6077_v53 = vpop.f32.mrf.mxu3  ;;  %7871 = vmatpush.bf16.msrb.mxu3 %v9336_v20 }
 0x976   :  { %v5195_v22 = vmax.f32 %v4889_v10, 0.0  ;;  %v6078_v5 = vadd.f32 %v6077_v53, %v5748_v38 }
 0x978   :  { %v7050_v11 = vmax.f32 %v6078_v5, 0.0  ;;  %5790 = vmatmul.bf16.gmra.mxu2 %v13092_v21  ;;  %v11265_v13 = vpack.c.bf16 %v5195_v22, %v5193_v0  ;;  %v13097_v21 = vld [vmem:[#allocation49_spill] sm:$0xff] }
 0x97a   :  { %13093 = vst [vmem:[#allocation44_spill] sm:$0xff] %v11265_v13  ;;  %6119 = vmatmul.bf16.gmra.mxu3 %v11265_v13  ;;  %v11274_v29 = vpack.c.bf16 %v7050_v11, %v7048_v4 }
 0x97b   :  { %v4562_v45 = vpop.f32.mrf.mxu0  ;;  %v4891_v53 = vpop.f32.mrf.mxu1 }
 0x97c   :  { %13094 = vst [vmem:[#allocation39_spill] sm:$0xff] %v11274_v29  ;;  %v5751_v46 = vpop.f32.mrf.mxu2  ;;  %v4892_v43 = vadd.f32 %v4891_v53, %v4562_v45 }
 0x97d   :  { %v6080_v42 = vpop.f32.mrf.mxu3 }
 0x97e   :  { %v6081_v0 = vadd.f32 %v6080_v42, %v5751_v46  ;;  %4601 = vmatmul.bf16.gmra.mxu0 %v13095_v51  ;;  %4930 = vmatmul.bf16.gmra.mxu1 %v13096_v47  ;;  %v5197_v22 = vmax.f32 %v4892_v43, 0.0  ;;  %v13100_v47 = vld [vmem:[#allocation53_spill] sm:$0xff]  ;;  %v13101_v43 = vld [vmem:[#allocation48_spill] sm:$0xff] }
 0x980   :  { %v7052_v4 = vmax.f32 %v6081_v0, 0.0 }
 0x983   :  { %v4564_v8 = vpop.f32.mrf.mxu0  ;;  %v4893_v2 = vpop.f32.mrf.mxu1 }
 0x984   :  { %v4894_v50 = vadd.f32 %v4893_v2, %v4564_v8  ;;  %v5753_v10 = vpop.f32.mrf.mxu2 }
 0x985   :  { %v6082_v38 = vpop.f32.mrf.mxu3 }
 0x986   :  { %v5199_v11 = vmax.f32 %v4894_v50, 0.0  ;;  %v6083_v5 = vadd.f32 %v6082_v38, %v5753_v10 }
 0x988   :  { %v7054_v13 = vmax.f32 %v6083_v5, 0.0  ;;  %5795 = vmatmul.bf16.gmra.mxu2 %v13097_v21  ;;  %v11279_v52 = vpack.c.bf16 %v5199_v11, %v5197_v22 }
 0x98a   :  { %13098 = vst [vmem:[#allocation47_spill] sm:$0xff] %v11279_v52  ;;  %6124 = vmatmul.bf16.gmra.mxu3 %v11279_v52  ;;  %v11282_v20 = vpack.c.bf16 %v7054_v13, %v7052_v4  ;;  %v13102_v52 = vld [vmem:[#allocation52_spill] sm:$0xff] }
 0x98b   :  { %v4567_v46 = vpop.f32.mrf.mxu0  ;;  %v4896_v45 = vpop.f32.mrf.mxu1 }
 0x98c   :  { %13099 = vst [vmem:[#allocation42_spill] sm:$0xff] %v11282_v20  ;;  %v5756_v53 = vpop.f32.mrf.mxu2  ;;  %v4897_v8 = vadd.f32 %v4896_v45, %v4567_v46 }
 0x98d   :  { %v6085_v42 = vpop.f32.mrf.mxu3 }
 0x98e   :  { %v6086_v51 = vadd.f32 %v6085_v42, %v5756_v53  ;;  %4606 = vmatmul.bf16.gmra.mxu0 %v13100_v47  ;;  %4935 = vmatmul.bf16.gmra.mxu1 %v13101_v43  ;;  %v5201_v22 = vmax.f32 %v4897_v8, 0.0  ;;  %v13106_v8 = vld [vmem:[#allocation51_spill] sm:$0xff] }
 0x990   :  { %v7056_v13 = vmax.f32 %v6086_v51, 0.0 }
 0x993   :  { %v4569_v0 = vpop.f32.mrf.mxu0  ;;  %v4898_v2 = vpop.f32.mrf.mxu1 }
 0x994   :  { %v4899_v50 = vadd.f32 %v4898_v2, %v4569_v0  ;;  %v5758_v10 = vpop.f32.mrf.mxu2  ;;  %v13105_v0 = vld [vmem:[#allocation56_spill] sm:$0xff] }
 0x995   :  { %v6087_v38 = vpop.f32.mrf.mxu3 }
 0x996   :  { %v5203_v11 = vmax.f32 %v4899_v50, 0.0  ;;  %v6088_v5 = vadd.f32 %v6087_v38, %v5758_v10 }
 0x998   :  { %v7058_v4 = vmax.f32 %v6088_v5, 0.0  ;;  %5800 = vmatmul.bf16.gmra.mxu2 %v13102_v52  ;;  %v11287_v21 = vpack.c.bf16 %v5203_v11, %v5201_v22  ;;  %v13107_v52 = vld [vmem:[#allocation55_spill] sm:$0xff] }
 0x99a   :  { %13103 = vst [vmem:[#allocation50_spill] sm:$0xff] %v11287_v21  ;;  %6129 = vmatmul.bf16.gmra.mxu3 %v11287_v21  ;;  %v11290_v53 = vpack.c.bf16 %v7058_v4, %v7056_v13 }
 0x99b   :  { %v4572_v42 = vpop.f32.mrf.mxu0  ;;  %v4901_v46 = vpop.f32.mrf.mxu1 }
 0x99c   :  { %13104 = vst [vmem:[#allocation45_spill] sm:$0xff] %v11290_v53  ;;  %v5761_v45 = vpop.f32.mrf.mxu2  ;;  %v4902_v2 = vadd.f32 %v4901_v46, %v4572_v42 }
 0x99d   :  { %v6090_v47 = vpop.f32.mrf.mxu3 }
 0x99e   :  { %v6091_v43 = vadd.f32 %v6090_v47, %v5761_v45  ;;  %4611 = vmatmul.bf16.gmra.mxu0 %v13105_v0  ;;  %4940 = vmatmul.bf16.gmra.mxu1 %v13106_v8  ;;  %v5205_v11 = vmax.f32 %v4902_v2, 0.0  ;;  %v13111_v2 = vld [vmem:[#allocation54_spill] sm:$0xff] }
 0x9a0   :  { %v7060_v13 = vmax.f32 %v6091_v43, 0.0 }
 0x9a3   :  { %v4574_v51 = vpop.f32.mrf.mxu0  ;;  %v4903_v50 = vpop.f32.mrf.mxu1 }
 0x9a4   :  { %v4904_v10 = vadd.f32 %v4903_v50, %v4574_v51  ;;  %v5763_v38 = vpop.f32.mrf.mxu2  ;;  %v13110_v51 = vld [vmem:[#allocation59_spill] sm:$0xff] }
 0x9a5   :  { %v6092_v22 = vpop.f32.mrf.mxu3 }
 0x9a6   :  { %v5207_v5 = vmax.f32 %v4904_v10, 0.0  ;;  %v6093_v21 = vadd.f32 %v6092_v22, %v5763_v38 }
 0x9a8   :  { %v7062_v4 = vmax.f32 %v6093_v21, 0.0  ;;  %5805 = vmatmul.bf16.gmra.mxu2 %v13107_v52  ;;  %v11295_v53 = vpack.c.bf16 %v5207_v5, %v5205_v11  ;;  %v13112_v52 = vld [vmem:[#allocation58_spill] sm:$0xff] }
 0x9aa   :  { %13108 = vst [vmem:[#allocation53_spill] sm:$0xff] %v11295_v53  ;;  %6134 = vmatmul.bf16.gmra.mxu3 %v11295_v53  ;;  %v11298_v45 = vpack.c.bf16 %v7062_v4, %v7060_v13 }
 0x9ab   :  { %v4577_v47 = vpop.f32.mrf.mxu0  ;;  %v4906_v42 = vpop.f32.mrf.mxu1 }
 0x9ac   :  { %13109 = vst [vmem:[#allocation48_spill] sm:$0xff] %v11298_v45  ;;  %v5766_v46 = vpop.f32.mrf.mxu2  ;;  %v4907_v50 = vadd.f32 %v4906_v42, %v4577_v47 }
 0x9ad   :  { %v6095_v0 = vpop.f32.mrf.mxu3 }
 0x9ae   :  { %v6096_v8 = vadd.f32 %v6095_v0, %v5766_v46  ;;  %4616 = vmatmul.bf16.gmra.mxu0 %v13110_v51  ;;  %4945 = vmatmul.bf16.gmra.mxu1 %v13111_v2  ;;  %v5209_v11 = vmax.f32 %v4907_v50, 0.0  ;;  %v13116_v50 = vld [vmem:[#allocation57_spill] sm:$0xff] }
 0x9b0   :  { %v7064_v13 = vmax.f32 %v6096_v8, 0.0 }
 0x9b3   :  { %v4579_v43 = vpop.f32.mrf.mxu0  ;;  %v4908_v21 = vpop.f32.mrf.mxu1 }
 0x9b4   :  { %v4909_v10 = vadd.f32 %v4908_v21, %v4579_v43  ;;  %v5768_v38 = vpop.f32.mrf.mxu2  ;;  %v13115_v43 = vld [vmem:[#allocation62_spill] sm:$0xff] }
 0x9b5   :  { %v6097_v22 = vpop.f32.mrf.mxu3 }
 0x9b6   :  { %v5211_v5 = vmax.f32 %v4909_v10, 0.0  ;;  %v6098_v53 = vadd.f32 %v6097_v22, %v5768_v38 }
 0x9b8   :  { %v7066_v4 = vmax.f32 %v6098_v53, 0.0  ;;  %5810 = vmatmul.bf16.gmra.mxu2 %v13112_v52  ;;  %v11303_v45 = vpack.c.bf16 %v5211_v5, %v5209_v11  ;;  %v13117_v52 = vld [vmem:[#allocation61_spill] sm:$0xff] }
 0x9ba   :  { %13113 = vst [vmem:[#allocation56_spill] sm:$0xff] %v11303_v45  ;;  %6139 = vmatmul.bf16.gmra.mxu3 %v11303_v45  ;;  %v11306_v46 = vpack.c.bf16 %v7066_v4, %v7064_v13 }
 0x9bb   :  { %v4582_v0 = vpop.f32.mrf.mxu0  ;;  %v4911_v47 = vpop.f32.mrf.mxu1 }
 0x9bc   :  { %13114 = vst [vmem:[#allocation51_spill] sm:$0xff] %v11306_v46  ;;  %v5771_v42 = vpop.f32.mrf.mxu2  ;;  %v4912_v21 = vadd.f32 %v4911_v47, %v4582_v0 }
 0x9bd   :  { %v6100_v51 = vpop.f32.mrf.mxu3 }
 0x9be   :  { %v6101_v2 = vadd.f32 %v6100_v51, %v5771_v42  ;;  %4621 = vmatmul.bf16.gmra.mxu0 %v13115_v43  ;;  %4950 = vmatmul.bf16.gmra.mxu1 %v13116_v50  ;;  %v5213_v11 = vmax.f32 %v4912_v21, 0.0  ;;  %v13121_v21 = vld [vmem:[#allocation60_spill] sm:$0xff] }
 0x9c0   :  { %v7068_v13 = vmax.f32 %v6101_v2, 0.0 }
 0x9c3   :  { %v4584_v8 = vpop.f32.mrf.mxu0  ;;  %v4913_v53 = vpop.f32.mrf.mxu1 }
 0x9c4   :  { %v4914_v10 = vadd.f32 %v4913_v53, %v4584_v8  ;;  %v5773_v38 = vpop.f32.mrf.mxu2  ;;  %v13120_v8 = vld [vmem:[#allocation65_spill] sm:$0xff] }
 0x9c5   :  { %v6102_v22 = vpop.f32.mrf.mxu3 }
 0x9c6   :  { %v5215_v5 = vmax.f32 %v4914_v10, 0.0  ;;  %v6103_v45 = vadd.f32 %v6102_v22, %v5773_v38 }
 0x9c8   :  { %v7070_v4 = vmax.f32 %v6103_v45, 0.0  ;;  %5815 = vmatmul.bf16.gmra.mxu2 %v13117_v52  ;;  %v11311_v46 = vpack.c.bf16 %v5215_v5, %v5213_v11  ;;  %v13122_v52 = vld [vmem:[#allocation64_spill] sm:$0xff] }
 0x9ca   :  { %13118 = vst [vmem:[#allocation59_spill] sm:$0xff] %v11311_v46  ;;  %6144 = vmatmul.bf16.gmra.mxu3 %v11311_v46  ;;  %v11314_v42 = vpack.c.bf16 %v7070_v4, %v7068_v13 }
 0x9cb   :  { %v4587_v51 = vpop.f32.mrf.mxu0  ;;  %v4916_v0 = vpop.f32.mrf.mxu1 }
 0x9cc   :  { %13119 = vst [vmem:[#allocation54_spill] sm:$0xff] %v11314_v42  ;;  %v5776_v47 = vpop.f32.mrf.mxu2  ;;  %v4917_v53 = vadd.f32 %v4916_v0, %v4587_v51 }
 0x9cd   :  { %v6105_v43 = vpop.f32.mrf.mxu3 }
 0x9ce   :  { %v6106_v50 = vadd.f32 %v6105_v43, %v5776_v47  ;;  %4626 = vmatmul.bf16.gmra.mxu0 %v13120_v8  ;;  %4955 = vmatmul.bf16.gmra.mxu1 %v13121_v21  ;;  %v5217_v11 = vmax.f32 %v4917_v53, 0.0  ;;  %v13126_v53 = vld [vmem:[#allocation63_spill] sm:$0xff] }
 0x9d0   :  { %v7072_v13 = vmax.f32 %v6106_v50, 0.0 }
 0x9d3   :  { %v4589_v2 = vpop.f32.mrf.mxu0  ;;  %v4918_v45 = vpop.f32.mrf.mxu1 }
 0x9d4   :  { %v4919_v10 = vadd.f32 %v4918_v45, %v4589_v2  ;;  %v5778_v38 = vpop.f32.mrf.mxu2  ;;  %v13125_v2 = vld [vmem:[#allocation68_spill] sm:$0xff] }
 0x9d5   :  { %v6107_v22 = vpop.f32.mrf.mxu3 }
 0x9d6   :  { %v5219_v5 = vmax.f32 %v4919_v10, 0.0  ;;  %v6108_v46 = vadd.f32 %v6107_v22, %v5778_v38 }
 0x9d8   :  { %v7074_v4 = vmax.f32 %v6108_v46, 0.0  ;;  %5820 = vmatmul.bf16.gmra.mxu2 %v13122_v52  ;;  %v11319_v42 = vpack.c.bf16 %v5219_v5, %v5217_v11  ;;  %v13127_v52 = vld [vmem:[#allocation67_spill] sm:$0xff] }
 0x9da   :  { %13123 = vst [vmem:[#allocation62_spill] sm:$0xff] %v11319_v42  ;;  %6149 = vmatmul.bf16.gmra.mxu3 %v11319_v42  ;;  %v11322_v47 = vpack.c.bf16 %v7074_v4, %v7072_v13 }
 0x9db   :  { %v4592_v43 = vpop.f32.mrf.mxu0  ;;  %v4921_v51 = vpop.f32.mrf.mxu1 }
 0x9dc   :  { %13124 = vst [vmem:[#allocation57_spill] sm:$0xff] %v11322_v47  ;;  %v5781_v0 = vpop.f32.mrf.mxu2  ;;  %v4922_v45 = vadd.f32 %v4921_v51, %v4592_v43 }
 0x9dd   :  { %v6110_v8 = vpop.f32.mrf.mxu3 }
 0x9de   :  { %v6111_v21 = vadd.f32 %v6110_v8, %v5781_v0  ;;  %4631 = vmatmul.bf16.gmra.mxu0 %v13125_v2  ;;  %4960 = vmatmul.bf16.gmra.mxu1 %v13126_v53  ;;  %v5221_v11 = vmax.f32 %v4922_v45, 0.0  ;;  %v13131_v45 = vld [vmem:[#allocation66_spill] sm:$0xff] }
 0x9e0   :  { %v7076_v13 = vmax.f32 %v6111_v21, 0.0  ;;  %v8999_v21 = vld [vmem:[#allocation2 + $0x38] sm:$0xf0] }
 0x9e3   :  { %v4594_v50 = vpop.f32.mrf.mxu0  ;;  %v4923_v46 = vpop.f32.mrf.mxu1 }
 0x9e4   :  { %v4924_v10 = vadd.f32 %v4923_v46, %v4594_v50  ;;  %v5783_v38 = vpop.f32.mrf.mxu2  ;;  %v13130_v50 = vld [vmem:[#allocation71_spill] sm:$0xff] }
 0x9e5   :  { %v6112_v22 = vpop.f32.mrf.mxu3  ;;  %v9297_v46 = vld [vmem:[#allocation2 + $0x34] sm:$0xf] }
 0x9e6   :  { %v5223_v5 = vmax.f32 %v4924_v10, 0.0  ;;  %v6113_v42 = vadd.f32 %v6112_v22, %v5783_v38  ;;  %v9313_v10 = vld [vmem:[#allocation2 + $0xb4] sm:$0xf]  ;;  %v9063_v38 = vld [vmem:[#allocation2 + $0xb8] sm:$0xf0] }
 0x9e8   :  { %v7078_v4 = vmax.f32 %v6113_v42, 0.0  ;;  %5825 = vmatmul.bf16.gmra.mxu2 %v13127_v52  ;;  %v11327_v47 = vpack.c.bf16 %v5223_v5, %v5221_v11  ;;  %v9002_v42 = vor.u32 %v9297_v46, %v8999_v21  ;;  %v9066_v11 = vor.u32 %v9313_v10, %v9063_v38  ;;  %v13135_v10 = vld [vmem:[#allocation69_spill] sm:$0xff] }
 0x9ea   :  { %13128 = vst [vmem:[#allocation65_spill] sm:$0xff] %v11327_v47  ;;  %6154 = vmatmul.bf16.gmra.mxu3 %v11327_v47  ;;  %v11330_v0 = vpack.c.bf16 %v7078_v4, %v7076_v13  ;;  %6374 = vmatpush.bf16.msrb.mxu0 %v9002_v42  ;;  %v13134_v42 = vld [vmem:[#allocation74_spill] sm:$0xff] }
 0x9eb   :  { %v4597_v8 = vpop.f32.mrf.mxu0  ;;  %v4926_v43 = vpop.f32.mrf.mxu1  ;;  %6703 = vmatpush.bf16.msrb.mxu1 %v9066_v11 }
 0x9ec   :  { %13129 = vst [vmem:[#allocation60_spill] sm:$0xff] %v11330_v0  ;;  %v5786_v51 = vpop.f32.mrf.mxu2  ;;  %v4927_v22 = vadd.f32 %v4926_v43, %v4597_v8  ;;  %v9327_v8 = vld [vmem:[%s12409_s5 + $0x20] sm:$0xff] }
 0x9ed   :  { %v6115_v2 = vpop.f32.mrf.mxu3  ;;  %7543 = vmatpush.bf16.msrb.mxu2 %v9327_v8 }
 0x9ee   :  { %v6116_v53 = vadd.f32 %v6115_v2, %v5786_v51  ;;  %4636 = vmatmul.bf16.gmra.mxu0 %v13130_v50  ;;  %4965 = vmatmul.bf16.gmra.mxu1 %v13131_v45  ;;  %v5225_v0 = vmax.f32 %v4927_v22, 0.0  ;;  %v13132_v45 = vld [vmem:[#allocation70_spill] sm:$0xff] }
 0x9f0   :  { %v7080_v50 = vmax.f32 %v6116_v53, 0.0 }
 0x9f3   :  { %v4599_v5 = vpop.f32.mrf.mxu0  ;;  %v4928_v47 = vpop.f32.mrf.mxu1 }
 0x9f4   :  { %v4929_v13 = vadd.f32 %v4928_v47, %v4599_v5  ;;  %v5788_v4 = vpop.f32.mrf.mxu2  ;;  %v9335_v47 = vld [vmem:[%s12409_s5 + $0x60] sm:$0xff] }
 0x9f5   :  { %v6117_v52 = vpop.f32.mrf.mxu3  ;;  %7872 = vmatpush.bf16.msrb.mxu3 %v9335_v47 }
 0x9f6   :  { %v5227_v51 = vmax.f32 %v4929_v13, 0.0  ;;  %v6118_v2 = vadd.f32 %v6117_v52, %v5788_v4 }
 0x9f8   :  { %v7082_v20 = vmax.f32 %v6118_v2, 0.0  ;;  %5830 = vmatmul.bf16.gmra.mxu2 %v13132_v45  ;;  %v11335_v29 = vpack.c.bf16 %v5227_v51, %v5225_v0  ;;  %v13136_v45 = vld [vmem:[#allocation73_spill] sm:$0xff] }
 0x9fa   :  { %13133 = vst [vmem:[#allocation68_spill] sm:$0xff] %v11335_v29  ;;  %6159 = vmatmul.bf16.gmra.mxu3 %v11335_v29  ;;  %v11344_v43 = vpack.c.bf16 %v7082_v20, %v7080_v50 }
 0x9fb   :  { %v4602_v46 = vpop.f32.mrf.mxu0  ;;  %v4931_v52 = vpop.f32.mrf.mxu1 }
 0x9fc   :  { %v5791_v53 = vpop.f32.mrf.mxu2  ;;  %v4932_v38 = vadd.f32 %v4931_v52, %v4602_v46 }
 0x9fd   :  { %v6120_v21 = vpop.f32.mrf.mxu3 }
 0x9fe   :  { %v6121_v0 = vadd.f32 %v6120_v21, %v5791_v53  ;;  %4641 = vmatmul.bf16.gmra.mxu0 %v13134_v42  ;;  %4970 = vmatmul.bf16.gmra.mxu1 %v13135_v10  ;;  %v5229_v51 = vmax.f32 %v4932_v38, 0.0  ;;  %v13139_v10 = vld [vmem:[#allocation77_spill] sm:$0xff]  ;;  %v13140_v38 = vld [vmem:[#allocation72_spill] sm:$0xff] }
 0xa00   :  { %v7084_v50 = vmax.f32 %v6121_v0, 0.0 }
 0xa03   :  { %v4604_v22 = vpop.f32.mrf.mxu0  ;;  %v4933_v11 = vpop.f32.mrf.mxu1 }
 0xa04   :  { %v4934_v5 = vadd.f32 %v4933_v11, %v4604_v22  ;;  %v5793_v13 = vpop.f32.mrf.mxu2 }
 0xa05   :  { %v6122_v4 = vpop.f32.mrf.mxu3 }
 0xa06   :  { %v5231_v20 = vmax.f32 %v4934_v5, 0.0  ;;  %v6123_v2 = vadd.f32 %v6122_v4, %v5793_v13 }
 0xa08   :  { %v7086_v29 = vmax.f32 %v6123_v2, 0.0  ;;  %5835 = vmatmul.bf16.gmra.mxu2 %v13136_v45  ;;  %v11349_v8 = vpack.c.bf16 %v5231_v20, %v5229_v51 }
 0xa0a   :  { %13137 = vst [vmem:[#allocation63_spill] sm:$0xff] %v11349_v8  ;;  %6164 = vmatmul.bf16.gmra.mxu3 %v11349_v8  ;;  %v11352_v47 = vpack.c.bf16 %v7086_v29, %v7084_v50  ;;  %v13141_v8 = vld [vmem:[#allocation76_spill] sm:$0xff] }
 0xa0b   :  { %v4607_v53 = vpop.f32.mrf.mxu0  ;;  %v4936_v46 = vpop.f32.mrf.mxu1 }
 0xa0c   :  { %13138 = vst [vmem:[#allocation71_spill] sm:$0xff] %v11352_v47  ;;  %v5796_v52 = vpop.f32.mrf.mxu2  ;;  %v4937_v22 = vadd.f32 %v4936_v46, %v4607_v53 }
 0xa0d   :  { %v6125_v21 = vpop.f32.mrf.mxu3 }
 0xa0e   :  { %v6126_v42 = vadd.f32 %v6125_v21, %v5796_v52  ;;  %4646 = vmatmul.bf16.gmra.mxu0 %v13139_v10  ;;  %4975 = vmatmul.bf16.gmra.mxu1 %v13140_v38  ;;  %v5233_v51 = vmax.f32 %v4937_v22, 0.0  ;;  %v13145_v22 = vld [vmem:[#allocation75_spill] sm:$0xff] }
 0xa10   :  { %v7088_v29 = vmax.f32 %v6126_v42, 0.0 }
 0xa13   :  { %v4609_v0 = vpop.f32.mrf.mxu0  ;;  %v4938_v11 = vpop.f32.mrf.mxu1 }
 0xa14   :  { %v4939_v5 = vadd.f32 %v4938_v11, %v4609_v0  ;;  %v5798_v13 = vpop.f32.mrf.mxu2  ;;  %v13144_v0 = vld [vmem:[#allocation80_spill] sm:$0xff] }
 0xa15   :  { %v6127_v4 = vpop.f32.mrf.mxu3 }
 0xa16   :  { %v5235_v20 = vmax.f32 %v4939_v5, 0.0  ;;  %v6128_v2 = vadd.f32 %v6127_v4, %v5798_v13 }
 0xa18   :  { %v7090_v50 = vmax.f32 %v6128_v2, 0.0  ;;  %5840 = vmatmul.bf16.gmra.mxu2 %v13141_v8  ;;  %v11357_v45 = vpack.c.bf16 %v5235_v20, %v5233_v51  ;;  %v13146_v8 = vld [vmem:[#allocation79_spill] sm:$0xff] }
 0xa1a   :  { %13142 = vst [vmem:[#allocation66_spill] sm:$0xff] %v11357_v45  ;;  %6169 = vmatmul.bf16.gmra.mxu3 %v11357_v45  ;;  %v11360_v52 = vpack.c.bf16 %v7090_v50, %v7088_v29 }
 0xa1b   :  { %v4612_v21 = vpop.f32.mrf.mxu0  ;;  %v4941_v53 = vpop.f32.mrf.mxu1 }
 0xa1c   :  { %13143 = vst [vmem:[#allocation74_spill] sm:$0xff] %v11360_v52  ;;  %v5801_v46 = vpop.f32.mrf.mxu2  ;;  %v4942_v11 = vadd.f32 %v4941_v53, %v4612_v21 }
 0xa1d   :  { %v6130_v10 = vpop.f32.mrf.mxu3 }
 0xa1e   :  { %v6131_v38 = vadd.f32 %v6130_v10, %v5801_v46  ;;  %4651 = vmatmul.bf16.gmra.mxu0 %v13144_v0  ;;  %4980 = vmatmul.bf16.gmra.mxu1 %v13145_v22  ;;  %v5237_v20 = vmax.f32 %v4942_v11, 0.0  ;;  %v13150_v11 = vld [vmem:[#allocation78_spill] sm:$0xff] }
 0xa20   :  { %v7092_v29 = vmax.f32 %v6131_v38, 0.0 }
 0xa23   :  { %v4614_v42 = vpop.f32.mrf.mxu0  ;;  %v4943_v5 = vpop.f32.mrf.mxu1 }
 0xa24   :  { %v4944_v13 = vadd.f32 %v4943_v5, %v4614_v42  ;;  %v5803_v4 = vpop.f32.mrf.mxu2  ;;  %v13149_v42 = vld [vmem:[#allocation83_spill] sm:$0xff] }
 0xa25   :  { %v6132_v51 = vpop.f32.mrf.mxu3 }
 0xa26   :  { %v5239_v2 = vmax.f32 %v4944_v13, 0.0  ;;  %v6133_v45 = vadd.f32 %v6132_v51, %v5803_v4 }
 0xa28   :  { %v7094_v50 = vmax.f32 %v6133_v45, 0.0  ;;  %5845 = vmatmul.bf16.gmra.mxu2 %v13146_v8  ;;  %v11365_v52 = vpack.c.bf16 %v5239_v2, %v5237_v20  ;;  %v13151_v8 = vld [vmem:[#allocation82_spill] sm:$0xff] }
 0xa2a   :  { %13147 = vst [vmem:[#allocation69_spill] sm:$0xff] %v11365_v52  ;;  %6174 = vmatmul.bf16.gmra.mxu3 %v11365_v52  ;;  %v11368_v46 = vpack.c.bf16 %v7094_v50, %v7092_v29 }
 0xa2b   :  { %v4617_v10 = vpop.f32.mrf.mxu0  ;;  %v4946_v21 = vpop.f32.mrf.mxu1 }
 0xa2c   :  { %13148 = vst [vmem:[#allocation77_spill] sm:$0xff] %v11368_v46  ;;  %v5806_v53 = vpop.f32.mrf.mxu2  ;;  %v4947_v5 = vadd.f32 %v4946_v21, %v4617_v10 }
 0xa2d   :  { %v6135_v0 = vpop.f32.mrf.mxu3 }
 0xa2e   :  { %v6136_v22 = vadd.f32 %v6135_v0, %v5806_v53  ;;  %4656 = vmatmul.bf16.gmra.mxu0 %v13149_v42  ;;  %4985 = vmatmul.bf16.gmra.mxu1 %v13150_v11  ;;  %v5241_v20 = vmax.f32 %v4947_v5, 0.0  ;;  %v13155_v5 = vld [vmem:[#allocation81_spill] sm:$0xff] }
 0xa30   :  { %v7096_v29 = vmax.f32 %v6136_v22, 0.0 }
 0xa33   :  { %v4619_v38 = vpop.f32.mrf.mxu0  ;;  %v4948_v45 = vpop.f32.mrf.mxu1 }
 0xa34   :  { %v4949_v13 = vadd.f32 %v4948_v45, %v4619_v38  ;;  %v5808_v4 = vpop.f32.mrf.mxu2  ;;  %v13154_v38 = vld [vmem:[#allocation86_spill] sm:$0xff] }
 0xa35   :  { %v6137_v51 = vpop.f32.mrf.mxu3 }
 0xa36   :  { %v5243_v2 = vmax.f32 %v4949_v13, 0.0  ;;  %v6138_v52 = vadd.f32 %v6137_v51, %v5808_v4 }
 0xa38   :  { %v7098_v50 = vmax.f32 %v6138_v52, 0.0  ;;  %5850 = vmatmul.bf16.gmra.mxu2 %v13151_v8  ;;  %v11373_v46 = vpack.c.bf16 %v5243_v2, %v5241_v20  ;;  %v13156_v8 = vld [vmem:[#allocation85_spill] sm:$0xff] }
 0xa3a   :  { %13152 = vst [vmem:[#allocation72_spill] sm:$0xff] %v11373_v46  ;;  %6179 = vmatmul.bf16.gmra.mxu3 %v11373_v46  ;;  %v11376_v53 = vpack.c.bf16 %v7098_v50, %v7096_v29 }
 0xa3b   :  { %v4622_v0 = vpop.f32.mrf.mxu0  ;;  %v4951_v10 = vpop.f32.mrf.mxu1 }
 0xa3c   :  { %13153 = vst [vmem:[#allocation80_spill] sm:$0xff] %v11376_v53  ;;  %v5811_v21 = vpop.f32.mrf.mxu2  ;;  %v4952_v45 = vadd.f32 %v4951_v10, %v4622_v0 }
 0xa3d   :  { %v6140_v42 = vpop.f32.mrf.mxu3 }
 0xa3e   :  { %v6141_v11 = vadd.f32 %v6140_v42, %v5811_v21  ;;  %4661 = vmatmul.bf16.gmra.mxu0 %v13154_v38  ;;  %4990 = vmatmul.bf16.gmra.mxu1 %v13155_v5  ;;  %v5245_v20 = vmax.f32 %v4952_v45, 0.0  ;;  %v13160_v45 = vld [vmem:[#allocation84_spill] sm:$0xff] }
 0xa40   :  { %v7100_v29 = vmax.f32 %v6141_v11, 0.0 }
 0xa43   :  { %v4624_v22 = vpop.f32.mrf.mxu0  ;;  %v4953_v52 = vpop.f32.mrf.mxu1 }
 0xa44   :  { %v4954_v13 = vadd.f32 %v4953_v52, %v4624_v22  ;;  %v5813_v4 = vpop.f32.mrf.mxu2  ;;  %v13159_v22 = vld [vmem:[#allocation89_spill] sm:$0xff] }
 0xa45   :  { %v6142_v51 = vpop.f32.mrf.mxu3 }
 0xa46   :  { %v5247_v2 = vmax.f32 %v4954_v13, 0.0  ;;  %v6143_v46 = vadd.f32 %v6142_v51, %v5813_v4 }
 0xa48   :  { %v7102_v50 = vmax.f32 %v6143_v46, 0.0  ;;  %5855 = vmatmul.bf16.gmra.mxu2 %v13156_v8  ;;  %v11381_v53 = vpack.c.bf16 %v5247_v2, %v5245_v20  ;;  %v13161_v8 = vld [vmem:[#allocation88_spill] sm:$0xff] }
 0xa4a   :  { %13157 = vst [vmem:[#allocation75_spill] sm:$0xff] %v11381_v53  ;;  %6184 = vmatmul.bf16.gmra.mxu3 %v11381_v53  ;;  %v11384_v21 = vpack.c.bf16 %v7102_v50, %v7100_v29 }
 0xa4b   :  { %v4627_v42 = vpop.f32.mrf.mxu0  ;;  %v4956_v0 = vpop.f32.mrf.mxu1 }
 0xa4c   :  { %13158 = vst [vmem:[#allocation83_spill] sm:$0xff] %v11384_v21  ;;  %v5816_v10 = vpop.f32.mrf.mxu2  ;;  %v4957_v52 = vadd.f32 %v4956_v0, %v4627_v42 }
 0xa4d   :  { %v6145_v38 = vpop.f32.mrf.mxu3 }
 0xa4e   :  { %v6146_v5 = vadd.f32 %v6145_v38, %v5816_v10  ;;  %4666 = vmatmul.bf16.gmra.mxu0 %v13159_v22  ;;  %4995 = vmatmul.bf16.gmra.mxu1 %v13160_v45  ;;  %v5249_v20 = vmax.f32 %v4957_v52, 0.0  ;;  %v13165_v52 = vld [vmem:[#allocation87_spill] sm:$0xff] }
 0xa50   :  { %v7104_v29 = vmax.f32 %v6146_v5, 0.0 }
 0xa53   :  { %v4629_v11 = vpop.f32.mrf.mxu0  ;;  %v4958_v46 = vpop.f32.mrf.mxu1 }
 0xa54   :  { %v4959_v13 = vadd.f32 %v4958_v46, %v4629_v11  ;;  %v5818_v4 = vpop.f32.mrf.mxu2  ;;  %v13164_v11 = vld [vmem:[#allocation92_spill] sm:$0xff] }
 0xa55   :  { %v6147_v51 = vpop.f32.mrf.mxu3 }
 0xa56   :  { %v5251_v2 = vmax.f32 %v4959_v13, 0.0  ;;  %v6148_v53 = vadd.f32 %v6147_v51, %v5818_v4 }
 0xa58   :  { %v7106_v50 = vmax.f32 %v6148_v53, 0.0  ;;  %5860 = vmatmul.bf16.gmra.mxu2 %v13161_v8  ;;  %v11389_v21 = vpack.c.bf16 %v5251_v2, %v5249_v20  ;;  %v13166_v8 = vld [vmem:[#allocation91_spill] sm:$0xff] }
 0xa5a   :  { %13162 = vst [vmem:[#allocation78_spill] sm:$0xff] %v11389_v21  ;;  %6189 = vmatmul.bf16.gmra.mxu3 %v11389_v21  ;;  %v11392_v10 = vpack.c.bf16 %v7106_v50, %v7104_v29 }
 0xa5b   :  { %v4632_v38 = vpop.f32.mrf.mxu0  ;;  %v4961_v42 = vpop.f32.mrf.mxu1 }
 0xa5c   :  { %13163 = vst [vmem:[#allocation86_spill] sm:$0xff] %v11392_v10  ;;  %v5821_v0 = vpop.f32.mrf.mxu2  ;;  %v4962_v46 = vadd.f32 %v4961_v42, %v4632_v38 }
 0xa5d   :  { %v6150_v22 = vpop.f32.mrf.mxu3 }
 0xa5e   :  { %v6151_v45 = vadd.f32 %v6150_v22, %v5821_v0  ;;  %4671 = vmatmul.bf16.gmra.mxu0 %v13164_v11  ;;  %5000 = vmatmul.bf16.gmra.mxu1 %v13165_v52  ;;  %v5253_v20 = vmax.f32 %v4962_v46, 0.0  ;;  %v13170_v46 = vld [vmem:[#allocation90_spill] sm:$0xff] }
 0xa60   :  { %v7108_v29 = vmax.f32 %v6151_v45, 0.0  ;;  %v8991_v45 = vld [vmem:[#allocation2 + $0x28] sm:$0xf0] }
 0xa63   :  { %v4634_v5 = vpop.f32.mrf.mxu0  ;;  %v4963_v53 = vpop.f32.mrf.mxu1 }
 0xa64   :  { %v4964_v13 = vadd.f32 %v4963_v53, %v4634_v5  ;;  %v5823_v4 = vpop.f32.mrf.mxu2  ;;  %v13169_v5 = vld [vmem:[#allocation95_spill] sm:$0xff]  ;;  %v9295_v53 = vld [vmem:[#allocation2 + $0x24] sm:$0xf] }
 0xa65   :  { %v6152_v51 = vpop.f32.mrf.mxu3 }
 0xa66   :  { %v5255_v2 = vmax.f32 %v4964_v13, 0.0  ;;  %v6153_v21 = vadd.f32 %v6152_v51, %v5823_v4  ;;  %v9311_v13 = vld [vmem:[#allocation2 + $0xa4] sm:$0xf]  ;;  %v9055_v4 = vld [vmem:[#allocation2 + $0xa8] sm:$0xf0] }
 0xa68   :  { %v7110_v50 = vmax.f32 %v6153_v21, 0.0  ;;  %5865 = vmatmul.bf16.gmra.mxu2 %v13166_v8  ;;  %v11397_v10 = vpack.c.bf16 %v5255_v2, %v5253_v20  ;;  %v8994_v21 = vor.u32 %v9295_v53, %v8991_v45  ;;  %v9058_v20 = vor.u32 %v9311_v13, %v9055_v4 }
 0xa6a   :  { %13167 = vst [vmem:[#allocation81_spill] sm:$0xff] %v11397_v10  ;;  %6194 = vmatmul.bf16.gmra.mxu3 %v11397_v10  ;;  %v11400_v0 = vpack.c.bf16 %v7110_v50, %v7108_v29  ;;  %6375 = vmatpush.bf16.msrb.mxu0 %v8994_v21  ;;  %v13172_v21 = vld [vmem:[#allocation93_spill] sm:$0xff] }
 0xa6b   :  { %v4637_v22 = vpop.f32.mrf.mxu0  ;;  %v4966_v38 = vpop.f32.mrf.mxu1  ;;  %6704 = vmatpush.bf16.msrb.mxu1 %v9058_v20 }
 0xa6c   :  { %13168 = vst [vmem:[#allocation89_spill] sm:$0xff] %v11400_v0  ;;  %v5826_v42 = vpop.f32.mrf.mxu2  ;;  %v4967_v51 = vadd.f32 %v4966_v38, %v4637_v22  ;;  %v9326_v22 = vld [vmem:[%s12409_s5 + $0x18] sm:$0xff] }
 0xa6d   :  { %v6155_v11 = vpop.f32.mrf.mxu3  ;;  %7544 = vmatpush.bf16.msrb.mxu2 %v9326_v22 }
 0xa6e   :  { %v6156_v52 = vadd.f32 %v6155_v11, %v5826_v42  ;;  %4676 = vmatmul.bf16.gmra.mxu0 %v13169_v5  ;;  %5005 = vmatmul.bf16.gmra.mxu1 %v13170_v46  ;;  %v5257_v0 = vmax.f32 %v4967_v51, 0.0 }
 0xa70   :  { %v7112_v5 = vmax.f32 %v6156_v52, 0.0 }
 0xa73   :  { %v4639_v2 = vpop.f32.mrf.mxu0  ;;  %v4968_v10 = vpop.f32.mrf.mxu1 }
 0xa74   :  { %v4969_v29 = vadd.f32 %v4968_v10, %v4639_v2  ;;  %v5828_v50 = vpop.f32.mrf.mxu2  ;;  %v9334_v10 = vld [vmem:[%s12409_s5 + $0x58] sm:$0xff] }
 0xa75   :  { %v6157_v8 = vpop.f32.mrf.mxu3  ;;  %7873 = vmatpush.bf16.msrb.mxu3 %v9334_v10 }
 0xa76   :  { %v5259_v42 = vmax.f32 %v4969_v29, 0.0  ;;  %v6158_v11 = vadd.f32 %v6157_v8, %v5828_v50 }
 0xa78   :  { %v7114_v47 = vmax.f32 %v6158_v11, 0.0  ;;  %5870 = vmatmul.bf16.gmra.mxu2 %v10932_v58  ;;  %v11405_v46 = vpack.c.bf16 %v5259_v42, %v5257_v0 }
 0xa7a   :  { %13171 = vst [vmem:[#allocation84_spill] sm:$0xff] %v11405_v46  ;;  %6199 = vmatmul.bf16.gmra.mxu3 %v11405_v46  ;;  %v11414_v38 = vpack.c.bf16 %v7114_v47, %v7112_v5  ;;  %v13173_v46 = vld [vmem:[#allocation98_spill] sm:$0xff] }
 0xa7b   :  { %v4642_v53 = vpop.f32.mrf.mxu0  ;;  %v4971_v8 = vpop.f32.mrf.mxu1 }
 0xa7c   :  { %v5831_v52 = vpop.f32.mrf.mxu2  ;;  %v4972_v13 = vadd.f32 %v4971_v8, %v4642_v53 }
 0xa7d   :  { %v6160_v45 = vpop.f32.mrf.mxu3 }
 0xa7e   :  { %v6161_v0 = vadd.f32 %v6160_v45, %v5831_v52  ;;  %4681 = vmatmul.bf16.gmra.mxu0 %v12964_v24  ;;  %5010 = vmatmul.bf16.gmra.mxu1 %v13172_v21  ;;  %v5261_v50 = vmax.f32 %v4972_v13, 0.0  ;;  %v13176_v21 = vld [vmem:[#allocation101_spill] sm:$0xff]  ;;  %v13177_v13 = vld [vmem:[#allocation94_spill] sm:$0xff] }
 0xa80   :  { %v7116_v11 = vmax.f32 %v6161_v0, 0.0 }
 0xa83   :  { %v4644_v4 = vpop.f32.mrf.mxu0  ;;  %v4973_v51 = vpop.f32.mrf.mxu1 }
 0xa84   :  { %v4974_v20 = vadd.f32 %v4973_v51, %v4644_v4  ;;  %v5833_v2 = vpop.f32.mrf.mxu2 }
 0xa85   :  { %v6162_v29 = vpop.f32.mrf.mxu3 }
 0xa86   :  { %v5263_v47 = vmax.f32 %v4974_v20, 0.0  ;;  %v6163_v42 = vadd.f32 %v6162_v29, %v5833_v2 }
 0xa88   :  { %v7118_v5 = vmax.f32 %v6163_v42, 0.0  ;;  %5875 = vmatmul.bf16.gmra.mxu2 %v13173_v46  ;;  %v11419_v22 = vpack.c.bf16 %v5263_v47, %v5261_v50 }
 0xa8a   :  { %13174 = vst [vmem:[#allocation92_spill] sm:$0xff] %v11419_v22  ;;  %6204 = vmatmul.bf16.gmra.mxu3 %v11419_v22  ;;  %v11422_v24 = vpack.c.bf16 %v7118_v5, %v7116_v11  ;;  %v13178_v22 = vld [vmem:[#allocation97_spill] sm:$0xff] }
 0xa8b   :  { %v4647_v10 = vpop.f32.mrf.mxu0  ;;  %v4976_v53 = vpop.f32.mrf.mxu1 }
 0xa8c   :  { %13175 = vst [vmem:[#allocation87_spill] sm:$0xff] %v11422_v24  ;;  %v5836_v8 = vpop.f32.mrf.mxu2  ;;  %v4977_v4 = vadd.f32 %v4976_v53, %v4647_v10 }
 0xa8d   :  { %v6165_v52 = vpop.f32.mrf.mxu3 }
 0xa8e   :  { %v6166_v45 = vadd.f32 %v6165_v52, %v5836_v8  ;;  %4686 = vmatmul.bf16.gmra.mxu0 %v13176_v21  ;;  %5015 = vmatmul.bf16.gmra.mxu1 %v13177_v13  ;;  %v5265_v50 = vmax.f32 %v4977_v4, 0.0  ;;  %v13182_v4 = vld [vmem:[#allocation96_spill] sm:$0xff] }
 0xa90   :  { %v7120_v11 = vmax.f32 %v6166_v45, 0.0 }
 0xa93   :  { %v4649_v0 = vpop.f32.mrf.mxu0  ;;  %v4978_v51 = vpop.f32.mrf.mxu1 }
 0xa94   :  { %v4979_v20 = vadd.f32 %v4978_v51, %v4649_v0  ;;  %v5838_v2 = vpop.f32.mrf.mxu2  ;;  %v13181_v0 = vld [vmem:[#allocation104_spill] sm:$0xff] }
 0xa95   :  { %v6167_v29 = vpop.f32.mrf.mxu3 }
 0xa96   :  { %v5267_v47 = vmax.f32 %v4979_v20, 0.0  ;;  %v6168_v42 = vadd.f32 %v6167_v29, %v5838_v2 }
 0xa98   :  { %v7122_v5 = vmax.f32 %v6168_v42, 0.0  ;;  %5880 = vmatmul.bf16.gmra.mxu2 %v13178_v22  ;;  %v11427_v46 = vpack.c.bf16 %v5267_v47, %v5265_v50  ;;  %v13183_v22 = vld [vmem:[#allocation100_spill] sm:$0xff] }
 0xa9a   :  { %13179 = vst [vmem:[#allocation95_spill] sm:$0xff] %v11427_v46  ;;  %6209 = vmatmul.bf16.gmra.mxu3 %v11427_v46  ;;  %v11430_v8 = vpack.c.bf16 %v7122_v5, %v7120_v11 }
 0xa9b   :  { %v4652_v52 = vpop.f32.mrf.mxu0  ;;  %v4981_v10 = vpop.f32.mrf.mxu1 }
 0xa9c   :  { %13180 = vst [vmem:[#allocation90_spill] sm:$0xff] %v11430_v8  ;;  %v5841_v53 = vpop.f32.mrf.mxu2  ;;  %v4982_v51 = vadd.f32 %v4981_v10, %v4652_v52 }
 0xa9d   :  { %v6170_v21 = vpop.f32.mrf.mxu3 }
 0xa9e   :  { %v6171_v13 = vadd.f32 %v6170_v21, %v5841_v53  ;;  %4691 = vmatmul.bf16.gmra.mxu0 %v13181_v0  ;;  %5020 = vmatmul.bf16.gmra.mxu1 %v13182_v4  ;;  %v5269_v47 = vmax.f32 %v4982_v51, 0.0  ;;  %v13187_v51 = vld [vmem:[#allocation99_spill] sm:$0xff] }
 0xaa0   :  { %v7124_v11 = vmax.f32 %v6171_v13, 0.0 }
 0xaa3   :  { %v4654_v45 = vpop.f32.mrf.mxu0  ;;  %v4983_v20 = vpop.f32.mrf.mxu1 }
 0xaa4   :  { %v4984_v2 = vadd.f32 %v4983_v20, %v4654_v45  ;;  %v5843_v29 = vpop.f32.mrf.mxu2  ;;  %v13186_v45 = vld [vmem:[#allocation107_spill] sm:$0xff] }
 0xaa5   :  { %v6172_v50 = vpop.f32.mrf.mxu3 }
 0xaa6   :  { %v5271_v42 = vmax.f32 %v4984_v2, 0.0  ;;  %v6173_v46 = vadd.f32 %v6172_v50, %v5843_v29 }
 0xaa8   :  { %v7126_v5 = vmax.f32 %v6173_v46, 0.0  ;;  %5885 = vmatmul.bf16.gmra.mxu2 %v13183_v22  ;;  %v11435_v8 = vpack.c.bf16 %v5271_v42, %v5269_v47  ;;  %v13188_v22 = vld [vmem:[#allocation103_spill] sm:$0xff] }
 0xaaa   :  { %13184 = vst [vmem:[#allocation93_spill] sm:$0xff] %v11435_v8  ;;  %6214 = vmatmul.bf16.gmra.mxu3 %v11435_v8  ;;  %v11438_v53 = vpack.c.bf16 %v7126_v5, %v7124_v11 }
 0xaab   :  { %v4657_v21 = vpop.f32.mrf.mxu0  ;;  %v4986_v52 = vpop.f32.mrf.mxu1 }
 0xaac   :  { %13185 = vst [vmem:[#allocation101_spill] sm:$0xff] %v11438_v53  ;;  %v5846_v10 = vpop.f32.mrf.mxu2  ;;  %v4987_v20 = vadd.f32 %v4986_v52, %v4657_v21 }
 0xaad   :  { %v6175_v0 = vpop.f32.mrf.mxu3 }
 0xaae   :  { %v6176_v4 = vadd.f32 %v6175_v0, %v5846_v10  ;;  %4696 = vmatmul.bf16.gmra.mxu0 %v13186_v45  ;;  %5025 = vmatmul.bf16.gmra.mxu1 %v13187_v51  ;;  %v5273_v47 = vmax.f32 %v4987_v20, 0.0  ;;  %v13192_v20 = vld [vmem:[#allocation102_spill] sm:$0xff] }
 0xab0   :  { %v7128_v11 = vmax.f32 %v6176_v4, 0.0 }
 0xab3   :  { %v4659_v13 = vpop.f32.mrf.mxu0  ;;  %v4988_v46 = vpop.f32.mrf.mxu1 }
 0xab4   :  { %v4989_v2 = vadd.f32 %v4988_v46, %v4659_v13  ;;  %v5848_v29 = vpop.f32.mrf.mxu2  ;;  %v13191_v13 = vld [vmem:[#allocation110_spill] sm:$0xff] }
 0xab5   :  { %v6177_v50 = vpop.f32.mrf.mxu3 }
 0xab6   :  { %v5275_v42 = vmax.f32 %v4989_v2, 0.0  ;;  %v6178_v8 = vadd.f32 %v6177_v50, %v5848_v29 }
 0xab8   :  { %v7130_v5 = vmax.f32 %v6178_v8, 0.0  ;;  %5890 = vmatmul.bf16.gmra.mxu2 %v13188_v22  ;;  %v11443_v53 = vpack.c.bf16 %v5275_v42, %v5273_v47  ;;  %v13193_v22 = vld [vmem:[#allocation106_spill] sm:$0xff] }
 0xaba   :  { %13189 = vst [vmem:[#allocation94_spill] sm:$0xff] %v11443_v53  ;;  %6219 = vmatmul.bf16.gmra.mxu3 %v11443_v53  ;;  %v11446_v10 = vpack.c.bf16 %v7130_v5, %v7128_v11 }
 0xabb   :  { %v4662_v0 = vpop.f32.mrf.mxu0  ;;  %v4991_v21 = vpop.f32.mrf.mxu1 }
 0xabc   :  { %13190 = vst [vmem:[#allocation104_spill] sm:$0xff] %v11446_v10  ;;  %v5851_v52 = vpop.f32.mrf.mxu2  ;;  %v4992_v46 = vadd.f32 %v4991_v21, %v4662_v0 }
 0xabd   :  { %v6180_v45 = vpop.f32.mrf.mxu3 }
 0xabe   :  { %v6181_v51 = vadd.f32 %v6180_v45, %v5851_v52  ;;  %4701 = vmatmul.bf16.gmra.mxu0 %v13191_v13  ;;  %5030 = vmatmul.bf16.gmra.mxu1 %v13192_v20  ;;  %v5277_v47 = vmax.f32 %v4992_v46, 0.0  ;;  %v13197_v46 = vld [vmem:[#allocation105_spill] sm:$0xff] }
 0xac0   :  { %v7132_v11 = vmax.f32 %v6181_v51, 0.0 }
 0xac3   :  { %v4664_v4 = vpop.f32.mrf.mxu0  ;;  %v4993_v8 = vpop.f32.mrf.mxu1 }
 0xac4   :  { %v4994_v2 = vadd.f32 %v4993_v8, %v4664_v4  ;;  %v5853_v29 = vpop.f32.mrf.mxu2  ;;  %v13196_v4 = vld [vmem:[#allocation113_spill] sm:$0xff] }
 0xac5   :  { %v6182_v50 = vpop.f32.mrf.mxu3 }
 0xac6   :  { %v5279_v42 = vmax.f32 %v4994_v2, 0.0  ;;  %v6183_v53 = vadd.f32 %v6182_v50, %v5853_v29 }
 0xac8   :  { %v7134_v5 = vmax.f32 %v6183_v53, 0.0  ;;  %5895 = vmatmul.bf16.gmra.mxu2 %v13193_v22  ;;  %v11451_v10 = vpack.c.bf16 %v5279_v42, %v5277_v47  ;;  %v13198_v22 = vld [vmem:[#allocation109_spill] sm:$0xff] }
 0xaca   :  { %13194 = vst [vmem:[#allocation96_spill] sm:$0xff] %v11451_v10  ;;  %6224 = vmatmul.bf16.gmra.mxu3 %v11451_v10  ;;  %v11454_v52 = vpack.c.bf16 %v7134_v5, %v7132_v11 }
 0xacb   :  { %v4667_v45 = vpop.f32.mrf.mxu0  ;;  %v4996_v0 = vpop.f32.mrf.mxu1 }
 0xacc   :  { %13195 = vst [vmem:[#allocation107_spill] sm:$0xff] %v11454_v52  ;;  %v5856_v21 = vpop.f32.mrf.mxu2  ;;  %v4997_v8 = vadd.f32 %v4996_v0, %v4667_v45 }
 0xacd   :  { %v6185_v13 = vpop.f32.mrf.mxu3 }
 0xace   :  { %v6186_v20 = vadd.f32 %v6185_v13, %v5856_v21  ;;  %4706 = vmatmul.bf16.gmra.mxu0 %v13196_v4  ;;  %5035 = vmatmul.bf16.gmra.mxu1 %v13197_v46  ;;  %v5281_v47 = vmax.f32 %v4997_v8, 0.0  ;;  %v13202_v8 = vld [vmem:[#allocation108_spill] sm:$0xff] }
 0xad0   :  { %v7136_v11 = vmax.f32 %v6186_v20, 0.0 }
 0xad3   :  { %v4669_v51 = vpop.f32.mrf.mxu0  ;;  %v4998_v53 = vpop.f32.mrf.mxu1 }
 0xad4   :  { %v4999_v2 = vadd.f32 %v4998_v53, %v4669_v51  ;;  %v5858_v29 = vpop.f32.mrf.mxu2  ;;  %v13201_v51 = vld [vmem:[#allocation116_spill] sm:$0xff] }
 0xad5   :  { %v6187_v50 = vpop.f32.mrf.mxu3 }
 0xad6   :  { %v5283_v42 = vmax.f32 %v4999_v2, 0.0  ;;  %v6188_v10 = vadd.f32 %v6187_v50, %v5858_v29 }
 0xad8   :  { %v7138_v5 = vmax.f32 %v6188_v10, 0.0  ;;  %5900 = vmatmul.bf16.gmra.mxu2 %v13198_v22  ;;  %v11459_v52 = vpack.c.bf16 %v5283_v42, %v5281_v47  ;;  %v13203_v22 = vld [vmem:[#allocation112_spill] sm:$0xff] }
 0xada   :  { %13199 = vst [vmem:[#allocation99_spill] sm:$0xff] %v11459_v52  ;;  %6229 = vmatmul.bf16.gmra.mxu3 %v11459_v52  ;;  %v11462_v21 = vpack.c.bf16 %v7138_v5, %v7136_v11 }
 0xadb   :  { %v4672_v13 = vpop.f32.mrf.mxu0  ;;  %v5001_v45 = vpop.f32.mrf.mxu1 }
 0xadc   :  { %13200 = vst [vmem:[#allocation110_spill] sm:$0xff] %v11462_v21  ;;  %v5861_v0 = vpop.f32.mrf.mxu2  ;;  %v5002_v53 = vadd.f32 %v5001_v45, %v4672_v13 }
 0xadd   :  { %v6190_v4 = vpop.f32.mrf.mxu3 }
 0xade   :  { %v6191_v46 = vadd.f32 %v6190_v4, %v5861_v0  ;;  %4711 = vmatmul.bf16.gmra.mxu0 %v13201_v51  ;;  %5040 = vmatmul.bf16.gmra.mxu1 %v13202_v8  ;;  %v5285_v47 = vmax.f32 %v5002_v53, 0.0  ;;  %v13207_v53 = vld [vmem:[#allocation111_spill] sm:$0xff] }
 0xae0   :  { %v7140_v11 = vmax.f32 %v6191_v46, 0.0  ;;  %v8983_v46 = vld [vmem:[#allocation2 + $0x18] sm:$0xf0] }
 0xae3   :  { %v4674_v20 = vpop.f32.mrf.mxu0  ;;  %v5003_v10 = vpop.f32.mrf.mxu1 }
 0xae4   :  { %v5004_v2 = vadd.f32 %v5003_v10, %v4674_v20  ;;  %v5863_v29 = vpop.f32.mrf.mxu2  ;;  %v13206_v20 = vld [vmem:[#allocation119_spill] sm:$0xff] }
 0xae5   :  { %v6192_v50 = vpop.f32.mrf.mxu3  ;;  %v9293_v10 = vld [vmem:[#allocation2 + $0x14] sm:$0xf] }
 0xae6   :  { %v5287_v42 = vmax.f32 %v5004_v2, 0.0  ;;  %v6193_v52 = vadd.f32 %v6192_v50, %v5863_v29  ;;  %v9309_v2 = vld [vmem:[#allocation2 + $0x94] sm:$0xf]  ;;  %v9047_v29 = vld [vmem:[#allocation2 + $0x98] sm:$0xf0] }
 0xae8   :  { %v7142_v5 = vmax.f32 %v6193_v52, 0.0  ;;  %5905 = vmatmul.bf16.gmra.mxu2 %v13203_v22  ;;  %v11467_v21 = vpack.c.bf16 %v5287_v42, %v5285_v47  ;;  %v8986_v52 = vor.u32 %v9293_v10, %v8983_v46  ;;  %v9050_v47 = vor.u32 %v9309_v2, %v9047_v29 }
 0xaea   :  { %13204 = vst [vmem:[#allocation102_spill] sm:$0xff] %v11467_v21  ;;  %6234 = vmatmul.bf16.gmra.mxu3 %v11467_v21  ;;  %v11470_v0 = vpack.c.bf16 %v7142_v5, %v7140_v11  ;;  %6376 = vmatpush.bf16.msrb.mxu0 %v8986_v52 }
 0xaeb   :  { %v4677_v4 = vpop.f32.mrf.mxu0  ;;  %v5006_v13 = vpop.f32.mrf.mxu1  ;;  %6705 = vmatpush.bf16.msrb.mxu1 %v9050_v47 }
 0xaec   :  { %13205 = vst [vmem:[#allocation113_spill] sm:$0xff] %v11470_v0  ;;  %v5866_v45 = vpop.f32.mrf.mxu2  ;;  %v5007_v50 = vadd.f32 %v5006_v13, %v4677_v4  ;;  %v9325_v4 = vld [vmem:[%s12409_s5 + $0x10] sm:$0xff] }
 0xaed   :  { %v6195_v51 = vpop.f32.mrf.mxu3  ;;  %7545 = vmatpush.bf16.msrb.mxu2 %v9325_v4 }
 0xaee   :  { %v6196_v8 = vadd.f32 %v6195_v51, %v5866_v45  ;;  %4716 = vmatmul.bf16.gmra.mxu0 %v13206_v20  ;;  %5045 = vmatmul.bf16.gmra.mxu1 %v13207_v53  ;;  %v5289_v0 = vmax.f32 %v5007_v50, 0.0 }
 0xaf0   :  { %v7144_v20 = vmax.f32 %v6196_v8, 0.0 }
 0xaf3   :  { %v4679_v42 = vpop.f32.mrf.mxu0  ;;  %v5008_v21 = vpop.f32.mrf.mxu1 }
 0xaf4   :  { %v5009_v11 = vadd.f32 %v5008_v21, %v4679_v42  ;;  %v5868_v5 = vpop.f32.mrf.mxu2  ;;  %v9333_v21 = vld [vmem:[%s12409_s5 + $0x50] sm:$0xff] }
 0xaf5   :  { %v6197_v22 = vpop.f32.mrf.mxu3  ;;  %7874 = vmatpush.bf16.msrb.mxu3 %v9333_v21 }
 0xaf6   :  { %v5291_v45 = vmax.f32 %v5009_v11, 0.0  ;;  %v6198_v51 = vadd.f32 %v6197_v22, %v5868_v5 }
 0xaf8   :  { %v7146_v24 = vmax.f32 %v6198_v51, 0.0  ;;  %5910 = vmatmul.bf16.gmra.mxu2 %v11008_v12  ;;  %v11475_v53 = vpack.c.bf16 %v5291_v45, %v5289_v0 }
 0xafa   :  { %6239 = vmatmul.bf16.gmra.mxu3 %v11475_v53  ;;  %v11484_v13 = vpack.c.bf16 %v7146_v24, %v7144_v20 }
 0xafb   :  { %v4682_v10 = vpop.f32.mrf.mxu0  ;;  %v5011_v22 = vpop.f32.mrf.mxu1 }
 0xafc   :  { %v5871_v8 = vpop.f32.mrf.mxu2  ;;  %v5012_v52 = vadd.f32 %v5011_v22, %v4682_v10 }
 0xafd   :  { %v6200_v46 = vpop.f32.mrf.mxu3 }
 0xafe   :  { %v6201_v0 = vadd.f32 %v6200_v46, %v5871_v8  ;;  %4721 = vmatmul.bf16.gmra.mxu0 %v10470_v26  ;;  %5050 = vmatmul.bf16.gmra.mxu1 %v11005_v9  ;;  %v5293_v11 = vmax.f32 %v5012_v52, 0.0 }
 0xb00   :  { %v7148_v45 = vmax.f32 %v6201_v0, 0.0 }
 0xb03   :  { %v4684_v2 = vpop.f32.mrf.mxu0  ;;  %v5013_v29 = vpop.f32.mrf.mxu1 }
 0xb04   :  { %v5014_v50 = vadd.f32 %v5013_v29, %v4684_v2  ;;  %v5873_v47 = vpop.f32.mrf.mxu2 }
 0xb05   :  { %v6202_v42 = vpop.f32.mrf.mxu3 }
 0xb06   :  { %v5295_v24 = vmax.f32 %v5014_v50, 0.0  ;;  %v6203_v5 = vadd.f32 %v6202_v42, %v5873_v47 }
 0xb08   :  { %v7150_v51 = vmax.f32 %v6203_v5, 0.0  ;;  %5915 = vmatmul.bf16.gmra.mxu2 %v11016_v34  ;;  %v11489_v20 = vpack.c.bf16 %v5295_v24, %v5293_v11 }
 0xb0a   :  { %6244 = vmatmul.bf16.gmra.mxu3 %v11489_v20  ;;  %v11492_v26 = vpack.c.bf16 %v7150_v51, %v7148_v45 }
 0xb0b   :  { %v4687_v9 = vpop.f32.mrf.mxu0  ;;  %v5016_v4 = vpop.f32.mrf.mxu1 }
 0xb0c   :  { %v5876_v21 = vpop.f32.mrf.mxu2  ;;  %v5017_v8 = vadd.f32 %v5016_v4, %v4687_v9 }
 0xb0d   :  { %v6205_v10 = vpop.f32.mrf.mxu3 }
 0xb0e   :  { %v6206_v22 = vadd.f32 %v6205_v10, %v5876_v21  ;;  %4726 = vmatmul.bf16.gmra.mxu0 %v10480_v37  ;;  %5055 = vmatmul.bf16.gmra.mxu1 %v11013_v23  ;;  %v5297_v50 = vmax.f32 %v5017_v8, 0.0 }
 0xb10   :  { %v7152_v11 = vmax.f32 %v6206_v22, 0.0 }
 0xb13   :  { %v4689_v46 = vpop.f32.mrf.mxu0  ;;  %v5018_v0 = vpop.f32.mrf.mxu1 }
 0xb14   :  { %v5019_v52 = vadd.f32 %v5018_v0, %v4689_v46  ;;  %v5878_v2 = vpop.f32.mrf.mxu2 }
 0xb15   :  { %v6207_v29 = vpop.f32.mrf.mxu3 }
 0xb16   :  { %v5299_v47 = vmax.f32 %v5019_v52, 0.0  ;;  %v6208_v42 = vadd.f32 %v6207_v29, %v5878_v2 }
 0xb18   :  { %v7154_v24 = vmax.f32 %v6208_v42, 0.0  ;;  %5920 = vmatmul.bf16.gmra.mxu2 %v11024_v16  ;;  %v11497_v5 = vpack.c.bf16 %v5299_v47, %v5297_v50 }
 0xb1a   :  { %6249 = vmatmul.bf16.gmra.mxu3 %v11497_v5  ;;  %v11500_v37 = vpack.c.bf16 %v7154_v24, %v7152_v11 }
 0xb1b   :  { %v4692_v23 = vpop.f32.mrf.mxu0  ;;  %v5021_v45 = vpop.f32.mrf.mxu1 }
 0xb1c   :  { %v5881_v51 = vpop.f32.mrf.mxu2  ;;  %v5022_v21 = vadd.f32 %v5021_v45, %v4692_v23 }
 0xb1d   :  { %v6210_v9 = vpop.f32.mrf.mxu3 }
 0xb1e   :  { %v6211_v4 = vadd.f32 %v6210_v9, %v5881_v51  ;;  %4731 = vmatmul.bf16.gmra.mxu0 %v10490_v48  ;;  %5060 = vmatmul.bf16.gmra.mxu1 %v11021_v30  ;;  %v5301_v52 = vmax.f32 %v5022_v21, 0.0  ;;  %v13208_v51 = vld [vmem:[#allocation114_spill] sm:$0xff] }
 0xb20   :  { %v7156_v50 = vmax.f32 %v6211_v4, 0.0 }
 0xb23   :  { %v4694_v10 = vpop.f32.mrf.mxu0  ;;  %v5023_v22 = vpop.f32.mrf.mxu1 }
 0xb24   :  { %v5024_v8 = vadd.f32 %v5023_v22, %v4694_v10  ;;  %v5883_v46 = vpop.f32.mrf.mxu2 }
 0xb25   :  { %v6212_v0 = vpop.f32.mrf.mxu3 }
 0xb26   :  { %v5303_v2 = vmax.f32 %v5024_v8, 0.0  ;;  %v6213_v29 = vadd.f32 %v6212_v0, %v5883_v46 }
 0xb28   :  { %v7158_v47 = vmax.f32 %v6213_v29, 0.0  ;;  %5925 = vmatmul.bf16.gmra.mxu2 %v11032_v35  ;;  %v11505_v42 = vpack.c.bf16 %v5303_v2, %v5301_v52 }
 0xb2a   :  { %6254 = vmatmul.bf16.gmra.mxu3 %v11505_v42  ;;  %v11508_v48 = vpack.c.bf16 %v7158_v47, %v7156_v50 }
 0xb2b   :  { %v4697_v30 = vpop.f32.mrf.mxu0  ;;  %v5026_v11 = vpop.f32.mrf.mxu1 }
 0xb2c   :  { %v5886_v24 = vpop.f32.mrf.mxu2  ;;  %v5027_v9 = vadd.f32 %v5026_v11, %v4697_v30 }
 0xb2d   :  { %v6215_v23 = vpop.f32.mrf.mxu3 }
 0xb2e   :  { %v6216_v45 = vadd.f32 %v6215_v23, %v5886_v24  ;;  %4736 = vmatmul.bf16.gmra.mxu0 %v10500_v59  ;;  %5065 = vmatmul.bf16.gmra.mxu1 %v13208_v51  ;;  %v5305_v46 = vmax.f32 %v5027_v9, 0.0  ;;  %v13210_v51 = vld [vmem:[#allocation115_spill] sm:$0xff] }
 0xb30   :  { %v7160_v2 = vmax.f32 %v6216_v45, 0.0 }
 0xb33   :  { %v4699_v4 = vpop.f32.mrf.mxu0  ;;  %v5028_v21 = vpop.f32.mrf.mxu1 }
 0xb34   :  { %v5029_v10 = vadd.f32 %v5028_v21, %v4699_v4  ;;  %v5888_v22 = vpop.f32.mrf.mxu2 }
 0xb35   :  { %v6217_v8 = vpop.f32.mrf.mxu3 }
 0xb36   :  { %v5307_v0 = vmax.f32 %v5029_v10, 0.0  ;;  %v6218_v52 = vadd.f32 %v6217_v8, %v5888_v22 }
 0xb38   :  { %v7162_v29 = vmax.f32 %v6218_v52, 0.0  ;;  %5930 = vmatmul.bf16.gmra.mxu2 %v11040_v14  ;;  %v11513_v50 = vpack.c.bf16 %v5307_v0, %v5305_v46 }
 0xb3a   :  { %13209 = vst [vmem:[#allocation105_spill] sm:$0xff] %v11513_v50  ;;  %6259 = vmatmul.bf16.gmra.mxu3 %v11513_v50  ;;  %v11516_v59 = vpack.c.bf16 %v7162_v29, %v7160_v2  ;;  %v13211_v29 = vld [vmem:[#allocation118_spill] sm:$0xff] }
 0xb3b   :  { %v4702_v47 = vpop.f32.mrf.mxu0  ;;  %v5031_v30 = vpop.f32.mrf.mxu1 }
 0xb3c   :  { %v5891_v11 = vpop.f32.mrf.mxu2  ;;  %v5032_v9 = vadd.f32 %v5031_v30, %v4702_v47 }
 0xb3d   :  { %v6220_v24 = vpop.f32.mrf.mxu3 }
 0xb3e   :  { %v6221_v23 = vadd.f32 %v6220_v24, %v5891_v11  ;;  %4741 = vmatmul.bf16.gmra.mxu0 %v10510_v6  ;;  %5070 = vmatmul.bf16.gmra.mxu1 %v13210_v51  ;;  %v5309_v8 = vmax.f32 %v5032_v9, 0.0  ;;  %v13215_v9 = vld [vmem:[#allocation117_spill] sm:$0xff] }
 0xb40   :  { %v7164_v52 = vmax.f32 %v6221_v23, 0.0 }
 0xb43   :  { %v4704_v45 = vpop.f32.mrf.mxu0  ;;  %v5033_v4 = vpop.f32.mrf.mxu1 }
 0xb44   :  { %v5034_v21 = vadd.f32 %v5033_v4, %v4704_v45  ;;  %v5893_v10 = vpop.f32.mrf.mxu2  ;;  %v13214_v45 = vld [vmem:[#allocation126_spill] sm:$0xff] }
 0xb45   :  { %v6222_v22 = vpop.f32.mrf.mxu3 }
 0xb46   :  { %v5311_v46 = vmax.f32 %v5034_v21, 0.0  ;;  %v6223_v0 = vadd.f32 %v6222_v22, %v5893_v10 }
 0xb48   :  { %v7166_v2 = vmax.f32 %v6223_v0, 0.0  ;;  %5935 = vmatmul.bf16.gmra.mxu2 %v13211_v29  ;;  %v11521_v50 = vpack.c.bf16 %v5311_v46, %v5309_v8  ;;  %v13216_v29 = vld [vmem:[#allocation121_spill] sm:$0xff] }
 0xb4a   :  { %13212 = vst [vmem:[#allocation116_spill] sm:$0xff] %v11521_v50  ;;  %6264 = vmatmul.bf16.gmra.mxu3 %v11521_v50  ;;  %v11524_v6 = vpack.c.bf16 %v7166_v2, %v7164_v52 }
 0xb4b   :  { %v4707_v11 = vpop.f32.mrf.mxu0  ;;  %v5036_v47 = vpop.f32.mrf.mxu1 }
 0xb4c   :  { %13213 = vst [vmem:[#allocation108_spill] sm:$0xff] %v11524_v6  ;;  %v5896_v30 = vpop.f32.mrf.mxu2  ;;  %v5037_v4 = vadd.f32 %v5036_v47, %v4707_v11 }
 0xb4d   :  { %v6225_v24 = vpop.f32.mrf.mxu3 }
 0xb4e   :  { %v6226_v51 = vadd.f32 %v6225_v24, %v5896_v30  ;;  %4746 = vmatmul.bf16.gmra.mxu0 %v13214_v45  ;;  %5075 = vmatmul.bf16.gmra.mxu1 %v13215_v9  ;;  %v5313_v46 = vmax.f32 %v5037_v4, 0.0  ;;  %v13219_v4 = vld [vmem:[#allocation120_spill] sm:$0xff] }
 0xb50   :  { %v7168_v52 = vmax.f32 %v6226_v51, 0.0 }
 0xb53   :  { %v4709_v23 = vpop.f32.mrf.mxu0  ;;  %v5038_v21 = vpop.f32.mrf.mxu1 }
 0xb54   :  { %v5039_v10 = vadd.f32 %v5038_v21, %v4709_v23  ;;  %v5898_v22 = vpop.f32.mrf.mxu2  ;;  %v13218_v23 = vld [vmem:[#allocation129_spill] sm:$0xff] }
 0xb55   :  { %v6227_v8 = vpop.f32.mrf.mxu3 }
 0xb56   :  { %v5315_v0 = vmax.f32 %v5039_v10, 0.0  ;;  %v6228_v50 = vadd.f32 %v6227_v8, %v5898_v22 }
 0xb58   :  { %v7170_v2 = vmax.f32 %v6228_v50, 0.0  ;;  %5940 = vmatmul.bf16.gmra.mxu2 %v13216_v29  ;;  %v11529_v6 = vpack.c.bf16 %v5315_v0, %v5313_v46 }
 0xb5a   :  { %13217 = vst [vmem:[#allocation119_spill] sm:$0xff] %v11529_v6  ;;  %6269 = vmatmul.bf16.gmra.mxu3 %v11529_v6  ;;  %v11532_v30 = vpack.c.bf16 %v7170_v2, %v7168_v52 }
 0xb5b   :  { %v4712_v24 = vpop.f32.mrf.mxu0  ;;  %v5041_v11 = vpop.f32.mrf.mxu1 }
 0xb5c   :  { %v5901_v47 = vpop.f32.mrf.mxu2  ;;  %v5042_v21 = vadd.f32 %v5041_v11, %v4712_v24 }
 0xb5d   :  { %v6230_v45 = vpop.f32.mrf.mxu3 }
 0xb5e   :  { %v6231_v9 = vadd.f32 %v6230_v45, %v5901_v47  ;;  %4751 = vmatmul.bf16.gmra.mxu0 %v13218_v23  ;;  %5080 = vmatmul.bf16.gmra.mxu1 %v13219_v4  ;;  %v5317_v46 = vmax.f32 %v5042_v21, 0.0  ;;  %v13222_v21 = vld [vmem:[#allocation122_spill] sm:$0xff] }
 0xb60   :  { %v7172_v52 = vmax.f32 %v6231_v9, 0.0  ;;  %v8975_v9 = vld [vmem:[#allocation2 + $0x8] sm:$0xf0] }
 0xb63   :  { %v4714_v51 = vpop.f32.mrf.mxu0  ;;  %v5043_v50 = vpop.f32.mrf.mxu1 }
 0xb64   :  { %v5044_v10 = vadd.f32 %v5043_v50, %v4714_v51  ;;  %v5903_v22 = vpop.f32.mrf.mxu2  ;;  %v9291_v51 = vld [vmem:[#allocation2 + $0x4] sm:$0xf] }
 0xb65   :  { %v6232_v8 = vpop.f32.mrf.mxu3  ;;  %v9307_v50 = vld [vmem:[#allocation2 + $0x84] sm:$0xf] }
 0xb66   :  { %v5319_v0 = vmax.f32 %v5044_v10, 0.0  ;;  %v6233_v6 = vadd.f32 %v6232_v8, %v5903_v22  ;;  %v9039_v10 = vld [vmem:[#allocation2 + $0x88] sm:$0xf0] }
 0xb67   :  { %v9042_v8 = vor.u32 %v9307_v50, %v9039_v10 }
 0xb68   :  { %v7174_v2 = vmax.f32 %v6233_v6, 0.0  ;;  %5945 = vmatmul.bf16.gmra.mxu2 %v11064_v3  ;;  %v11537_v29 = vpack.c.bf16 %v5319_v0, %v5317_v46  ;;  %v8978_v6 = vor.u32 %v9291_v51, %v8975_v9 }
 0xb69   :  { %6706 = vmatpush.bf16.msrb.mxu1 %v9042_v8 }
 0xb6a   :  { %13220 = vst [vmem:[#allocation111_spill] sm:$0xff] %v11537_v29  ;;  %6274 = vmatmul.bf16.gmra.mxu3 %v11537_v29  ;;  %v11540_v47 = vpack.c.bf16 %v7174_v2, %v7172_v52  ;;  %6377 = vmatpush.bf16.msrb.mxu0 %v8978_v6 }
 0xb6b   :  { %v4717_v45 = vpop.f32.mrf.mxu0  ;;  %v5046_v24 = vpop.f32.mrf.mxu1 }
 0xb6c   :  { %13221 = vst [vmem:[#allocation114_spill] sm:$0xff] %v11540_v47  ;;  %v5906_v11 = vpop.f32.mrf.mxu2  ;;  %v5047_v22 = vadd.f32 %v5046_v24, %v4717_v45  ;;  %v9324_v45 = vld [vmem:[%s12409_s5 + $0x8] sm:$0xff] }
 0xb6d   :  { %v6235_v23 = vpop.f32.mrf.mxu3  ;;  %v9332_v24 = vld [vmem:[%s12409_s5 + $0x48] sm:$0xff]  ;;  %7546 = vmatpush.bf16.msrb.mxu2 %v9324_v45 }
 0xb6e   :  { %v6236_v4 = vadd.f32 %v6235_v23, %v5906_v11  ;;  %4756 = vmatmul.bf16.gmra.mxu0 %v10552_v57  ;;  %5085 = vmatmul.bf16.gmra.mxu1 %v13222_v21  ;;  %v5321_v3 = vmax.f32 %v5047_v22, 0.0 }
 0xb6f   :  { %7875 = vmatpush.bf16.msrb.mxu3 %v9332_v24 }
 0xb70   :  { %v7176_v57 = vmax.f32 %v6236_v4, 0.0 }
 0xb73   :  { %v4719_v46 = vpop.f32.mrf.mxu0  ;;  %v5048_v0 = vpop.f32.mrf.mxu1 }
 0xb74   :  { %v5049_v52 = vadd.f32 %v5048_v0, %v4719_v46  ;;  %v5908_v2 = vpop.f32.mrf.mxu2 }
 0xb75   :  { %v6237_v29 = vpop.f32.mrf.mxu3 }
 0xb76   :  { %v5323_v11 = vmax.f32 %v5049_v52, 0.0  ;;  %v6238_v23 = vadd.f32 %v6237_v29, %v5908_v2 }
 0xb78   :  { %v7178_v47 = vmax.f32 %v6238_v23, 0.0  ;;  %5950 = vmatmul.bf16.gmra.mxu2 %v11072_v18  ;;  %v11545_v21 = vpack.c.bf16 %v5323_v11, %v5321_v3 }
 0xb7a   :  { %6279 = vmatmul.bf16.gmra.mxu3 %v11545_v21  ;;  %v11554_v51 = vpack.c.bf16 %v7178_v47, %v7176_v57 }
 0xb7b   :  { %v4722_v9 = vpop.f32.mrf.mxu0  ;;  %v5051_v29 = vpop.f32.mrf.mxu1 }
 0xb7c   :  { %v5911_v4 = vpop.f32.mrf.mxu2  ;;  %v5052_v50 = vadd.f32 %v5051_v29, %v4722_v9 }
 0xb7d   :  { %v6240_v6 = vpop.f32.mrf.mxu3 }
 0xb7e   :  { %v6241_v3 = vadd.f32 %v6240_v6, %v5911_v4  ;;  %4761 = vmatmul.bf16.gmra.mxu0 %v10559_v7  ;;  %5090 = vmatmul.bf16.gmra.mxu1 %v11069_v19  ;;  %v5325_v52 = vmax.f32 %v5052_v50, 0.0 }
 0xb80   :  { %v7180_v11 = vmax.f32 %v6241_v3, 0.0 }
 0xb83   :  { %v4724_v10 = vpop.f32.mrf.mxu0  ;;  %v5053_v22 = vpop.f32.mrf.mxu1 }
 0xb84   :  { %v5054_v8 = vadd.f32 %v5053_v22, %v4724_v10  ;;  %v5913_v46 = vpop.f32.mrf.mxu2 }
 0xb85   :  { %v6242_v0 = vpop.f32.mrf.mxu3 }
 0xb86   :  { %v5327_v47 = vmax.f32 %v5054_v8, 0.0  ;;  %v6243_v2 = vadd.f32 %v6242_v0, %v5913_v46 }
 0xb88   :  { %v7182_v23 = vmax.f32 %v6243_v2, 0.0  ;;  %5955 = vmatmul.bf16.gmra.mxu2 %v11080_v33  ;;  %v11559_v57 = vpack.c.bf16 %v5327_v47, %v5325_v52 }
 0xb8a   :  { %6284 = vmatmul.bf16.gmra.mxu3 %v11559_v57  ;;  %v11562_v7 = vpack.c.bf16 %v7182_v23, %v7180_v11 }
 0xb8b   :  { %v4727_v19 = vpop.f32.mrf.mxu0  ;;  %v5056_v45 = vpop.f32.mrf.mxu1 }
 0xb8c   :  { %v5916_v24 = vpop.f32.mrf.mxu2  ;;  %v5057_v4 = vadd.f32 %v5056_v45, %v4727_v19 }
 0xb8d   :  { %v6245_v9 = vpop.f32.mrf.mxu3 }
 0xb8e   :  { %v6246_v29 = vadd.f32 %v6245_v9, %v5916_v24  ;;  %4766 = vmatmul.bf16.gmra.mxu0 %v10567_v60  ;;  %5095 = vmatmul.bf16.gmra.mxu1 %v11077_v15  ;;  %v5329_v8 = vmax.f32 %v5057_v4, 0.0 }
 0xb90   :  { %v7184_v52 = vmax.f32 %v6246_v29, 0.0 }
 0xb93   :  { %v4729_v6 = vpop.f32.mrf.mxu0  ;;  %v5058_v3 = vpop.f32.mrf.mxu1 }
 0xb94   :  { %v5059_v50 = vadd.f32 %v5058_v3, %v4729_v6  ;;  %v5918_v10 = vpop.f32.mrf.mxu2 }
 0xb95   :  { %v6247_v22 = vpop.f32.mrf.mxu3 }
 0xb96   :  { %v5331_v46 = vmax.f32 %v5059_v50, 0.0  ;;  %v6248_v0 = vadd.f32 %v6247_v22, %v5918_v10 }
 0xb98   :  { %v7186_v47 = vmax.f32 %v6248_v0, 0.0  ;;  %5960 = vmatmul.bf16.gmra.mxu2 %v11088_v63  ;;  %v11567_v2 = vpack.c.bf16 %v5331_v46, %v5329_v8 }
 0xb9a   :  { %6289 = vmatmul.bf16.gmra.mxu3 %v11567_v2  ;;  %v11570_v60 = vpack.c.bf16 %v7186_v47, %v7184_v52 }
 0xb9b   :  { %v4732_v15 = vpop.f32.mrf.mxu0  ;;  %v5061_v11 = vpop.f32.mrf.mxu1 }
 0xb9c   :  { %v5921_v23 = vpop.f32.mrf.mxu2  ;;  %v5062_v24 = vadd.f32 %v5061_v11, %v4732_v15 }
 0xb9d   :  { %v6250_v19 = vpop.f32.mrf.mxu3 }
 0xb9e   :  { %v6251_v45 = vadd.f32 %v6250_v19, %v5921_v23  ;;  %4771 = vmatmul.bf16.gmra.mxu0 %v10575_v1  ;;  %5100 = vmatmul.bf16.gmra.mxu1 %v11085_v39  ;;  %v5333_v50 = vmax.f32 %v5062_v24, 0.0 }
 0xba0   :  { %v7188_v8 = vmax.f32 %v6251_v45, 0.0 }
 0xba3   :  { %v4734_v9 = vpop.f32.mrf.mxu0  ;;  %v5063_v29 = vpop.f32.mrf.mxu1 }
 0xba4   :  { %v5064_v4 = vadd.f32 %v5063_v29, %v4734_v9  ;;  %v5923_v6 = vpop.f32.mrf.mxu2 }
 0xba5   :  { %v6252_v3 = vpop.f32.mrf.mxu3 }
 0xba6   :  { %v5335_v10 = vmax.f32 %v5064_v4, 0.0  ;;  %v6253_v22 = vadd.f32 %v6252_v3, %v5923_v6 }
 0xba8   :  { %v7190_v46 = vmax.f32 %v6253_v22, 0.0  ;;  %5965 = vmatmul.bf16.gmra.mxu2 %v11096_v25  ;;  %v11575_v0 = vpack.c.bf16 %v5335_v10, %v5333_v50 }
 0xbaa   :  { %6294 = vmatmul.bf16.gmra.mxu3 %v11575_v0  ;;  %v11578_v1 = vpack.c.bf16 %v7190_v46, %v7188_v8 }
 0xbab   :  { %v4737_v39 = vpop.f32.mrf.mxu0  ;;  %v5066_v52 = vpop.f32.mrf.mxu1 }
 0xbac   :  { %v5926_v47 = vpop.f32.mrf.mxu2  ;;  %v5067_v23 = vadd.f32 %v5066_v52, %v4737_v39 }
 0xbad   :  { %v6255_v15 = vpop.f32.mrf.mxu3 }
 0xbae   :  { %v6256_v11 = vadd.f32 %v6255_v15, %v5926_v47  ;;  %4776 = vmatmul.bf16.gmra.mxu0 %v10583_v28  ;;  %5105 = vmatmul.bf16.gmra.mxu1 %v11093_v56  ;;  %v5337_v4 = vmax.f32 %v5067_v23, 0.0 }
 0xbb0   :  { %v7192_v50 = vmax.f32 %v6256_v11, 0.0 }
 0xbb3   :  { %v4739_v19 = vpop.f32.mrf.mxu0  ;;  %v5068_v45 = vpop.f32.mrf.mxu1 }
 0xbb4   :  { %v5069_v24 = vadd.f32 %v5068_v45, %v4739_v19  ;;  %v5928_v9 = vpop.f32.mrf.mxu2 }
 0xbb5   :  { %v6257_v29 = vpop.f32.mrf.mxu3 }
 0xbb6   :  { %v5339_v6 = vmax.f32 %v5069_v24, 0.0  ;;  %v6258_v3 = vadd.f32 %v6257_v29, %v5928_v9 }
 0xbb8   :  { %v7194_v10 = vmax.f32 %v6258_v3, 0.0  ;;  %5970 = vmatmul.bf16.gmra.mxu2 %v11104_v62  ;;  %v11583_v22 = vpack.c.bf16 %v5339_v6, %v5337_v4 }
 0xbba   :  { %6299 = vmatmul.bf16.gmra.mxu3 %v11583_v22  ;;  %v11586_v28 = vpack.c.bf16 %v7194_v10, %v7192_v50 }
 0xbbb   :  { %v4742_v56 = vpop.f32.mrf.mxu0  ;;  %v5071_v8 = vpop.f32.mrf.mxu1 }
 0xbbc   :  { %v5931_v46 = vpop.f32.mrf.mxu2  ;;  %v5072_v47 = vadd.f32 %v5071_v8, %v4742_v56 }
 0xbbd   :  { %v6260_v39 = vpop.f32.mrf.mxu3 }
 0xbbe   :  { %v6261_v52 = vadd.f32 %v6260_v39, %v5931_v46  ;;  %4781 = vmatmul.bf16.gmra.mxu0 %v10591_v49  ;;  %5110 = vmatmul.bf16.gmra.mxu1 %v11101_v41  ;;  %v5341_v24 = vmax.f32 %v5072_v47, 0.0 }
 0xbc0   :  { %v7196_v4 = vmax.f32 %v6261_v52, 0.0 }
 0xbc3   :  { %v4744_v15 = vpop.f32.mrf.mxu0  ;;  %v5073_v11 = vpop.f32.mrf.mxu1 }
 0xbc4   :  { %v5074_v23 = vadd.f32 %v5073_v11, %v4744_v15  ;;  %v5933_v19 = vpop.f32.mrf.mxu2 }
 0xbc5   :  { %v6262_v45 = vpop.f32.mrf.mxu3 }
 0xbc6   :  { %v5343_v9 = vmax.f32 %v5074_v23, 0.0  ;;  %v6263_v29 = vadd.f32 %v6262_v45, %v5933_v19 }
 0xbc8   :  { %v7198_v6 = vmax.f32 %v6263_v29, 0.0  ;;  %5975 = vmatmul.bf16.gmra.mxu2 %v11112_v32  ;;  %v11591_v3 = vpack.c.bf16 %v5343_v9, %v5341_v24 }
 0xbca   :  { %6304 = vmatmul.bf16.gmra.mxu3 %v11591_v3  ;;  %v11594_v49 = vpack.c.bf16 %v7198_v6, %v7196_v4 }
 0xbcb   :  { %v4747_v41 = vpop.f32.mrf.mxu0  ;;  %v5076_v50 = vpop.f32.mrf.mxu1 }
 0xbcc   :  { %v5936_v10 = vpop.f32.mrf.mxu2  ;;  %v5077_v46 = vadd.f32 %v5076_v50, %v4747_v41 }
 0xbcd   :  { %v6265_v56 = vpop.f32.mrf.mxu3 }
 0xbce   :  { %v6266_v8 = vadd.f32 %v6265_v56, %v5936_v10  ;;  %4786 = vmatmul.bf16.gmra.mxu0 %v10599_v36  ;;  %5115 = vmatmul.bf16.gmra.mxu1 %v11109_v40  ;;  %v5345_v23 = vmax.f32 %v5077_v46, 0.0 }
 0xbd0   :  { %v7200_v24 = vmax.f32 %v6266_v8, 0.0 }
 0xbd3   :  { %v4749_v39 = vpop.f32.mrf.mxu0  ;;  %v5078_v52 = vpop.f32.mrf.mxu1 }
 0xbd4   :  { %v5079_v47 = vadd.f32 %v5078_v52, %v4749_v39  ;;  %v5938_v15 = vpop.f32.mrf.mxu2 }
 0xbd5   :  { %v6267_v11 = vpop.f32.mrf.mxu3 }
 0xbd6   :  { %v5347_v19 = vmax.f32 %v5079_v47, 0.0  ;;  %v6268_v45 = vadd.f32 %v6267_v11, %v5938_v15 }
 0xbd8   :  { %v7202_v9 = vmax.f32 %v6268_v45, 0.0  ;;  %5980 = vmatmul.bf16.gmra.mxu2 %v11120_v31  ;;  %v11599_v29 = vpack.c.bf16 %v5347_v19, %v5345_v23 }
 0xbda   :  { %6309 = vmatmul.bf16.gmra.mxu3 %v11599_v29  ;;  %v11602_v36 = vpack.c.bf16 %v7202_v9, %v7200_v24 }
 0xbdb   :  { %v4752_v40 = vpop.f32.mrf.mxu0  ;;  %v5081_v4 = vpop.f32.mrf.mxu1 }
 0xbdc   :  { %v5941_v6 = vpop.f32.mrf.mxu2  ;;  %v5082_v10 = vadd.f32 %v5081_v4, %v4752_v40 }
 0xbdd   :  { %v6270_v41 = vpop.f32.mrf.mxu3 }
 0xbde   :  { %v6271_v50 = vadd.f32 %v6270_v41, %v5941_v6  ;;  %4791 = vmatmul.bf16.gmra.mxu0 %v10619_v27  ;;  %5120 = vmatmul.bf16.gmra.mxu1 %v11117_v61  ;;  %v5349_v47 = vmax.f32 %v5082_v10, 0.0 }
 0xbe0   :  { %v7204_v23 = vmax.f32 %v6271_v50, 0.0 }
 0xbe3   :  { %v4754_v56 = vpop.f32.mrf.mxu0  ;;  %v5083_v8 = vpop.f32.mrf.mxu1 }
 0xbe4   :  { %v5084_v46 = vadd.f32 %v5083_v8, %v4754_v56  ;;  %v5943_v39 = vpop.f32.mrf.mxu2 }
 0xbe5   :  { %v6272_v52 = vpop.f32.mrf.mxu3 }
 0xbe6   :  { %v5351_v15 = vmax.f32 %v5084_v46, 0.0  ;;  %v6273_v11 = vadd.f32 %v6272_v52, %v5943_v39 }
 0xbe8   :  { %v7206_v19 = vmax.f32 %v6273_v11, 0.0  ;;  %5985 = vmatmul.bf16.gmra.mxu2 %v11134_v44  ;;  %v11607_v45 = vpack.c.bf16 %v5351_v15, %v5349_v47 }
 0xbea   :  { %6314 = vmatmul.bf16.gmra.mxu3 %v11607_v45  ;;  %v11610_v27 = vpack.c.bf16 %v7206_v19, %v7204_v23 }
 0xbeb   :  { %v4757_v61 = vpop.f32.mrf.mxu0  ;;  %v5086_v24 = vpop.f32.mrf.mxu1 }
 0xbec   :  { %v5946_v9 = vpop.f32.mrf.mxu2  ;;  %v5087_v6 = vadd.f32 %v5086_v24, %v4757_v61 }
 0xbed   :  { %v6275_v40 = vpop.f32.mrf.mxu3 }
 0xbee   :  { %v6276_v4 = vadd.f32 %v6275_v40, %v5946_v9  ;;  %4796 = vmatmul.bf16.gmra.mxu0 %v10627_v55  ;;  %5125 = vmatmul.bf16.gmra.mxu1 %v11125_v17  ;;  %v5353_v46 = vmax.f32 %v5087_v6, 0.0  ;;  %v9323_v55 = vld [vmem:[%s12409_s5] sm:$0xff]  ;;  %v13225_v6 = vld [vmem:[#allocation124_spill] sm:$0xff] }
 0xbef   :  { %v9331_v17 = vld [vmem:[%s12409_s5 + $0x40] sm:$0xff]  ;;  %7547 = vmatpush.bf16.msrb.mxu2 %v9323_v55 }
 0xbf0   :  { %v7208_v47 = vmax.f32 %v6276_v4, 0.0  ;;  %7876 = vmatpush.bf16.msrb.mxu3 %v9331_v17  ;;  %v13224_v4 = vld [vmem:[#allocation132_spill] sm:$0xff] }
 0xbf3   :  { %v4759_v41 = vpop.f32.mrf.mxu0  ;;  %v5088_v50 = vpop.f32.mrf.mxu1 }
 0xbf4   :  { %v5089_v10 = vadd.f32 %v5088_v50, %v4759_v41  ;;  %v5948_v56 = vpop.f32.mrf.mxu2 }
 0xbf5   :  { %v6277_v8 = vpop.f32.mrf.mxu3 }
 0xbf6   :  { %v5355_v39 = vmax.f32 %v5089_v10, 0.0  ;;  %v6278_v52 = vadd.f32 %v6277_v8, %v5948_v56 }
 0xbf8   :  { %v7210_v15 = vmax.f32 %v6278_v52, 0.0  ;;  %5990 = vmatmul.bf16.gmra.mxu2 %v11142_v54  ;;  %v11615_v11 = vpack.c.bf16 %v5355_v39, %v5353_v46  ;;  %v13226_v54 = vld [vmem:[#allocation128_spill] sm:$0xff] }
 0xbfa   :  { %13223 = vst [vmem:[#allocation115_spill] sm:$0xff] %v11615_v11  ;;  %6319 = vmatmul.bf16.gmra.mxu3 %v11615_v11  ;;  %v11624_v23 = vpack.c.bf16 %v7210_v15, %v7208_v47 }
 0xbfb   :  { %v4762_v19 = vpop.f32.mrf.mxu0  ;;  %v5091_v61 = vpop.f32.mrf.mxu1 }
 0xbfc   :  { %v5951_v24 = vpop.f32.mrf.mxu2  ;;  %v5092_v41 = vadd.f32 %v5091_v61, %v4762_v19 }
 0xbfd   :  { %v6280_v9 = vpop.f32.mrf.mxu3 }
 0xbfe   :  { %v6281_v40 = vadd.f32 %v6280_v9, %v5951_v24  ;;  %4801 = vmatmul.bf16.gmra.mxu0 %v13224_v4  ;;  %5130 = vmatmul.bf16.gmra.mxu1 %v13225_v6  ;;  %v5357_v39 = vmax.f32 %v5092_v41, 0.0  ;;  %v13229_v6 = vld [vmem:[#allocation133_spill] sm:$0xff]  ;;  %v13230_v41 = vld [vmem:[#allocation127_spill] sm:$0xff] }
 0xc00   :  { %v7212_v15 = vmax.f32 %v6281_v40, 0.0 }
 0xc03   :  { %v4764_v50 = vpop.f32.mrf.mxu0  ;;  %v5093_v10 = vpop.f32.mrf.mxu1 }
 0xc04   :  { %v5094_v56 = vadd.f32 %v5093_v10, %v4764_v50  ;;  %v5953_v8 = vpop.f32.mrf.mxu2 }
 0xc05   :  { %v6282_v46 = vpop.f32.mrf.mxu3 }
 0xc06   :  { %v5359_v52 = vmax.f32 %v5094_v56, 0.0  ;;  %v6283_v47 = vadd.f32 %v6282_v46, %v5953_v8 }
 0xc08   :  { %v7214_v11 = vmax.f32 %v6283_v47, 0.0  ;;  %5995 = vmatmul.bf16.gmra.mxu2 %v13226_v54  ;;  %v11629_v55 = vpack.c.bf16 %v5359_v52, %v5357_v39 }
 0xc0a   :  { %13227 = vst [vmem:[#allocation126_spill] sm:$0xff] %v11629_v55  ;;  %6324 = vmatmul.bf16.gmra.mxu3 %v11629_v55  ;;  %v11632_v17 = vpack.c.bf16 %v7214_v11, %v7212_v15  ;;  %v13231_v55 = vld [vmem:[#allocation131_spill] sm:$0xff] }
 0xc0b   :  { %v4767_v24 = vpop.f32.mrf.mxu0  ;;  %v5096_v19 = vpop.f32.mrf.mxu1 }
 0xc0c   :  { %13228 = vst [vmem:[#allocation117_spill] sm:$0xff] %v11632_v17  ;;  %v5956_v61 = vpop.f32.mrf.mxu2  ;;  %v5097_v50 = vadd.f32 %v5096_v19, %v4767_v24  ;;  %v13273_v17 = vld [vmem:[#allocation31_spill] sm:$0xff] }
 0xc0d   :  { %v6285_v9 = vpop.f32.mrf.mxu3 }
 0xc0e   :  { %v6286_v4 = vadd.f32 %v6285_v9, %v5956_v61  ;;  %6378 = vmatmul.bf16.vlgmr.msrb.gmra.mxu0 %v13229_v6  ;;  %6707 = vmatmul.bf16.vlgmr.msrb.gmra.mxu1 %v13230_v41  ;;  %v5361_v39 = vmax.f32 %v5097_v50, 0.0  ;;  %v13235_v50 = vld [vmem:[#allocation130_spill] sm:$0xff] }
 0xc10   :  { %v7216_v11 = vmax.f32 %v6286_v4, 0.0 }
 0xc13   :  { %v4769_v40 = vpop.f32.mrf.mxu0  ;;  %v5098_v10 = vpop.f32.mrf.mxu1 }
 0xc14   :  { %v5099_v56 = vadd.f32 %v5098_v10, %v4769_v40  ;;  %v5958_v8 = vpop.f32.mrf.mxu2  ;;  %v13234_v40 = vld [vmem:[#allocation7_spill] sm:$0xff] }
 0xc15   :  { %v6287_v46 = vpop.f32.mrf.mxu3 }
 0xc16   :  { %v5363_v52 = vmax.f32 %v5099_v56, 0.0  ;;  %v6288_v47 = vadd.f32 %v6287_v46, %v5958_v8 }
 0xc18   :  { %v7218_v15 = vmax.f32 %v6288_v47, 0.0  ;;  %6000 = vmatmul.bf16.gmra.mxu2 %v13231_v55  ;;  %v11637_v54 = vpack.c.bf16 %v5363_v52, %v5361_v39  ;;  %v13236_v55 = vld [vmem:[#allocation5_spill] sm:$0xff] }
 0xc1a   :  { %13232 = vst [vmem:[#allocation129_spill] sm:$0xff] %v11637_v54  ;;  %6329 = vmatmul.bf16.gmra.mxu3 %v11637_v54  ;;  %v11640_v61 = vpack.c.bf16 %v7218_v15, %v7216_v11 }
 0xc1b   :  { %v4772_v9 = vpop.f32.mrf.mxu0  ;;  %v5101_v24 = vpop.f32.mrf.mxu1 }
 0xc1c   :  { %13233 = vst [vmem:[#allocation120_spill] sm:$0xff] %v11640_v61  ;;  %v5961_v19 = vpop.f32.mrf.mxu2  ;;  %v5102_v10 = vadd.f32 %v5101_v24, %v4772_v9 }
 0xc1d   :  { %v6290_v6 = vpop.f32.mrf.mxu3 }
 0xc1e   :  { %v6291_v41 = vadd.f32 %v6290_v6, %v5961_v19  ;;  %6383 = vmatmul.bf16.gmra.mxu0 %v13234_v40  ;;  %6712 = vmatmul.bf16.gmra.mxu1 %v13235_v50  ;;  %v5365_v52 = vmax.f32 %v5102_v10, 0.0  ;;  %v13240_v10 = vld [vmem:[#allocation8_spill] sm:$0xff] }
 0xc20   :  { %v7220_v11 = vmax.f32 %v6291_v41, 0.0 }
 0xc23   :  { %v4774_v4 = vpop.f32.mrf.mxu0  ;;  %v5103_v56 = vpop.f32.mrf.mxu1 }
 0xc24   :  { %v5104_v8 = vadd.f32 %v5103_v56, %v4774_v4  ;;  %v5963_v46 = vpop.f32.mrf.mxu2  ;;  %v13239_v4 = vld [vmem:[#allocation10_spill] sm:$0xff] }
 0xc25   :  { %v6292_v39 = vpop.f32.mrf.mxu3 }
 0xc26   :  { %v5367_v47 = vmax.f32 %v5104_v8, 0.0  ;;  %v6293_v54 = vadd.f32 %v6292_v39, %v5963_v46 }
 0xc28   :  { %v7222_v15 = vmax.f32 %v6293_v54, 0.0  ;;  %6005 = vmatmul.bf16.gmra.mxu2 %v13236_v55  ;;  %v11645_v61 = vpack.c.bf16 %v5367_v47, %v5365_v52  ;;  %v13241_v55 = vld [vmem:[#allocation6_spill] sm:$0xff] }
 0xc2a   :  { %13237 = vst [vmem:[#allocation122_spill] sm:$0xff] %v11645_v61  ;;  %6334 = vmatmul.bf16.gmra.mxu3 %v11645_v61  ;;  %v11648_v19 = vpack.c.bf16 %v7222_v15, %v7220_v11 }
 0xc2b   :  { %v4777_v6 = vpop.f32.mrf.mxu0  ;;  %v5106_v9 = vpop.f32.mrf.mxu1 }
 0xc2c   :  { %13238 = vst [vmem:[#allocation132_spill] sm:$0xff] %v11648_v19  ;;  %v5966_v24 = vpop.f32.mrf.mxu2  ;;  %v5107_v56 = vadd.f32 %v5106_v9, %v4777_v6 }
 0xc2d   :  { %v6295_v40 = vpop.f32.mrf.mxu3 }
 0xc2e   :  { %v6296_v50 = vadd.f32 %v6295_v40, %v5966_v24  ;;  %6388 = vmatmul.bf16.gmra.mxu0 %v13239_v4  ;;  %6717 = vmatmul.bf16.gmra.mxu1 %v13240_v10  ;;  %v5369_v52 = vmax.f32 %v5107_v56, 0.0  ;;  %v13245_v56 = vld [vmem:[#allocation11_spill] sm:$0xff] }
 0xc30   :  { %v7224_v11 = vmax.f32 %v6296_v50, 0.0 }
 0xc33   :  { %v4779_v41 = vpop.f32.mrf.mxu0  ;;  %v5108_v54 = vpop.f32.mrf.mxu1 }
 0xc34   :  { %v5109_v8 = vadd.f32 %v5108_v54, %v4779_v41  ;;  %v5968_v46 = vpop.f32.mrf.mxu2  ;;  %v13244_v41 = vld [vmem:[#allocation13_spill] sm:$0xff] }
 0xc35   :  { %v6297_v39 = vpop.f32.mrf.mxu3 }
 0xc36   :  { %v5371_v47 = vmax.f32 %v5109_v8, 0.0  ;;  %v6298_v61 = vadd.f32 %v6297_v39, %v5968_v46 }
 0xc38   :  { %v7226_v15 = vmax.f32 %v6298_v61, 0.0  ;;  %6010 = vmatmul.bf16.gmra.mxu2 %v13241_v55  ;;  %v11653_v19 = vpack.c.bf16 %v5371_v47, %v5369_v52  ;;  %v13246_v55 = vld [vmem:[#allocation9_spill] sm:$0xff] }
 0xc3a   :  { %13242 = vst [vmem:[#allocation124_spill] sm:$0xff] %v11653_v19  ;;  %6339 = vmatmul.bf16.gmra.mxu3 %v11653_v19  ;;  %v11656_v24 = vpack.c.bf16 %v7226_v15, %v7224_v11 }
 0xc3b   :  { %v4782_v40 = vpop.f32.mrf.mxu0  ;;  %v5111_v6 = vpop.f32.mrf.mxu1 }
 0xc3c   :  { %13243 = vst [vmem:[#allocation133_spill] sm:$0xff] %v11656_v24  ;;  %v5971_v9 = vpop.f32.mrf.mxu2  ;;  %v5112_v54 = vadd.f32 %v5111_v6, %v4782_v40 }
 0xc3d   :  { %v6300_v4 = vpop.f32.mrf.mxu3 }
 0xc3e   :  { %v6301_v10 = vadd.f32 %v6300_v4, %v5971_v9  ;;  %6393 = vmatmul.bf16.gmra.mxu0 %v13244_v41  ;;  %6722 = vmatmul.bf16.gmra.mxu1 %v13245_v56  ;;  %v5373_v52 = vmax.f32 %v5112_v54, 0.0  ;;  %v13250_v54 = vld [vmem:[#allocation14_spill] sm:$0xff] }
 0xc40   :  { %v7228_v11 = vmax.f32 %v6301_v10, 0.0 }
 0xc43   :  { %v4784_v50 = vpop.f32.mrf.mxu0  ;;  %v5113_v61 = vpop.f32.mrf.mxu1 }
 0xc44   :  { %v5114_v8 = vadd.f32 %v5113_v61, %v4784_v50  ;;  %v5973_v46 = vpop.f32.mrf.mxu2  ;;  %v13249_v50 = vld [vmem:[#allocation16_spill] sm:$0xff] }
 0xc45   :  { %v6302_v39 = vpop.f32.mrf.mxu3 }
 0xc46   :  { %v5375_v47 = vmax.f32 %v5114_v8, 0.0  ;;  %v6303_v19 = vadd.f32 %v6302_v39, %v5973_v46 }
 0xc48   :  { %v7230_v15 = vmax.f32 %v6303_v19, 0.0  ;;  %6015 = vmatmul.bf16.gmra.mxu2 %v13246_v55  ;;  %v11661_v24 = vpack.c.bf16 %v5375_v47, %v5373_v52  ;;  %v13251_v55 = vld [vmem:[#allocation12_spill] sm:$0xff] }
 0xc4a   :  { %13247 = vst [vmem:[#allocation127_spill] sm:$0xff] %v11661_v24  ;;  %6344 = vmatmul.bf16.gmra.mxu3 %v11661_v24  ;;  %v11664_v9 = vpack.c.bf16 %v7230_v15, %v7228_v11 }
 0xc4b   :  { %v4787_v4 = vpop.f32.mrf.mxu0  ;;  %v5116_v40 = vpop.f32.mrf.mxu1 }
 0xc4c   :  { %13248 = vst [vmem:[#allocation7_spill] sm:$0xff] %v11664_v9  ;;  %v5976_v6 = vpop.f32.mrf.mxu2  ;;  %v5117_v61 = vadd.f32 %v5116_v40, %v4787_v4 }
 0xc4d   :  { %v6305_v41 = vpop.f32.mrf.mxu3 }
 0xc4e   :  { %v6306_v56 = vadd.f32 %v6305_v41, %v5976_v6  ;;  %6398 = vmatmul.bf16.gmra.mxu0 %v13249_v50  ;;  %6727 = vmatmul.bf16.gmra.mxu1 %v13250_v54  ;;  %v5377_v52 = vmax.f32 %v5117_v61, 0.0  ;;  %v13255_v61 = vld [vmem:[#allocation17_spill] sm:$0xff] }
 0xc50   :  { %v7232_v11 = vmax.f32 %v6306_v56, 0.0 }
 0xc53   :  { %v4789_v10 = vpop.f32.mrf.mxu0  ;;  %v5118_v19 = vpop.f32.mrf.mxu1 }
 0xc54   :  { %v5119_v8 = vadd.f32 %v5118_v19, %v4789_v10  ;;  %v5978_v46 = vpop.f32.mrf.mxu2  ;;  %v13254_v10 = vld [vmem:[#allocation19_spill] sm:$0xff] }
 0xc55   :  { %v6307_v39 = vpop.f32.mrf.mxu3 }
 0xc56   :  { %v5379_v47 = vmax.f32 %v5119_v8, 0.0  ;;  %v6308_v24 = vadd.f32 %v6307_v39, %v5978_v46 }
 0xc58   :  { %v7234_v15 = vmax.f32 %v6308_v24, 0.0  ;;  %6020 = vmatmul.bf16.gmra.mxu2 %v13251_v55  ;;  %v11669_v9 = vpack.c.bf16 %v5379_v47, %v5377_v52  ;;  %v13256_v55 = vld [vmem:[#allocation15_spill] sm:$0xff] }
 0xc5a   :  { %13252 = vst [vmem:[#allocation130_spill] sm:$0xff] %v11669_v9  ;;  %6349 = vmatmul.bf16.gmra.mxu3 %v11669_v9  ;;  %v11672_v6 = vpack.c.bf16 %v7234_v15, %v7232_v11 }
 0xc5b   :  { %v4792_v41 = vpop.f32.mrf.mxu0  ;;  %v5121_v4 = vpop.f32.mrf.mxu1 }
 0xc5c   :  { %13253 = vst [vmem:[#allocation10_spill] sm:$0xff] %v11672_v6  ;;  %v5981_v40 = vpop.f32.mrf.mxu2  ;;  %v5122_v19 = vadd.f32 %v5121_v4, %v4792_v41 }
 0xc5d   :  { %v6310_v50 = vpop.f32.mrf.mxu3 }
 0xc5e   :  { %v6311_v54 = vadd.f32 %v6310_v50, %v5981_v40  ;;  %6403 = vmatmul.bf16.gmra.mxu0 %v13254_v10  ;;  %6732 = vmatmul.bf16.gmra.mxu1 %v13255_v61  ;;  %v5381_v52 = vmax.f32 %v5122_v19, 0.0  ;;  %v13260_v19 = vld [vmem:[#allocation20_spill] sm:$0xff] }
 0xc60   :  { %v7236_v11 = vmax.f32 %v6311_v54, 0.0 }
 0xc63   :  { %v4794_v56 = vpop.f32.mrf.mxu0  ;;  %v5123_v24 = vpop.f32.mrf.mxu1 }
 0xc64   :  { %v5124_v8 = vadd.f32 %v5123_v24, %v4794_v56  ;;  %v5983_v46 = vpop.f32.mrf.mxu2  ;;  %v13259_v56 = vld [vmem:[#allocation22_spill] sm:$0xff] }
 0xc65   :  { %v6312_v39 = vpop.f32.mrf.mxu3 }
 0xc66   :  { %v5383_v47 = vmax.f32 %v5124_v8, 0.0  ;;  %v6313_v9 = vadd.f32 %v6312_v39, %v5983_v46 }
 0xc68   :  { %v7238_v15 = vmax.f32 %v6313_v9, 0.0  ;;  %6025 = vmatmul.bf16.gmra.mxu2 %v13256_v55  ;;  %v11677_v6 = vpack.c.bf16 %v5383_v47, %v5381_v52  ;;  %v13261_v55 = vld [vmem:[#allocation18_spill] sm:$0xff] }
 0xc6a   :  { %13257 = vst [vmem:[#allocation8_spill] sm:$0xff] %v11677_v6  ;;  %6354 = vmatmul.bf16.gmra.mxu3 %v11677_v6  ;;  %v11680_v40 = vpack.c.bf16 %v7238_v15, %v7236_v11 }
 0xc6b   :  { %v4797_v50 = vpop.f32.mrf.mxu0  ;;  %v5126_v41 = vpop.f32.mrf.mxu1 }
 0xc6c   :  { %13258 = vst [vmem:[#allocation13_spill] sm:$0xff] %v11680_v40  ;;  %v5986_v4 = vpop.f32.mrf.mxu2  ;;  %v5127_v24 = vadd.f32 %v5126_v41, %v4797_v50 }
 0xc6d   :  { %v6315_v10 = vpop.f32.mrf.mxu3 }
 0xc6e   :  { %v6316_v61 = vadd.f32 %v6315_v10, %v5986_v4  ;;  %6408 = vmatmul.bf16.gmra.mxu0 %v13259_v56  ;;  %6737 = vmatmul.bf16.gmra.mxu1 %v13260_v19  ;;  %v5385_v52 = vmax.f32 %v5127_v24, 0.0  ;;  %v13265_v24 = vld [vmem:[#allocation23_spill] sm:$0xff] }
 0xc70   :  { %v7240_v11 = vmax.f32 %v6316_v61, 0.0 }
 0xc73   :  { %v4799_v54 = vpop.f32.mrf.mxu0  ;;  %v5128_v9 = vpop.f32.mrf.mxu1 }
 0xc74   :  { %v5129_v8 = vadd.f32 %v5128_v9, %v4799_v54  ;;  %v5988_v46 = vpop.f32.mrf.mxu2  ;;  %v13264_v54 = vld [vmem:[#allocation25_spill] sm:$0xff] }
 0xc75   :  { %v6317_v39 = vpop.f32.mrf.mxu3 }
 0xc76   :  { %v5387_v47 = vmax.f32 %v5129_v8, 0.0  ;;  %v6318_v6 = vadd.f32 %v6317_v39, %v5988_v46 }
 0xc78   :  { %v7242_v15 = vmax.f32 %v6318_v6, 0.0  ;;  %6030 = vmatmul.bf16.gmra.mxu2 %v13261_v55  ;;  %v11685_v40 = vpack.c.bf16 %v5387_v47, %v5385_v52  ;;  %v13266_v55 = vld [vmem:[#allocation21_spill] sm:$0xff] }
 0xc7a   :  { %13262 = vst [vmem:[#allocation11_spill] sm:$0xff] %v11685_v40  ;;  %6359 = vmatmul.bf16.gmra.mxu3 %v11685_v40  ;;  %v11688_v4 = vpack.c.bf16 %v7242_v15, %v7240_v11 }
 0xc7b   :  { %v4802_v10 = vpop.f32.mrf.mxu0  ;;  %v5131_v50 = vpop.f32.mrf.mxu1 }
 0xc7c   :  { %13263 = vst [vmem:[#allocation16_spill] sm:$0xff] %v11688_v4  ;;  %v5991_v41 = vpop.f32.mrf.mxu2  ;;  %v5132_v9 = vadd.f32 %v5131_v50, %v4802_v10 }
 0xc7d   :  { %v6320_v56 = vpop.f32.mrf.mxu3 }
 0xc7e   :  { %v6321_v19 = vadd.f32 %v6320_v56, %v5991_v41  ;;  %6413 = vmatmul.bf16.gmra.mxu0 %v13264_v54  ;;  %6742 = vmatmul.bf16.gmra.mxu1 %v13265_v24  ;;  %v5389_v52 = vmax.f32 %v5132_v9, 0.0  ;;  %v13270_v9 = vld [vmem:[#allocation26_spill] sm:$0xff] }
 0xc80   :  { %v7244_v11 = vmax.f32 %v6321_v19, 0.0 }
 0xc83   :  { %v4804_v61 = vpop.f32.mrf.mxu0  ;;  %v5133_v6 = vpop.f32.mrf.mxu1 }
 0xc84   :  { %v5134_v8 = vadd.f32 %v5133_v6, %v4804_v61  ;;  %v5993_v46 = vpop.f32.mrf.mxu2  ;;  %v13269_v61 = vld [vmem:[#allocation28_spill] sm:$0xff] }
 0xc85   :  { %v6322_v39 = vpop.f32.mrf.mxu3 }
 0xc86   :  { %v5391_v47 = vmax.f32 %v5134_v8, 0.0  ;;  %v6323_v40 = vadd.f32 %v6322_v39, %v5993_v46 }
 0xc88   :  { %v7246_v15 = vmax.f32 %v6323_v40, 0.0  ;;  %6035 = vmatmul.bf16.gmra.mxu2 %v13266_v55  ;;  %v11693_v4 = vpack.c.bf16 %v5391_v47, %v5389_v52 }
 0xc8a   :  { %13267 = vst [vmem:[#allocation14_spill] sm:$0xff] %v11693_v4  ;;  %6364 = vmatmul.bf16.gmra.mxu3 %v11693_v4  ;;  %v11696_v41 = vpack.c.bf16 %v7246_v15, %v7244_v11 }
 0xc8b   :  { %v6379_v56 = vpop.f32.mrf.mxu0  ;;  %v6708_v10 = vpop.f32.mrf.mxu1 }
 0xc8c   :  { %13268 = vst [vmem:[#allocation19_spill] sm:$0xff] %v11696_v41  ;;  %v5996_v50 = vpop.f32.mrf.mxu2  ;;  %v6709_v6 = vadd.f32 %v6708_v10, %v6379_v56  ;;  %v13271_v41 = vld [vmem:[#allocation24_spill] sm:$0xff] }
 0xc8d   :  { %v6325_v54 = vpop.f32.mrf.mxu3 }
 0xc8e   :  { %v6326_v24 = vadd.f32 %v6325_v54, %v5996_v50  ;;  %6418 = vmatmul.bf16.gmra.mxu0 %v13269_v61  ;;  %6747 = vmatmul.bf16.gmra.mxu1 %v13270_v9  ;;  %v7029_v52 = vmax.f32 %v6709_v6, 0.0 }
 0xc90   :  { %v7248_v11 = vmax.f32 %v6326_v24, 0.0 }
 0xc93   :  { %v6381_v19 = vpop.f32.mrf.mxu0  ;;  %v6710_v40 = vpop.f32.mrf.mxu1 }
 0xc94   :  { %v5998_v8 = vpop.f32.mrf.mxu2  ;;  %v6711_v46 = vadd.f32 %v6710_v40, %v6381_v19  ;;  %v13274_v19 = vld [vmem:[#allocation29_spill] sm:$0xff] }
 0xc95   :  { %v6327_v39 = vpop.f32.mrf.mxu3 }
 0xc96   :  { %v7031_v47 = vmax.f32 %v6711_v46, 0.0  ;;  %v6328_v4 = vadd.f32 %v6327_v39, %v5998_v8 }
 0xc98   :  { %v7285_v15 = vpack.c.bf16 %v7031_v47, %v7029_v52  ;;  %v7250_v55 = vmax.f32 %v6328_v4, 0.0  ;;  %7548 = vmatmul.bf16.vlgmr.msrb.gmra.mxu2 %v13271_v41 }
 0xc9a   :  { %7877 = vmatmul.bf16.vlgmr.msrb.gmra.mxu3 %v7285_v15  ;;  %v11701_v50 = vpack.c.bf16 %v7250_v55, %v7248_v11  ;;  %v13275_v11 = vld [vmem:[#allocation27_spill] sm:$0xff] }
 0xc9b   :  { %v6384_v54 = vpop.f32.mrf.mxu0  ;;  %v6713_v61 = vpop.f32.mrf.mxu1 }
 0xc9c   :  { %13272 = vst [vmem:[#allocation17_spill] sm:$0xff] %v11701_v50  ;;  %v6001_v9 = vpop.f32.mrf.mxu2  ;;  %v6714_v6 = vadd.f32 %v6713_v61, %v6384_v54  ;;  %v13277_v50 = vld [vmem:[#allocation34_spill] sm:$0xff] }
 0xc9d   :  { %v6330_v56 = vpop.f32.mrf.mxu3 }
 0xc9e   :  { %v6331_v10 = vadd.f32 %v6330_v56, %v6001_v9  ;;  %6423 = vmatmul.bf16.gmra.mxu0 %v13273_v17  ;;  %6752 = vmatmul.bf16.gmra.mxu1 %v13274_v19  ;;  %v7033_v39 = vmax.f32 %v6714_v6, 0.0 }
 0xca0   :  { %v7252_v55 = vmax.f32 %v6331_v10, 0.0 }
 0xca3   :  { %v6386_v40 = vpop.f32.mrf.mxu0  ;;  %v6715_v8 = vpop.f32.mrf.mxu1 }
 0xca4   :  { %v6003_v24 = vpop.f32.mrf.mxu2  ;;  %v6716_v46 = vadd.f32 %v6715_v8, %v6386_v40  ;;  %v13278_v40 = vld [vmem:[#allocation32_spill] sm:$0xff] }
 0xca5   :  { %v6332_v4 = vpop.f32.mrf.mxu3 }
 0xca6   :  { %v7035_v41 = vmax.f32 %v6716_v46, 0.0  ;;  %v6333_v52 = vadd.f32 %v6332_v4, %v6003_v24 }
 0xca8   :  { %v7254_v47 = vmax.f32 %v6333_v52, 0.0  ;;  %7553 = vmatmul.bf16.gmra.mxu2 %v13275_v11  ;;  %v7287_v15 = vpack.c.bf16 %v7035_v41, %v7033_v39  ;;  %v13279_v11 = vld [vmem:[#allocation30_spill] sm:$0xff] }
 0xcaa   :  { %7882 = vmatmul.bf16.gmra.mxu3 %v7287_v15  ;;  %v11706_v9 = vpack.c.bf16 %v7254_v47, %v7252_v55 }
 0xcab   :  { %v6389_v17 = vpop.f32.mrf.mxu0  ;;  %v6718_v56 = vpop.f32.mrf.mxu1 }
 0xcac   :  { %13276 = vst [vmem:[#allocation22_spill] sm:$0xff] %v11706_v9  ;;  %v6006_v19 = vpop.f32.mrf.mxu2  ;;  %v6719_v6 = vadd.f32 %v6718_v56, %v6389_v17  ;;  %v13281_v9 = vld [vmem:[#allocation37_spill] sm:$0xff] }
 0xcad   :  { %v6335_v54 = vpop.f32.mrf.mxu3 }
 0xcae   :  { %v6336_v61 = vadd.f32 %v6335_v54, %v6006_v19  ;;  %6428 = vmatmul.bf16.gmra.mxu0 %v13277_v50  ;;  %6757 = vmatmul.bf16.gmra.mxu1 %v13278_v40  ;;  %v7037_v52 = vmax.f32 %v6719_v6, 0.0 }
 0xcb0   :  { %v7256_v55 = vmax.f32 %v6336_v61, 0.0 }
 0xcb3   :  { %v6391_v8 = vpop.f32.mrf.mxu0  ;;  %v6720_v24 = vpop.f32.mrf.mxu1 }
 0xcb4   :  { %v6008_v10 = vpop.f32.mrf.mxu2  ;;  %v6721_v46 = vadd.f32 %v6720_v24, %v6391_v8  ;;  %v13282_v8 = vld [vmem:[#allocation35_spill] sm:$0xff] }
 0xcb5   :  { %v6337_v4 = vpop.f32.mrf.mxu3 }
 0xcb6   :  { %v7039_v39 = vmax.f32 %v6721_v46, 0.0  ;;  %v6338_v41 = vadd.f32 %v6337_v4, %v6008_v10 }
 0xcb8   :  { %v7258_v47 = vmax.f32 %v6338_v41, 0.0  ;;  %7558 = vmatmul.bf16.gmra.mxu2 %v13279_v11  ;;  %v7289_v15 = vpack.c.bf16 %v7039_v39, %v7037_v52  ;;  %v13283_v11 = vld [vmem:[#allocation33_spill] sm:$0xff] }
 0xcba   :  { %7887 = vmatmul.bf16.gmra.mxu3 %v7289_v15  ;;  %v11711_v19 = vpack.c.bf16 %v7258_v47, %v7256_v55 }
 0xcbb   :  { %v6394_v50 = vpop.f32.mrf.mxu0  ;;  %v6723_v54 = vpop.f32.mrf.mxu1 }
 0xcbc   :  { %13280 = vst [vmem:[#allocation20_spill] sm:$0xff] %v11711_v19  ;;  %v6011_v40 = vpop.f32.mrf.mxu2  ;;  %v6724_v6 = vadd.f32 %v6723_v54, %v6394_v50  ;;  %v13285_v19 = vld [vmem:[#allocation40_spill] sm:$0xff] }
 0xcbd   :  { %v6340_v17 = vpop.f32.mrf.mxu3 }
 0xcbe   :  { %v6341_v56 = vadd.f32 %v6340_v17, %v6011_v40  ;;  %6433 = vmatmul.bf16.gmra.mxu0 %v13281_v9  ;;  %6762 = vmatmul.bf16.gmra.mxu1 %v13282_v8  ;;  %v7041_v41 = vmax.f32 %v6724_v6, 0.0 }
 0xcc0   :  { %v7260_v55 = vmax.f32 %v6341_v56, 0.0 }
 0xcc3   :  { %v6396_v24 = vpop.f32.mrf.mxu0  ;;  %v6725_v10 = vpop.f32.mrf.mxu1 }
 0xcc4   :  { %v6013_v61 = vpop.f32.mrf.mxu2  ;;  %v6726_v46 = vadd.f32 %v6725_v10, %v6396_v24  ;;  %v13286_v24 = vld [vmem:[#allocation38_spill] sm:$0xff] }
 0xcc5   :  { %v6342_v4 = vpop.f32.mrf.mxu3 }
 0xcc6   :  { %v7043_v52 = vmax.f32 %v6726_v46, 0.0  ;;  %v6343_v39 = vadd.f32 %v6342_v4, %v6013_v61 }
 0xcc8   :  { %v7262_v47 = vmax.f32 %v6343_v39, 0.0  ;;  %7563 = vmatmul.bf16.gmra.mxu2 %v13283_v11  ;;  %v7291_v15 = vpack.c.bf16 %v7043_v52, %v7041_v41  ;;  %v13287_v11 = vld [vmem:[#allocation36_spill] sm:$0xff] }
 0xcca   :  { %7892 = vmatmul.bf16.gmra.mxu3 %v7291_v15  ;;  %v11716_v40 = vpack.c.bf16 %v7262_v47, %v7260_v55 }
 0xccb   :  { %v6399_v9 = vpop.f32.mrf.mxu0  ;;  %v6728_v17 = vpop.f32.mrf.mxu1 }
 0xccc   :  { %13284 = vst [vmem:[#allocation25_spill] sm:$0xff] %v11716_v40  ;;  %v6016_v8 = vpop.f32.mrf.mxu2  ;;  %v6729_v6 = vadd.f32 %v6728_v17, %v6399_v9  ;;  %v13289_v40 = vld [vmem:[#allocation43_spill] sm:$0xff] }
 0xccd   :  { %v6345_v50 = vpop.f32.mrf.mxu3 }
 0xcce   :  { %v6346_v54 = vadd.f32 %v6345_v50, %v6016_v8  ;;  %6438 = vmatmul.bf16.gmra.mxu0 %v13285_v19  ;;  %6767 = vmatmul.bf16.gmra.mxu1 %v13286_v24  ;;  %v7045_v39 = vmax.f32 %v6729_v6, 0.0 }
 0xcd0   :  { %v7264_v55 = vmax.f32 %v6346_v54, 0.0 }
 0xcd3   :  { %v6401_v10 = vpop.f32.mrf.mxu0  ;;  %v6730_v61 = vpop.f32.mrf.mxu1 }
 0xcd4   :  { %v6018_v56 = vpop.f32.mrf.mxu2  ;;  %v6731_v46 = vadd.f32 %v6730_v61, %v6401_v10  ;;  %v13290_v10 = vld [vmem:[#allocation41_spill] sm:$0xff] }
 0xcd5   :  { %v6347_v4 = vpop.f32.mrf.mxu3 }
 0xcd6   :  { %v7047_v41 = vmax.f32 %v6731_v46, 0.0  ;;  %v6348_v52 = vadd.f32 %v6347_v4, %v6018_v56 }
 0xcd8   :  { %v7266_v47 = vmax.f32 %v6348_v52, 0.0  ;;  %7568 = vmatmul.bf16.gmra.mxu2 %v13287_v11  ;;  %v7293_v15 = vpack.c.bf16 %v7047_v41, %v7045_v39  ;;  %v13291_v11 = vld [vmem:[#allocation39_spill] sm:$0xff] }
 0xcda   :  { %7897 = vmatmul.bf16.gmra.mxu3 %v7293_v15  ;;  %v11721_v8 = vpack.c.bf16 %v7266_v47, %v7264_v55 }
 0xcdb   :  { %v6404_v19 = vpop.f32.mrf.mxu0  ;;  %v6733_v50 = vpop.f32.mrf.mxu1 }
 0xcdc   :  { %13288 = vst [vmem:[#allocation23_spill] sm:$0xff] %v11721_v8  ;;  %v6021_v24 = vpop.f32.mrf.mxu2  ;;  %v6734_v6 = vadd.f32 %v6733_v50, %v6404_v19  ;;  %v13293_v8 = vld [vmem:[#allocation46_spill] sm:$0xff] }
 0xcdd   :  { %v6350_v9 = vpop.f32.mrf.mxu3 }
 0xcde   :  { %v6351_v17 = vadd.f32 %v6350_v9, %v6021_v24  ;;  %6443 = vmatmul.bf16.gmra.mxu0 %v13289_v40  ;;  %6772 = vmatmul.bf16.gmra.mxu1 %v13290_v10  ;;  %v7049_v52 = vmax.f32 %v6734_v6, 0.0 }
 0xce0   :  { %v7268_v55 = vmax.f32 %v6351_v17, 0.0 }
 0xce3   :  { %v6406_v61 = vpop.f32.mrf.mxu0  ;;  %v6735_v56 = vpop.f32.mrf.mxu1 }
 0xce4   :  { %v6023_v54 = vpop.f32.mrf.mxu2  ;;  %v6736_v46 = vadd.f32 %v6735_v56, %v6406_v61  ;;  %v13294_v61 = vld [vmem:[#allocation44_spill] sm:$0xff] }
 0xce5   :  { %v6352_v4 = vpop.f32.mrf.mxu3 }
 0xce6   :  { %v7051_v39 = vmax.f32 %v6736_v46, 0.0  ;;  %v6353_v41 = vadd.f32 %v6352_v4, %v6023_v54 }
 0xce8   :  { %v7270_v47 = vmax.f32 %v6353_v41, 0.0  ;;  %7573 = vmatmul.bf16.gmra.mxu2 %v13291_v11  ;;  %v7295_v15 = vpack.c.bf16 %v7051_v39, %v7049_v52  ;;  %v13295_v11 = vld [vmem:[#allocation42_spill] sm:$0xff] }
 0xcea   :  { %7902 = vmatmul.bf16.gmra.mxu3 %v7295_v15  ;;  %v11726_v24 = vpack.c.bf16 %v7270_v47, %v7268_v55 }
 0xceb   :  { %v6409_v40 = vpop.f32.mrf.mxu0  ;;  %v6738_v9 = vpop.f32.mrf.mxu1 }
 0xcec   :  { %13292 = vst [vmem:[#allocation28_spill] sm:$0xff] %v11726_v24  ;;  %v6026_v10 = vpop.f32.mrf.mxu2  ;;  %v6739_v6 = vadd.f32 %v6738_v9, %v6409_v40  ;;  %v13297_v24 = vld [vmem:[#allocation49_spill] sm:$0xff] }
 0xced   :  { %v6355_v19 = vpop.f32.mrf.mxu3 }
 0xcee   :  { %v6356_v50 = vadd.f32 %v6355_v19, %v6026_v10  ;;  %6448 = vmatmul.bf16.gmra.mxu0 %v13293_v8  ;;  %6777 = vmatmul.bf16.gmra.mxu1 %v13294_v61  ;;  %v7053_v41 = vmax.f32 %v6739_v6, 0.0 }
 0xcf0   :  { %v7272_v55 = vmax.f32 %v6356_v50, 0.0 }
 0xcf3   :  { %v6411_v56 = vpop.f32.mrf.mxu0  ;;  %v6740_v54 = vpop.f32.mrf.mxu1 }
 0xcf4   :  { %v6028_v17 = vpop.f32.mrf.mxu2  ;;  %v6741_v46 = vadd.f32 %v6740_v54, %v6411_v56  ;;  %v13298_v56 = vld [vmem:[#allocation47_spill] sm:$0xff] }
 0xcf5   :  { %v6357_v4 = vpop.f32.mrf.mxu3 }
 0xcf6   :  { %v7055_v52 = vmax.f32 %v6741_v46, 0.0  ;;  %v6358_v39 = vadd.f32 %v6357_v4, %v6028_v17 }
 0xcf8   :  { %v7274_v47 = vmax.f32 %v6358_v39, 0.0  ;;  %7578 = vmatmul.bf16.gmra.mxu2 %v13295_v11  ;;  %v7297_v15 = vpack.c.bf16 %v7055_v52, %v7053_v41  ;;  %v13299_v11 = vld [vmem:[#allocation45_spill] sm:$0xff] }
 0xcfa   :  { %7907 = vmatmul.bf16.gmra.mxu3 %v7297_v15  ;;  %v11731_v10 = vpack.c.bf16 %v7274_v47, %v7272_v55 }
 0xcfb   :  { %v6414_v8 = vpop.f32.mrf.mxu0  ;;  %v6743_v19 = vpop.f32.mrf.mxu1 }
 0xcfc   :  { %13296 = vst [vmem:[#allocation26_spill] sm:$0xff] %v11731_v10  ;;  %v6031_v61 = vpop.f32.mrf.mxu2  ;;  %v6744_v6 = vadd.f32 %v6743_v19, %v6414_v8  ;;  %v13301_v10 = vld [vmem:[#allocation52_spill] sm:$0xff] }
 0xcfd   :  { %v6360_v40 = vpop.f32.mrf.mxu3 }
 0xcfe   :  { %v6361_v9 = vadd.f32 %v6360_v40, %v6031_v61  ;;  %6453 = vmatmul.bf16.gmra.mxu0 %v13297_v24  ;;  %6782 = vmatmul.bf16.gmra.mxu1 %v13298_v56  ;;  %v7057_v39 = vmax.f32 %v6744_v6, 0.0 }
 0xd00   :  { %v7276_v55 = vmax.f32 %v6361_v9, 0.0 }
 0xd03   :  { %v6416_v54 = vpop.f32.mrf.mxu0  ;;  %v6745_v17 = vpop.f32.mrf.mxu1 }
 0xd04   :  { %v6033_v50 = vpop.f32.mrf.mxu2  ;;  %v6746_v46 = vadd.f32 %v6745_v17, %v6416_v54  ;;  %v13302_v54 = vld [vmem:[#allocation50_spill] sm:$0xff] }
 0xd05   :  { %v6362_v4 = vpop.f32.mrf.mxu3 }
 0xd06   :  { %v7059_v41 = vmax.f32 %v6746_v46, 0.0  ;;  %v6363_v52 = vadd.f32 %v6362_v4, %v6033_v50 }
 0xd08   :  { %v7278_v47 = vmax.f32 %v6363_v52, 0.0  ;;  %7583 = vmatmul.bf16.gmra.mxu2 %v13299_v11  ;;  %v7299_v15 = vpack.c.bf16 %v7059_v41, %v7057_v39  ;;  %v13303_v11 = vld [vmem:[#allocation48_spill] sm:$0xff] }
 0xd0a   :  { %7912 = vmatmul.bf16.gmra.mxu3 %v7299_v15  ;;  %v11736_v61 = vpack.c.bf16 %v7278_v47, %v7276_v55 }
 0xd0b   :  { %v6419_v24 = vpop.f32.mrf.mxu0  ;;  %v6748_v40 = vpop.f32.mrf.mxu1 }
 0xd0c   :  { %13300 = vst [vmem:[#allocation24_spill] sm:$0xff] %v11736_v61  ;;  %v6036_v56 = vpop.f32.mrf.mxu2  ;;  %v6749_v6 = vadd.f32 %v6748_v40, %v6419_v24  ;;  %v13304_v61 = vld [vmem:[#allocation55_spill] sm:$0xff] }
 0xd0d   :  { %v6365_v8 = vpop.f32.mrf.mxu3 }
 0xd0e   :  { %v6366_v19 = vadd.f32 %v6365_v8, %v6036_v56  ;;  %6458 = vmatmul.bf16.gmra.mxu0 %v13301_v10  ;;  %6787 = vmatmul.bf16.gmra.mxu1 %v13302_v54  ;;  %v7061_v52 = vmax.f32 %v6749_v6, 0.0 }
 0xd10   :  { %v7280_v55 = vmax.f32 %v6366_v19, 0.0 }
 0xd13   :  { %v6421_v17 = vpop.f32.mrf.mxu0  ;;  %v6750_v50 = vpop.f32.mrf.mxu1 }
 0xd14   :  { %v6038_v9 = vpop.f32.mrf.mxu2  ;;  %v6751_v46 = vadd.f32 %v6750_v50, %v6421_v17  ;;  %v13305_v17 = vld [vmem:[#allocation53_spill] sm:$0xff] }
 0xd15   :  { %v6367_v4 = vpop.f32.mrf.mxu3 }
 0xd16   :  { %v7063_v39 = vmax.f32 %v6751_v46, 0.0  ;;  %v6368_v41 = vadd.f32 %v6367_v4, %v6038_v9 }
 0xd18   :  { %v7282_v47 = vmax.f32 %v6368_v41, 0.0  ;;  %7588 = vmatmul.bf16.gmra.mxu2 %v13303_v11  ;;  %v7301_v15 = vpack.c.bf16 %v7063_v39, %v7061_v52 }
 0xd1a   :  { %7917 = vmatmul.bf16.gmra.mxu3 %v7301_v15  ;;  %v11741_v56 = vpack.c.bf16 %v7282_v47, %v7280_v55 }
 0xd1b   :  { %v6424_v10 = vpop.f32.mrf.mxu0  ;;  %v6753_v8 = vpop.f32.mrf.mxu1 }
 0xd1c   :  { %v7549_v54 = vpop.f32.mrf.mxu2  ;;  %v6754_v19 = vadd.f32 %v6753_v8, %v6424_v10 }
 0xd1d   :  { %v7878_v24 = vpop.f32.mrf.mxu3 }
 0xd1e   :  { %v7879_v40 = vadd.f32 %v7878_v24, %v7549_v54  ;;  %6463 = vmatmul.bf16.gmra.mxu0 %v13304_v61  ;;  %6792 = vmatmul.bf16.gmra.mxu1 %v13305_v17  ;;  %v7065_v52 = vmax.f32 %v6754_v19, 0.0  ;;  %v13306_v61 = vld [vmem:[#allocation51_spill] sm:$0xff]  ;;  %v13307_v54 = vld [vmem:[#allocation58_spill] sm:$0xff]  ;;  %v13308_v24 = vld [vmem:[#allocation56_spill] sm:$0xff] }
 0xd20   :  { %8198 = vst.msk [vmem:[%s12410_s6] sm:$0xff] %vm494_vm1, %v7879_v40 }
 0xd23   :  { %v6426_v6 = vpop.f32.mrf.mxu0  ;;  %v6755_v50 = vpop.f32.mrf.mxu1 }
 0xd24   :  { %v6756_v9 = vadd.f32 %v6755_v50, %v6426_v6  ;;  %v7551_v46 = vpop.f32.mrf.mxu2 }
 0xd25   :  { %v7880_v4 = vpop.f32.mrf.mxu3 }
 0xd26   :  { %v7067_v39 = vmax.f32 %v6756_v9, 0.0  ;;  %v7881_v41 = vadd.f32 %v7880_v4, %v7551_v46 }
 0xd28   :  { %8199 = vst.msk [vmem:[%s12410_s6 + $0x8] sm:$0xff] %vm494_vm1, %v7881_v41  ;;  %7593 = vmatmul.bf16.gmra.mxu2 %v13306_v61  ;;  %v7303_v55 = vpack.c.bf16 %v7067_v39, %v7065_v52  ;;  %v13309_v39 = vld [vmem:[#allocation54_spill] sm:$0xff] }
 0xd2a   :  { %7922 = vmatmul.bf16.gmra.mxu3 %v7303_v55 }
 0xd2b   :  { %v6429_v47 = vpop.f32.mrf.mxu0  ;;  %v6758_v11 = vpop.f32.mrf.mxu1 }
 0xd2c   :  { %v7554_v15 = vpop.f32.mrf.mxu2  ;;  %v6759_v40 = vadd.f32 %v6758_v11, %v6429_v47 }
 0xd2d   :  { %v7883_v10 = vpop.f32.mrf.mxu3 }
 0xd2e   :  { %v7884_v8 = vadd.f32 %v7883_v10, %v7554_v15  ;;  %6468 = vmatmul.bf16.gmra.mxu0 %v13307_v54  ;;  %6797 = vmatmul.bf16.gmra.mxu1 %v13308_v24  ;;  %v7069_v46 = vmax.f32 %v6759_v40, 0.0  ;;  %v13310_v10 = vld [vmem:[#allocation61_spill] sm:$0xff] }
 0xd30   :  { %8200 = vst.msk [vmem:[%s12410_s6 + $0x10] sm:$0xff] %vm494_vm1, %v7884_v8  ;;  %v13311_v8 = vld [vmem:[#allocation59_spill] sm:$0xff] }
 0xd33   :  { %v6431_v17 = vpop.f32.mrf.mxu0  ;;  %v6760_v19 = vpop.f32.mrf.mxu1 }
 0xd34   :  { %v6761_v6 = vadd.f32 %v6760_v19, %v6431_v17  ;;  %v7556_v50 = vpop.f32.mrf.mxu2 }
 0xd35   :  { %v7885_v9 = vpop.f32.mrf.mxu3 }
 0xd36   :  { %v7071_v4 = vmax.f32 %v6761_v6, 0.0  ;;  %v7886_v52 = vadd.f32 %v7885_v9, %v7556_v50 }
 0xd38   :  { %8201 = vst.msk [vmem:[%s12410_s6 + $0x18] sm:$0xff] %vm494_vm1, %v7886_v52  ;;  %7598 = vmatmul.bf16.gmra.mxu2 %v13309_v39  ;;  %v7305_v41 = vpack.c.bf16 %v7071_v4, %v7069_v46  ;;  %v13312_v4 = vld [vmem:[#allocation57_spill] sm:$0xff] }
 0xd3a   :  { %7927 = vmatmul.bf16.gmra.mxu3 %v7305_v41 }
 0xd3b   :  { %v6434_v61 = vpop.f32.mrf.mxu0  ;;  %v6763_v55 = vpop.f32.mrf.mxu1 }
 0xd3c   :  { %v7559_v47 = vpop.f32.mrf.mxu2  ;;  %v6764_v54 = vadd.f32 %v6763_v55, %v6434_v61 }
 0xd3d   :  { %v7888_v11 = vpop.f32.mrf.mxu3 }
 0xd3e   :  { %v7889_v15 = vadd.f32 %v7888_v11, %v7559_v47  ;;  %6473 = vmatmul.bf16.gmra.mxu0 %v13310_v10  ;;  %6802 = vmatmul.bf16.gmra.mxu1 %v13311_v8  ;;  %v7073_v50 = vmax.f32 %v6764_v54, 0.0  ;;  %v13313_v11 = vld [vmem:[#allocation64_spill] sm:$0xff] }
 0xd40   :  { %8202 = vst.msk [vmem:[%s12410_s6 + $0x20] sm:$0xff] %vm494_vm1, %v7889_v15  ;;  %v13314_v15 = vld [vmem:[#allocation62_spill] sm:$0xff] }
 0xd43   :  { %v6436_v24 = vpop.f32.mrf.mxu0  ;;  %v6765_v40 = vpop.f32.mrf.mxu1 }
 0xd44   :  { %v6766_v17 = vadd.f32 %v6765_v40, %v6436_v24  ;;  %v7561_v19 = vpop.f32.mrf.mxu2 }
 0xd45   :  { %v7890_v6 = vpop.f32.mrf.mxu3 }
 0xd46   :  { %v7075_v9 = vmax.f32 %v6766_v17, 0.0  ;;  %v7891_v46 = vadd.f32 %v7890_v6, %v7561_v19 }
 0xd48   :  { %8203 = vst.msk [vmem:[%s12410_s6 + $0x28] sm:$0xff] %vm494_vm1, %v7891_v46  ;;  %7603 = vmatmul.bf16.gmra.mxu2 %v13312_v4  ;;  %v7307_v52 = vpack.c.bf16 %v7075_v9, %v7073_v50  ;;  %v13315_v9 = vld [vmem:[#allocation60_spill] sm:$0xff] }
 0xd4a   :  { %7932 = vmatmul.bf16.gmra.mxu3 %v7307_v52 }
 0xd4b   :  { %v6439_v39 = vpop.f32.mrf.mxu0  ;;  %v6768_v41 = vpop.f32.mrf.mxu1 }
 0xd4c   :  { %v7564_v61 = vpop.f32.mrf.mxu2  ;;  %v6769_v10 = vadd.f32 %v6768_v41, %v6439_v39 }
 0xd4d   :  { %v7893_v55 = vpop.f32.mrf.mxu3 }
 0xd4e   :  { %v7894_v47 = vadd.f32 %v7893_v55, %v7564_v61  ;;  %6478 = vmatmul.bf16.gmra.mxu0 %v13313_v11  ;;  %6807 = vmatmul.bf16.gmra.mxu1 %v13314_v15  ;;  %v7077_v19 = vmax.f32 %v6769_v10, 0.0  ;;  %v13316_v55 = vld [vmem:[#allocation67_spill] sm:$0xff] }
 0xd50   :  { %8204 = vst.msk [vmem:[%s12410_s6 + $0x30] sm:$0xff] %vm494_vm1, %v7894_v47  ;;  %v13317_v47 = vld [vmem:[#allocation65_spill] sm:$0xff] }
 0xd53   :  { %v6441_v8 = vpop.f32.mrf.mxu0  ;;  %v6770_v54 = vpop.f32.mrf.mxu1 }
 0xd54   :  { %v6771_v24 = vadd.f32 %v6770_v54, %v6441_v8  ;;  %v7566_v40 = vpop.f32.mrf.mxu2 }
 0xd55   :  { %v7895_v17 = vpop.f32.mrf.mxu3 }
 0xd56   :  { %v7079_v6 = vmax.f32 %v6771_v24, 0.0  ;;  %v7896_v50 = vadd.f32 %v7895_v17, %v7566_v40 }
 0xd58   :  { %8205 = vst.msk [vmem:[%s12410_s6 + $0x38] sm:$0xff] %vm494_vm1, %v7896_v50  ;;  %7608 = vmatmul.bf16.gmra.mxu2 %v13315_v9  ;;  %v7309_v46 = vpack.c.bf16 %v7079_v6, %v7077_v19 }
 0xd5a   :  { %7937 = vmatmul.bf16.gmra.mxu3 %v7309_v46 }
 0xd5b   :  { %v6444_v4 = vpop.f32.mrf.mxu0  ;;  %v6773_v52 = vpop.f32.mrf.mxu1 }
 0xd5c   :  { %v7569_v39 = vpop.f32.mrf.mxu2  ;;  %v6774_v11 = vadd.f32 %v6773_v52, %v6444_v4 }
 0xd5d   :  { %v7898_v41 = vpop.f32.mrf.mxu3 }
 0xd5e   :  { %v7899_v61 = vadd.f32 %v7898_v41, %v7569_v39  ;;  %6483 = vmatmul.bf16.gmra.mxu0 %v13316_v55  ;;  %6812 = vmatmul.bf16.gmra.mxu1 %v13317_v47  ;;  %v7081_v40 = vmax.f32 %v6774_v11, 0.0  ;;  %v13318_v39 = vld [vmem:[#allocation70_spill] sm:$0xff]  ;;  %v13319_v41 = vld [vmem:[#allocation68_spill] sm:$0xff] }
 0xd60   :  { %8206 = vst.msk [vmem:[%s12410_s6 + $0x40] sm:$0xff] %vm494_vm1, %v7899_v61 }
 0xd63   :  { %v6446_v15 = vpop.f32.mrf.mxu0  ;;  %v6775_v10 = vpop.f32.mrf.mxu1 }
 0xd64   :  { %v6776_v8 = vadd.f32 %v6775_v10, %v6446_v15  ;;  %v7571_v54 = vpop.f32.mrf.mxu2 }
 0xd65   :  { %v7900_v24 = vpop.f32.mrf.mxu3 }
 0xd66   :  { %v7083_v17 = vmax.f32 %v6776_v8, 0.0  ;;  %v7901_v19 = vadd.f32 %v7900_v24, %v7571_v54  ;;  %v13320_v24 = vld [vmem:[#allocation71_spill] sm:$0xff] }
 0xd68   :  { %8207 = vst.msk [vmem:[%s12410_s6 + $0x48] sm:$0xff] %vm494_vm1, %v7901_v19  ;;  %7613 = vmatmul.bf16.gmra.mxu2 %v11344_v43  ;;  %v7311_v6 = vpack.c.bf16 %v7083_v17, %v7081_v40 }
 0xd6a   :  { %7942 = vmatmul.bf16.gmra.mxu3 %v7311_v6 }
 0xd6b   :  { %v6449_v50 = vpop.f32.mrf.mxu0  ;;  %v6778_v9 = vpop.f32.mrf.mxu1 }
 0xd6c   :  { %v7574_v46 = vpop.f32.mrf.mxu2  ;;  %v6779_v61 = vadd.f32 %v6778_v9, %v6449_v50 }
 0xd6d   :  { %v7903_v4 = vpop.f32.mrf.mxu3 }
 0xd6e   :  { %v7904_v52 = vadd.f32 %v7903_v4, %v7574_v46  ;;  %6488 = vmatmul.bf16.gmra.mxu0 %v13318_v39  ;;  %6817 = vmatmul.bf16.gmra.mxu1 %v13319_v41  ;;  %v7085_v10 = vmax.f32 %v6779_v61, 0.0  ;;  %v13321_v46 = vld [vmem:[#allocation73_spill] sm:$0xff]  ;;  %v13322_v4 = vld [vmem:[#allocation63_spill] sm:$0xff] }
 0xd70   :  { %8208 = vst.msk [vmem:[%s12410_s6 + $0x50] sm:$0xff] %vm494_vm1, %v7904_v52 }
 0xd73   :  { %v6451_v55 = vpop.f32.mrf.mxu0  ;;  %v6780_v47 = vpop.f32.mrf.mxu1 }
 0xd74   :  { %v6781_v43 = vadd.f32 %v6780_v47, %v6451_v55  ;;  %v7576_v11 = vpop.f32.mrf.mxu2 }
 0xd75   :  { %v7905_v15 = vpop.f32.mrf.mxu3 }
 0xd76   :  { %v7087_v8 = vmax.f32 %v6781_v43, 0.0  ;;  %v7906_v54 = vadd.f32 %v7905_v15, %v7576_v11 }
 0xd78   :  { %8209 = vst.msk [vmem:[%s12410_s6 + $0x58] sm:$0xff] %vm494_vm1, %v7906_v54  ;;  %7618 = vmatmul.bf16.gmra.mxu2 %v13320_v24  ;;  %v7313_v40 = vpack.c.bf16 %v7087_v8, %v7085_v10  ;;  %v13323_v10 = vld [vmem:[#allocation74_spill] sm:$0xff] }
 0xd7a   :  { %7947 = vmatmul.bf16.gmra.mxu3 %v7313_v40 }
 0xd7b   :  { %v6454_v17 = vpop.f32.mrf.mxu0  ;;  %v6783_v19 = vpop.f32.mrf.mxu1 }
 0xd7c   :  { %v7579_v6 = vpop.f32.mrf.mxu2  ;;  %v6784_v52 = vadd.f32 %v6783_v19, %v6454_v17 }
 0xd7d   :  { %v7908_v50 = vpop.f32.mrf.mxu3 }
 0xd7e   :  { %v7909_v9 = vadd.f32 %v7908_v50, %v7579_v6  ;;  %6493 = vmatmul.bf16.gmra.mxu0 %v13321_v46  ;;  %6822 = vmatmul.bf16.gmra.mxu1 %v13322_v4  ;;  %v7089_v43 = vmax.f32 %v6784_v52, 0.0  ;;  %v13324_v6 = vld [vmem:[#allocation76_spill] sm:$0xff]  ;;  %v13325_v50 = vld [vmem:[#allocation66_spill] sm:$0xff] }
 0xd80   :  { %8210 = vst.msk [vmem:[%s12410_s6 + $0x60] sm:$0xff] %vm494_vm1, %v7909_v9 }
 0xd83   :  { %v6456_v39 = vpop.f32.mrf.mxu0  ;;  %v6785_v41 = vpop.f32.mrf.mxu1 }
 0xd84   :  { %v6786_v61 = vadd.f32 %v6785_v41, %v6456_v39  ;;  %v7581_v55 = vpop.f32.mrf.mxu2 }
 0xd85   :  { %v7910_v47 = vpop.f32.mrf.mxu3 }
 0xd86   :  { %v7091_v11 = vmax.f32 %v6786_v61, 0.0  ;;  %v7911_v15 = vadd.f32 %v7910_v47, %v7581_v55 }
 0xd88   :  { %8211 = vst.msk [vmem:[%s12410_s6 + $0x68] sm:$0xff] %vm494_vm1, %v7911_v15  ;;  %7623 = vmatmul.bf16.gmra.mxu2 %v13323_v10  ;;  %v7315_v8 = vpack.c.bf16 %v7091_v11, %v7089_v43  ;;  %v13326_v43 = vld [vmem:[#allocation77_spill] sm:$0xff] }
 0xd8a   :  { %7952 = vmatmul.bf16.gmra.mxu3 %v7315_v8 }
 0xd8b   :  { %v6459_v54 = vpop.f32.mrf.mxu0  ;;  %v6788_v24 = vpop.f32.mrf.mxu1 }
 0xd8c   :  { %v7584_v40 = vpop.f32.mrf.mxu2  ;;  %v6789_v9 = vadd.f32 %v6788_v24, %v6459_v54 }
 0xd8d   :  { %v7913_v17 = vpop.f32.mrf.mxu3 }
 0xd8e   :  { %v7914_v19 = vadd.f32 %v7913_v17, %v7584_v40  ;;  %6498 = vmatmul.bf16.gmra.mxu0 %v13324_v6  ;;  %6827 = vmatmul.bf16.gmra.mxu1 %v13325_v50  ;;  %v7093_v61 = vmax.f32 %v6789_v9, 0.0  ;;  %v13327_v40 = vld [vmem:[#allocation79_spill] sm:$0xff]  ;;  %v13328_v17 = vld [vmem:[#allocation69_spill] sm:$0xff] }
 0xd90   :  { %8212 = vst.msk [vmem:[%s12410_s6 + $0x70] sm:$0xff] %vm494_vm1, %v7914_v19 }
 0xd93   :  { %v6461_v46 = vpop.f32.mrf.mxu0  ;;  %v6790_v4 = vpop.f32.mrf.mxu1 }
 0xd94   :  { %v6791_v52 = vadd.f32 %v6790_v4, %v6461_v46  ;;  %v7586_v39 = vpop.f32.mrf.mxu2 }
 0xd95   :  { %v7915_v41 = vpop.f32.mrf.mxu3 }
 0xd96   :  { %v7095_v55 = vmax.f32 %v6791_v52, 0.0  ;;  %v7916_v47 = vadd.f32 %v7915_v41, %v7586_v39 }
 0xd98   :  { %8213 = vst.msk [vmem:[%s12410_s6 + $0x78] sm:$0xff] %vm494_vm1, %v7916_v47  ;;  %7628 = vmatmul.bf16.gmra.mxu2 %v13326_v43  ;;  %v7317_v11 = vpack.c.bf16 %v7095_v55, %v7093_v61  ;;  %v13329_v61 = vld [vmem:[#allocation80_spill] sm:$0xff] }
 0xd9a   :  { %7957 = vmatmul.bf16.gmra.mxu3 %v7317_v11 }
 0xd9b   :  { %v6464_v15 = vpop.f32.mrf.mxu0  ;;  %v6793_v10 = vpop.f32.mrf.mxu1 }
 0xd9c   :  { %v7589_v8 = vpop.f32.mrf.mxu2  ;;  %v6794_v19 = vadd.f32 %v6793_v10, %v6464_v15 }
 0xd9d   :  { %v7918_v54 = vpop.f32.mrf.mxu3 }
 0xd9e   :  { %v7919_v24 = vadd.f32 %v7918_v54, %v7589_v8  ;;  %6503 = vmatmul.bf16.gmra.mxu0 %v13327_v40  ;;  %6832 = vmatmul.bf16.gmra.mxu1 %v13328_v17  ;;  %v7097_v52 = vmax.f32 %v6794_v19, 0.0  ;;  %v13330_v8 = vld [vmem:[#allocation82_spill] sm:$0xff]  ;;  %v13331_v54 = vld [vmem:[#allocation72_spill] sm:$0xff] }
 0xda0   :  { %8214 = vst.msk [vmem:[%s12410_s6 + $0x80] sm:$0xff] %vm494_vm1, %v7919_v24 }
 0xda3   :  { %v6466_v6 = vpop.f32.mrf.mxu0  ;;  %v6795_v50 = vpop.f32.mrf.mxu1 }
 0xda4   :  { %v6796_v9 = vadd.f32 %v6795_v50, %v6466_v6  ;;  %v7591_v46 = vpop.f32.mrf.mxu2 }
 0xda5   :  { %v7920_v4 = vpop.f32.mrf.mxu3 }
 0xda6   :  { %v7099_v39 = vmax.f32 %v6796_v9, 0.0  ;;  %v7921_v41 = vadd.f32 %v7920_v4, %v7591_v46 }
 0xda8   :  { %8215 = vst.msk [vmem:[%s12410_s6 + $0x88] sm:$0xff] %vm494_vm1, %v7921_v41  ;;  %7633 = vmatmul.bf16.gmra.mxu2 %v13329_v61  ;;  %v7319_v55 = vpack.c.bf16 %v7099_v39, %v7097_v52  ;;  %v13332_v52 = vld [vmem:[#allocation83_spill] sm:$0xff] }
 0xdaa   :  { %7962 = vmatmul.bf16.gmra.mxu3 %v7319_v55 }
 0xdab   :  { %v6469_v47 = vpop.f32.mrf.mxu0  ;;  %v6798_v43 = vpop.f32.mrf.mxu1 }
 0xdac   :  { %v7594_v11 = vpop.f32.mrf.mxu2  ;;  %v6799_v24 = vadd.f32 %v6798_v43, %v6469_v47 }
 0xdad   :  { %v7923_v15 = vpop.f32.mrf.mxu3 }
 0xdae   :  { %v7924_v10 = vadd.f32 %v7923_v15, %v7594_v11  ;;  %6508 = vmatmul.bf16.gmra.mxu0 %v13330_v8  ;;  %6837 = vmatmul.bf16.gmra.mxu1 %v13331_v54  ;;  %v7101_v9 = vmax.f32 %v6799_v24, 0.0  ;;  %v13333_v11 = vld [vmem:[#allocation85_spill] sm:$0xff]  ;;  %v13334_v15 = vld [vmem:[#allocation75_spill] sm:$0xff] }
 0xdb0   :  { %8216 = vst.msk [vmem:[%s12410_s6 + $0x90] sm:$0xff] %vm494_vm1, %v7924_v10 }
 0xdb3   :  { %v6471_v40 = vpop.f32.mrf.mxu0  ;;  %v6800_v17 = vpop.f32.mrf.mxu1 }
 0xdb4   :  { %v6801_v19 = vadd.f32 %v6800_v17, %v6471_v40  ;;  %v7596_v6 = vpop.f32.mrf.mxu2 }
 0xdb5   :  { %v7925_v50 = vpop.f32.mrf.mxu3 }
 0xdb6   :  { %v7103_v46 = vmax.f32 %v6801_v19, 0.0  ;;  %v7926_v4 = vadd.f32 %v7925_v50, %v7596_v6 }
 0xdb8   :  { %8217 = vst.msk [vmem:[%s12410_s6 + $0x98] sm:$0xff] %vm494_vm1, %v7926_v4  ;;  %7638 = vmatmul.bf16.gmra.mxu2 %v13332_v52  ;;  %v7321_v39 = vpack.c.bf16 %v7103_v46, %v7101_v9  ;;  %v13335_v9 = vld [vmem:[#allocation86_spill] sm:$0xff] }
 0xdba   :  { %7967 = vmatmul.bf16.gmra.mxu3 %v7321_v39 }
 0xdbb   :  { %v6474_v41 = vpop.f32.mrf.mxu0  ;;  %v6803_v61 = vpop.f32.mrf.mxu1 }
 0xdbc   :  { %v7599_v55 = vpop.f32.mrf.mxu2  ;;  %v6804_v10 = vadd.f32 %v6803_v61, %v6474_v41 }
 0xdbd   :  { %v7928_v47 = vpop.f32.mrf.mxu3 }
 0xdbe   :  { %v7929_v43 = vadd.f32 %v7928_v47, %v7599_v55  ;;  %6513 = vmatmul.bf16.gmra.mxu0 %v13333_v11  ;;  %6842 = vmatmul.bf16.gmra.mxu1 %v13334_v15  ;;  %v7105_v19 = vmax.f32 %v6804_v10, 0.0  ;;  %v13336_v55 = vld [vmem:[#allocation88_spill] sm:$0xff]  ;;  %v13337_v47 = vld [vmem:[#allocation78_spill] sm:$0xff] }
 0xdc0   :  { %8218 = vst.msk [vmem:[%s12410_s6 + $0xa0] sm:$0xff] %vm494_vm1, %v7929_v43 }
 0xdc3   :  { %v6476_v8 = vpop.f32.mrf.mxu0  ;;  %v6805_v54 = vpop.f32.mrf.mxu1 }
 0xdc4   :  { %v6806_v24 = vadd.f32 %v6805_v54, %v6476_v8  ;;  %v7601_v40 = vpop.f32.mrf.mxu2 }
 0xdc5   :  { %v7930_v17 = vpop.f32.mrf.mxu3 }
 0xdc6   :  { %v7107_v6 = vmax.f32 %v6806_v24, 0.0  ;;  %v7931_v50 = vadd.f32 %v7930_v17, %v7601_v40 }
 0xdc8   :  { %8219 = vst.msk [vmem:[%s12410_s6 + $0xa8] sm:$0xff] %vm494_vm1, %v7931_v50  ;;  %7643 = vmatmul.bf16.gmra.mxu2 %v13335_v9  ;;  %v7323_v46 = vpack.c.bf16 %v7107_v6, %v7105_v19  ;;  %v13338_v19 = vld [vmem:[#allocation89_spill] sm:$0xff] }
 0xdca   :  { %7972 = vmatmul.bf16.gmra.mxu3 %v7323_v46 }
 0xdcb   :  { %v6479_v4 = vpop.f32.mrf.mxu0  ;;  %v6808_v52 = vpop.f32.mrf.mxu1 }
 0xdcc   :  { %v7604_v39 = vpop.f32.mrf.mxu2  ;;  %v6809_v43 = vadd.f32 %v6808_v52, %v6479_v4 }
 0xdcd   :  { %v7933_v41 = vpop.f32.mrf.mxu3 }
 0xdce   :  { %v7934_v61 = vadd.f32 %v7933_v41, %v7604_v39  ;;  %6518 = vmatmul.bf16.gmra.mxu0 %v13336_v55  ;;  %6847 = vmatmul.bf16.gmra.mxu1 %v13337_v47  ;;  %v7109_v24 = vmax.f32 %v6809_v43, 0.0  ;;  %v13339_v39 = vld [vmem:[#allocation91_spill] sm:$0xff]  ;;  %v13340_v41 = vld [vmem:[#allocation81_spill] sm:$0xff] }
 0xdd0   :  { %8220 = vst.msk [vmem:[%s12410_s6 + $0xb0] sm:$0xff] %vm494_vm1, %v7934_v61 }
 0xdd3   :  { %v6481_v11 = vpop.f32.mrf.mxu0  ;;  %v6810_v15 = vpop.f32.mrf.mxu1 }
 0xdd4   :  { %v6811_v10 = vadd.f32 %v6810_v15, %v6481_v11  ;;  %v7606_v8 = vpop.f32.mrf.mxu2 }
 0xdd5   :  { %v7935_v54 = vpop.f32.mrf.mxu3 }
 0xdd6   :  { %v7111_v40 = vmax.f32 %v6811_v10, 0.0  ;;  %v7936_v17 = vadd.f32 %v7935_v54, %v7606_v8 }
 0xdd8   :  { %8221 = vst.msk [vmem:[%s12410_s6 + $0xb8] sm:$0xff] %vm494_vm1, %v7936_v17  ;;  %7648 = vmatmul.bf16.gmra.mxu2 %v13338_v19  ;;  %v7325_v6 = vpack.c.bf16 %v7111_v40, %v7109_v24 }
 0xdda   :  { %7977 = vmatmul.bf16.gmra.mxu3 %v7325_v6 }
 0xddb   :  { %v6484_v50 = vpop.f32.mrf.mxu0  ;;  %v6813_v9 = vpop.f32.mrf.mxu1 }
 0xddc   :  { %v7609_v46 = vpop.f32.mrf.mxu2  ;;  %v6814_v61 = vadd.f32 %v6813_v9, %v6484_v50  ;;  %v13341_v9 = vld [vmem:[#allocation84_spill] sm:$0xff] }
 0xddd   :  { %v7938_v4 = vpop.f32.mrf.mxu3 }
 0xdde   :  { %v7939_v52 = vadd.f32 %v7938_v4, %v7609_v46  ;;  %6523 = vmatmul.bf16.gmra.mxu0 %v13339_v39  ;;  %6852 = vmatmul.bf16.gmra.mxu1 %v13340_v41  ;;  %v7113_v10 = vmax.f32 %v6814_v61, 0.0 }
 0xde0   :  { %8222 = vst.msk [vmem:[%s12410_s6 + $0xc0] sm:$0xff] %vm494_vm1, %v7939_v52 }
 0xde3   :  { %v6486_v55 = vpop.f32.mrf.mxu0  ;;  %v6815_v47 = vpop.f32.mrf.mxu1 }
 0xde4   :  { %v6816_v43 = vadd.f32 %v6815_v47, %v6486_v55  ;;  %v7611_v11 = vpop.f32.mrf.mxu2 }
 0xde5   :  { %v7940_v15 = vpop.f32.mrf.mxu3 }
 0xde6   :  { %v7115_v8 = vmax.f32 %v6816_v43, 0.0  ;;  %v7941_v54 = vadd.f32 %v7940_v15, %v7611_v11 }
 0xde8   :  { %8223 = vst.msk [vmem:[%s12410_s6 + $0xc8] sm:$0xff] %vm494_vm1, %v7941_v54  ;;  %7653 = vmatmul.bf16.gmra.mxu2 %v11414_v38  ;;  %v7327_v24 = vpack.c.bf16 %v7115_v8, %v7113_v10 }
 0xdea   :  { %7982 = vmatmul.bf16.gmra.mxu3 %v7327_v24  ;;  %v13343_v24 = vld [vmem:[#allocation98_spill] sm:$0xff] }
 0xdeb   :  { %v6489_v40 = vpop.f32.mrf.mxu0  ;;  %v6818_v17 = vpop.f32.mrf.mxu1 }
 0xdec   :  { %v7614_v19 = vpop.f32.mrf.mxu2  ;;  %v6819_v46 = vadd.f32 %v6818_v17, %v6489_v40  ;;  %v13344_v40 = vld [vmem:[#allocation92_spill] sm:$0xff] }
 0xded   :  { %v7943_v6 = vpop.f32.mrf.mxu3 }
 0xdee   :  { %v7944_v50 = vadd.f32 %v7943_v6, %v7614_v19  ;;  %6528 = vmatmul.bf16.gmra.mxu0 %v10932_v58  ;;  %6857 = vmatmul.bf16.gmra.mxu1 %v13341_v9  ;;  %v7117_v61 = vmax.f32 %v6819_v46, 0.0  ;;  %v13342_v58 = vld [vmem:[#allocation87_spill] sm:$0xff] }
 0xdf0   :  { %8224 = vst.msk [vmem:[%s12410_s6 + $0xd0] sm:$0xff] %vm494_vm1, %v7944_v50 }
 0xdf3   :  { %v6491_v4 = vpop.f32.mrf.mxu0  ;;  %v6820_v52 = vpop.f32.mrf.mxu1 }
 0xdf4   :  { %v6821_v38 = vadd.f32 %v6820_v52, %v6491_v4  ;;  %v7616_v39 = vpop.f32.mrf.mxu2 }
 0xdf5   :  { %v7945_v41 = vpop.f32.mrf.mxu3 }
 0xdf6   :  { %v7119_v55 = vmax.f32 %v6821_v38, 0.0  ;;  %v7946_v47 = vadd.f32 %v7945_v41, %v7616_v39  ;;  %v13345_v39 = vld [vmem:[#allocation90_spill] sm:$0xff] }
 0xdf8   :  { %8225 = vst.msk [vmem:[%s12410_s6 + $0xd8] sm:$0xff] %vm494_vm1, %v7946_v47  ;;  %7658 = vmatmul.bf16.gmra.mxu2 %v13342_v58  ;;  %v7329_v43 = vpack.c.bf16 %v7119_v55, %v7117_v61 }
 0xdfa   :  { %7987 = vmatmul.bf16.gmra.mxu3 %v7329_v43 }
 0xdfb   :  { %v6494_v11 = vpop.f32.mrf.mxu0  ;;  %v6823_v15 = vpop.f32.mrf.mxu1 }
 0xdfc   :  { %v7619_v10 = vpop.f32.mrf.mxu2  ;;  %v6824_v17 = vadd.f32 %v6823_v15, %v6494_v11  ;;  %v13346_v11 = vld [vmem:[#allocation97_spill] sm:$0xff]  ;;  %v13347_v15 = vld [vmem:[#allocation95_spill] sm:$0xff] }
 0xdfd   :  { %v7948_v8 = vpop.f32.mrf.mxu3 }
 0xdfe   :  { %v7949_v54 = vadd.f32 %v7948_v8, %v7619_v10  ;;  %6533 = vmatmul.bf16.gmra.mxu0 %v13343_v24  ;;  %6862 = vmatmul.bf16.gmra.mxu1 %v13344_v40  ;;  %v7121_v4 = vmax.f32 %v6824_v17, 0.0 }
 0xe00   :  { %8226 = vst.msk [vmem:[%s12410_s6 + $0xe0] sm:$0xff] %vm494_vm1, %v7949_v54 }
 0xe03   :  { %v6496_v19 = vpop.f32.mrf.mxu0  ;;  %v6825_v6 = vpop.f32.mrf.mxu1 }
 0xe04   :  { %v6826_v50 = vadd.f32 %v6825_v6, %v6496_v19  ;;  %v7621_v9 = vpop.f32.mrf.mxu2 }
 0xe05   :  { %v7950_v46 = vpop.f32.mrf.mxu3 }
 0xe06   :  { %v7123_v52 = vmax.f32 %v6826_v50, 0.0  ;;  %v7951_v38 = vadd.f32 %v7950_v46, %v7621_v9  ;;  %v13348_v9 = vld [vmem:[#allocation101_spill] sm:$0xff] }
 0xe08   :  { %8227 = vst.msk [vmem:[%s12410_s6 + $0xe8] sm:$0xff] %vm494_vm1, %v7951_v38  ;;  %7663 = vmatmul.bf16.gmra.mxu2 %v13345_v39  ;;  %v7331_v41 = vpack.c.bf16 %v7123_v52, %v7121_v4 }
 0xe0a   :  { %7992 = vmatmul.bf16.gmra.mxu3 %v7331_v41 }
 0xe0b   :  { %v6499_v61 = vpop.f32.mrf.mxu0  ;;  %v6828_v55 = vpop.f32.mrf.mxu1 }
 0xe0c   :  { %v7624_v47 = vpop.f32.mrf.mxu2  ;;  %v6829_v10 = vadd.f32 %v6828_v55, %v6499_v61  ;;  %v13349_v61 = vld [vmem:[#allocation100_spill] sm:$0xff]  ;;  %v13350_v55 = vld [vmem:[#allocation93_spill] sm:$0xff] }
 0xe0d   :  { %v7953_v58 = vpop.f32.mrf.mxu3 }
 0xe0e   :  { %v7954_v43 = vadd.f32 %v7953_v58, %v7624_v47  ;;  %6538 = vmatmul.bf16.gmra.mxu0 %v13346_v11  ;;  %6867 = vmatmul.bf16.gmra.mxu1 %v13347_v15  ;;  %v7125_v19 = vmax.f32 %v6829_v10, 0.0 }
 0xe10   :  { %8228 = vst.msk [vmem:[%s12410_s6 + $0xf0] sm:$0xff] %vm494_vm1, %v7954_v43 }
 0xe13   :  { %v6501_v8 = vpop.f32.mrf.mxu0  ;;  %v6830_v54 = vpop.f32.mrf.mxu1 }
 0xe14   :  { %v6831_v24 = vadd.f32 %v6830_v54, %v6501_v8  ;;  %v7626_v40 = vpop.f32.mrf.mxu2 }
 0xe15   :  { %v7955_v17 = vpop.f32.mrf.mxu3 }
 0xe16   :  { %v7127_v6 = vmax.f32 %v6831_v24, 0.0  ;;  %v7956_v50 = vadd.f32 %v7955_v17, %v7626_v40  ;;  %v13351_v40 = vld [vmem:[#allocation104_spill] sm:$0xff] }
 0xe18   :  { %8229 = vst.msk [vmem:[%s12410_s6 + $0xf8] sm:$0xff] %vm494_vm1, %v7956_v50  ;;  %7668 = vmatmul.bf16.gmra.mxu2 %v13348_v9  ;;  %v7333_v46 = vpack.c.bf16 %v7127_v6, %v7125_v19 }
 0xe1a   :  { %7997 = vmatmul.bf16.gmra.mxu3 %v7333_v46 }
 0xe1b   :  { %v6504_v4 = vpop.f32.mrf.mxu0  ;;  %v6833_v52 = vpop.f32.mrf.mxu1 }
 0xe1c   :  { %v7629_v38 = vpop.f32.mrf.mxu2  ;;  %v6834_v47 = vadd.f32 %v6833_v52, %v6504_v4  ;;  %v13352_v4 = vld [vmem:[#allocation103_spill] sm:$0xff]  ;;  %v13353_v52 = vld [vmem:[#allocation94_spill] sm:$0xff] }
 0xe1d   :  { %v7958_v39 = vpop.f32.mrf.mxu3 }
 0xe1e   :  { %v7959_v41 = vadd.f32 %v7958_v39, %v7629_v38  ;;  %6543 = vmatmul.bf16.gmra.mxu0 %v13349_v61  ;;  %6872 = vmatmul.bf16.gmra.mxu1 %v13350_v55  ;;  %v7129_v8 = vmax.f32 %v6834_v47, 0.0 }
 0xe20   :  { %8230 = vst.msk [vmem:[%s12410_s6 + $0x100] sm:$0xff] %vm494_vm1, %v7959_v41 }
 0xe23   :  { %v6506_v58 = vpop.f32.mrf.mxu0  ;;  %v6835_v43 = vpop.f32.mrf.mxu1 }
 0xe24   :  { %v6836_v11 = vadd.f32 %v6835_v43, %v6506_v58  ;;  %v7631_v15 = vpop.f32.mrf.mxu2 }
 0xe25   :  { %v7960_v10 = vpop.f32.mrf.mxu3 }
 0xe26   :  { %v7131_v54 = vmax.f32 %v6836_v11, 0.0  ;;  %v7961_v24 = vadd.f32 %v7960_v10, %v7631_v15  ;;  %v13354_v15 = vld [vmem:[#allocation107_spill] sm:$0xff] }
 0xe28   :  { %8231 = vst.msk [vmem:[%s12410_s6 + $0x108] sm:$0xff] %vm494_vm1, %v7961_v24  ;;  %7673 = vmatmul.bf16.gmra.mxu2 %v13351_v40  ;;  %v7335_v17 = vpack.c.bf16 %v7131_v54, %v7129_v8 }
 0xe2a   :  { %8002 = vmatmul.bf16.gmra.mxu3 %v7335_v17 }
 0xe2b   :  { %v6509_v19 = vpop.f32.mrf.mxu0  ;;  %v6838_v6 = vpop.f32.mrf.mxu1 }
 0xe2c   :  { %v7634_v50 = vpop.f32.mrf.mxu2  ;;  %v6839_v38 = vadd.f32 %v6838_v6, %v6509_v19  ;;  %v13355_v19 = vld [vmem:[#allocation106_spill] sm:$0xff]  ;;  %v13356_v6 = vld [vmem:[#allocation96_spill] sm:$0xff] }
 0xe2d   :  { %v7963_v9 = vpop.f32.mrf.mxu3 }
 0xe2e   :  { %v7964_v46 = vadd.f32 %v7963_v9, %v7634_v50  ;;  %6548 = vmatmul.bf16.gmra.mxu0 %v13352_v4  ;;  %6877 = vmatmul.bf16.gmra.mxu1 %v13353_v52  ;;  %v7133_v58 = vmax.f32 %v6839_v38, 0.0 }
 0xe30   :  { %8232 = vst.msk [vmem:[%s12410_s6 + $0x110] sm:$0xff] %vm494_vm1, %v7964_v46 }
 0xe33   :  { %v6511_v39 = vpop.f32.mrf.mxu0  ;;  %v6840_v41 = vpop.f32.mrf.mxu1 }
 0xe34   :  { %v6841_v61 = vadd.f32 %v6840_v41, %v6511_v39  ;;  %v7636_v55 = vpop.f32.mrf.mxu2 }
 0xe35   :  { %v7965_v47 = vpop.f32.mrf.mxu3 }
 0xe36   :  { %v7135_v43 = vmax.f32 %v6841_v61, 0.0  ;;  %v7966_v11 = vadd.f32 %v7965_v47, %v7636_v55  ;;  %v13357_v55 = vld [vmem:[#allocation110_spill] sm:$0xff] }
 0xe38   :  { %8233 = vst.msk [vmem:[%s12410_s6 + $0x118] sm:$0xff] %vm494_vm1, %v7966_v11  ;;  %7678 = vmatmul.bf16.gmra.mxu2 %v13354_v15  ;;  %v7337_v10 = vpack.c.bf16 %v7135_v43, %v7133_v58 }
 0xe3a   :  { %8007 = vmatmul.bf16.gmra.mxu3 %v7337_v10 }
 0xe3b   :  { %v6514_v8 = vpop.f32.mrf.mxu0  ;;  %v6843_v54 = vpop.f32.mrf.mxu1 }
 0xe3c   :  { %v7639_v24 = vpop.f32.mrf.mxu2  ;;  %v6844_v50 = vadd.f32 %v6843_v54, %v6514_v8  ;;  %v13358_v8 = vld [vmem:[#allocation109_spill] sm:$0xff]  ;;  %v13359_v54 = vld [vmem:[#allocation99_spill] sm:$0xff] }
 0xe3d   :  { %v7968_v40 = vpop.f32.mrf.mxu3 }
 0xe3e   :  { %v7969_v17 = vadd.f32 %v7968_v40, %v7639_v24  ;;  %6553 = vmatmul.bf16.gmra.mxu0 %v13355_v19  ;;  %6882 = vmatmul.bf16.gmra.mxu1 %v13356_v6  ;;  %v7137_v39 = vmax.f32 %v6844_v50, 0.0 }
 0xe40   :  { %8234 = vst.msk [vmem:[%s12410_s6 + $0x120] sm:$0xff] %vm494_vm1, %v7969_v17 }
 0xe43   :  { %v6516_v9 = vpop.f32.mrf.mxu0  ;;  %v6845_v46 = vpop.f32.mrf.mxu1 }
 0xe44   :  { %v6846_v4 = vadd.f32 %v6845_v46, %v6516_v9  ;;  %v7641_v52 = vpop.f32.mrf.mxu2 }
 0xe45   :  { %v7970_v38 = vpop.f32.mrf.mxu3 }
 0xe46   :  { %v7139_v41 = vmax.f32 %v6846_v4, 0.0  ;;  %v7971_v61 = vadd.f32 %v7970_v38, %v7641_v52  ;;  %v13360_v52 = vld [vmem:[#allocation113_spill] sm:$0xff] }
 0xe48   :  { %8235 = vst.msk [vmem:[%s12410_s6 + $0x128] sm:$0xff] %vm494_vm1, %v7971_v61  ;;  %7683 = vmatmul.bf16.gmra.mxu2 %v13357_v55  ;;  %v7339_v47 = vpack.c.bf16 %v7139_v41, %v7137_v39 }
 0xe4a   :  { %8012 = vmatmul.bf16.gmra.mxu3 %v7339_v47 }
 0xe4b   :  { %v6519_v58 = vpop.f32.mrf.mxu0  ;;  %v6848_v43 = vpop.f32.mrf.mxu1 }
 0xe4c   :  { %v7644_v11 = vpop.f32.mrf.mxu2  ;;  %v6849_v24 = vadd.f32 %v6848_v43, %v6519_v58  ;;  %v13361_v58 = vld [vmem:[#allocation112_spill] sm:$0xff]  ;;  %v13362_v43 = vld [vmem:[#allocation102_spill] sm:$0xff] }
 0xe4d   :  { %v7973_v15 = vpop.f32.mrf.mxu3 }
 0xe4e   :  { %v7974_v10 = vadd.f32 %v7973_v15, %v7644_v11  ;;  %6558 = vmatmul.bf16.gmra.mxu0 %v13358_v8  ;;  %6887 = vmatmul.bf16.gmra.mxu1 %v13359_v54  ;;  %v7141_v9 = vmax.f32 %v6849_v24, 0.0 }
 0xe50   :  { %8236 = vst.msk [vmem:[%s12410_s6 + $0x130] sm:$0xff] %vm494_vm1, %v7974_v10 }
 0xe53   :  { %v6521_v40 = vpop.f32.mrf.mxu0  ;;  %v6850_v17 = vpop.f32.mrf.mxu1 }
 0xe54   :  { %v6851_v19 = vadd.f32 %v6850_v17, %v6521_v40  ;;  %v7646_v6 = vpop.f32.mrf.mxu2 }
 0xe55   :  { %v7975_v50 = vpop.f32.mrf.mxu3 }
 0xe56   :  { %v7143_v46 = vmax.f32 %v6851_v19, 0.0  ;;  %v7976_v4 = vadd.f32 %v7975_v50, %v7646_v6 }
 0xe58   :  { %8237 = vst.msk [vmem:[%s12410_s6 + $0x138] sm:$0xff] %vm494_vm1, %v7976_v4  ;;  %7688 = vmatmul.bf16.gmra.mxu2 %v13360_v52  ;;  %v7341_v38 = vpack.c.bf16 %v7143_v46, %v7141_v9 }
 0xe5a   :  { %8017 = vmatmul.bf16.gmra.mxu3 %v7341_v38 }
 0xe5b   :  { %v6524_v39 = vpop.f32.mrf.mxu0  ;;  %v6853_v41 = vpop.f32.mrf.mxu1 }
 0xe5c   :  { %v7649_v61 = vpop.f32.mrf.mxu2  ;;  %v6854_v11 = vadd.f32 %v6853_v41, %v6524_v39 }
 0xe5d   :  { %v7978_v55 = vpop.f32.mrf.mxu3 }
 0xe5e   :  { %v7979_v47 = vadd.f32 %v7978_v55, %v7649_v61  ;;  %6563 = vmatmul.bf16.gmra.mxu0 %v13361_v58  ;;  %6892 = vmatmul.bf16.gmra.mxu1 %v13362_v43  ;;  %v7145_v40 = vmax.f32 %v6854_v11, 0.0 }
 0xe60   :  { %8238 = vst.msk [vmem:[%s12410_s6 + $0x140] sm:$0xff] %vm494_vm1, %v7979_v47 }
 0xe63   :  { %v6526_v15 = vpop.f32.mrf.mxu0  ;;  %v6855_v10 = vpop.f32.mrf.mxu1 }
 0xe64   :  { %v6856_v8 = vadd.f32 %v6855_v10, %v6526_v15  ;;  %v7651_v54 = vpop.f32.mrf.mxu2 }
 0xe65   :  { %v7980_v24 = vpop.f32.mrf.mxu3 }
 0xe66   :  { %v7147_v17 = vmax.f32 %v6856_v8, 0.0  ;;  %v7981_v19 = vadd.f32 %v7980_v24, %v7651_v54 }
 0xe68   :  { %8239 = vst.msk [vmem:[%s12410_s6 + $0x148] sm:$0xff] %vm494_vm1, %v7981_v19  ;;  %7693 = vmatmul.bf16.gmra.mxu2 %v11484_v13  ;;  %v7343_v6 = vpack.c.bf16 %v7147_v17, %v7145_v40 }
 0xe6a   :  { %8022 = vmatmul.bf16.gmra.mxu3 %v7343_v6 }
 0xe6b   :  { %v6529_v50 = vpop.f32.mrf.mxu0  ;;  %v6858_v9 = vpop.f32.mrf.mxu1 }
 0xe6c   :  { %v7654_v46 = vpop.f32.mrf.mxu2  ;;  %v6859_v38 = vadd.f32 %v6858_v9, %v6529_v50 }
 0xe6d   :  { %v7983_v4 = vpop.f32.mrf.mxu3 }
 0xe6e   :  { %v7984_v52 = vadd.f32 %v7983_v4, %v7654_v46  ;;  %6568 = vmatmul.bf16.gmra.mxu0 %v11008_v12  ;;  %6897 = vmatmul.bf16.gmra.mxu1 %v11475_v53  ;;  %v7149_v47 = vmax.f32 %v6859_v38, 0.0 }
 0xe70   :  { %8240 = vst.msk [vmem:[%s12410_s6 + $0x150] sm:$0xff] %vm494_vm1, %v7984_v52 }
 0xe73   :  { %v6531_v39 = vpop.f32.mrf.mxu0  ;;  %v6860_v41 = vpop.f32.mrf.mxu1 }
 0xe74   :  { %v6861_v13 = vadd.f32 %v6860_v41, %v6531_v39  ;;  %v7656_v61 = vpop.f32.mrf.mxu2 }
 0xe75   :  { %v7985_v55 = vpop.f32.mrf.mxu3 }
 0xe76   :  { %v7151_v58 = vmax.f32 %v6861_v13, 0.0  ;;  %v7986_v43 = vadd.f32 %v7985_v55, %v7656_v61 }
 0xe78   :  { %8241 = vst.msk [vmem:[%s12410_s6 + $0x158] sm:$0xff] %vm494_vm1, %v7986_v43  ;;  %7698 = vmatmul.bf16.gmra.mxu2 %v11492_v26  ;;  %v7345_v12 = vpack.c.bf16 %v7151_v58, %v7149_v47 }
 0xe7a   :  { %8027 = vmatmul.bf16.gmra.mxu3 %v7345_v12 }
 0xe7b   :  { %v6534_v53 = vpop.f32.mrf.mxu0  ;;  %v6863_v11 = vpop.f32.mrf.mxu1 }
 0xe7c   :  { %v7659_v15 = vpop.f32.mrf.mxu2  ;;  %v6864_v54 = vadd.f32 %v6863_v11, %v6534_v53 }
 0xe7d   :  { %v7988_v10 = vpop.f32.mrf.mxu3 }
 0xe7e   :  { %v7989_v8 = vadd.f32 %v7988_v10, %v7659_v15  ;;  %6573 = vmatmul.bf16.gmra.mxu0 %v11016_v34  ;;  %6902 = vmatmul.bf16.gmra.mxu1 %v11489_v20  ;;  %v7153_v6 = vmax.f32 %v6864_v54, 0.0 }
 0xe80   :  { %8242 = vst.msk [vmem:[%s12410_s6 + $0x160] sm:$0xff] %vm494_vm1, %v7989_v8 }
 0xe83   :  { %v6536_v24 = vpop.f32.mrf.mxu0  ;;  %v6865_v40 = vpop.f32.mrf.mxu1 }
 0xe84   :  { %v6866_v26 = vadd.f32 %v6865_v40, %v6536_v24  ;;  %v7661_v17 = vpop.f32.mrf.mxu2 }
 0xe85   :  { %v7990_v19 = vpop.f32.mrf.mxu3 }
 0xe86   :  { %v7155_v50 = vmax.f32 %v6866_v26, 0.0  ;;  %v7991_v9 = vadd.f32 %v7990_v19, %v7661_v17 }
 0xe88   :  { %8243 = vst.msk [vmem:[%s12410_s6 + $0x168] sm:$0xff] %vm494_vm1, %v7991_v9  ;;  %7703 = vmatmul.bf16.gmra.mxu2 %v11500_v37  ;;  %v7347_v34 = vpack.c.bf16 %v7155_v50, %v7153_v6 }
 0xe8a   :  { %8032 = vmatmul.bf16.gmra.mxu3 %v7347_v34 }
 0xe8b   :  { %v6539_v20 = vpop.f32.mrf.mxu0  ;;  %v6868_v46 = vpop.f32.mrf.mxu1 }
 0xe8c   :  { %v7664_v4 = vpop.f32.mrf.mxu2  ;;  %v6869_v39 = vadd.f32 %v6868_v46, %v6539_v20  ;;  %v13363_v20 = vld [vmem:[#allocation105_spill] sm:$0xff] }
 0xe8d   :  { %v7993_v52 = vpop.f32.mrf.mxu3 }
 0xe8e   :  { %v7994_v38 = vadd.f32 %v7993_v52, %v7664_v4  ;;  %6578 = vmatmul.bf16.gmra.mxu0 %v11024_v16  ;;  %6907 = vmatmul.bf16.gmra.mxu1 %v11497_v5  ;;  %v7157_v47 = vmax.f32 %v6869_v39, 0.0 }
 0xe90   :  { %8244 = vst.msk [vmem:[%s12410_s6 + $0x170] sm:$0xff] %vm494_vm1, %v7994_v38 }
 0xe93   :  { %v6541_v41 = vpop.f32.mrf.mxu0  ;;  %v6870_v13 = vpop.f32.mrf.mxu1 }
 0xe94   :  { %v6871_v37 = vadd.f32 %v6870_v13, %v6541_v41  ;;  %v7666_v61 = vpop.f32.mrf.mxu2 }
 0xe95   :  { %v7995_v55 = vpop.f32.mrf.mxu3 }
 0xe96   :  { %v7159_v58 = vmax.f32 %v6871_v37, 0.0  ;;  %v7996_v43 = vadd.f32 %v7995_v55, %v7666_v61 }
 0xe98   :  { %8245 = vst.msk [vmem:[%s12410_s6 + $0x178] sm:$0xff] %vm494_vm1, %v7996_v43  ;;  %7708 = vmatmul.bf16.gmra.mxu2 %v11508_v48  ;;  %v7349_v16 = vpack.c.bf16 %v7159_v58, %v7157_v47 }
 0xe9a   :  { %8037 = vmatmul.bf16.gmra.mxu3 %v7349_v16 }
 0xe9b   :  { %v6544_v5 = vpop.f32.mrf.mxu0  ;;  %v6873_v12 = vpop.f32.mrf.mxu1 }
 0xe9c   :  { %v7669_v53 = vpop.f32.mrf.mxu2  ;;  %v6874_v10 = vadd.f32 %v6873_v12, %v6544_v5  ;;  %v13365_v5 = vld [vmem:[#allocation118_spill] sm:$0xff]  ;;  %v13366_v12 = vld [vmem:[#allocation116_spill] sm:$0xff] }
 0xe9d   :  { %v7998_v11 = vpop.f32.mrf.mxu3 }
 0xe9e   :  { %v7999_v15 = vadd.f32 %v7998_v11, %v7669_v53  ;;  %6583 = vmatmul.bf16.gmra.mxu0 %v11032_v35  ;;  %6912 = vmatmul.bf16.gmra.mxu1 %v11505_v42  ;;  %v7161_v26 = vmax.f32 %v6874_v10, 0.0 }
 0xea0   :  { %8246 = vst.msk [vmem:[%s12410_s6 + $0x180] sm:$0xff] %vm494_vm1, %v7999_v15 }
 0xea3   :  { %v6546_v8 = vpop.f32.mrf.mxu0  ;;  %v6875_v54 = vpop.f32.mrf.mxu1 }
 0xea4   :  { %v6876_v48 = vadd.f32 %v6875_v54, %v6546_v8  ;;  %v7671_v24 = vpop.f32.mrf.mxu2 }
 0xea5   :  { %v8000_v40 = vpop.f32.mrf.mxu3 }
 0xea6   :  { %v7163_v17 = vmax.f32 %v6876_v48, 0.0  ;;  %v8001_v19 = vadd.f32 %v8000_v40, %v7671_v24 }
 0xea8   :  { %8247 = vst.msk [vmem:[%s12410_s6 + $0x188] sm:$0xff] %vm494_vm1, %v8001_v19  ;;  %7713 = vmatmul.bf16.gmra.mxu2 %v11516_v59  ;;  %v7351_v35 = vpack.c.bf16 %v7163_v17, %v7161_v26 }
 0xeaa   :  { %8042 = vmatmul.bf16.gmra.mxu3 %v7351_v35 }
 0xeab   :  { %v6549_v42 = vpop.f32.mrf.mxu0  ;;  %v6878_v6 = vpop.f32.mrf.mxu1 }
 0xeac   :  { %v7674_v50 = vpop.f32.mrf.mxu2  ;;  %v6879_v46 = vadd.f32 %v6878_v6, %v6549_v42 }
 0xead   :  { %v8003_v9 = vpop.f32.mrf.mxu3 }
 0xeae   :  { %v8004_v34 = vadd.f32 %v8003_v9, %v7674_v50  ;;  %6588 = vmatmul.bf16.gmra.mxu0 %v11040_v14  ;;  %6917 = vmatmul.bf16.gmra.mxu1 %v13363_v20  ;;  %v7165_v41 = vmax.f32 %v6879_v46, 0.0  ;;  %v13364_v14 = vld [vmem:[#allocation108_spill] sm:$0xff]  ;;  %v13367_v50 = vld [vmem:[#allocation121_spill] sm:$0xff]  ;;  %v13368_v9 = vld [vmem:[#allocation119_spill] sm:$0xff] }
 0xeb0   :  { %8248 = vst.msk [vmem:[%s12410_s6 + $0x190] sm:$0xff] %vm494_vm1, %v8004_v34 }
 0xeb3   :  { %v6551_v4 = vpop.f32.mrf.mxu0  ;;  %v6880_v52 = vpop.f32.mrf.mxu1 }
 0xeb4   :  { %v6881_v59 = vadd.f32 %v6880_v52, %v6551_v4  ;;  %v7676_v38 = vpop.f32.mrf.mxu2 }
 0xeb5   :  { %v8005_v39 = vpop.f32.mrf.mxu3 }
 0xeb6   :  { %v7167_v13 = vmax.f32 %v6881_v59, 0.0  ;;  %v8006_v37 = vadd.f32 %v8005_v39, %v7676_v38 }
 0xeb8   :  { %8249 = vst.msk [vmem:[%s12410_s6 + $0x198] sm:$0xff] %vm494_vm1, %v8006_v37  ;;  %7718 = vmatmul.bf16.gmra.mxu2 %v13364_v14  ;;  %v7353_v61 = vpack.c.bf16 %v7167_v13, %v7165_v41  ;;  %v13369_v41 = vld [vmem:[#allocation114_spill] sm:$0xff] }
 0xeba   :  { %8047 = vmatmul.bf16.gmra.mxu3 %v7353_v61 }
 0xebb   :  { %v6554_v55 = vpop.f32.mrf.mxu0  ;;  %v6883_v47 = vpop.f32.mrf.mxu1 }
 0xebc   :  { %v7679_v58 = vpop.f32.mrf.mxu2  ;;  %v6884_v53 = vadd.f32 %v6883_v47, %v6554_v55 }
 0xebd   :  { %v8008_v43 = vpop.f32.mrf.mxu3 }
 0xebe   :  { %v8009_v16 = vadd.f32 %v8008_v43, %v7679_v58  ;;  %6593 = vmatmul.bf16.gmra.mxu0 %v13365_v5  ;;  %6922 = vmatmul.bf16.gmra.mxu1 %v13366_v12  ;;  %v7169_v48 = vmax.f32 %v6884_v53, 0.0  ;;  %v13370_v58 = vld [vmem:[#allocation123_spill] sm:$0xff] }
 0xebf   :  { %v13371_v43 = vld [vmem:[#allocation111_spill] sm:$0xff] }
 0xec0   :  { %8250 = vst.msk [vmem:[%s12410_s6 + $0x1a0] sm:$0xff] %vm494_vm1, %v8009_v16 }
 0xec3   :  { %v6556_v11 = vpop.f32.mrf.mxu0  ;;  %v6885_v15 = vpop.f32.mrf.mxu1 }
 0xec4   :  { %v6886_v10 = vadd.f32 %v6885_v15, %v6556_v11  ;;  %v7681_v8 = vpop.f32.mrf.mxu2 }
 0xec5   :  { %v8010_v54 = vpop.f32.mrf.mxu3 }
 0xec6   :  { %v7171_v24 = vmax.f32 %v6886_v10, 0.0  ;;  %v8011_v40 = vadd.f32 %v8010_v54, %v7681_v8 }
 0xec8   :  { %8251 = vst.msk [vmem:[%s12410_s6 + $0x1a8] sm:$0xff] %vm494_vm1, %v8011_v40  ;;  %7723 = vmatmul.bf16.gmra.mxu2 %v11532_v30  ;;  %v7355_v26 = vpack.c.bf16 %v7171_v24, %v7169_v48 }
 0xeca   :  { %8052 = vmatmul.bf16.gmra.mxu3 %v7355_v26 }
 0xecb   :  { %v6559_v17 = vpop.f32.mrf.mxu0  ;;  %v6888_v19 = vpop.f32.mrf.mxu1 }
 0xecc   :  { %v7684_v35 = vpop.f32.mrf.mxu2  ;;  %v6889_v34 = vadd.f32 %v6888_v19, %v6559_v17 }
 0xecd   :  { %v8013_v42 = vpop.f32.mrf.mxu3 }
 0xece   :  { %v8014_v6 = vadd.f32 %v8013_v42, %v7684_v35  ;;  %6598 = vmatmul.bf16.gmra.mxu0 %v13367_v50  ;;  %6927 = vmatmul.bf16.gmra.mxu1 %v13368_v9  ;;  %v7173_v59 = vmax.f32 %v6889_v34, 0.0 }
 0xed0   :  { %8252 = vst.msk [vmem:[%s12410_s6 + $0x1b0] sm:$0xff] %vm494_vm1, %v8014_v6 }
 0xed3   :  { %v6561_v20 = vpop.f32.mrf.mxu0  ;;  %v6890_v46 = vpop.f32.mrf.mxu1 }
 0xed4   :  { %v6891_v30 = vadd.f32 %v6890_v46, %v6561_v20  ;;  %v7686_v4 = vpop.f32.mrf.mxu2 }
 0xed5   :  { %v8015_v52 = vpop.f32.mrf.mxu3 }
 0xed6   :  { %v7175_v38 = vmax.f32 %v6891_v30, 0.0  ;;  %v8016_v39 = vadd.f32 %v8015_v52, %v7686_v4 }
 0xed8   :  { %8253 = vst.msk [vmem:[%s12410_s6 + $0x1b8] sm:$0xff] %vm494_vm1, %v8016_v39  ;;  %7728 = vmatmul.bf16.gmra.mxu2 %v13369_v41  ;;  %v7357_v13 = vpack.c.bf16 %v7175_v38, %v7173_v59 }
 0xeda   :  { %8057 = vmatmul.bf16.gmra.mxu3 %v7357_v13 }
 0xedb   :  { %v6564_v37 = vpop.f32.mrf.mxu0  ;;  %v6893_v14 = vpop.f32.mrf.mxu1 }
 0xedc   :  { %v7689_v61 = vpop.f32.mrf.mxu2  ;;  %v6894_v16 = vadd.f32 %v6893_v14, %v6564_v37 }
 0xedd   :  { %v8018_v55 = vpop.f32.mrf.mxu3 }
 0xede   :  { %v8019_v47 = vadd.f32 %v8018_v55, %v7689_v61  ;;  %6603 = vmatmul.bf16.gmra.mxu0 %v13370_v58  ;;  %6932 = vmatmul.bf16.gmra.mxu1 %v13371_v43  ;;  %v7177_v10 = vmax.f32 %v6894_v16, 0.0 }
 0xee0   :  { %8254 = vst.msk [vmem:[%s12410_s6 + $0x1c0] sm:$0xff] %vm494_vm1, %v8019_v47 }
 0xee3   :  { %v6566_v5 = vpop.f32.mrf.mxu0  ;;  %v6895_v12 = vpop.f32.mrf.mxu1 }
 0xee4   :  { %v6896_v53 = vadd.f32 %v6895_v12, %v6566_v5  ;;  %v7691_v11 = vpop.f32.mrf.mxu2 }
 0xee5   :  { %v8020_v15 = vpop.f32.mrf.mxu3 }
 0xee6   :  { %v7179_v8 = vmax.f32 %v6896_v53, 0.0  ;;  %v8021_v54 = vadd.f32 %v8020_v15, %v7691_v11 }
 0xee8   :  { %8255 = vst.msk [vmem:[%s12410_s6 + $0x1c8] sm:$0xff] %vm494_vm1, %v8021_v54  ;;  %7733 = vmatmul.bf16.gmra.mxu2 %v11554_v51  ;;  %v7359_v48 = vpack.c.bf16 %v7179_v8, %v7177_v10 }
 0xeea   :  { %8062 = vmatmul.bf16.gmra.mxu3 %v7359_v48 }
 0xeeb   :  { %v6569_v24 = vpop.f32.mrf.mxu0  ;;  %v6898_v40 = vpop.f32.mrf.mxu1 }
 0xeec   :  { %v7694_v26 = vpop.f32.mrf.mxu2  ;;  %v6899_v35 = vadd.f32 %v6898_v40, %v6569_v24 }
 0xeed   :  { %v8023_v17 = vpop.f32.mrf.mxu3 }
 0xeee   :  { %v8024_v19 = vadd.f32 %v8023_v17, %v7694_v26  ;;  %6608 = vmatmul.bf16.gmra.mxu0 %v11072_v18  ;;  %6937 = vmatmul.bf16.gmra.mxu1 %v11545_v21  ;;  %v7181_v34 = vmax.f32 %v6899_v35, 0.0 }
 0xef0   :  { %8256 = vst.msk [vmem:[%s12410_s6 + $0x1d0] sm:$0xff] %vm494_vm1, %v8024_v19 }
 0xef3   :  { %v6571_v42 = vpop.f32.mrf.mxu0  ;;  %v6900_v6 = vpop.f32.mrf.mxu1 }
 0xef4   :  { %v6901_v51 = vadd.f32 %v6900_v6, %v6571_v42  ;;  %v7696_v50 = vpop.f32.mrf.mxu2 }
 0xef5   :  { %v8025_v9 = vpop.f32.mrf.mxu3 }
 0xef6   :  { %v7183_v20 = vmax.f32 %v6901_v51, 0.0  ;;  %v8026_v46 = vadd.f32 %v8025_v9, %v7696_v50 }
 0xef8   :  { %8257 = vst.msk [vmem:[%s12410_s6 + $0x1d8] sm:$0xff] %vm494_vm1, %v8026_v46  ;;  %7738 = vmatmul.bf16.gmra.mxu2 %v11562_v7  ;;  %v7361_v18 = vpack.c.bf16 %v7183_v20, %v7181_v34 }
 0xefa   :  { %8067 = vmatmul.bf16.gmra.mxu3 %v7361_v18 }
 0xefb   :  { %v6574_v21 = vpop.f32.mrf.mxu0  ;;  %v6903_v30 = vpop.f32.mrf.mxu1 }
 0xefc   :  { %v7699_v4 = vpop.f32.mrf.mxu2  ;;  %v6904_v38 = vadd.f32 %v6903_v30, %v6574_v21 }
 0xefd   :  { %v8028_v52 = vpop.f32.mrf.mxu3 }
 0xefe   :  { %v8029_v59 = vadd.f32 %v8028_v52, %v7699_v4  ;;  %6613 = vmatmul.bf16.gmra.mxu0 %v11080_v33  ;;  %6942 = vmatmul.bf16.gmra.mxu1 %v11559_v57  ;;  %v7185_v14 = vmax.f32 %v6904_v38, 0.0 }
 0xf00   :  { %8258 = vst.msk [vmem:[%s12410_s6 + $0x1e0] sm:$0xff] %vm494_vm1, %v8029_v59 }
 0xf03   :  { %v6576_v39 = vpop.f32.mrf.mxu0  ;;  %v6905_v41 = vpop.f32.mrf.mxu1 }
 0xf04   :  { %v6906_v7 = vadd.f32 %v6905_v41, %v6576_v39  ;;  %v7701_v13 = vpop.f32.mrf.mxu2 }
 0xf05   :  { %v8030_v37 = vpop.f32.mrf.mxu3 }
 0xf06   :  { %v7187_v61 = vmax.f32 %v6906_v7, 0.0  ;;  %v8031_v55 = vadd.f32 %v8030_v37, %v7701_v13 }
 0xf08   :  { %8259 = vst.msk [vmem:[%s12410_s6 + $0x1e8] sm:$0xff] %vm494_vm1, %v8031_v55  ;;  %7743 = vmatmul.bf16.gmra.mxu2 %v11570_v60  ;;  %v7363_v33 = vpack.c.bf16 %v7187_v61, %v7185_v14 }
 0xf0a   :  { %8072 = vmatmul.bf16.gmra.mxu3 %v7363_v33 }
 0xf0b   :  { %v6579_v57 = vpop.f32.mrf.mxu0  ;;  %v6908_v47 = vpop.f32.mrf.mxu1 }
 0xf0c   :  { %v7704_v58 = vpop.f32.mrf.mxu2  ;;  %v6909_v5 = vadd.f32 %v6908_v47, %v6579_v57 }
 0xf0d   :  { %v8033_v43 = vpop.f32.mrf.mxu3 }
 0xf0e   :  { %v8034_v16 = vadd.f32 %v8033_v43, %v7704_v58  ;;  %6618 = vmatmul.bf16.gmra.mxu0 %v11088_v63  ;;  %6947 = vmatmul.bf16.gmra.mxu1 %v11567_v2  ;;  %v7189_v10 = vmax.f32 %v6909_v5, 0.0 }
 0xf10   :  { %8260 = vst.msk [vmem:[%s12410_s6 + $0x1f0] sm:$0xff] %vm494_vm1, %v8034_v16 }
 0xf13   :  { %v6581_v12 = vpop.f32.mrf.mxu0  ;;  %v6910_v53 = vpop.f32.mrf.mxu1 }
 0xf14   :  { %v6911_v60 = vadd.f32 %v6910_v53, %v6581_v12  ;;  %v7706_v11 = vpop.f32.mrf.mxu2 }
 0xf15   :  { %v8035_v15 = vpop.f32.mrf.mxu3 }
 0xf16   :  { %v7191_v8 = vmax.f32 %v6911_v60, 0.0  ;;  %v8036_v54 = vadd.f32 %v8035_v15, %v7706_v11 }
 0xf18   :  { %8261 = vst.msk [vmem:[%s12410_s6 + $0x1f8] sm:$0xff] %vm494_vm1, %v8036_v54  ;;  %7748 = vmatmul.bf16.gmra.mxu2 %v11578_v1  ;;  %v7365_v63 = vpack.c.bf16 %v7191_v8, %v7189_v10 }
 0xf1a   :  { %8077 = vmatmul.bf16.gmra.mxu3 %v7365_v63 }
 0xf1b   :  { %v6584_v2 = vpop.f32.mrf.mxu0  ;;  %v6913_v48 = vpop.f32.mrf.mxu1 }
 0xf1c   :  { %v7709_v24 = vpop.f32.mrf.mxu2  ;;  %v6914_v17 = vadd.f32 %v6913_v48, %v6584_v2 }
 0xf1d   :  { %v8038_v40 = vpop.f32.mrf.mxu3 }
 0xf1e   :  { %v8039_v26 = vadd.f32 %v8038_v40, %v7709_v24  ;;  %6623 = vmatmul.bf16.gmra.mxu0 %v11096_v25  ;;  %6952 = vmatmul.bf16.gmra.mxu1 %v11575_v0  ;;  %v7193_v51 = vmax.f32 %v6914_v17, 0.0 }
 0xf20   :  { %8262 = vst.msk [vmem:[%s12410_s6 + $0x200] sm:$0xff] %vm494_vm1, %v8039_v26 }
 0xf23   :  { %v6586_v19 = vpop.f32.mrf.mxu0  ;;  %v6915_v35 = vpop.f32.mrf.mxu1 }
 0xf24   :  { %v6916_v1 = vadd.f32 %v6915_v35, %v6586_v19  ;;  %v7711_v42 = vpop.f32.mrf.mxu2 }
 0xf25   :  { %v8040_v6 = vpop.f32.mrf.mxu3 }
 0xf26   :  { %v7195_v50 = vmax.f32 %v6916_v1, 0.0  ;;  %v8041_v9 = vadd.f32 %v8040_v6, %v7711_v42 }
 0xf28   :  { %8263 = vst.msk [vmem:[%s12410_s6 + $0x208] sm:$0xff] %vm494_vm1, %v8041_v9  ;;  %7753 = vmatmul.bf16.gmra.mxu2 %v11586_v28  ;;  %v7367_v25 = vpack.c.bf16 %v7195_v50, %v7193_v51 }
 0xf2a   :  { %8082 = vmatmul.bf16.gmra.mxu3 %v7367_v25 }
 0xf2b   :  { %v6589_v0 = vpop.f32.mrf.mxu0  ;;  %v6918_v34 = vpop.f32.mrf.mxu1 }
 0xf2c   :  { %v7714_v20 = vpop.f32.mrf.mxu2  ;;  %v6919_v21 = vadd.f32 %v6918_v34, %v6589_v0 }
 0xf2d   :  { %v8043_v46 = vpop.f32.mrf.mxu3 }
 0xf2e   :  { %v8044_v18 = vadd.f32 %v8043_v46, %v7714_v20  ;;  %6628 = vmatmul.bf16.gmra.mxu0 %v11104_v62  ;;  %6957 = vmatmul.bf16.gmra.mxu1 %v11583_v22  ;;  %v7197_v38 = vmax.f32 %v6919_v21, 0.0  ;;  %v13372_v46 = vld [vmem:[#allocation125_spill] sm:$0xff] }
 0xf30   :  { %8264 = vst.msk [vmem:[%s12410_s6 + $0x210] sm:$0xff] %vm494_vm1, %v8044_v18  ;;  %v13373_v18 = vld [vmem:[#allocation115_spill] sm:$0xff] }
 0xf33   :  { %v6591_v30 = vpop.f32.mrf.mxu0  ;;  %v6920_v4 = vpop.f32.mrf.mxu1 }
 0xf34   :  { %v6921_v28 = vadd.f32 %v6920_v4, %v6591_v30  ;;  %v7716_v52 = vpop.f32.mrf.mxu2 }
 0xf35   :  { %v8045_v59 = vpop.f32.mrf.mxu3 }
 0xf36   :  { %v7199_v39 = vmax.f32 %v6921_v28, 0.0  ;;  %v8046_v41 = vadd.f32 %v8045_v59, %v7716_v52 }
 0xf38   :  { %8265 = vst.msk [vmem:[%s12410_s6 + $0x218] sm:$0xff] %vm494_vm1, %v8046_v41  ;;  %7758 = vmatmul.bf16.gmra.mxu2 %v11594_v49  ;;  %v7369_v62 = vpack.c.bf16 %v7199_v39, %v7197_v38  ;;  %v13374_v41 = vld [vmem:[#allocation117_spill] sm:$0xff] }
 0xf3a   :  { %8087 = vmatmul.bf16.gmra.mxu3 %v7369_v62 }
 0xf3b   :  { %v6594_v22 = vpop.f32.mrf.mxu0  ;;  %v6923_v7 = vpop.f32.mrf.mxu1 }
 0xf3c   :  { %v7719_v13 = vpop.f32.mrf.mxu2  ;;  %v6924_v61 = vadd.f32 %v6923_v7, %v6594_v22 }
 0xf3d   :  { %v8048_v37 = vpop.f32.mrf.mxu3 }
 0xf3e   :  { %v8049_v14 = vadd.f32 %v8048_v37, %v7719_v13  ;;  %6633 = vmatmul.bf16.gmra.mxu0 %v11112_v32  ;;  %6962 = vmatmul.bf16.gmra.mxu1 %v11591_v3  ;;  %v7201_v58 = vmax.f32 %v6924_v61, 0.0  ;;  %v13375_v61 = vld [vmem:[#allocation128_spill] sm:$0xff] }
 0xf40   :  { %8266 = vst.msk [vmem:[%s12410_s6 + $0x220] sm:$0xff] %vm494_vm1, %v8049_v14 }
 0xf43   :  { %v6596_v55 = vpop.f32.mrf.mxu0  ;;  %v6925_v33 = vpop.f32.mrf.mxu1 }
 0xf44   :  { %v6926_v49 = vadd.f32 %v6925_v33, %v6596_v55  ;;  %v7721_v57 = vpop.f32.mrf.mxu2  ;;  %v13376_v55 = vld [vmem:[#allocation126_spill] sm:$0xff] }
 0xf45   :  { %v8050_v47 = vpop.f32.mrf.mxu3 }
 0xf46   :  { %v7203_v43 = vmax.f32 %v6926_v49, 0.0  ;;  %v8051_v16 = vadd.f32 %v8050_v47, %v7721_v57 }
 0xf48   :  { %8267 = vst.msk [vmem:[%s12410_s6 + $0x228] sm:$0xff] %vm494_vm1, %v8051_v16  ;;  %7763 = vmatmul.bf16.gmra.mxu2 %v11602_v36  ;;  %v7371_v32 = vpack.c.bf16 %v7203_v43, %v7201_v58 }
 0xf4a   :  { %8092 = vmatmul.bf16.gmra.mxu3 %v7371_v32 }
 0xf4b   :  { %v6599_v3 = vpop.f32.mrf.mxu0  ;;  %v6928_v5 = vpop.f32.mrf.mxu1 }
 0xf4c   :  { %v7724_v12 = vpop.f32.mrf.mxu2  ;;  %v6929_v11 = vadd.f32 %v6928_v5, %v6599_v3  ;;  %v13377_v5 = vld [vmem:[#allocation120_spill] sm:$0xff] }
 0xf4d   :  { %v8053_v53 = vpop.f32.mrf.mxu3 }
 0xf4e   :  { %v8054_v60 = vadd.f32 %v8053_v53, %v7724_v12  ;;  %6638 = vmatmul.bf16.gmra.mxu0 %v11120_v31  ;;  %6967 = vmatmul.bf16.gmra.mxu1 %v11599_v29  ;;  %v7205_v63 = vmax.f32 %v6929_v11, 0.0 }
 0xf50   :  { %8268 = vst.msk [vmem:[%s12410_s6 + $0x230] sm:$0xff] %vm494_vm1, %v8054_v60 }
 0xf53   :  { %v6601_v15 = vpop.f32.mrf.mxu0  ;;  %v6930_v10 = vpop.f32.mrf.mxu1 }
 0xf54   :  { %v6931_v36 = vadd.f32 %v6930_v10, %v6601_v15  ;;  %v7726_v8 = vpop.f32.mrf.mxu2 }
 0xf55   :  { %v8055_v54 = vpop.f32.mrf.mxu3 }
 0xf56   :  { %v7207_v2 = vmax.f32 %v6931_v36, 0.0  ;;  %v8056_v48 = vadd.f32 %v8055_v54, %v7726_v8  ;;  %v13378_v36 = vld [vmem:[#allocation131_spill] sm:$0xff]  ;;  %v13379_v8 = vld [vmem:[#allocation129_spill] sm:$0xff] }
 0xf58   :  { %8269 = vst.msk [vmem:[%s12410_s6 + $0x238] sm:$0xff] %vm494_vm1, %v8056_v48  ;;  %7768 = vmatmul.bf16.gmra.mxu2 %v11610_v27  ;;  %v7373_v31 = vpack.c.bf16 %v7207_v2, %v7205_v63 }
 0xf5a   :  { %8097 = vmatmul.bf16.gmra.mxu3 %v7373_v31 }
 0xf5b   :  { %v6604_v29 = vpop.f32.mrf.mxu0  ;;  %v6933_v24 = vpop.f32.mrf.mxu1 }
 0xf5c   :  { %v7729_v40 = vpop.f32.mrf.mxu2  ;;  %v6934_v19 = vadd.f32 %v6933_v24, %v6604_v29 }
 0xf5d   :  { %v8058_v26 = vpop.f32.mrf.mxu3 }
 0xf5e   :  { %v8059_v17 = vadd.f32 %v8058_v26, %v7729_v40  ;;  %6643 = vmatmul.bf16.gmra.mxu0 %v11134_v44  ;;  %6972 = vmatmul.bf16.gmra.mxu1 %v11607_v45  ;;  %v7209_v51 = vmax.f32 %v6934_v19, 0.0 }
 0xf60   :  { %8270 = vst.msk [vmem:[%s12410_s6 + $0x240] sm:$0xff] %vm494_vm1, %v8059_v17  ;;  %v13380_v17 = vld [vmem:[#allocation132_spill] sm:$0xff] }
 0xf63   :  { %v6606_v35 = vpop.f32.mrf.mxu0  ;;  %v6935_v1 = vpop.f32.mrf.mxu1 }
 0xf64   :  { %v6936_v27 = vadd.f32 %v6935_v1, %v6606_v35  ;;  %v7731_v42 = vpop.f32.mrf.mxu2 }
 0xf65   :  { %v8060_v6 = vpop.f32.mrf.mxu3 }
 0xf66   :  { %v7211_v50 = vmax.f32 %v6936_v27, 0.0  ;;  %v8061_v9 = vadd.f32 %v8060_v6, %v7731_v42 }
 0xf68   :  { %8271 = vst.msk [vmem:[%s12410_s6 + $0x248] sm:$0xff] %vm494_vm1, %v8061_v9  ;;  %7773 = vmatmul.bf16.gmra.mxu2 %v11624_v23  ;;  %v7375_v44 = vpack.c.bf16 %v7211_v50, %v7209_v51  ;;  %v13381_v51 = vld [vmem:[#allocation5_spill] sm:$0xff]  ;;  %v13382_v50 = vld [vmem:[#allocation122_spill] sm:$0xff] }
 0xf6a   :  { %8102 = vmatmul.bf16.gmra.mxu3 %v7375_v44 }
 0xf6b   :  { %v6609_v45 = vpop.f32.mrf.mxu0  ;;  %v6938_v25 = vpop.f32.mrf.mxu1 }
 0xf6c   :  { %v7734_v0 = vpop.f32.mrf.mxu2  ;;  %v6939_v21 = vadd.f32 %v6938_v25, %v6609_v45 }
 0xf6d   :  { %v8063_v34 = vpop.f32.mrf.mxu3 }
 0xf6e   :  { %v8064_v20 = vadd.f32 %v8063_v34, %v7734_v0  ;;  %6648 = vmatmul.bf16.gmra.mxu0 %v13372_v46  ;;  %6977 = vmatmul.bf16.gmra.mxu1 %v13373_v18  ;;  %v7213_v59 = vmax.f32 %v6939_v21, 0.0  ;;  %v13383_v21 = vld [vmem:[#allocation133_spill] sm:$0xff] }
 0xf70   :  { %8272 = vst.msk [vmem:[%s12410_s6 + $0x250] sm:$0xff] %vm494_vm1, %v8064_v20 }
 0xf73   :  { %v6611_v30 = vpop.f32.mrf.mxu0  ;;  %v6940_v4 = vpop.f32.mrf.mxu1 }
 0xf74   :  { %v6941_v23 = vadd.f32 %v6940_v4, %v6611_v30  ;;  %v7736_v28 = vpop.f32.mrf.mxu2 }
 0xf75   :  { %v8065_v52 = vpop.f32.mrf.mxu3 }
 0xf76   :  { %v7215_v38 = vmax.f32 %v6941_v23, 0.0  ;;  %v8066_v39 = vadd.f32 %v8065_v52, %v7736_v28 }
 0xf78   :  { %8273 = vst.msk [vmem:[%s12410_s6 + $0x258] sm:$0xff] %vm494_vm1, %v8066_v39  ;;  %7778 = vmatmul.bf16.gmra.mxu2 %v13374_v41  ;;  %v7377_v62 = vpack.c.bf16 %v7215_v38, %v7213_v59  ;;  %v13384_v38 = vld [vmem:[#allocation6_spill] sm:$0xff]  ;;  %v13385_v39 = vld [vmem:[#allocation124_spill] sm:$0xff] }
 0xf7a   :  { %8107 = vmatmul.bf16.gmra.mxu3 %v7377_v62 }
 0xf7b   :  { %v6614_v22 = vpop.f32.mrf.mxu0  ;;  %v6943_v7 = vpop.f32.mrf.mxu1 }
 0xf7c   :  { %v7739_v13 = vpop.f32.mrf.mxu2  ;;  %v6944_v33 = vadd.f32 %v6943_v7, %v6614_v22 }
 0xf7d   :  { %v8068_v37 = vpop.f32.mrf.mxu3 }
 0xf7e   :  { %v8069_v14 = vadd.f32 %v8068_v37, %v7739_v13  ;;  %6653 = vmatmul.bf16.gmra.mxu0 %v13375_v61  ;;  %6982 = vmatmul.bf16.gmra.mxu1 %v13376_v55  ;;  %v7217_v16 = vmax.f32 %v6944_v33, 0.0  ;;  %v13386_v33 = vld [vmem:[#allocation7_spill] sm:$0xff] }
 0xf80   :  { %8274 = vst.msk [vmem:[%s12410_s6 + $0x260] sm:$0xff] %vm494_vm1, %v8069_v14 }
 0xf83   :  { %v6616_v49 = vpop.f32.mrf.mxu0  ;;  %v6945_v57 = vpop.f32.mrf.mxu1 }
 0xf84   :  { %v6946_v47 = vadd.f32 %v6945_v57, %v6616_v49  ;;  %v7741_v58 = vpop.f32.mrf.mxu2 }
 0xf85   :  { %v8070_v43 = vpop.f32.mrf.mxu3 }
 0xf86   :  { %v7219_v32 = vmax.f32 %v6946_v47, 0.0  ;;  %v8071_v3 = vadd.f32 %v8070_v43, %v7741_v58 }
 0xf88   :  { %8275 = vst.msk [vmem:[%s12410_s6 + $0x268] sm:$0xff] %vm494_vm1, %v8071_v3  ;;  %7783 = vmatmul.bf16.gmra.mxu2 %v13377_v5  ;;  %v7379_v12 = vpack.c.bf16 %v7219_v32, %v7217_v16  ;;  %v13387_v32 = vld [vmem:[#allocation9_spill] sm:$0xff]  ;;  %v13388_v3 = vld [vmem:[#allocation127_spill] sm:$0xff] }
 0xf8a   :  { %8112 = vmatmul.bf16.gmra.mxu3 %v7379_v12 }
 0xf8b   :  { %v6619_v53 = vpop.f32.mrf.mxu0  ;;  %v6948_v60 = vpop.f32.mrf.mxu1 }
 0xf8c   :  { %v7744_v11 = vpop.f32.mrf.mxu2  ;;  %v6949_v54 = vadd.f32 %v6948_v60, %v6619_v53 }
 0xf8d   :  { %v8073_v15 = vpop.f32.mrf.mxu3 }
 0xf8e   :  { %v8074_v10 = vadd.f32 %v8073_v15, %v7744_v11  ;;  %6658 = vmatmul.bf16.gmra.mxu0 %v13378_v36  ;;  %6987 = vmatmul.bf16.gmra.mxu1 %v13379_v8  ;;  %v7221_v24 = vmax.f32 %v6949_v54, 0.0  ;;  %v13389_v54 = vld [vmem:[#allocation10_spill] sm:$0xff] }
 0xf90   :  { %8276 = vst.msk [vmem:[%s12410_s6 + $0x270] sm:$0xff] %vm494_vm1, %v8074_v10 }
 0xf93   :  { %v6621_v63 = vpop.f32.mrf.mxu0  ;;  %v6950_v2 = vpop.f32.mrf.mxu1 }
 0xf94   :  { %v6951_v48 = vadd.f32 %v6950_v2, %v6621_v63  ;;  %v7746_v31 = vpop.f32.mrf.mxu2 }
 0xf95   :  { %v8075_v29 = vpop.f32.mrf.mxu3 }
 0xf96   :  { %v7223_v40 = vmax.f32 %v6951_v48, 0.0  ;;  %v8076_v26 = vadd.f32 %v8075_v29, %v7746_v31 }
 0xf98   :  { %8277 = vst.msk [vmem:[%s12410_s6 + $0x278] sm:$0xff] %vm494_vm1, %v8076_v26  ;;  %7788 = vmatmul.bf16.gmra.mxu2 %v13380_v17  ;;  %v7381_v19 = vpack.c.bf16 %v7223_v40, %v7221_v24  ;;  %v13390_v40 = vld [vmem:[#allocation12_spill] sm:$0xff]  ;;  %v13391_v26 = vld [vmem:[#allocation130_spill] sm:$0xff] }
 0xf9a   :  { %8117 = vmatmul.bf16.gmra.mxu3 %v7381_v19 }
 0xf9b   :  { %v6624_v35 = vpop.f32.mrf.mxu0  ;;  %v6953_v1 = vpop.f32.mrf.mxu1 }
 0xf9c   :  { %v7749_v27 = vpop.f32.mrf.mxu2  ;;  %v6954_v9 = vadd.f32 %v6953_v1, %v6624_v35 }
 0xf9d   :  { %v8078_v42 = vpop.f32.mrf.mxu3 }
 0xf9e   :  { %v8079_v6 = vadd.f32 %v8078_v42, %v7749_v27  ;;  %6663 = vmatmul.bf16.gmra.mxu0 %v13381_v51  ;;  %6992 = vmatmul.bf16.gmra.mxu1 %v13382_v50  ;;  %v7225_v20 = vmax.f32 %v6954_v9, 0.0 }
 0xfa0   :  { %8278 = vst.msk [vmem:[%s12410_s6 + $0x280] sm:$0xff] %vm494_vm1, %v8079_v6 }
 0xfa3   :  { %v6626_v44 = vpop.f32.mrf.mxu0  ;;  %v6955_v45 = vpop.f32.mrf.mxu1 }
 0xfa4   :  { %v6956_v25 = vadd.f32 %v6955_v45, %v6626_v44  ;;  %v7751_v0 = vpop.f32.mrf.mxu2  ;;  %v13392_v44 = vld [vmem:[#allocation13_spill] sm:$0xff] }
 0xfa5   :  { %v8080_v34 = vpop.f32.mrf.mxu3 }
 0xfa6   :  { %v7227_v46 = vmax.f32 %v6956_v25, 0.0  ;;  %v8081_v18 = vadd.f32 %v8080_v34, %v7751_v0 }
 0xfa8   :  { %8279 = vst.msk [vmem:[%s12410_s6 + $0x288] sm:$0xff] %vm494_vm1, %v8081_v18  ;;  %7793 = vmatmul.bf16.gmra.mxu2 %v13383_v21  ;;  %v7383_v30 = vpack.c.bf16 %v7227_v46, %v7225_v20  ;;  %v13393_v46 = vld [vmem:[#allocation15_spill] sm:$0xff]  ;;  %v13394_v18 = vld [vmem:[#allocation8_spill] sm:$0xff] }
 0xfaa   :  { %8122 = vmatmul.bf16.gmra.mxu3 %v7383_v30 }
 0xfab   :  { %v6629_v4 = vpop.f32.mrf.mxu0  ;;  %v6958_v23 = vpop.f32.mrf.mxu1 }
 0xfac   :  { %v7754_v28 = vpop.f32.mrf.mxu2  ;;  %v6959_v41 = vadd.f32 %v6958_v23, %v6629_v4 }
 0xfad   :  { %v8083_v52 = vpop.f32.mrf.mxu3 }
 0xfae   :  { %v8084_v59 = vadd.f32 %v8083_v52, %v7754_v28  ;;  %6668 = vmatmul.bf16.gmra.mxu0 %v13384_v38  ;;  %6997 = vmatmul.bf16.gmra.mxu1 %v13385_v39  ;;  %v7229_v14 = vmax.f32 %v6959_v41, 0.0 }
 0xfb0   :  { %8280 = vst.msk [vmem:[%s12410_s6 + $0x290] sm:$0xff] %vm494_vm1, %v8084_v59 }
 0xfb3   :  { %v6631_v62 = vpop.f32.mrf.mxu0  ;;  %v6960_v22 = vpop.f32.mrf.mxu1 }
 0xfb4   :  { %v6961_v7 = vadd.f32 %v6960_v22, %v6631_v62  ;;  %v7756_v13 = vpop.f32.mrf.mxu2  ;;  %v13395_v62 = vld [vmem:[#allocation16_spill] sm:$0xff] }
 0xfb5   :  { %v8085_v37 = vpop.f32.mrf.mxu3 }
 0xfb6   :  { %v7231_v61 = vmax.f32 %v6961_v7, 0.0  ;;  %v8086_v55 = vadd.f32 %v8085_v37, %v7756_v13 }
 0xfb8   :  { %8281 = vst.msk [vmem:[%s12410_s6 + $0x298] sm:$0xff] %vm494_vm1, %v8086_v55  ;;  %7798 = vmatmul.bf16.gmra.mxu2 %v13386_v33  ;;  %v7385_v49 = vpack.c.bf16 %v7231_v61, %v7229_v14  ;;  %v13396_v61 = vld [vmem:[#allocation18_spill] sm:$0xff]  ;;  %v13397_v55 = vld [vmem:[#allocation11_spill] sm:$0xff] }
 0xfba   :  { %8127 = vmatmul.bf16.gmra.mxu3 %v7385_v49 }
 0xfbb   :  { %v6634_v57 = vpop.f32.mrf.mxu0  ;;  %v6963_v47 = vpop.f32.mrf.mxu1 }
 0xfbc   :  { %v7759_v58 = vpop.f32.mrf.mxu2  ;;  %v6964_v5 = vadd.f32 %v6963_v47, %v6634_v57 }
 0xfbd   :  { %v8088_v43 = vpop.f32.mrf.mxu3 }
 0xfbe   :  { %v8089_v16 = vadd.f32 %v8088_v43, %v7759_v58  ;;  %6673 = vmatmul.bf16.gmra.mxu0 %v13387_v32  ;;  %7002 = vmatmul.bf16.gmra.mxu1 %v13388_v3  ;;  %v7233_v10 = vmax.f32 %v6964_v5, 0.0 }
 0xfc0   :  { %8282 = vst.msk [vmem:[%s12410_s6 + $0x2a0] sm:$0xff] %vm494_vm1, %v8089_v16 }
 0xfc3   :  { %v6636_v12 = vpop.f32.mrf.mxu0  ;;  %v6965_v53 = vpop.f32.mrf.mxu1 }
 0xfc4   :  { %v6966_v60 = vadd.f32 %v6965_v53, %v6636_v12  ;;  %v7761_v11 = vpop.f32.mrf.mxu2  ;;  %v13398_v12 = vld [vmem:[#allocation19_spill] sm:$0xff] }
 0xfc5   :  { %v8090_v15 = vpop.f32.mrf.mxu3 }
 0xfc6   :  { %v7235_v36 = vmax.f32 %v6966_v60, 0.0  ;;  %v8091_v8 = vadd.f32 %v8090_v15, %v7761_v11 }
 0xfc8   :  { %8283 = vst.msk [vmem:[%s12410_s6 + $0x2a8] sm:$0xff] %vm494_vm1, %v8091_v8  ;;  %7803 = vmatmul.bf16.gmra.mxu2 %v13389_v54  ;;  %v7387_v63 = vpack.c.bf16 %v7235_v36, %v7233_v10  ;;  %v13399_v36 = vld [vmem:[#allocation21_spill] sm:$0xff]  ;;  %v13400_v8 = vld [vmem:[#allocation14_spill] sm:$0xff] }
 0xfca   :  { %8132 = vmatmul.bf16.gmra.mxu3 %v7387_v63 }
 0xfcb   :  { %v6639_v2 = vpop.f32.mrf.mxu0  ;;  %v6968_v48 = vpop.f32.mrf.mxu1 }
 0xfcc   :  { %v7764_v31 = vpop.f32.mrf.mxu2  ;;  %v6969_v17 = vadd.f32 %v6968_v48, %v6639_v2 }
 0xfcd   :  { %v8093_v29 = vpop.f32.mrf.mxu3 }
 0xfce   :  { %v8094_v24 = vadd.f32 %v8093_v29, %v7764_v31  ;;  %6678 = vmatmul.bf16.gmra.mxu0 %v13390_v40  ;;  %7007 = vmatmul.bf16.gmra.mxu1 %v13391_v26  ;;  %v7237_v6 = vmax.f32 %v6969_v17, 0.0 }
 0xfd0   :  { %8284 = vst.msk [vmem:[%s12410_s6 + $0x2b0] sm:$0xff] %vm494_vm1, %v8094_v24 }
 0xfd3   :  { %v6641_v19 = vpop.f32.mrf.mxu0  ;;  %v6970_v35 = vpop.f32.mrf.mxu1 }
 0xfd4   :  { %v6971_v1 = vadd.f32 %v6970_v35, %v6641_v19  ;;  %v7766_v27 = vpop.f32.mrf.mxu2  ;;  %v13401_v19 = vld [vmem:[#allocation17_spill] sm:$0xff] }
 0xfd5   :  { %v8095_v42 = vpop.f32.mrf.mxu3 }
 0xfd6   :  { %v7239_v51 = vmax.f32 %v6971_v1, 0.0  ;;  %v8096_v50 = vadd.f32 %v8095_v42, %v7766_v27 }
 0xfd8   :  { %v7389_v9 = vpack.c.bf16 %v7239_v51, %v7237_v6  ;;  %8285 = vst.msk [vmem:[%s12410_s6 + $0x2b8] sm:$0xff] %vm494_vm1, %v8096_v50  ;;  %7808 = vmatmul.bf16.gmra.mxu2 %v13392_v44 }
 0xfda   :  { %8137 = vmatmul.bf16.gmra.mxu3 %v7389_v9 }
 0xfdb   :  { %v6644_v45 = vpop.f32.mrf.mxu0  ;;  %v6973_v25 = vpop.f32.mrf.mxu1 }
 0xfdc   :  { %v7769_v0 = vpop.f32.mrf.mxu2  ;;  %v6974_v21 = vadd.f32 %v6973_v25, %v6644_v45 }
 0xfdd   :  { %v8098_v34 = vpop.f32.mrf.mxu3 }
 0xfde   :  { %v8099_v20 = vadd.f32 %v8098_v34, %v7769_v0  ;;  %6683 = vmatmul.bf16.gmra.mxu0 %v13393_v46  ;;  %7012 = vmatmul.bf16.gmra.mxu1 %v13394_v18  ;;  %v7241_v59 = vmax.f32 %v6974_v21, 0.0  ;;  %v13402_v18 = vld [vmem:[#allocation22_spill] sm:$0xff] }
 0xfe0   :  { %8286 = vst.msk [vmem:[%s12410_s6 + $0x2c0] sm:$0xff] %vm494_vm1, %v8099_v20 }
 0xfe3   :  { %v6646_v30 = vpop.f32.mrf.mxu0  ;;  %v6975_v4 = vpop.f32.mrf.mxu1 }
 0xfe4   :  { %v6976_v23 = vadd.f32 %v6975_v4, %v6646_v30  ;;  %v7771_v28 = vpop.f32.mrf.mxu2 }
 0xfe5   :  { %v8100_v52 = vpop.f32.mrf.mxu3 }
 0xfe6   :  { %v7243_v38 = vmax.f32 %v6976_v23, 0.0  ;;  %v8101_v39 = vadd.f32 %v8100_v52, %v7771_v28 }
 0xfe8   :  { %v7391_v41 = vpack.c.bf16 %v7243_v38, %v7241_v59  ;;  %8287 = vst.msk [vmem:[%s12410_s6 + $0x2c8] sm:$0xff] %vm494_vm1, %v8101_v39  ;;  %7813 = vmatmul.bf16.gmra.mxu2 %v13395_v62 }
 0xfea   :  { %8142 = vmatmul.bf16.gmra.mxu3 %v7391_v41 }
 0xfeb   :  { %v6649_v22 = vpop.f32.mrf.mxu0  ;;  %v6978_v7 = vpop.f32.mrf.mxu1 }
 0xfec   :  { %v7774_v13 = vpop.f32.mrf.mxu2  ;;  %v6979_v33 = vadd.f32 %v6978_v7, %v6649_v22 }
 0xfed   :  { %v8103_v37 = vpop.f32.mrf.mxu3 }
 0xfee   :  { %v8104_v14 = vadd.f32 %v8103_v37, %v7774_v13  ;;  %6688 = vmatmul.bf16.gmra.mxu0 %v13396_v61  ;;  %7017 = vmatmul.bf16.gmra.mxu1 %v13397_v55  ;;  %v7245_v16 = vmax.f32 %v6979_v33, 0.0 }
 0xff0   :  { %8288 = vst.msk [vmem:[%s12410_s6 + $0x2d0] sm:$0xff] %vm494_vm1, %v8104_v14  ;;  %v13403_v14 = vld [vmem:[#allocation20_spill] sm:$0xff] }
 0xff3   :  { %v6651_v49 = vpop.f32.mrf.mxu0  ;;  %v6980_v57 = vpop.f32.mrf.mxu1 }
 0xff4   :  { %v6981_v47 = vadd.f32 %v6980_v57, %v6651_v49  ;;  %v7776_v58 = vpop.f32.mrf.mxu2 }
 0xff5   :  { %v8105_v43 = vpop.f32.mrf.mxu3 }
 0xff6   :  { %v7247_v32 = vmax.f32 %v6981_v47, 0.0  ;;  %v8106_v3 = vadd.f32 %v8105_v43, %v7776_v58 }
 0xff8   :  { %v7393_v5 = vpack.c.bf16 %v7247_v32, %v7245_v16  ;;  %8289 = vst.msk [vmem:[%s12410_s6 + $0x2d8] sm:$0xff] %vm494_vm1, %v8106_v3  ;;  %7818 = vmatmul.bf16.gmra.mxu2 %v13398_v12 }
 0xffa   :  { %8147 = vmatmul.bf16.gmra.mxu3 %v7393_v5 }
 0xffb   :  { %v6654_v53 = vpop.f32.mrf.mxu0  ;;  %v6983_v60 = vpop.f32.mrf.mxu1 }
 0xffc   :  { %v7779_v11 = vpop.f32.mrf.mxu2  ;;  %v6984_v54 = vadd.f32 %v6983_v60, %v6654_v53 }
 0xffd   :  { %v8108_v15 = vpop.f32.mrf.mxu3 }
 0xffe   :  { %v8109_v10 = vadd.f32 %v8108_v15, %v7779_v11  ;;  %6693 = vmatmul.bf16.gmra.mxu0 %v13399_v36  ;;  %7022 = vmatmul.bf16.gmra.mxu1 %v13400_v8  ;;  %v7249_v24 = vmax.f32 %v6984_v54, 0.0  ;;  %v13404_v11 = vld [vmem:[#allocation25_spill] sm:$0xff] }
0x1000   :  { %8290 = vst.msk [vmem:[%s12410_s6 + $0x2e0] sm:$0xff] %vm494_vm1, %v8109_v10 }
0x1003   :  { %v6656_v63 = vpop.f32.mrf.mxu0  ;;  %v6985_v2 = vpop.f32.mrf.mxu1 }
0x1004   :  { %v6986_v48 = vadd.f32 %v6985_v2, %v6656_v63  ;;  %v7781_v31 = vpop.f32.mrf.mxu2 }
0x1005   :  { %v8110_v29 = vpop.f32.mrf.mxu3 }
0x1006   :  { %v7251_v40 = vmax.f32 %v6986_v48, 0.0  ;;  %v8111_v26 = vadd.f32 %v8110_v29, %v7781_v31 }
0x1008   :  { %v7395_v17 = vpack.c.bf16 %v7251_v40, %v7249_v24  ;;  %8291 = vst.msk [vmem:[%s12410_s6 + $0x2e8] sm:$0xff] %vm494_vm1, %v8111_v26  ;;  %7823 = vmatmul.bf16.gmra.mxu2 %v13401_v19 }
0x100a   :  { %8152 = vmatmul.bf16.gmra.mxu3 %v7395_v17 }
0x100b   :  { %v6659_v35 = vpop.f32.mrf.mxu0  ;;  %v6988_v1 = vpop.f32.mrf.mxu1 }
0x100c   :  { %v7784_v27 = vpop.f32.mrf.mxu2  ;;  %v6989_v51 = vadd.f32 %v6988_v1, %v6659_v35  ;;  %v13405_v35 = vld [vmem:[#allocation23_spill] sm:$0xff] }
0x100d   :  { %v8113_v42 = vpop.f32.mrf.mxu3 }
0x100e   :  { %v8114_v6 = vadd.f32 %v8113_v42, %v7784_v27  ;;  %v7253_v0 = vmax.f32 %v6989_v51, 0.0 }
0x1010   :  { %8292 = vst.msk [vmem:[%s12410_s6 + $0x2f0] sm:$0xff] %vm494_vm1, %v8114_v6 }
0x1013   :  { %v6661_v50 = vpop.f32.mrf.mxu0  ;;  %v6990_v9 = vpop.f32.mrf.mxu1 }
0x1014   :  { %v6991_v44 = vadd.f32 %v6990_v9, %v6661_v50  ;;  %v7786_v45 = vpop.f32.mrf.mxu2 }
0x1015   :  { %v8115_v25 = vpop.f32.mrf.mxu3 }
0x1016   :  { %v7255_v34 = vmax.f32 %v6991_v44, 0.0  ;;  %v8116_v20 = vadd.f32 %v8115_v25, %v7786_v45 }
0x1018   :  { %v7397_v46 = vpack.c.bf16 %v7255_v34, %v7253_v0  ;;  %8293 = vst.msk [vmem:[%s12410_s6 + $0x2f8] sm:$0xff] %vm494_vm1, %v8116_v20  ;;  %7828 = vmatmul.bf16.gmra.mxu2 %v13402_v18 }
0x101a   :  { %8157 = vmatmul.bf16.gmra.mxu3 %v7397_v46 }
0x101b   :  { %v6664_v21 = vpop.f32.mrf.mxu0  ;;  %v6993_v30 = vpop.f32.mrf.mxu1 }
0x101c   :  { %v7789_v4 = vpop.f32.mrf.mxu2  ;;  %v6994_v52 = vadd.f32 %v6993_v30, %v6664_v21  ;;  %v13406_v21 = vld [vmem:[#allocation28_spill] sm:$0xff] }
0x101d   :  { %v8118_v23 = vpop.f32.mrf.mxu3 }
0x101e   :  { %v8119_v28 = vadd.f32 %v8118_v23, %v7789_v4  ;;  %v7257_v22 = vmax.f32 %v6994_v52, 0.0 }
0x1020   :  { %8294 = vst.msk [vmem:[%s12410_s6 + $0x300] sm:$0xff] %vm494_vm1, %v8119_v28 }
0x1023   :  { %v6666_v59 = vpop.f32.mrf.mxu0  ;;  %v6995_v38 = vpop.f32.mrf.mxu1 }
0x1024   :  { %v6996_v39 = vadd.f32 %v6995_v38, %v6666_v59  ;;  %v7791_v41 = vpop.f32.mrf.mxu2 }
0x1025   :  { %v8120_v62 = vpop.f32.mrf.mxu3 }
0x1026   :  { %v7259_v7 = vmax.f32 %v6996_v39, 0.0  ;;  %v8121_v13 = vadd.f32 %v8120_v62, %v7791_v41 }
0x1028   :  { %v7399_v37 = vpack.c.bf16 %v7259_v7, %v7257_v22  ;;  %8295 = vst.msk [vmem:[%s12410_s6 + $0x308] sm:$0xff] %vm494_vm1, %v8121_v13  ;;  %7833 = vmatmul.bf16.gmra.mxu2 %v13403_v14 }
0x102a   :  { %8162 = vmatmul.bf16.gmra.mxu3 %v7399_v37 }
0x102b   :  { %v6669_v61 = vpop.f32.mrf.mxu0  ;;  %v6998_v55 = vpop.f32.mrf.mxu1 }
0x102c   :  { %v7794_v33 = vpop.f32.mrf.mxu2  ;;  %v6999_v47 = vadd.f32 %v6998_v55, %v6669_v61  ;;  %v13407_v61 = vld [vmem:[#allocation26_spill] sm:$0xff] }
0x102d   :  { %v8123_v49 = vpop.f32.mrf.mxu3 }
0x102e   :  { %v8124_v57 = vadd.f32 %v8123_v49, %v7794_v33  ;;  %v7261_v5 = vmax.f32 %v6999_v47, 0.0 }
0x1030   :  { %8296 = vst.msk [vmem:[%s12410_s6 + $0x310] sm:$0xff] %vm494_vm1, %v8124_v57 }
0x1033   :  { %v6671_v58 = vpop.f32.mrf.mxu0  ;;  %v7000_v43 = vpop.f32.mrf.mxu1 }
0x1034   :  { %v7001_v16 = vadd.f32 %v7000_v43, %v6671_v58  ;;  %v7796_v32 = vpop.f32.mrf.mxu2 }
0x1035   :  { %v8125_v3 = vpop.f32.mrf.mxu3 }
0x1036   :  { %v7263_v12 = vmax.f32 %v7001_v16, 0.0  ;;  %v8126_v53 = vadd.f32 %v8125_v3, %v7796_v32 }
0x1038   :  { %v7401_v60 = vpack.c.bf16 %v7263_v12, %v7261_v5  ;;  %8297 = vst.msk [vmem:[%s12410_s6 + $0x318] sm:$0xff] %vm494_vm1, %v8126_v53  ;;  %7838 = vmatmul.bf16.gmra.mxu2 %v13404_v11 }
0x103a   :  { %8167 = vmatmul.bf16.gmra.mxu3 %v7401_v60 }
0x103b   :  { %v6674_v15 = vpop.f32.mrf.mxu0  ;;  %v7003_v10 = vpop.f32.mrf.mxu1 }
0x103c   :  { %v7799_v36 = vpop.f32.mrf.mxu2  ;;  %v7004_v63 = vadd.f32 %v7003_v10, %v6674_v15  ;;  %v13408_v15 = vld [vmem:[#allocation24_spill] sm:$0xff] }
0x103d   :  { %v8128_v8 = vpop.f32.mrf.mxu3 }
0x103e   :  { %v8129_v54 = vadd.f32 %v8128_v8, %v7799_v36  ;;  %v7265_v40 = vmax.f32 %v7004_v63, 0.0 }
0x1040   :  { %8298 = vst.msk [vmem:[%s12410_s6 + $0x320] sm:$0xff] %vm494_vm1, %v8129_v54 }
0x1043   :  { %v6676_v2 = vpop.f32.mrf.mxu0  ;;  %v7005_v48 = vpop.f32.mrf.mxu1 }
0x1044   :  { %v7006_v31 = vadd.f32 %v7005_v48, %v6676_v2  ;;  %v7801_v29 = vpop.f32.mrf.mxu2 }
0x1045   :  { %v8130_v24 = vpop.f32.mrf.mxu3 }
0x1046   :  { %v7267_v26 = vmax.f32 %v7006_v31, 0.0  ;;  %v8131_v17 = vadd.f32 %v8130_v24, %v7801_v29 }
0x1048   :  { %v7403_v19 = vpack.c.bf16 %v7267_v26, %v7265_v40  ;;  %8299 = vst.msk [vmem:[%s12410_s6 + $0x328] sm:$0xff] %vm494_vm1, %v8131_v17  ;;  %7843 = vmatmul.bf16.gmra.mxu2 %v13405_v35 }
0x104a   :  { %8172 = vmatmul.bf16.gmra.mxu3 %v7403_v19 }
0x104b   :  { %v6679_v1 = vpop.f32.mrf.mxu0  ;;  %v7008_v27 = vpop.f32.mrf.mxu1 }
0x104c   :  { %v7804_v42 = vpop.f32.mrf.mxu2  ;;  %v7009_v50 = vadd.f32 %v7008_v27, %v6679_v1 }
0x104d   :  { %v8133_v6 = vpop.f32.mrf.mxu3 }
0x104e   :  { %v8134_v51 = vadd.f32 %v8133_v6, %v7804_v42  ;;  %v7269_v34 = vmax.f32 %v7009_v50, 0.0 }
0x1050   :  { %8300 = vst.msk [vmem:[%s12410_s6 + $0x330] sm:$0xff] %vm494_vm1, %v8134_v51 }
0x1053   :  { %v6681_v9 = vpop.f32.mrf.mxu0  ;;  %v7010_v44 = vpop.f32.mrf.mxu1 }
0x1054   :  { %v7011_v45 = vadd.f32 %v7010_v44, %v6681_v9  ;;  %v7806_v25 = vpop.f32.mrf.mxu2 }
0x1055   :  { %v8135_v0 = vpop.f32.mrf.mxu3 }
0x1056   :  { %v7271_v20 = vmax.f32 %v7011_v45, 0.0  ;;  %v8136_v46 = vadd.f32 %v8135_v0, %v7806_v25 }
0x1058   :  { %v7405_v18 = vpack.c.bf16 %v7271_v20, %v7269_v34  ;;  %8301 = vst.msk [vmem:[%s12410_s6 + $0x338] sm:$0xff] %vm494_vm1, %v8136_v46  ;;  %7848 = vmatmul.bf16.gmra.mxu2 %v13406_v21 }
0x105a   :  { %8177 = vmatmul.bf16.gmra.mxu3 %v7405_v18 }
0x105b   :  { %v6684_v30 = vpop.f32.mrf.mxu0  ;;  %v7013_v4 = vpop.f32.mrf.mxu1 }
0x105c   :  { %v7809_v23 = vpop.f32.mrf.mxu2  ;;  %v7014_v59 = vadd.f32 %v7013_v4, %v6684_v30 }
0x105d   :  { %v8138_v28 = vpop.f32.mrf.mxu3 }
0x105e   :  { %v8139_v52 = vadd.f32 %v8138_v28, %v7809_v23  ;;  %v7273_v7 = vmax.f32 %v7014_v59, 0.0 }
0x1060   :  { %8302 = vst.msk [vmem:[%s12410_s6 + $0x340] sm:$0xff] %vm494_vm1, %v8139_v52 }
0x1063   :  { %v6686_v38 = vpop.f32.mrf.mxu0  ;;  %v7015_v39 = vpop.f32.mrf.mxu1 }
0x1064   :  { %v7016_v41 = vadd.f32 %v7015_v39, %v6686_v38  ;;  %v7811_v62 = vpop.f32.mrf.mxu2 }
0x1065   :  { %v8140_v22 = vpop.f32.mrf.mxu3 }
0x1066   :  { %v7275_v13 = vmax.f32 %v7016_v41, 0.0  ;;  %v8141_v37 = vadd.f32 %v8140_v22, %v7811_v62 }
0x1068   :  { %v7407_v14 = vpack.c.bf16 %v7275_v13, %v7273_v7  ;;  %8303 = vst.msk [vmem:[%s12410_s6 + $0x348] sm:$0xff] %vm494_vm1, %v8141_v37  ;;  %7853 = vmatmul.bf16.gmra.mxu2 %v13407_v61 }
0x106a   :  { %8182 = vmatmul.bf16.gmra.mxu3 %v7407_v14 }
0x106b   :  { %v6689_v55 = vpop.f32.mrf.mxu0  ;;  %v7018_v33 = vpop.f32.mrf.mxu1 }
0x106c   :  { %v7814_v49 = vpop.f32.mrf.mxu2  ;;  %v7019_v58 = vadd.f32 %v7018_v33, %v6689_v55 }
0x106d   :  { %v8143_v57 = vpop.f32.mrf.mxu3 }
0x106e   :  { %v8144_v47 = vadd.f32 %v8143_v57, %v7814_v49  ;;  %v7277_v12 = vmax.f32 %v7019_v58, 0.0 }
0x1070   :  { %8304 = vst.msk [vmem:[%s12410_s6 + $0x350] sm:$0xff] %vm494_vm1, %v8144_v47 }
0x1073   :  { %v6691_v43 = vpop.f32.mrf.mxu0  ;;  %v7020_v16 = vpop.f32.mrf.mxu1 }
0x1074   :  { %v7021_v32 = vadd.f32 %v7020_v16, %v6691_v43  ;;  %v7816_v3 = vpop.f32.mrf.mxu2 }
0x1075   :  { %v8145_v5 = vpop.f32.mrf.mxu3 }
0x1076   :  { %v7279_v53 = vmax.f32 %v7021_v32, 0.0  ;;  %v8146_v60 = vadd.f32 %v8145_v5, %v7816_v3 }
0x1078   :  { %v7409_v11 = vpack.c.bf16 %v7279_v53, %v7277_v12  ;;  %8305 = vst.msk [vmem:[%s12410_s6 + $0x358] sm:$0xff] %vm494_vm1, %v8146_v60  ;;  %7858 = vmatmul.bf16.gmra.mxu2 %v13408_v15 }
0x107a   :  { %8187 = vmatmul.bf16.gmra.mxu3 %v7409_v11 }
0x107b   :  { %v6694_v10 = vpop.f32.mrf.mxu0  ;;  %v7023_v36 = vpop.f32.mrf.mxu1 }
0x107c   :  { %v7819_v8 = vpop.f32.mrf.mxu2  ;;  %v7024_v2 = vadd.f32 %v7023_v36, %v6694_v10 }
0x107d   :  { %v8148_v54 = vpop.f32.mrf.mxu3 }
0x107e   :  { %v8149_v63 = vadd.f32 %v8148_v54, %v7819_v8  ;;  %v7281_v26 = vmax.f32 %v7024_v2, 0.0 }
0x1080   :  { %8306 = vst.msk [vmem:[%s12410_s6 + $0x360] sm:$0xff] %vm494_vm1, %v8149_v63 }
0x1083   :  { %v6696_v48 = vpop.f32.mrf.mxu0  ;;  %v7025_v31 = vpop.f32.mrf.mxu1 }
0x1084   :  { %v7026_v29 = vadd.f32 %v7025_v31, %v6696_v48  ;;  %v7821_v24 = vpop.f32.mrf.mxu2 }
0x1085   :  { %v8150_v40 = vpop.f32.mrf.mxu3 }
0x1086   :  { %v7283_v17 = vmax.f32 %v7026_v29, 0.0  ;;  %v8151_v19 = vadd.f32 %v8150_v40, %v7821_v24 }
0x1088   :  { %v7411_v35 = vpack.c.bf16 %v7283_v17, %v7281_v26  ;;  %8307 = vst.msk [vmem:[%s12410_s6 + $0x368] sm:$0xff] %vm494_vm1, %v8151_v19  ;;  %7863 = vmatmul.bf16.gmra.mxu2 %v11741_v56 }
0x108a   :  { %8192 = vmatmul.bf16.gmra.mxu3 %v7411_v35 }
0x108c   :  { %v7824_v1 = vpop.f32.mrf.mxu2 }
0x108d   :  { %v8153_v27 = vpop.f32.mrf.mxu3 }
0x108e   :  { %v8154_v42 = vadd.f32 %v8153_v27, %v7824_v1 }
0x1090   :  { %8308 = vst.msk [vmem:[%s12410_s6 + $0x370] sm:$0xff] %vm494_vm1, %v8154_v42 }
0x1094   :  { %v7826_v6 = vpop.f32.mrf.mxu2 }
0x1095   :  { %v8155_v51 = vpop.f32.mrf.mxu3 }
0x1096   :  { %v8156_v50 = vadd.f32 %v8155_v51, %v7826_v6 }
0x1098   :  { %8309 = vst.msk [vmem:[%s12410_s6 + $0x378] sm:$0xff] %vm494_vm1, %v8156_v50 }
0x109c   :  { %v7829_v9 = vpop.f32.mrf.mxu2 }
0x109d   :  { %v8158_v44 = vpop.f32.mrf.mxu3 }
0x109e   :  { %v8159_v56 = vadd.f32 %v8158_v44, %v7829_v9 }
0x10a0   :  { %8310 = vst.msk [vmem:[%s12410_s6 + $0x380] sm:$0xff] %vm494_vm1, %v8159_v56 }
0x10a4   :  { %v7831_v45 = vpop.f32.mrf.mxu2 }
0x10a5   :  { %v8160_v25 = vpop.f32.mrf.mxu3 }
0x10a6   :  { %v8161_v0 = vadd.f32 %v8160_v25, %v7831_v45 }
0x10a8   :  { %8311 = vst.msk [vmem:[%s12410_s6 + $0x388] sm:$0xff] %vm494_vm1, %v8161_v0 }
0x10ac   :  { %v7834_v34 = vpop.f32.mrf.mxu2 }
0x10ad   :  { %v8163_v20 = vpop.f32.mrf.mxu3 }
0x10ae   :  { %v8164_v46 = vadd.f32 %v8163_v20, %v7834_v34 }
0x10b0   :  { %8312 = vst.msk [vmem:[%s12410_s6 + $0x390] sm:$0xff] %vm494_vm1, %v8164_v46 }
0x10b4   :  { %v7836_v18 = vpop.f32.mrf.mxu2 }
0x10b5   :  { %v8165_v21 = vpop.f32.mrf.mxu3 }
0x10b6   :  { %v8166_v30 = vadd.f32 %v8165_v21, %v7836_v18 }
0x10b8   :  { %8313 = vst.msk [vmem:[%s12410_s6 + $0x398] sm:$0xff] %vm494_vm1, %v8166_v30 }
0x10bc   :  { %v7839_v4 = vpop.f32.mrf.mxu2 }
0x10bd   :  { %v8168_v23 = vpop.f32.mrf.mxu3 }
0x10be   :  { %v8169_v28 = vadd.f32 %v8168_v23, %v7839_v4 }
0x10c0   :  { %8314 = vst.msk [vmem:[%s12410_s6 + $0x3a0] sm:$0xff] %vm494_vm1, %v8169_v28 }
0x10c4   :  { %v7841_v52 = vpop.f32.mrf.mxu2 }
0x10c5   :  { %v8170_v59 = vpop.f32.mrf.mxu3 }
0x10c6   :  { %v8171_v38 = vadd.f32 %v8170_v59, %v7841_v52 }
0x10c8   :  { %8315 = vst.msk [vmem:[%s12410_s6 + $0x3a8] sm:$0xff] %vm494_vm1, %v8171_v38 }
0x10cc   :  { %v7844_v39 = vpop.f32.mrf.mxu2 }
0x10cd   :  { %v8173_v41 = vpop.f32.mrf.mxu3 }
0x10ce   :  { %v8174_v62 = vadd.f32 %v8173_v41, %v7844_v39 }
0x10d0   :  { %8316 = vst.msk [vmem:[%s12410_s6 + $0x3b0] sm:$0xff] %vm494_vm1, %v8174_v62 }
0x10d4   :  { %v7846_v22 = vpop.f32.mrf.mxu2 }
0x10d5   :  { %v8175_v7 = vpop.f32.mrf.mxu3 }
0x10d6   :  { %v8176_v13 = vadd.f32 %v8175_v7, %v7846_v22 }
0x10d8   :  { %8317 = vst.msk [vmem:[%s12410_s6 + $0x3b8] sm:$0xff] %vm494_vm1, %v8176_v13 }
0x10dc   :  { %v7849_v37 = vpop.f32.mrf.mxu2 }
0x10dd   :  { %v8178_v14 = vpop.f32.mrf.mxu3 }
0x10de   :  { %v8179_v61 = vadd.f32 %v8178_v14, %v7849_v37 }
0x10e0   :  { %8318 = vst.msk [vmem:[%s12410_s6 + $0x3c0] sm:$0xff] %vm494_vm1, %v8179_v61 }
0x10e4   :  { %v7851_v55 = vpop.f32.mrf.mxu2 }
0x10e5   :  { %v8180_v33 = vpop.f32.mrf.mxu3 }
0x10e6   :  { %v8181_v49 = vadd.f32 %v8180_v33, %v7851_v55 }
0x10e8   :  { %8319 = vst.msk [vmem:[%s12410_s6 + $0x3c8] sm:$0xff] %vm494_vm1, %v8181_v49 }
0x10ec   :  { %v7854_v57 = vpop.f32.mrf.mxu2 }
0x10ed   :  { %v8183_v47 = vpop.f32.mrf.mxu3 }
0x10ee   :  { %v8184_v58 = vadd.f32 %v8183_v47, %v7854_v57 }
0x10f0   :  { %8320 = vst.msk [vmem:[%s12410_s6 + $0x3d0] sm:$0xff] %vm494_vm1, %v8184_v58 }
0x10f4   :  { %v7856_v43 = vpop.f32.mrf.mxu2 }
0x10f5   :  { %v8185_v16 = vpop.f32.mrf.mxu3 }
0x10f6   :  { %v8186_v32 = vadd.f32 %v8185_v16, %v7856_v43 }
0x10f8   :  { %8321 = vst.msk [vmem:[%s12410_s6 + $0x3d8] sm:$0xff] %vm494_vm1, %v8186_v32 }
0x10fc   :  { %v7859_v3 = vpop.f32.mrf.mxu2 }
0x10fd   :  { %v8188_v5 = vpop.f32.mrf.mxu3 }
0x10fe   :  { %v8189_v12 = vadd.f32 %v8188_v5, %v7859_v3 }
0x1100   :  { %8322 = vst.msk [vmem:[%s12410_s6 + $0x3e0] sm:$0xff] %vm494_vm1, %v8189_v12 }
0x1104   :  { %v7861_v53 = vpop.f32.mrf.mxu2 }
0x1105   :  { %v8190_v60 = vpop.f32.mrf.mxu3 }
0x1106   :  { %v8191_v11 = vadd.f32 %v8190_v60, %v7861_v53 }
0x1108   :  { %8323 = vst.msk [vmem:[%s12410_s6 + $0x3e8] sm:$0xff] %vm494_vm1, %v8191_v11 }
0x110c   :  { %v7864_v15 = vpop.f32.mrf.mxu2 }
0x110d   :  { %v8193_v10 = vpop.f32.mrf.mxu3 }
0x110e   :  { %v8194_v36 = vadd.f32 %v8193_v10, %v7864_v15 }
0x1110   :  { %8324 = vst.msk [vmem:[%s12410_s6 + $0x3f0] sm:$0xff] %vm494_vm1, %v8194_v36 }
0x1114   :  { %v7866_v8 = vpop.f32.mrf.mxu2 }
0x1115   :  { %v8195_v54 = vpop.f32.mrf.mxu3 }
0x1116   :  { %v8196_v63 = vadd.f32 %v8195_v54, %v7866_v8 }
0x1118   :  { %8325 = vst.msk [vmem:[%s12410_s6 + $0x3f8] sm:$0xff] %vm494_vm1, %v8196_v63 }
0x1119   :  { %8330 = vsyncpa [#allocation3], 1 }

</bundles_post_ra>
